<compile_context>
chip_gen: v7x
topology: tpu7x:2x2x1
jax: 0.10.0
libtpu: 0.0.40
codegen_flags: <defaults>
</compile_context>

<pallas_src>
import functools

import jax
import jax.numpy as jnp
from jax.experimental import pallas as pl
from jax.experimental.pallas import tpu as pltpu

LN_EPS = 1e-5

# Octant order of the PyTorch module: (h%2, w%2, d%2) for x0..x7.
_OCTANTS = ((0, 0, 0), (1, 0, 0), (0, 1, 0), (0, 0, 1),
            (1, 1, 0), (0, 1, 1), (1, 0, 1), (1, 1, 1))


def _merge_kernel(x_ref, w_ref, gw_ref, bw_ref, o_ref):
    # x_ref : (RB, 2*W2, 2*D2, 2*C)  -- RB rows of (batch, h') pairs
    # w_ref : (8*C, TN)              -- folded weight  W' = diag(gamma) @ W.T
    # gw_ref: (1, TN)  f32           -- gamma @ W.T
    # bw_ref: (1, TN)  f32           -- beta  @ W.T
    # o_ref : (RB*W2*D2, TN)
    rb = x_ref.shape[0]
    w2 = x_ref.shape[1] // 2
    d2 = x_ref.shape[2] // 2
    c = x_ref.shape[3] // 2
    t = rb * w2 * d2
    inv_n = 1.0 / (8 * c)
    mm_dtype = w_ref.dtype

    # Gather each octant exactly once: accumulate f32 LN statistics and stage
    # the matmul operand in the same pass.  Slices are sublane/lane aligned
    # for realistic dims (D2 % 8 == 0, C % 128 == 0).
    parts = []
    s = jnp.zeros((t, 1), jnp.float32)
    ss = jnp.zeros((t, 1), jnp.float32)
    for (ho, wo, do) in _OCTANTS:
        xo = x_ref[:, ho * w2:(ho + 1) * w2,
                      wo * d2:(wo + 1) * d2,
                      do * c:(do + 1) * c].reshape(t, c)
        xf = xo.astype(jnp.float32)
        s = s + jnp.sum(xf, axis=-1, keepdims=True)
        ss = ss + jnp.sum(xf * xf, axis=-1, keepdims=True)
        parts.append(xo.astype(mm_dtype))
    x8 = jnp.concatenate(parts, axis=-1)                      # (T, 8C)

    mean = s * inv_n
    # One-pass (clamped) variance; inputs here are activations of O(1) scale.
    # TODO(synk): switch to a centered two-pass variance if large-magnitude
    # activations ever push LayerNorm past tolerance.
    var = jnp.maximum(ss * inv_n - mean * mean, 0.0)
    inv_std = jax.lax.rsqrt(var + LN_EPS)

    # Single fused MXU matmul over the full 8C reduction depth.
    acc = jnp.dot(x8, w_ref[...], preferred_element_type=jnp.float32)  # (T, TN)

    # Post-matmul LN epilogue over 2C (f32 correction terms).
    out = acc * inv_std - (mean * inv_std) * gw_ref[...] + bw_ref[...]
    o_ref[...] = out.astype(o_ref.dtype)


def _vmem_capacity():
    try:
        info = pltpu.get_tpu_info()
        cap = getattr(info, "vmem_capacity_bytes", None)
        if cap:
            return int(cap)
    except Exception:
        pass
    return 64 * 1024 * 1024  # conservative (v7x per-TC)


def _pick_col_tile(c2, c8, wsz, budget):
    """Output-feature tile.  Prefer the full 2C axis (weight DMA'd once and
    resident); otherwise the largest 128-multiple divisor that fits."""
    if 2 * c8 * c2 * wsz <= budget // 3:
        return c2
    tns = [tcol for tcol in range(c2, 0, -128)
           if c2 % tcol == 0 and tcol % 128 == 0]
    for tcol in tns:
        if 2 * c8 * tcol * wsz <= budget // 3:
            return tcol
    return tns[-1] if tns else c2  # block == full dim is always legal


def _pick_row_block(n_rows, tok_per_row, tile_tokens, fits):
    """Largest divisor rb of n_rows such that the token tile is a multiple of
    8 (sublane-dense stores), fits the VMEM budget, is <= tile_tokens, is
    >= 256 tokens when possible, and leaves several grid steps for
    pipelining / megacore."""
    divs = [r for r in range(1, n_rows + 1) if n_rows % r == 0]
    cands = [r for r in divs
             if ((r * tok_per_row) % 8 == 0 or r == n_rows) and fits(r)]
    if not cands:
        # Nothing fits the budget: smallest legal block (caller raises the
        # VMEM limit accordingly).
        legal = [r for r in divs if (r * tok_per_row) % 8 == 0] or [n_rows]
        return min(legal)
    within = [r for r in cands if r * tok_per_row <= tile_tokens]
    if not within:
        return min(cands)
    big = [r for r in within if r * tok_per_row >= 256] or within
    for min_steps in (4, 2):
        multi = [r for r in big if n_rows // r >= min_steps]
        if multi:
            return max(multi)
    return max(big)


def fold_params(params, *, matmul_dtype=None):
    """One-time (offline) fold of the LayerNorm affine into the reduction
    weight.  params: 'reduction_w' (2C, 8C) PyTorch nn.Linear layout,
    'norm_gamma' (8C,), 'norm_beta' (8C,)."""
    w = jnp.asarray(params["reduction_w"])
    gamma = jnp.asarray(params["norm_gamma"], jnp.float32)
    beta = jnp.asarray(params["norm_beta"], jnp.float32)
    wt = w.T.astype(jnp.float32)                       # (8C, 2C)
    w_fold = gamma[:, None] * wt                       # (8C, 2C)
    gw = (gamma @ wt)[None, :].astype(jnp.float32)     # (1, 2C)  keep f32
    bw = (beta @ wt)[None, :].astype(jnp.float32)      # (1, 2C)  keep f32
    if matmul_dtype is not None:                       # e.g. jnp.bfloat16
        w_fold = w_fold.astype(matmul_dtype)
    return {"w_fold": w_fold, "gw": gw, "bw": bw}


def patch_merging_forward(x, folded, input_resolution, dim, *,
                          tile_tokens=1024):
    """x: (B, H*W*D, C) -> (B, (H/2)*(W/2)*(D/2), 2*C).
    `folded` comes from fold_params()."""
    B, L, C = x.shape
    H, W, D = input_resolution
    assert C == dim and L == H * W * D
    assert H % 2 == 0 and W % 2 == 0 and D % 2 == 0
    H2, W2, D2 = H // 2, W // 2, D // 2
    c8, c2 = 8 * C, 2 * C

    w_fold, gw, bw = folded["w_fold"], folded["gw"], folded["bw"]
    assert w_fold.shape == (c8, c2)

    # Free, contiguous reshape -- no HBM copy.  Octants are gathered in-kernel.
    xv = x.reshape(B * H2, 2 * W2, 2 * D2, 2 * C)

    n_rows = B * H2
    tok_per_row = W2 * D2
    n_tok = n_rows * tok_per_row

    isz = jnp.dtype(x.dtype).itemsize
    wsz = jnp.dtype(w_fold.dtype).itemsize
    osz = isz

    cap = _vmem_capacity()
    budget = min(cap // 2, 96 * 1024 * 1024)

    tn = _pick_col_tile(c2, c8, wsz, budget)

    def est(rb):
        t = rb * tok_per_row
        return (2 * t * c8 * isz            # input tile (double-buffered)
                + 2 * c8 * tn * wsz         # weight tile
                + 2 * t * tn * osz          # output tile
                + t * c8 * max(wsz, 4)      # in-kernel concatenated operand
                + 2 * t * tn * 4            # matmul result / epilogue temps
                + 4 * tn * 4 + (64 << 10))

    rb = _pick_row_block(n_rows, tok_per_row, tile_tokens,
                         lambda r: est(r) <= budget)
    t_blk = rb * tok_per_row
    grid = (n_rows // rb, c2 // tn)
    vmem_limit = min(int(cap * 0.9), max(budget, int(est(rb) * 1.25)))

    cost = pl.CostEstimate(
        flops=2 * n_tok * c8 * c2 + 6 * n_tok * c8 + 4 * n_tok * c2,
        transcendentals=n_tok,
        bytes_accessed=(n_tok * c8 * isz + n_tok * c2 * osz
                        + (grid[0] if grid[1] > 1 else 1) * c8 * c2 * wsz
                        + 2 * c2 * 4),
    )

    out = pl.pallas_call(
        _merge_kernel,
        out_shape=jax.ShapeDtypeStruct((n_tok, c2), x.dtype),
        grid_spec=pltpu.PrefetchScalarGridSpec(
            num_scalar_prefetch=0,
            grid=grid,
            in_specs=[
                # Input block index only depends on i -> not re-fetched across j.
                pl.BlockSpec((rb, 2 * W2, 2 * D2, 2 * C),
                             lambda i, j: (i, 0, 0, 0)),
                # Folded weight; resident when tn == 2C (block index constant).
                pl.BlockSpec((c8, tn), lambda i, j: (0, j)),
                pl.BlockSpec((1, tn), lambda i, j: (0, j)),
                pl.BlockSpec((1, tn), lambda i, j: (0, j)),
            ],
            out_specs=pl.BlockSpec((t_blk, tn), lambda i, j: (i, j)),
        ),
        compiler_params=pltpu.CompilerParams(
            dimension_semantics=("parallel", "parallel"),
            vmem_limit_bytes=vmem_limit,
        ),
        cost_estimate=cost,
    )(xv, w_fold, gw, bw)

    return out.reshape(B, H2 * W2 * D2, c2)


def init_params(key, dim):
    c8, c2 = 8 * dim, 2 * dim
    kw, kg, kb = jax.random.split(key, 3)
    w = jax.random.normal(kw, (c2, c8), jnp.float32) * (1.0 / jnp.sqrt(c8))
    gamma = 1.0 + 0.1 * jax.random.normal(kg, (c8,), jnp.float32)
    beta = 0.1 * jax.random.normal(kb, (c8,), jnp.float32)
    return {"reduction_w": w, "norm_gamma": gamma, "norm_beta": beta}


def _reference(x, params, input_resolution, dim):
    """Pure-JAX mirror of the PyTorch module (for a correctness check)."""
    B, L, C = x.shape
    H, W, D = input_resolution
    xv = x.reshape(B, H, W, D, C)
    parts = [xv[:, ho::2, wo::2, do::2, :] for (ho, wo, do) in _OCTANTS]
    x8 = jnp.concatenate(parts, axis=-1).reshape(B, -1, 8 * C)
    mean = jnp.mean(x8, axis=-1, keepdims=True)
    var = jnp.mean((x8 - mean) ** 2, axis=-1, keepdims=True)
    xn = (x8 - mean) * jax.lax.rsqrt(var + LN_EPS)
    y = xn * params["norm_gamma"] + params["norm_beta"]
    return jnp.einsum("blk,ok->blo", y, params["reduction_w"])


if __name__ == "__main__":
    # Small but lane/sublane-friendly shapes: B=2, (H,W,D)=(32,8,16), dim=128.
    # After merging: 1024 tokens, 8C=1024 features -> 2C=256 outputs.
    B, H, W, D, dim = 2, 32, 8, 16, 128
    input_resolution = (H, W, D)

    key = jax.random.PRNGKey(0)
    k_x, k_p = jax.random.split(key)
    x = jax.random.normal(k_x, (B, H * W * D, dim), jnp.float32)
    params = init_params(k_p, dim)

    # Weight fold happens once, outside the per-call path.
    folded = fold_params(params)          # matmul_dtype=jnp.bfloat16 optional

    fwd = jax.jit(functools.partial(
        patch_merging_forward,
        input_resolution=input_resolution,
        dim=dim,
    ))
    out = fwd(x, folded)
    jax.block_until_ready(out)

    ref = _reference(x, params, input_resolution, dim)
    assert out.shape == (B, (H // 2) * (W // 2) * (D // 2), 2 * dim)
    err = float(jnp.max(jnp.abs(out - ref)))
    assert err < 5e-4, f"max abs error {err}"

    print("KERNEL_OK")
</pallas_src>

<mosaic_0001>
module attributes {stable_mosaic.version = 11 : i64} {
  func.func @_merge_kernel(%arg0: i32, %arg1: i32, %arg2: memref<8x8x16x256xf32, #tpu.memory_space<vmem>>, %arg3: memref<1024x256xf32, #tpu.memory_space<vmem>>, %arg4: memref<1x256xf32, #tpu.memory_space<vmem>>, %arg5: memref<1x256xf32, #tpu.memory_space<vmem>>, %arg6: memref<256x256xf32, #tpu.memory_space<vmem>>) attributes {dimension_semantics = [#tpu.dimension_semantics<parallel>, #tpu.dimension_semantics<parallel>], iteration_bounds = array<i64: 4, 1>, scalar_prefetch = 0 : i64, scratch_operands = 0 : i64, tpu.core_type = #tpu.core_type<tc>, window_params = [{transform_indices = @transform_0, window_bounds = array<i64: 8, 8, 16, 256>}, {transform_indices = @transform_1, window_bounds = array<i64: 1024, 256>}, {transform_indices = @transform_2, window_bounds = array<i64: 1, 256>}, {transform_indices = @transform_3, window_bounds = array<i64: 1, 256>}, {transform_indices = @transform_4, window_bounds = array<i64: 256, 256>}]} {
    %cst = arith.constant 0.000000e+00 : f32
    %0 = vector.broadcast %cst : f32 to vector<256x1xf32>
    %cst_0 = arith.constant 0.000000e+00 : f32
    %1 = vector.broadcast %cst_0 : f32 to vector<256x1xf32>
    %c0 = arith.constant 0 : index
    %c0_1 = arith.constant 0 : index
    %c0_2 = arith.constant 0 : index
    %c0_3 = arith.constant 0 : index
    %2 = vector.load %arg2[%c0, %c0_1, %c0_2, %c0_3] : memref<8x8x16x256xf32, #tpu.memory_space<vmem>>, vector<8x4x8x128xf32>
    %3 = vector.shape_cast %2 : vector<8x4x8x128xf32> to vector<256x128xf32>
    %cst_4 = arith.constant dense<0.000000e+00> : vector<256xf32>
    %4 = vector.multi_reduction <add>, %3, %cst_4 [1] : vector<256x128xf32> to vector<256xf32>
    %5 = vector.shape_cast %4 : vector<256xf32> to vector<256x1xf32>
    %6 = arith.addf %0, %5 : vector<256x1xf32>
    %7 = arith.mulf %3, %3 : vector<256x128xf32>
    %cst_5 = arith.constant dense<0.000000e+00> : vector<256xf32>
    %8 = vector.multi_reduction <add>, %7, %cst_5 [1] : vector<256x128xf32> to vector<256xf32>
    %9 = vector.shape_cast %8 : vector<256xf32> to vector<256x1xf32>
    %10 = arith.addf %1, %9 : vector<256x1xf32>
    %c0_6 = arith.constant 0 : index
    %c4 = arith.constant 4 : index
    %c0_7 = arith.constant 0 : index
    %c0_8 = arith.constant 0 : index
    %11 = vector.load %arg2[%c0_6, %c4, %c0_7, %c0_8] : memref<8x8x16x256xf32, #tpu.memory_space<vmem>>, vector<8x4x8x128xf32>
    %12 = vector.shape_cast %11 : vector<8x4x8x128xf32> to vector<256x128xf32>
    %cst_9 = arith.constant dense<0.000000e+00> : vector<256xf32>
    %13 = vector.multi_reduction <add>, %12, %cst_9 [1] : vector<256x128xf32> to vector<256xf32>
    %14 = vector.shape_cast %13 : vector<256xf32> to vector<256x1xf32>
    %15 = arith.addf %6, %14 : vector<256x1xf32>
    %16 = arith.mulf %12, %12 : vector<256x128xf32>
    %cst_10 = arith.constant dense<0.000000e+00> : vector<256xf32>
    %17 = vector.multi_reduction <add>, %16, %cst_10 [1] : vector<256x128xf32> to vector<256xf32>
    %18 = vector.shape_cast %17 : vector<256xf32> to vector<256x1xf32>
    %19 = arith.addf %10, %18 : vector<256x1xf32>
    %c0_11 = arith.constant 0 : index
    %c0_12 = arith.constant 0 : index
    %c8 = arith.constant 8 : index
    %c0_13 = arith.constant 0 : index
    %20 = vector.load %arg2[%c0_11, %c0_12, %c8, %c0_13] : memref<8x8x16x256xf32, #tpu.memory_space<vmem>>, vector<8x4x8x128xf32>
    %21 = vector.shape_cast %20 : vector<8x4x8x128xf32> to vector<256x128xf32>
    %cst_14 = arith.constant dense<0.000000e+00> : vector<256xf32>
    %22 = vector.multi_reduction <add>, %21, %cst_14 [1] : vector<256x128xf32> to vector<256xf32>
    %23 = vector.shape_cast %22 : vector<256xf32> to vector<256x1xf32>
    %24 = arith.addf %15, %23 : vector<256x1xf32>
    %25 = arith.mulf %21, %21 : vector<256x128xf32>
    %cst_15 = arith.constant dense<0.000000e+00> : vector<256xf32>
    %26 = vector.multi_reduction <add>, %25, %cst_15 [1] : vector<256x128xf32> to vector<256xf32>
    %27 = vector.shape_cast %26 : vector<256xf32> to vector<256x1xf32>
    %28 = arith.addf %19, %27 : vector<256x1xf32>
    %c0_16 = arith.constant 0 : index
    %c0_17 = arith.constant 0 : index
    %c0_18 = arith.constant 0 : index
    %c128 = arith.constant 128 : index
    %29 = vector.load %arg2[%c0_16, %c0_17, %c0_18, %c128] : memref<8x8x16x256xf32, #tpu.memory_space<vmem>>, vector<8x4x8x128xf32>
    %30 = vector.shape_cast %29 : vector<8x4x8x128xf32> to vector<256x128xf32>
    %cst_19 = arith.constant dense<0.000000e+00> : vector<256xf32>
    %31 = vector.multi_reduction <add>, %30, %cst_19 [1] : vector<256x128xf32> to vector<256xf32>
    %32 = vector.shape_cast %31 : vector<256xf32> to vector<256x1xf32>
    %33 = arith.addf %24, %32 : vector<256x1xf32>
    %34 = arith.mulf %30, %30 : vector<256x128xf32>
    %cst_20 = arith.constant dense<0.000000e+00> : vector<256xf32>
    %35 = vector.multi_reduction <add>, %34, %cst_20 [1] : vector<256x128xf32> to vector<256xf32>
    %36 = vector.shape_cast %35 : vector<256xf32> to vector<256x1xf32>
    %37 = arith.addf %28, %36 : vector<256x1xf32>
    %c0_21 = arith.constant 0 : index
    %c4_22 = arith.constant 4 : index
    %c8_23 = arith.constant 8 : index
    %c0_24 = arith.constant 0 : index
    %38 = vector.load %arg2[%c0_21, %c4_22, %c8_23, %c0_24] : memref<8x8x16x256xf32, #tpu.memory_space<vmem>>, vector<8x4x8x128xf32>
    %39 = vector.shape_cast %38 : vector<8x4x8x128xf32> to vector<256x128xf32>
    %cst_25 = arith.constant dense<0.000000e+00> : vector<256xf32>
    %40 = vector.multi_reduction <add>, %39, %cst_25 [1] : vector<256x128xf32> to vector<256xf32>
    %41 = vector.shape_cast %40 : vector<256xf32> to vector<256x1xf32>
    %42 = arith.addf %33, %41 : vector<256x1xf32>
    %43 = arith.mulf %39, %39 : vector<256x128xf32>
    %cst_26 = arith.constant dense<0.000000e+00> : vector<256xf32>
    %44 = vector.multi_reduction <add>, %43, %cst_26 [1] : vector<256x128xf32> to vector<256xf32>
    %45 = vector.shape_cast %44 : vector<256xf32> to vector<256x1xf32>
    %46 = arith.addf %37, %45 : vector<256x1xf32>
    %c0_27 = arith.constant 0 : index
    %c0_28 = arith.constant 0 : index
    %c8_29 = arith.constant 8 : index
    %c128_30 = arith.constant 128 : index
    %47 = vector.load %arg2[%c0_27, %c0_28, %c8_29, %c128_30] : memref<8x8x16x256xf32, #tpu.memory_space<vmem>>, vector<8x4x8x128xf32>
    %48 = vector.shape_cast %47 : vector<8x4x8x128xf32> to vector<256x128xf32>
    %cst_31 = arith.constant dense<0.000000e+00> : vector<256xf32>
    %49 = vector.multi_reduction <add>, %48, %cst_31 [1] : vector<256x128xf32> to vector<256xf32>
    %50 = vector.shape_cast %49 : vector<256xf32> to vector<256x1xf32>
    %51 = arith.addf %42, %50 : vector<256x1xf32>
    %52 = arith.mulf %48, %48 : vector<256x128xf32>
    %cst_32 = arith.constant dense<0.000000e+00> : vector<256xf32>
    %53 = vector.multi_reduction <add>, %52, %cst_32 [1] : vector<256x128xf32> to vector<256xf32>
    %54 = vector.shape_cast %53 : vector<256xf32> to vector<256x1xf32>
    %55 = arith.addf %46, %54 : vector<256x1xf32>
    %c0_33 = arith.constant 0 : index
    %c4_34 = arith.constant 4 : index
    %c0_35 = arith.constant 0 : index
    %c128_36 = arith.constant 128 : index
    %56 = vector.load %arg2[%c0_33, %c4_34, %c0_35, %c128_36] : memref<8x8x16x256xf32, #tpu.memory_space<vmem>>, vector<8x4x8x128xf32>
    %57 = vector.shape_cast %56 : vector<8x4x8x128xf32> to vector<256x128xf32>
    %cst_37 = arith.constant dense<0.000000e+00> : vector<256xf32>
    %58 = vector.multi_reduction <add>, %57, %cst_37 [1] : vector<256x128xf32> to vector<256xf32>
    %59 = vector.shape_cast %58 : vector<256xf32> to vector<256x1xf32>
    %60 = arith.addf %51, %59 : vector<256x1xf32>
    %61 = arith.mulf %57, %57 : vector<256x128xf32>
    %cst_38 = arith.constant dense<0.000000e+00> : vector<256xf32>
    %62 = vector.multi_reduction <add>, %61, %cst_38 [1] : vector<256x128xf32> to vector<256xf32>
    %63 = vector.shape_cast %62 : vector<256xf32> to vector<256x1xf32>
    %64 = arith.addf %55, %63 : vector<256x1xf32>
    %c0_39 = arith.constant 0 : index
    %c4_40 = arith.constant 4 : index
    %c8_41 = arith.constant 8 : index
    %c128_42 = arith.constant 128 : index
    %65 = vector.load %arg2[%c0_39, %c4_40, %c8_41, %c128_42] : memref<8x8x16x256xf32, #tpu.memory_space<vmem>>, vector<8x4x8x128xf32>
    %66 = vector.shape_cast %65 : vector<8x4x8x128xf32> to vector<256x128xf32>
    %cst_43 = arith.constant dense<0.000000e+00> : vector<256xf32>
    %67 = vector.multi_reduction <add>, %66, %cst_43 [1] : vector<256x128xf32> to vector<256xf32>
    %68 = vector.shape_cast %67 : vector<256xf32> to vector<256x1xf32>
    %69 = arith.addf %60, %68 : vector<256x1xf32>
    %70 = arith.mulf %66, %66 : vector<256x128xf32>
    %cst_44 = arith.constant dense<0.000000e+00> : vector<256xf32>
    %71 = vector.multi_reduction <add>, %70, %cst_44 [1] : vector<256x128xf32> to vector<256xf32>
    %72 = vector.shape_cast %71 : vector<256xf32> to vector<256x1xf32>
    %73 = arith.addf %64, %72 : vector<256x1xf32>
    %74 = tpu.concatenate %3, %12, %21, %30, %39, %48, %57, %66 in 1 : vector<256x128xf32>, vector<256x128xf32>, vector<256x128xf32>, vector<256x128xf32>, vector<256x128xf32>, vector<256x128xf32>, vector<256x128xf32>, vector<256x128xf32> -> vector<256x1024xf32>
    %cst_45 = arith.constant 9.765625E-4 : f32
    %75 = vector.broadcast %cst_45 : f32 to vector<256x1xf32>
    %76 = arith.mulf %69, %75 : vector<256x1xf32>
    %cst_46 = arith.constant 9.765625E-4 : f32
    %77 = vector.broadcast %cst_46 : f32 to vector<256x1xf32>
    %78 = arith.mulf %73, %77 : vector<256x1xf32>
    %79 = arith.mulf %76, %76 : vector<256x1xf32>
    %80 = arith.subf %78, %79 : vector<256x1xf32>
    %cst_47 = arith.constant 0.000000e+00 : f32
    %81 = vector.broadcast %cst_47 : f32 to vector<256x1xf32>
    %82 = arith.maximumf %80, %81 : vector<256x1xf32>
    %cst_48 = arith.constant 9.99999974E-6 : f32
    %83 = vector.broadcast %cst_48 : f32 to vector<256x1xf32>
    %84 = arith.addf %82, %83 : vector<256x1xf32>
    %85 = math.rsqrt %84 : vector<256x1xf32>
    %c0_49 = arith.constant 0 : index
    %c0_50 = arith.constant 0 : index
    %86 = vector.load %arg3[%c0_49, %c0_50] : memref<1024x256xf32, #tpu.memory_space<vmem>>, vector<1024x256xf32>
    %cst_51 = arith.constant dense<0.000000e+00> : vector<256x256xf32>
    %87 = tpu.matmul %74, %86, %cst_51 {dimension_numbers = #tpu.dot_dimension_numbers<[1], [0], [0], [1], [0, 0, 1, 1], [], []>} : vector<256x1024xf32>, vector<1024x256xf32>, vector<256x256xf32> -> vector<256x256xf32>
    %88 = vector.broadcast %85 : vector<256x1xf32> to vector<256x256xf32>
    %89 = arith.mulf %87, %88 : vector<256x256xf32>
    %90 = arith.mulf %76, %85 : vector<256x1xf32>
    %c0_52 = arith.constant 0 : index
    %c0_53 = arith.constant 0 : index
    %91 = vector.load %arg4[%c0_52, %c0_53] : memref<1x256xf32, #tpu.memory_space<vmem>>, vector<1x256xf32>
    %92 = vector.broadcast %90 : vector<256x1xf32> to vector<256x256xf32>
    %93 = vector.broadcast %91 : vector<1x256xf32> to vector<256x256xf32>
    %94 = arith.mulf %92, %93 : vector<256x256xf32>
    %95 = arith.subf %89, %94 : vector<256x256xf32>
    %c0_54 = arith.constant 0 : index
    %c0_55 = arith.constant 0 : index
    %96 = vector.load %arg5[%c0_54, %c0_55] : memref<1x256xf32, #tpu.memory_space<vmem>>, vector<1x256xf32>
    %97 = vector.broadcast %96 : vector<1x256xf32> to vector<256x256xf32>
    %98 = arith.addf %95, %97 : vector<256x256xf32>
    %c0_56 = arith.constant 0 : index
    %c0_57 = arith.constant 0 : index
    %99 = vector.load %arg6[%c0_56, %c0_57] : memref<256x256xf32, #tpu.memory_space<vmem>>, vector<256x256xf32>
    tpu.vector_store %arg6[%c0_56, %c0_57], %98 {strides = array<i32>} : memref<256x256xf32, #tpu.memory_space<vmem>>, vector<256x256xf32>,
    return
  }
  func.func @transform_0(%arg0: i32, %arg1: i32) -> (i32, i32, i32, i32) {
    %c0_i32 = arith.constant 0 : i32
    %c0_i32_0 = arith.constant 0 : i32
    %c0_i32_1 = arith.constant 0 : i32
    %c0_i32_2 = arith.constant 0 : i32
    return %arg0, %c0_i32, %c0_i32_0, %c0_i32_1 : i32, i32, i32, i32
  }
  func.func @transform_1(%arg0: i32, %arg1: i32) -> (i32, i32) {
    %c0_i32 = arith.constant 0 : i32
    %c0_i32_0 = arith.constant 0 : i32
    return %c0_i32, %arg1 : i32, i32
  }
  func.func @transform_2(%arg0: i32, %arg1: i32) -> (i32, i32) {
    %c0_i32 = arith.constant 0 : i32
    %c0_i32_0 = arith.constant 0 : i32
    return %c0_i32, %arg1 : i32, i32
  }
  func.func @transform_3(%arg0: i32, %arg1: i32) -> (i32, i32) {
    %c0_i32 = arith.constant 0 : i32
    %c0_i32_0 = arith.constant 0 : i32
    return %c0_i32, %arg1 : i32, i32
  }
  func.func @transform_4(%arg0: i32, %arg1: i32) -> (i32, i32) {
    %c0_i32 = arith.constant 0 : i32
    return %arg0, %arg1 : i32, i32
  }
}

</mosaic_0001>

<bundles_post_ra>
// kernel: patch_merging_forward.1
= control target key start
LH: loop header
LB: loop body
LE: loop exit
PB: predicated region body
PF: predicated region fallthrough
CT: control target
= control target key end

     0   :  { %9 = vsyncpa [#allocation3], 0  ;;  %s10145_s0 = inlined_call_operand.vmem [shape: f32[32,8,16,256], index: 0, kind: input, shape index: {}]   ;;  %s10146_s1 = inlined_call_operand.vmem [shape: f32[1024,256], index: 1, kind: input, shape index: {}]   ;;  %s10147_s2 = inlined_call_operand.vmem [shape: f32[1,256], index: 2, kind: input, shape index: {}]   ;;  %s10148_s3 = inlined_call_operand.vmem [shape: f32[1,256], index: 3, kind: input, shape index: {}]   ;;  %s10149_s4 = inlined_call_operand.hbm [shape: f32[1024,256], index: 4, kind: output, shape index: {}]  }
   0x1   :  { %11 = vsyncpa [#allocation3 + $0x1], 0  ;;  %s5364_s15 = smov 0   ;;  %s5366_s16 = smov 0  }
   0x2   :  { %s5368_s17 = smov 0   ;;  %s5370_s18 = smov 0  }
   0x3   :  { %s5372_s19 = smov 0   ;;  %s5374_s20 = smov 0  }
   0x4 LB: > { %s4339_s21 = sadd.s32 4294967295, %s5334_s20   ;;  %s4340_s22 = sadd.s32 4294967294, %s5334_s20   ;;  %s5334_s20 = sphi %s5374_s20, %s17_s20   ;;  %s5330_s19 = sphi %s5372_s19, %s11047_s19   ;;  %s5326_s18 = sphi %s5370_s18, %s11046_s18   ;;  %s5322_s17 = sphi %s5368_s17, %s11045_s17   ;;  %s5318_s16 = sphi %s5366_s16, %s11044_s16   ;;  %s5314_s15 = sphi %s5364_s15, %s11043_s15  }
   0x5   : > { %s29_s23 = sadd.s32 1, %s5330_s19  ;;  %s142_s24 = sadd.s32 1, %s5322_s17 }
   0x6   : > { %p31_p0 = scmp.ge.s32.totalorder %s29_s23, 4  ;;  %p152_p1 = scmp.ne.s32.totalorder %s5322_s17, %s5318_s16 }
   0x7   : > { %p153_p2 = scmp.eq.s32.totalorder %s4339_s21, 3  ;;  %p158_p3 = scmp.ne.s32.totalorder %s5318_s16, %s5314_s15 }
   0x8   : > { %s11049_s23 = smov (%p31_p0, %s29_s23), 0  ;;  %p159_p5 = scmp.eq.s32.totalorder %s4340_s22, 3 }
   0x9   : > { %p5404_p4 = por %p153_p2, %p152_p1  ;;  %s137_s26 = ssub.s32 %s5330_s19, %s11049_s23 }
   0xa   : > { %p4346_p6 = scmp.ge.s32.totalorder %s5334_s20, 1  ;;  %p140_p7 = scmp.eq.s32.totalorder %s137_s26, 0 }
   0xb   : > { %p5411_p8 = por %p159_p5, %p158_p3  ;;  %p212_p9 = scmp.lt.s32.totalorder %s5334_s20, 5 }
   0xc   : > { %s5417_s28 = scalar_select %p140_p7, %s5322_s17, %s142_s24  }
   0xd   : > { %p213_p10 = pnand %p4346_p6, %p212_p9 }
   0xf   : > { %216 = sbr.rel (%p213_p10) target bundleno = 1296 (0x510), region = 36 }
  0x16   : > { %s4348_s29 = sshll.u32 %s5326_s18, 3  ;;  %s249_s13 = sand.u32 1, %s5318_s16  }
  0x17   : > { %p253_p11 = scmp.lt.s32.totalorder %s4348_s29, 31  ;;  %s4347_s14 = sshll.u32 %s249_s13, 9 }
  0x18   : > { %s9739_s21 = scalar_lea.vmem [#allocation2], %s4347_s14  ;;  %s4487_s22 = sshll.u32 %s5326_s18, 13 }
  0x19   : > { %s11051_s29 = smov (!%p253_p11, %s4348_s29), 31  ;;  %s4227_s24 = sshll.u32 %s9739_s21, 4  ;;  %s10091_s24 = int_to_ptr.vmem [resolvable:$true] %s4227_s24 }
  0x1a   : > { %s4485_s30 = sshll.u32 %s11051_s29, 8  ;;  %s10099_s18 = scalar_lea.sflag [#allocation3], %s249_s13 }
  0x1b   : > { %s5423_s7 = scalar_lea.vmem %s10145_s0, %s4485_s30  ;;  %s10089_s30 = scalar_lea.hbm %s10149_s4, %s4487_s22 }
  0x1c   : > { %v5426_v0 = vld [vmem:[%s5423_s7 + $0x40] sm:$0xff]  ;;  %s5256_s5 = scalar_lea.vmem %s10091_s24, 8192  ;;  %s5336_s6 = smov [#allocation2]  }
  0x1d   : > { %v5429_v1 = vld [vmem:[%s5423_s7] sm:$0xff]  ;;  %313 = vadd.xlane.f32.xlu1 %v5426_v0  ;;  %v407_v36 = vmul.f32 %v5426_v0, %v5426_v0  ;;  %p5257_p12 = scmp.ne.s32.totalorder %s10091_s24, %s5256_s5  ;;  %s5260_s8 = sshll.u32 %s5336_s6, 4  ;;  %s5261_s8 = int_to_ptr.vmem [resolvable:$false] %s5260_s8 }
  0x1e   : > { %309 = vadd.xlane.f32.xlu0 %v5429_v1  ;;  %v5434_v2 = vld [vmem:[%s5423_s7 + $0x60] sm:$0xff]  ;;  %v405_v34 = vmul.f32 %v5429_v1, %v5429_v1  ;;  %s5262_s9 = scalar_lea.vmem %s5261_s8, 16384  ;;  %p5263_p1 = scmp.lt.s32.totalorder %s10091_s24, %s5261_s8 }
  0x1f   : > { %v278_v3 = vld [vmem:[%s5423_s7 + $0x20] sm:$0xff]  ;;  %v408_v35 = vmul.f32 %v5434_v2, %v5434_v2  ;;  %p5258_p13 = pnand %p5257_p12, %p5404_p4  ;;  %p5264_p2 = scmp.lt.s32.totalorder %s5262_s9, %s5256_s5 }
  0x20   : > { %v5439_v4 = vld [vmem:[%s5423_s7 + $0x120] sm:$0xff]  ;;  %v406_v33 = vmul.f32 %v278_v3, %v278_v3 }
  0x21   : > { %315 = vadd.xlane.f32.xlu1 %v5434_v2  ;;  %v5442_v5 = vld [vmem:[%s5423_s7 + $0x100] sm:$0xff]  ;;  %v410_v37 = vmul.f32 %v5439_v4, %v5439_v4  ;;  %p5259_p0 = pneg %p5258_p13  ;;  %p5265_p3 = por %p5264_p2, %p5263_p1 }
  0x22   : > { %311 = vadd.xlane.f32.xlu0 %v278_v3  ;;  %v5447_v6 = vld [vmem:[%s5423_s7 + $0x160] sm:$0xff]  ;;  %v409_v38 = vmul.f32 %v5442_v5, %v5442_v5 }
  0x23   : > { %v5450_v7 = vld [vmem:[%s5423_s7 + $0x140] sm:$0xff]  ;;  %v412_v39 = vmul.f32 %v5447_v6, %v5447_v6  ;;  %p5266_p5 = pnand %p5265_p3, %p5259_p0 }
  0x24   : > { %v5453_v8 = vld [vmem:[%s5423_s7 + $0x80] sm:$0xff]  ;;  %v411_v40 = vmul.f32 %v5450_v7, %v5450_v7 }
  0x25   : > { %319 = vadd.xlane.f32.xlu1 %v5439_v4  ;;  %2870 = vmatprep.mubr.f32.mxu1 %v5453_v8  ;;  %v5459_v9 = vld [vmem:[%s5423_s7 + $0x220] sm:$0xff] }
  0x26   : > { %317 = vadd.xlane.f32.xlu0 %v5442_v5  ;;  %v5462_v10 = vld [vmem:[%s5423_s7 + $0x200] sm:$0xff]  ;;  %v414_v41 = vmul.f32 %v5459_v9, %v5459_v9 }
  0x27   : > { %v5467_v11 = vld [vmem:[%s5423_s7 + $0x260] sm:$0xff]  ;;  %v413_v42 = vmul.f32 %v5462_v10, %v5462_v10 }
  0x28   : > { %v5470_v12 = vld [vmem:[%s5423_s7 + $0x240] sm:$0xff]  ;;  %v416_v43 = vmul.f32 %v5467_v11, %v5467_v11 }
  0x29   : > { %323 = vadd.xlane.f32.xlu1 %v5447_v6  ;;  %v5475_v13 = vld [vmem:[%s5423_s7 + $0x320] sm:$0xff]  ;;  %v415_v44 = vmul.f32 %v5470_v12, %v5470_v12 }
  0x2a   : > { %321 = vadd.xlane.f32.xlu0 %v5450_v7  ;;  %v5478_v14 = vld [vmem:[%s5423_s7 + $0x300] sm:$0xff]  ;;  %v418_v45 = vmul.f32 %v5475_v13, %v5475_v13 }
  0x2b   : > { %v5483_v15 = vld [vmem:[%s5423_s7 + $0x360] sm:$0xff]  ;;  %v417_v46 = vmul.f32 %v5478_v14, %v5478_v14 }
  0x2c   : > { %v5486_v16 = vld [vmem:[%s5423_s7 + $0x340] sm:$0xff]  ;;  %v420_v47 = vmul.f32 %v5483_v15, %v5483_v15 }
  0x2d   : > { %327 = vadd.xlane.f32.xlu1 %v5459_v9  ;;  %v5491_v17 = vld [vmem:[%s5423_s7 + $0x420] sm:$0xff]  ;;  %v419_v48 = vmul.f32 %v5486_v16, %v5486_v16 }
  0x2e   : > { %325 = vadd.xlane.f32.xlu0 %v5462_v10  ;;  %v5494_v18 = vld [vmem:[%s5423_s7 + $0x400] sm:$0xff]  ;;  %v422_v49 = vmul.f32 %v5491_v17, %v5491_v17 }
  0x2f   : > { %v5499_v19 = vld [vmem:[%s5423_s7 + $0x460] sm:$0xff]  ;;  %v421_v50 = vmul.f32 %v5494_v18, %v5494_v18 }
  0x30   : > { %v5502_v20 = vld [vmem:[%s5423_s7 + $0x440] sm:$0xff]  ;;  %v424_v51 = vmul.f32 %v5499_v19, %v5499_v19 }
  0x31   : > { %331 = vadd.xlane.f32.xlu1 %v5467_v11  ;;  %v5507_v21 = vld [vmem:[%s5423_s7 + $0x520] sm:$0xff]  ;;  %v423_v52 = vmul.f32 %v5502_v20, %v5502_v20 }
  0x32   : > { %329 = vadd.xlane.f32.xlu0 %v5470_v12  ;;  %v5510_v22 = vld [vmem:[%s5423_s7 + $0x500] sm:$0xff]  ;;  %v426_v53 = vmul.f32 %v5507_v21, %v5507_v21 }
  0x33   : > { %v5515_v23 = vld [vmem:[%s5423_s7 + $0x560] sm:$0xff]  ;;  %v425_v54 = vmul.f32 %v5510_v22, %v5510_v22 }
  0x34   : > { %v5518_v24 = vld [vmem:[%s5423_s7 + $0x540] sm:$0xff]  ;;  %v428_v55 = vmul.f32 %v5515_v23, %v5515_v23 }
  0x35   : > { %335 = vadd.xlane.f32.xlu1 %v5475_v13  ;;  %v5523_v25 = vld [vmem:[%s5423_s7 + $0x620] sm:$0xff]  ;;  %v427_v56 = vmul.f32 %v5518_v24, %v5518_v24 }
  0x36   : > { %333 = vadd.xlane.f32.xlu0 %v5478_v14  ;;  %v5526_v26 = vld [vmem:[%s5423_s7 + $0x600] sm:$0xff]  ;;  %v430_v57 = vmul.f32 %v5523_v25, %v5523_v25 }
  0x37   : > { %v5531_v27 = vld [vmem:[%s5423_s7 + $0x660] sm:$0xff]  ;;  %v429_v58 = vmul.f32 %v5526_v26, %v5526_v26 }
  0x38   : > { %v5534_v28 = vld [vmem:[%s5423_s7 + $0x640] sm:$0xff]  ;;  %v432_v59 = vmul.f32 %v5531_v27, %v5531_v27 }
  0x39   : > { %339 = vadd.xlane.f32.xlu1 %v5483_v15  ;;  %v5539_v29 = vld [vmem:[%s5423_s7 + $0x720] sm:$0xff]  ;;  %v431_v60 = vmul.f32 %v5534_v28, %v5534_v28 }
  0x3a   : > { %337 = vadd.xlane.f32.xlu0 %v5486_v16  ;;  %v5542_v30 = vld [vmem:[%s5423_s7 + $0x700] sm:$0xff]  ;;  %v434_v61 = vmul.f32 %v5539_v29, %v5539_v29 }
  0x3b   : > { %v5547_v31 = vld [vmem:[%s5423_s7 + $0x760] sm:$0xff]  ;;  %v433_v62 = vmul.f32 %v5542_v30, %v5542_v30 }
  0x3c   : > { %v5550_v32 = vld [vmem:[%s5423_s7 + $0x740] sm:$0xff]  ;;  %v436_v63 = vmul.f32 %v5547_v31, %v5547_v31 }
  0x3d   : > { %343 = vadd.xlane.f32.xlu1 %v5491_v17  ;;  %v435_v0 = vmul.f32 %v5550_v32, %v5550_v32  ;;  %v5617_v1 = vld [vmem:[%s5423_s7 + $0xa0] sm:$0xff] }
  0x3e   : > { %341 = vadd.xlane.f32.xlu0 %v5494_v18  ;;  %v5622_v2 = vld [vmem:[%s5423_s7 + $0xe0] sm:$0xff] }
  0x3f   : > { %v5625_v3 = vld [vmem:[%s5423_s7 + $0xc0] sm:$0xff] }
  0x40   : > { %v5630_v4 = vld [vmem:[%s5423_s7 + $0x1a0] sm:$0xff] }
  0x41   : > { %347 = vadd.xlane.f32.xlu1 %v5499_v19  ;;  %v5633_v5 = vld [vmem:[%s5423_s7 + $0x180] sm:$0xff] }
  0x42   : > { %345 = vadd.xlane.f32.xlu0 %v5502_v20  ;;  %v5638_v6 = vld [vmem:[%s5423_s7 + $0x1e0] sm:$0xff] }
  0x43   : > { %v5641_v7 = vld [vmem:[%s5423_s7 + $0x1c0] sm:$0xff] }
  0x44   : > { %v5650_v11 = vld [vmem:[%s5423_s7 + $0x2a0] sm:$0xff] }
  0x45   : > { %351 = vadd.xlane.f32.xlu1 %v5507_v21  ;;  %v5653_v12 = vld [vmem:[%s5423_s7 + $0x280] sm:$0xff] }
  0x46   : > { %349 = vadd.xlane.f32.xlu0 %v5510_v22  ;;  %v5662_v15 = vld [vmem:[%s5423_s7 + $0x2e0] sm:$0xff] }
  0x47   : > { %v5665_v16 = vld [vmem:[%s5423_s7 + $0x2c0] sm:$0xff] }
  0x48   : > { %v5674_v19 = vld [vmem:[%s5423_s7 + $0x3a0] sm:$0xff] }
  0x49   : > { %355 = vadd.xlane.f32.xlu1 %v5515_v23  ;;  %v5677_v20 = vld [vmem:[%s5423_s7 + $0x380] sm:$0xff] }
  0x4a   : > { %353 = vadd.xlane.f32.xlu0 %v5518_v24  ;;  %v5686_v23 = vld [vmem:[%s5423_s7 + $0x3e0] sm:$0xff] }
  0x4b   : > { %v5689_v24 = vld [vmem:[%s5423_s7 + $0x3c0] sm:$0xff] }
  0x4d   : > { %359 = vadd.xlane.f32.xlu1 %v5523_v25 }
  0x4e   : > { %357 = vadd.xlane.f32.xlu0 %v5526_v26 }
  0x51   : > { %363 = vadd.xlane.f32.xlu1 %v5531_v27  ;;  %v5698_v27 = vld [vmem:[%s5423_s7 + $0x4a0] sm:$0xff] }
  0x52   : > { %361 = vadd.xlane.f32.xlu0 %v5534_v28  ;;  %v5701_v28 = vld [vmem:[%s5423_s7 + $0x480] sm:$0xff] }
  0x55   : > { %367 = vadd.xlane.f32.xlu1 %v5539_v29 }
  0x56   : > { %365 = vadd.xlane.f32.xlu0 %v5542_v30 }
  0x59   : > { %371 = vadd.xlane.f32.xlu1 %v5547_v31  ;;  %v5710_v31 = vld [vmem:[%s5423_s7 + $0x4e0] sm:$0xff] }
  0x5a   : > { %369 = vadd.xlane.f32.xlu0 %v5550_v32  ;;  %v5713_v32 = vld [vmem:[%s5423_s7 + $0x4c0] sm:$0xff] }
  0x5d   : > { %439 = vadd.xlane.f32.xlu1 %v406_v33 }
  0x5e   : > { %437 = vadd.xlane.f32.xlu0 %v405_v34 }
  0x61   : > { %443 = vadd.xlane.f32.xlu1 %v408_v35  ;;  %v5722_v35 = vld [vmem:[%s5423_s7 + $0x5a0] sm:$0xff] }
  0x62   : > { %441 = vadd.xlane.f32.xlu0 %v407_v36  ;;  %v5725_v36 = vld [vmem:[%s5423_s7 + $0x580] sm:$0xff] }
  0x65   : > { %447 = vadd.xlane.f32.xlu1 %v410_v37 }
  0x66   : > { %445 = vadd.xlane.f32.xlu0 %v409_v38 }
  0x69   : > { %451 = vadd.xlane.f32.xlu1 %v412_v39  ;;  %v5734_v39 = vld [vmem:[%s5423_s7 + $0x5e0] sm:$0xff] }
  0x6a   : > { %449 = vadd.xlane.f32.xlu0 %v411_v40  ;;  %v5737_v40 = vld [vmem:[%s5423_s7 + $0x5c0] sm:$0xff] }
  0x6d   : > { %455 = vadd.xlane.f32.xlu1 %v414_v41 }
  0x6e   : > { %453 = vadd.xlane.f32.xlu0 %v413_v42 }
  0x71   : > { %459 = vadd.xlane.f32.xlu1 %v416_v43  ;;  %v5746_v43 = vld [vmem:[%s5423_s7 + $0x6a0] sm:$0xff] }
  0x72   : > { %457 = vadd.xlane.f32.xlu0 %v415_v44  ;;  %v5749_v44 = vld [vmem:[%s5423_s7 + $0x680] sm:$0xff] }
  0x75   : > { %463 = vadd.xlane.f32.xlu1 %v418_v45 }
  0x76   : > { %461 = vadd.xlane.f32.xlu0 %v417_v46 }
  0x79   : > { %467 = vadd.xlane.f32.xlu1 %v420_v47  ;;  %v5758_v47 = vld [vmem:[%s5423_s7 + $0x6e0] sm:$0xff] }
  0x7a   : > { %465 = vadd.xlane.f32.xlu0 %v419_v48  ;;  %v5761_v48 = vld [vmem:[%s5423_s7 + $0x6c0] sm:$0xff] }
  0x7d   : > { %471 = vadd.xlane.f32.xlu1 %v422_v49 }
  0x7e   : > { %469 = vadd.xlane.f32.xlu0 %v421_v50 }
  0x81   : > { %475 = vadd.xlane.f32.xlu1 %v424_v51  ;;  %v5770_v51 = vld [vmem:[%s5423_s7 + $0x7a0] sm:$0xff] }
  0x82   : > { %473 = vadd.xlane.f32.xlu0 %v423_v52  ;;  %v5773_v52 = vld [vmem:[%s5423_s7 + $0x780] sm:$0xff] }
  0x85   : > { %479 = vadd.xlane.f32.xlu1 %v426_v53 }
  0x86   : > { %477 = vadd.xlane.f32.xlu0 %v425_v54 }
  0x89   : > { %483 = vadd.xlane.f32.xlu1 %v428_v55  ;;  %v5782_v55 = vld [vmem:[%s5423_s7 + $0x7e0] sm:$0xff] }
  0x8a   : > { %481 = vadd.xlane.f32.xlu0 %v427_v56  ;;  %v5785_v56 = vld [vmem:[%s5423_s7 + $0x7c0] sm:$0xff] }
  0x8d   : > { %487 = vadd.xlane.f32.xlu1 %v430_v57  ;;  %v663_v57 = vmul.f32 %v5617_v1, %v5617_v1 }
  0x8e   : > { %485 = vadd.xlane.f32.xlu0 %v429_v58  ;;  %v662_v58 = vmul.f32 %v5453_v8, %v5453_v8 }
  0x91   : > { %491 = vadd.xlane.f32.xlu1 %v432_v59 }
  0x92   : > { %489 = vadd.xlane.f32.xlu0 %v431_v60 }
  0x95   : > { %495 = vadd.xlane.f32.xlu1 %v434_v61  ;;  %v665_v61 = vmul.f32 %v5622_v2, %v5622_v2 }
  0x96   : > { %493 = vadd.xlane.f32.xlu0 %v433_v62  ;;  %v664_v62 = vmul.f32 %v5625_v3, %v5625_v3 }
  0x99   : > { %499 = vadd.xlane.f32.xlu1 %v436_v63 }
  0x9a   : > { %497 = vadd.xlane.f32.xlu0 %v435_v0 }
  0x9d   : > { %568 = vadd.xlane.f32.xlu1 %v5617_v1  ;;  %v666_v1 = vmul.f32 %v5633_v5, %v5633_v5 }
  0x9e   : > { %566 = vadd.xlane.f32.xlu0 %v5453_v8  ;;  %v667_v8 = vmul.f32 %v5630_v4, %v5630_v4 }
  0xa1   : > { %572 = vadd.xlane.f32.xlu1 %v5622_v2  ;;  %v669_v2 = vmul.f32 %v5638_v6, %v5638_v6 }
  0xa2   : > { %570 = vadd.xlane.f32.xlu0 %v5625_v3  ;;  %v668_v3 = vmul.f32 %v5641_v7, %v5641_v7 }
  0xa5   : > { %576 = vadd.xlane.f32.xlu1 %v5630_v4  ;;  %v671_v4 = vmul.f32 %v5650_v11, %v5650_v11 }
  0xa6   : > { %574 = vadd.xlane.f32.xlu0 %v5633_v5  ;;  %v670_v5 = vmul.f32 %v5653_v12, %v5653_v12 }
  0xa9   : > { %580 = vadd.xlane.f32.xlu1 %v5638_v6  ;;  %v673_v6 = vmul.f32 %v5662_v15, %v5662_v15 }
  0xaa   : > { %578 = vadd.xlane.f32.xlu0 %v5641_v7  ;;  %v5645_v9 = vpop.xlane.xlu1 %313  ;;  %v672_v7 = vmul.f32 %v5665_v16, %v5665_v16 }
  0xab   : > { %v5647_v10 = vpop.xlane.xlu0 %309 }
  0xad   : > { %584 = vadd.xlane.f32.xlu1 %v5650_v11  ;;  %v675_v11 = vmul.f32 %v5674_v19, %v5674_v19 }
  0xae   : > { %582 = vadd.xlane.f32.xlu0 %v5653_v12  ;;  %v5657_v13 = vpop.xlane.xlu1 %315  ;;  %v674_v12 = vmul.f32 %v5677_v20, %v5677_v20 }
  0xaf   : > { %v5659_v14 = vpop.xlane.xlu0 %311 }
  0xb1   : > { %588 = vadd.xlane.f32.xlu1 %v5662_v15  ;;  %v677_v15 = vmul.f32 %v5686_v23, %v5686_v23 }
  0xb2   : > { %586 = vadd.xlane.f32.xlu0 %v5665_v16  ;;  %v5669_v17 = vpop.xlane.xlu1 %319  ;;  %v676_v16 = vmul.f32 %v5689_v24, %v5689_v24 }
  0xb3   : > { %v5671_v18 = vpop.xlane.xlu0 %317 }
  0xb5   : > { %592 = vadd.xlane.f32.xlu1 %v5674_v19  ;;  %v679_v19 = vmul.f32 %v5698_v27, %v5698_v27 }
  0xb6   : > { %590 = vadd.xlane.f32.xlu0 %v5677_v20  ;;  %v5681_v21 = vpop.xlane.xlu1 %323  ;;  %v678_v20 = vmul.f32 %v5701_v28, %v5701_v28 }
  0xb7   : > { %v5683_v22 = vpop.xlane.xlu0 %321 }
  0xb9   : > { %596 = vadd.xlane.f32.xlu1 %v5686_v23  ;;  %v681_v23 = vmul.f32 %v5710_v31, %v5710_v31 }
  0xba   : > { %594 = vadd.xlane.f32.xlu0 %v5689_v24  ;;  %v5693_v25 = vpop.xlane.xlu1 %327  ;;  %v680_v24 = vmul.f32 %v5713_v32, %v5713_v32 }
  0xbb   : > { %v5695_v26 = vpop.xlane.xlu0 %325 }
  0xbd   : > { %600 = vadd.xlane.f32.xlu1 %v5698_v27  ;;  %v683_v27 = vmul.f32 %v5722_v35, %v5722_v35 }
  0xbe   : > { %598 = vadd.xlane.f32.xlu0 %v5701_v28  ;;  %v5705_v29 = vpop.xlane.xlu1 %331  ;;  %v682_v28 = vmul.f32 %v5725_v36, %v5725_v36 }
  0xbf   : > { %v5707_v30 = vpop.xlane.xlu0 %329 }
  0xc1   : > { %604 = vadd.xlane.f32.xlu1 %v5710_v31  ;;  %v685_v31 = vmul.f32 %v5734_v39, %v5734_v39 }
  0xc2   : > { %602 = vadd.xlane.f32.xlu0 %v5713_v32  ;;  %v5717_v33 = vpop.xlane.xlu1 %335  ;;  %v684_v32 = vmul.f32 %v5737_v40, %v5737_v40 }
  0xc3   : > { %10219 = vst [vmem:[#allocation5_spill] sm:$0xff] %v5717_v33  ;;  %v5719_v34 = vpop.xlane.xlu0 %333 }
  0xc4   : > { %10220 = vst [vmem:[#allocation6_spill] sm:$0xff] %v5719_v34 }
  0xc5   : > { %608 = vadd.xlane.f32.xlu1 %v5722_v35  ;;  %v687_v35 = vmul.f32 %v5746_v43, %v5746_v43 }
  0xc6   : > { %606 = vadd.xlane.f32.xlu0 %v5725_v36  ;;  %v5729_v37 = vpop.xlane.xlu1 %339  ;;  %v686_v36 = vmul.f32 %v5749_v44, %v5749_v44 }
  0xc7   : > { %10221 = vst [vmem:[#allocation7_spill] sm:$0xff] %v5729_v37  ;;  %v5731_v38 = vpop.xlane.xlu0 %337  ;;  %v6105_v37 = vld [vmem:[%s5423_s7 + $0x750] sm:$0xff] }
  0xc8   : > { %10222 = vst [vmem:[#allocation8_spill] sm:$0xff] %v5731_v38  ;;  %v6093_v38 = vld [vmem:[%s5423_s7 + $0x710] sm:$0xff] }
  0xc9   : > { %612 = vadd.xlane.f32.xlu1 %v5734_v39  ;;  %v689_v39 = vmul.f32 %v5758_v47, %v5758_v47 }
  0xca   : > { %610 = vadd.xlane.f32.xlu0 %v5737_v40  ;;  %v5741_v41 = vpop.xlane.xlu1 %343  ;;  %v688_v40 = vmul.f32 %v5761_v48, %v5761_v48 }
  0xcb   : > { %10223 = vst [vmem:[#allocation9_spill] sm:$0xff] %v5741_v41  ;;  %v5743_v42 = vpop.xlane.xlu0 %341  ;;  %v6081_v41 = vld [vmem:[%s5423_s7 + $0x650] sm:$0xff] }
  0xcc   : > { %10224 = vst [vmem:[#allocation10_spill] sm:$0xff] %v5743_v42  ;;  %v6078_v42 = vld [vmem:[%s5423_s7 + $0x670] sm:$0xff] }
  0xcd   : > { %616 = vadd.xlane.f32.xlu1 %v5746_v43  ;;  %v691_v43 = vmul.f32 %v5770_v51, %v5770_v51 }
  0xce   : > { %614 = vadd.xlane.f32.xlu0 %v5749_v44  ;;  %v5753_v45 = vpop.xlane.xlu1 %347  ;;  %v690_v44 = vmul.f32 %v5773_v52, %v5773_v52 }
  0xcf   : > { %10225 = vst [vmem:[#allocation11_spill] sm:$0xff] %v5753_v45  ;;  %v5755_v46 = vpop.xlane.xlu0 %345 }
  0xd0   : > { %10226 = vst [vmem:[#allocation12_spill] sm:$0xff] %v5755_v46 }
  0xd1   : > { %620 = vadd.xlane.f32.xlu1 %v5758_v47 }
  0xd2   : > { %618 = vadd.xlane.f32.xlu0 %v5761_v48  ;;  %v5765_v49 = vpop.xlane.xlu1 %351  ;;  %v693_v48 = vmul.f32 %v5782_v55, %v5782_v55 }
  0xd3   : > { %10227 = vst [vmem:[#allocation13_spill] sm:$0xff] %v5765_v49  ;;  %v5767_v50 = vpop.xlane.xlu0 %349  ;;  %v6069_v49 = vld [vmem:[%s5423_s7 + $0x610] sm:$0xff] }
  0xd4   : > { %10228 = vst [vmem:[#allocation14_spill] sm:$0xff] %v5767_v50  ;;  %v6066_v50 = vld [vmem:[%s5423_s7 + $0x630] sm:$0xff] }
  0xd5   : > { %624 = vadd.xlane.f32.xlu1 %v5770_v51 }
  0xd6   : > { %622 = vadd.xlane.f32.xlu0 %v5773_v52  ;;  %v5777_v53 = vpop.xlane.xlu1 %355 }
  0xd7   : > { %10229 = vst [vmem:[#allocation15_spill] sm:$0xff] %v5777_v53  ;;  %v5779_v54 = vpop.xlane.xlu0 %353 }
  0xd8   : > { %10230 = vst [vmem:[#allocation16_spill] sm:$0xff] %v5779_v54 }
  0xd9   : > { %628 = vadd.xlane.f32.xlu1 %v5782_v55 }
  0xda   : > { %626 = vadd.xlane.f32.xlu0 %v5785_v56  ;;  %v5793_v59 = vpop.xlane.xlu1 %359 }
  0xdb   : > { %10231 = vst [vmem:[#allocation17_spill] sm:$0xff] %v5793_v59  ;;  %v5795_v60 = vpop.xlane.xlu0 %357  ;;  %v6057_v59 = vld [vmem:[%s5423_s7 + $0x550] sm:$0xff] }
  0xdc   : > { %10232 = vst [vmem:[#allocation18_spill] sm:$0xff] %v5795_v60  ;;  %v6054_v60 = vld [vmem:[%s5423_s7 + $0x570] sm:$0xff] }
  0xdd   : > { %696 = vadd.xlane.f32.xlu1 %v663_v57 }
  0xde   : > { %694 = vadd.xlane.f32.xlu0 %v662_v58  ;;  %v5801_v63 = vpop.xlane.xlu1 %363 }
  0xdf   : > { %10233 = vst [vmem:[#allocation19_spill] sm:$0xff] %v5801_v63  ;;  %v5803_v0 = vpop.xlane.xlu0 %361 }
  0xe0   : > { %10234 = vst [vmem:[#allocation20_spill] sm:$0xff] %v5803_v0 }
  0xe1   : > { %700 = vadd.xlane.f32.xlu1 %v665_v61 }
  0xe2   : > { %698 = vadd.xlane.f32.xlu0 %v664_v62  ;;  %v5809_v57 = vpop.xlane.xlu1 %367 }
  0xe3   : > { %10235 = vst [vmem:[#allocation21_spill] sm:$0xff] %v5809_v57  ;;  %v5811_v58 = vpop.xlane.xlu0 %365  ;;  %v6045_v57 = vld [vmem:[%s5423_s7 + $0x510] sm:$0xff] }
  0xe4   : > { %10236 = vst [vmem:[#allocation22_spill] sm:$0xff] %v5811_v58  ;;  %v6042_v58 = vld [vmem:[%s5423_s7 + $0x530] sm:$0xff] }
  0xe5   : > { %704 = vadd.xlane.f32.xlu1 %v667_v8 }
  0xe6   : > { %702 = vadd.xlane.f32.xlu0 %v666_v1  ;;  %v5817_v61 = vpop.xlane.xlu1 %371 }
  0xe7   : > { %10237 = vst [vmem:[#allocation23_spill] sm:$0xff] %v5817_v61  ;;  %v5819_v62 = vpop.xlane.xlu0 %369 }
  0xe8   : > { %10238 = vst [vmem:[#allocation24_spill] sm:$0xff] %v5819_v62 }
  0xe9   : > { %708 = vadd.xlane.f32.xlu1 %v669_v2 }
  0xea   : > { %706 = vadd.xlane.f32.xlu0 %v668_v3  ;;  %v5825_v8 = vpop.xlane.xlu1 %439 }
  0xeb   : > { %10239 = vst [vmem:[#allocation25_spill] sm:$0xff] %v5825_v8  ;;  %v5827_v1 = vpop.xlane.xlu0 %437  ;;  %v6033_v8 = vld [vmem:[%s5423_s7 + $0x450] sm:$0xff] }
  0xec   : > { %10240 = vst [vmem:[#allocation26_spill] sm:$0xff] %v5827_v1  ;;  %v6030_v1 = vld [vmem:[%s5423_s7 + $0x470] sm:$0xff] }
  0xed   : > { %712 = vadd.xlane.f32.xlu1 %v671_v4 }
  0xee   : > { %710 = vadd.xlane.f32.xlu0 %v670_v5  ;;  %v5833_v2 = vpop.xlane.xlu1 %443 }
  0xef   : > { %10241 = vst [vmem:[#allocation27_spill] sm:$0xff] %v5833_v2  ;;  %v5835_v3 = vpop.xlane.xlu0 %441 }
  0xf0   : > { %10242 = vst [vmem:[#allocation28_spill] sm:$0xff] %v5835_v3 }
  0xf1   : > { %716 = vadd.xlane.f32.xlu1 %v673_v6 }
  0xf2   : > { %714 = vadd.xlane.f32.xlu0 %v672_v7  ;;  %v5841_v4 = vpop.xlane.xlu1 %447 }
  0xf3   : > { %10243 = vst [vmem:[#allocation29_spill] sm:$0xff] %v5841_v4  ;;  %v5843_v5 = vpop.xlane.xlu0 %445  ;;  %v6021_v4 = vld [vmem:[%s5423_s7 + $0x410] sm:$0xff] }
  0xf4   : > { %10244 = vst [vmem:[#allocation30_spill] sm:$0xff] %v5843_v5  ;;  %v6018_v5 = vld [vmem:[%s5423_s7 + $0x430] sm:$0xff] }
  0xf5   : > { %720 = vadd.xlane.f32.xlu1 %v675_v11 }
  0xf6   : > { %718 = vadd.xlane.f32.xlu0 %v674_v12  ;;  %v5849_v6 = vpop.xlane.xlu1 %451 }
  0xf7   : > { %10245 = vst [vmem:[#allocation31_spill] sm:$0xff] %v5849_v6  ;;  %v5851_v7 = vpop.xlane.xlu0 %449 }
  0xf8   : > { %10246 = vst [vmem:[#allocation32_spill] sm:$0xff] %v5851_v7 }
  0xf9   : > { %724 = vadd.xlane.f32.xlu1 %v677_v15 }
  0xfa   : > { %722 = vadd.xlane.f32.xlu0 %v676_v16  ;;  %v5857_v11 = vpop.xlane.xlu1 %455 }
  0xfb   : > { %10247 = vst [vmem:[#allocation33_spill] sm:$0xff] %v5857_v11  ;;  %v5859_v12 = vpop.xlane.xlu0 %453  ;;  %v6009_v11 = vld [vmem:[%s5423_s7 + $0x350] sm:$0xff] }
  0xfc   : > { %10248 = vst [vmem:[#allocation34_spill] sm:$0xff] %v5859_v12  ;;  %v6006_v12 = vld [vmem:[%s5423_s7 + $0x370] sm:$0xff] }
  0xfd   : > { %728 = vadd.xlane.f32.xlu1 %v679_v19 }
  0xfe   : > { %726 = vadd.xlane.f32.xlu0 %v678_v20  ;;  %v5865_v15 = vpop.xlane.xlu1 %459 }
  0xff   : > { %10249 = vst [vmem:[#allocation35_spill] sm:$0xff] %v5865_v15  ;;  %v5867_v16 = vpop.xlane.xlu0 %457 }
 0x100   : > { %10250 = vst [vmem:[#allocation36_spill] sm:$0xff] %v5867_v16 }
 0x101   : > { %732 = vadd.xlane.f32.xlu1 %v681_v23 }
 0x102   : > { %730 = vadd.xlane.f32.xlu0 %v680_v24  ;;  %v5873_v19 = vpop.xlane.xlu1 %463 }
 0x103   : > { %10251 = vst [vmem:[#allocation37_spill] sm:$0xff] %v5873_v19  ;;  %v5875_v20 = vpop.xlane.xlu0 %461  ;;  %v5997_v19 = vld [vmem:[%s5423_s7 + $0x310] sm:$0xff] }
 0x104   : > { %10252 = vst [vmem:[#allocation38_spill] sm:$0xff] %v5875_v20  ;;  %v5994_v20 = vld [vmem:[%s5423_s7 + $0x330] sm:$0xff] }
 0x105   : > { %736 = vadd.xlane.f32.xlu1 %v683_v27 }
 0x106   : > { %734 = vadd.xlane.f32.xlu0 %v682_v28  ;;  %v5881_v23 = vpop.xlane.xlu1 %467 }
 0x107   : > { %10253 = vst [vmem:[#allocation39_spill] sm:$0xff] %v5881_v23  ;;  %v5883_v24 = vpop.xlane.xlu0 %465 }
 0x108   : > { %10254 = vst [vmem:[#allocation40_spill] sm:$0xff] %v5883_v24 }
 0x109   : > { %740 = vadd.xlane.f32.xlu1 %v685_v31 }
 0x10a   : > { %738 = vadd.xlane.f32.xlu0 %v684_v32  ;;  %v5889_v27 = vpop.xlane.xlu1 %471 }
 0x10b   : > { %10255 = vst [vmem:[#allocation41_spill] sm:$0xff] %v5889_v27  ;;  %v5891_v28 = vpop.xlane.xlu0 %469  ;;  %v5985_v27 = vld [vmem:[%s5423_s7 + $0x250] sm:$0xff] }
 0x10c   : > { %10256 = vst [vmem:[#allocation42_spill] sm:$0xff] %v5891_v28  ;;  %v5982_v28 = vld [vmem:[%s5423_s7 + $0x270] sm:$0xff] }
 0x10d   : > { %744 = vadd.xlane.f32.xlu1 %v687_v35 }
 0x10e   : > { %742 = vadd.xlane.f32.xlu0 %v686_v36  ;;  %v5897_v31 = vpop.xlane.xlu1 %475  ;;  %v692_v36 = vmul.f32 %v5785_v56, %v5785_v56 }
 0x10f   : > { %10257 = vst [vmem:[#allocation43_spill] sm:$0xff] %v5897_v31  ;;  %v5899_v32 = vpop.xlane.xlu0 %473  ;;  %v5973_v31 = vld [vmem:[%s5423_s7 + $0x210] sm:$0xff] }
 0x110   : > { %10258 = vst [vmem:[#allocation44_spill] sm:$0xff] %v5899_v32  ;;  %v5970_v32 = vld [vmem:[%s5423_s7 + $0x230] sm:$0xff] }
 0x111   : > { %748 = vadd.xlane.f32.xlu1 %v689_v39 }
 0x112   : > { %746 = vadd.xlane.f32.xlu0 %v688_v40  ;;  %v5905_v35 = vpop.xlane.xlu1 %479 }
 0x113   : > { %10259 = vst [vmem:[#allocation45_spill] sm:$0xff] %v5905_v35  ;;  %v5907_v47 = vpop.xlane.xlu0 %477  ;;  %v5961_v35 = vld [vmem:[%s5423_s7 + $0x150] sm:$0xff] }
 0x114   : > { %10260 = vst [vmem:[#allocation46_spill] sm:$0xff] %v5907_v47  ;;  %v5958_v47 = vld [vmem:[%s5423_s7 + $0x170] sm:$0xff] }
 0x115   : > { %752 = vadd.xlane.f32.xlu1 %v691_v43  ;;  %v5922_v43 = vld [vmem:[%s5423_s7 + $0x30] sm:$0xff] }
 0x116   : > { %750 = vadd.xlane.f32.xlu0 %v690_v44  ;;  %v5913_v39 = vpop.xlane.xlu1 %483  ;;  %v5925_v44 = vld [vmem:[%s5423_s7 + $0x10] sm:$0xff] }
 0x117   : > { %10261 = vst [vmem:[#allocation47_spill] sm:$0xff] %v5913_v39  ;;  %v5915_v51 = vpop.xlane.xlu0 %481  ;;  %v5949_v39 = vld [vmem:[%s5423_s7 + $0x110] sm:$0xff] }
 0x118   : > { %10262 = vst [vmem:[#allocation48_spill] sm:$0xff] %v5915_v51  ;;  %v5946_v51 = vld [vmem:[%s5423_s7 + $0x130] sm:$0xff] }
 0x119   : > { %756 = vadd.xlane.f32.xlu1 %v693_v48  ;;  %v5934_v48 = vld [vmem:[%s5423_s7 + $0x70] sm:$0xff] }
 0x11a   : > { %754 = vadd.xlane.f32.xlu0 %v692_v36  ;;  %v5917_v52 = vpop.xlane.xlu1 %487  ;;  %v5937_v36 = vld [vmem:[%s5423_s7 + $0x50] sm:$0xff] }
 0x11b   : > { %10263 = vst [vmem:[#allocation49_spill] sm:$0xff] %v5917_v52  ;;  %v5919_v40 = vpop.xlane.xlu0 %485 }
 0x11c   : > { %10264 = vst [vmem:[#allocation50_spill] sm:$0xff] %v5919_v40 }
 0x11d   : > { %824 = vadd.xlane.f32.xlu1 %v5922_v43 }
 0x11e   : > { %822 = vadd.xlane.f32.xlu0 %v5925_v44  ;;  %v5929_v55 = vpop.xlane.xlu1 %491 }
 0x11f   : > { %10265 = vst [vmem:[#allocation51_spill] sm:$0xff] %v5929_v55  ;;  %v5931_v56 = vpop.xlane.xlu0 %489 }
 0x120   : > { %10266 = vst [vmem:[#allocation52_spill] sm:$0xff] %v5931_v56 }
 0x121   : > { %828 = vadd.xlane.f32.xlu1 %v5934_v48 }
 0x122   : > { %826 = vadd.xlane.f32.xlu0 %v5937_v36  ;;  %v5941_v40 = vpop.xlane.xlu1 %495 }
 0x123   : > { %10267 = vst [vmem:[#allocation53_spill] sm:$0xff] %v5941_v40  ;;  %v5943_v52 = vpop.xlane.xlu0 %493 }
 0x124   : > { %10268 = vst [vmem:[#allocation54_spill] sm:$0xff] %v5943_v52 }
 0x125   : > { %832 = vadd.xlane.f32.xlu1 %v5946_v51 }
 0x126   : > { %830 = vadd.xlane.f32.xlu0 %v5949_v39  ;;  %v5953_v56 = vpop.xlane.xlu1 %499 }
 0x127   : > { %10269 = vst [vmem:[#allocation55_spill] sm:$0xff] %v5953_v56  ;;  %v5955_v55 = vpop.xlane.xlu0 %497 }
 0x128   : > { %10270 = vst [vmem:[#allocation56_spill] sm:$0xff] %v5955_v55 }
 0x129   : > { %836 = vadd.xlane.f32.xlu1 %v5958_v47 }
 0x12a   : > { %834 = vadd.xlane.f32.xlu0 %v5961_v35  ;;  %v5965_v52 = vpop.xlane.xlu1 %568 }
 0x12b   : > { %v5967_v40 = vpop.xlane.xlu0 %566 }
 0x12d   : > { %840 = vadd.xlane.f32.xlu1 %v5970_v32 }
 0x12e   : > { %838 = vadd.xlane.f32.xlu0 %v5973_v31  ;;  %v5977_v55 = vpop.xlane.xlu1 %572 }
 0x12f   : > { %v5979_v56 = vpop.xlane.xlu0 %570 }
 0x131   : > { %844 = vadd.xlane.f32.xlu1 %v5982_v28 }
 0x132   : > { %842 = vadd.xlane.f32.xlu0 %v5985_v27  ;;  %v5989_v24 = vpop.xlane.xlu1 %576 }
 0x133   : > { %v5991_v23 = vpop.xlane.xlu0 %574 }
 0x135   : > { %848 = vadd.xlane.f32.xlu1 %v5994_v20 }
 0x136   : > { %846 = vadd.xlane.f32.xlu0 %v5997_v19  ;;  %v6001_v16 = vpop.xlane.xlu1 %580 }
 0x137   : > { %v6003_v15 = vpop.xlane.xlu0 %578 }
 0x139   : > { %852 = vadd.xlane.f32.xlu1 %v6006_v12 }
 0x13a   : > { %850 = vadd.xlane.f32.xlu0 %v6009_v11  ;;  %v6013_v7 = vpop.xlane.xlu1 %584 }
 0x13b   : > { %v6015_v6 = vpop.xlane.xlu0 %582 }
 0x13d   : > { %856 = vadd.xlane.f32.xlu1 %v6018_v5 }
 0x13e   : > { %854 = vadd.xlane.f32.xlu0 %v6021_v4  ;;  %v6025_v3 = vpop.xlane.xlu1 %588 }
 0x13f   : > { %v6027_v2 = vpop.xlane.xlu0 %586 }
 0x141   : > { %860 = vadd.xlane.f32.xlu1 %v6030_v1 }
 0x142   : > { %858 = vadd.xlane.f32.xlu0 %v6033_v8  ;;  %v6037_v62 = vpop.xlane.xlu1 %592 }
 0x143   : > { %10271 = vst [vmem:[#allocation57_spill] sm:$0xff] %v6037_v62  ;;  %v6039_v61 = vpop.xlane.xlu0 %590 }
 0x144   : > { %10272 = vst [vmem:[#allocation58_spill] sm:$0xff] %v6039_v61 }
 0x145   : > { %864 = vadd.xlane.f32.xlu1 %v6042_v58 }
 0x146   : > { %862 = vadd.xlane.f32.xlu0 %v6045_v57  ;;  %v6049_v0 = vpop.xlane.xlu1 %596 }
 0x147   : > { %10273 = vst [vmem:[#allocation59_spill] sm:$0xff] %v6049_v0  ;;  %v6051_v63 = vpop.xlane.xlu0 %594  ;;  %v6102_v0 = vld [vmem:[%s5423_s7 + $0x770] sm:$0xff] }
 0x148   : > { %10274 = vst [vmem:[#allocation60_spill] sm:$0xff] %v6051_v63  ;;  %v6090_v63 = vld [vmem:[%s5423_s7 + $0x730] sm:$0xff] }
 0x149   : > { %868 = vadd.xlane.f32.xlu1 %v6054_v60 }
 0x14a   : > { %866 = vadd.xlane.f32.xlu0 %v6057_v59  ;;  %v6061_v54 = vpop.xlane.xlu1 %600 }
 0x14b   : > { %10275 = vst [vmem:[#allocation61_spill] sm:$0xff] %v6061_v54  ;;  %v6063_v53 = vpop.xlane.xlu0 %598 }
 0x14c   : > { %10276 = vst [vmem:[#allocation62_spill] sm:$0xff] %v6063_v53 }
 0x14d   : > { %872 = vadd.xlane.f32.xlu1 %v6066_v50 }
 0x14e   : > { %870 = vadd.xlane.f32.xlu0 %v6069_v49  ;;  %v6073_v46 = vpop.xlane.xlu1 %604 }
 0x14f   : > { %10277 = vst [vmem:[#allocation63_spill] sm:$0xff] %v6073_v46  ;;  %v6075_v45 = vpop.xlane.xlu0 %602 }
 0x150   : > { %10278 = vst [vmem:[#allocation64_spill] sm:$0xff] %v6075_v45 }
 0x151   : > { %876 = vadd.xlane.f32.xlu1 %v6078_v42 }
 0x152   : > { %874 = vadd.xlane.f32.xlu0 %v6081_v41  ;;  %v6085_v53 = vpop.xlane.xlu1 %608 }
 0x153   : > { %10279 = vst [vmem:[#allocation65_spill] sm:$0xff] %v6085_v53  ;;  %v6087_v54 = vpop.xlane.xlu0 %606  ;;  %v918_v53 = vmul.f32 %v5925_v44, %v5925_v44  ;;  %v922_v44 = vmul.f32 %v5949_v39, %v5949_v39  ;;  %v927_v39 = vmul.f32 %v5970_v32, %v5970_v32  ;;  %v930_v32 = vmul.f32 %v5997_v19, %v5997_v19 }
 0x154   : > { %10280 = vst [vmem:[#allocation66_spill] sm:$0xff] %v6087_v54  ;;  %v919_v54 = vmul.f32 %v5922_v43, %v5922_v43  ;;  %v923_v43 = vmul.f32 %v5946_v51, %v5946_v51  ;;  %v926_v51 = vmul.f32 %v5973_v31, %v5973_v31  ;;  %v931_v31 = vmul.f32 %v5994_v20, %v5994_v20 }
 0x155   : > { %880 = vadd.xlane.f32.xlu1 %v6090_v63  ;;  %v935_v19 = vmul.f32 %v6018_v5, %v6018_v5  ;;  %v934_v20 = vmul.f32 %v6021_v4, %v6021_v4  ;;  %v939_v4 = vmul.f32 %v6042_v58, %v6042_v58  ;;  %v938_v5 = vmul.f32 %v6045_v57, %v6045_v57 }
 0x156   : > { %878 = vadd.xlane.f32.xlu0 %v6093_v38  ;;  %v6097_v45 = vpop.xlane.xlu1 %612  ;;  %v943_v57 = vmul.f32 %v6066_v50, %v6066_v50  ;;  %v942_v58 = vmul.f32 %v6069_v49, %v6069_v49  ;;  %v947_v49 = vmul.f32 %v6090_v63, %v6090_v63  ;;  %v946_v50 = vmul.f32 %v6093_v38, %v6093_v38 }
 0x157   : > { %10281 = vst [vmem:[#allocation67_spill] sm:$0xff] %v6097_v45  ;;  %v6099_v46 = vpop.xlane.xlu0 %610  ;;  %v920_v45 = vmul.f32 %v5937_v36, %v5937_v36  ;;  %v924_v36 = vmul.f32 %v5961_v35, %v5961_v35  ;;  %v929_v35 = vmul.f32 %v5982_v28, %v5982_v28  ;;  %v932_v28 = vmul.f32 %v6009_v11, %v6009_v11 }
 0x158   : > { %10282 = vst [vmem:[#allocation68_spill] sm:$0xff] %v6099_v46  ;;  %v921_v46 = vmul.f32 %v5934_v48, %v5934_v48  ;;  %v925_v48 = vmul.f32 %v5958_v47, %v5958_v47  ;;  %v928_v47 = vmul.f32 %v5985_v27, %v5985_v27  ;;  %v933_v27 = vmul.f32 %v6006_v12, %v6006_v12 }
 0x159   : > { %884 = vadd.xlane.f32.xlu1 %v6102_v0  ;;  %v937_v11 = vmul.f32 %v6030_v1, %v6030_v1  ;;  %v936_v12 = vmul.f32 %v6033_v8, %v6033_v8  ;;  %v941_v8 = vmul.f32 %v6054_v60, %v6054_v60  ;;  %v940_v1 = vmul.f32 %v6057_v59, %v6057_v59 }
 0x15a   : > { %882 = vadd.xlane.f32.xlu0 %v6105_v37  ;;  %v6113_v61 = vpop.xlane.xlu1 %616  ;;  %v945_v59 = vmul.f32 %v6078_v42, %v6078_v42  ;;  %v944_v60 = vmul.f32 %v6081_v41, %v6081_v41  ;;  %v949_v41 = vmul.f32 %v6102_v0, %v6102_v0 }
 0x15b   : > { %v6115_v34 = vpop.xlane.xlu0 %614 }
 0x15d   : > { %952 = vadd.xlane.f32.xlu1 %v919_v54 }
 0x15e   : > { %950 = vadd.xlane.f32.xlu0 %v918_v53  ;;  %v6121_v62 = vpop.xlane.xlu1 %620 }
 0x15f   : > { %v6123_v33 = vpop.xlane.xlu0 %618 }
 0x161   : > { %956 = vadd.xlane.f32.xlu1 %v921_v46 }
 0x162   : > { %954 = vadd.xlane.f32.xlu0 %v920_v45  ;;  %v6129_v54 = vpop.xlane.xlu1 %624 }
 0x163   : > { %v6131_v53 = vpop.xlane.xlu0 %622 }
 0x165   : > { %960 = vadd.xlane.f32.xlu1 %v923_v43 }
 0x166   : > { %958 = vadd.xlane.f32.xlu0 %v922_v44  ;;  %v6137_v46 = vpop.xlane.xlu1 %628 }
 0x167   : > { %v6139_v45 = vpop.xlane.xlu0 %626 }
 0x169   : > { %964 = vadd.xlane.f32.xlu1 %v925_v48 }
 0x16a   : > { %962 = vadd.xlane.f32.xlu0 %v924_v36  ;;  %v6145_v43 = vpop.xlane.xlu1 %696 }
 0x16b   : > { %v6147_v44 = vpop.xlane.xlu0 %694 }
 0x16d   : > { %968 = vadd.xlane.f32.xlu1 %v927_v39 }
 0x16e   : > { %966 = vadd.xlane.f32.xlu0 %v926_v51  ;;  %v6153_v48 = vpop.xlane.xlu1 %700 }
 0x16f   : > { %v6155_v36 = vpop.xlane.xlu0 %698 }
 0x171   : > { %972 = vadd.xlane.f32.xlu1 %v929_v35 }
 0x172   : > { %970 = vadd.xlane.f32.xlu0 %v928_v47  ;;  %v6161_v39 = vpop.xlane.xlu1 %704 }
 0x173   : > { %v6163_v51 = vpop.xlane.xlu0 %702 }
 0x175   : > { %976 = vadd.xlane.f32.xlu1 %v931_v31 }
 0x176   : > { %974 = vadd.xlane.f32.xlu0 %v930_v32  ;;  %v6169_v35 = vpop.xlane.xlu1 %708 }
 0x177   : > { %v6171_v47 = vpop.xlane.xlu0 %706 }
 0x179   : > { %980 = vadd.xlane.f32.xlu1 %v933_v27 }
 0x17a   : > { %978 = vadd.xlane.f32.xlu0 %v932_v28  ;;  %v6177_v31 = vpop.xlane.xlu1 %712 }
 0x17b   : > { %v6179_v32 = vpop.xlane.xlu0 %710 }
 0x17d   : > { %984 = vadd.xlane.f32.xlu1 %v935_v19 }
 0x17e   : > { %982 = vadd.xlane.f32.xlu0 %v934_v20  ;;  %v6185_v27 = vpop.xlane.xlu1 %716 }
 0x17f   : > { %v6187_v28 = vpop.xlane.xlu0 %714 }
 0x180   : > { %10283 = vst [vmem:[#allocation69_spill] sm:$0xff] %v6187_v28  ;;  %v2555_v28 = vld [vmem:[%s10146_s1 + $0x28] sm:$0xff] }
 0x181   : > { %988 = vadd.xlane.f32.xlu1 %v937_v11 }
 0x182   : > { %986 = vadd.xlane.f32.xlu0 %v936_v12  ;;  %v6193_v19 = vpop.xlane.xlu1 %720 }
 0x183   : > { %10284 = vst [vmem:[#allocation70_spill] sm:$0xff] %v6193_v19  ;;  %v6195_v20 = vpop.xlane.xlu0 %718 }
 0x184   : > { %10285 = vst [vmem:[#allocation71_spill] sm:$0xff] %v6195_v20 }
 0x185   : > { %992 = vadd.xlane.f32.xlu1 %v939_v4 }
 0x186   : > { %990 = vadd.xlane.f32.xlu0 %v938_v5  ;;  %v6201_v11 = vpop.xlane.xlu1 %724 }
 0x187   : > { %10286 = vst [vmem:[#allocation72_spill] sm:$0xff] %v6201_v11  ;;  %v6203_v12 = vpop.xlane.xlu0 %722 }
 0x188   : > { %10287 = vst [vmem:[#allocation73_spill] sm:$0xff] %v6203_v12 }
 0x189   : > { %996 = vadd.xlane.f32.xlu1 %v941_v8 }
 0x18a   : > { %994 = vadd.xlane.f32.xlu0 %v940_v1  ;;  %v6209_v4 = vpop.xlane.xlu1 %728 }
 0x18b   : > { %10288 = vst [vmem:[#allocation74_spill] sm:$0xff] %v6209_v4  ;;  %v6211_v5 = vpop.xlane.xlu0 %726 }
 0x18c   : > { %10289 = vst [vmem:[#allocation75_spill] sm:$0xff] %v6211_v5  ;;  %v630_v5 = vadd.f32 %v5967_v40, %v5647_v10  ;;  %v6311_v10 = vld [vmem:[%s5423_s7 + $0x228] sm:$0xff] }
 0x18d   : > { %1000 = vadd.xlane.f32.xlu1 %v943_v57  ;;  %v6314_v40 = vld [vmem:[%s5423_s7 + $0x208] sm:$0xff] }
 0x18e   : > { %998 = vadd.xlane.f32.xlu0 %v942_v58  ;;  %v6217_v8 = vpop.xlane.xlu1 %732  ;;  %v948_v58 = vmul.f32 %v6105_v37, %v6105_v37 }
 0x18f   : > { %10290 = vst [vmem:[#allocation76_spill] sm:$0xff] %v6217_v8  ;;  %v6219_v1 = vpop.xlane.xlu0 %730  ;;  %v631_v8 = vadd.f32 %v5965_v52, %v5659_v14  ;;  %v2678_v14 = vld [vmem:[%s10146_s1 + $0x400] sm:$0xff] }
 0x190   : > { %10291 = vst [vmem:[#allocation77_spill] sm:$0xff] %v6219_v1 }
 0x191   : > { %1004 = vadd.xlane.f32.xlu1 %v945_v59 }
 0x192   : > { %1002 = vadd.xlane.f32.xlu0 %v944_v60  ;;  %v6225_v57 = vpop.xlane.xlu1 %736 }
 0x193   : > { %10292 = vst [vmem:[#allocation78_spill] sm:$0xff] %v6225_v57  ;;  %v6227_v42 = vpop.xlane.xlu0 %734  ;;  %v6281_v57 = vld [vmem:[%s5423_s7 + $0x148] sm:$0xff] }
 0x194   : > { %10293 = vst [vmem:[#allocation79_spill] sm:$0xff] %v6227_v42  ;;  %v6278_v42 = vld [vmem:[%s5423_s7 + $0x168] sm:$0xff] }
 0x195   : > { %1008 = vadd.xlane.f32.xlu1 %v947_v49  ;;  %v6242_v49 = vld [vmem:[%s5423_s7 + $0x28] sm:$0xff] }
 0x196   : > { %1006 = vadd.xlane.f32.xlu0 %v946_v50  ;;  %v6233_v59 = vpop.xlane.xlu1 %740  ;;  %v6245_v50 = vld [vmem:[%s5423_s7 + $0x8] sm:$0xff] }
 0x197   : > { %10294 = vst [vmem:[#allocation80_spill] sm:$0xff] %v6233_v59  ;;  %v6235_v63 = vpop.xlane.xlu0 %738  ;;  %v6269_v59 = vld [vmem:[%s5423_s7 + $0x108] sm:$0xff] }
 0x198   : > { %10295 = vst [vmem:[#allocation81_spill] sm:$0xff] %v6235_v63  ;;  %v6266_v63 = vld [vmem:[%s5423_s7 + $0x128] sm:$0xff] }
 0x199   : > { %1012 = vadd.xlane.f32.xlu1 %v949_v41  ;;  %v6254_v41 = vld [vmem:[%s5423_s7 + $0x68] sm:$0xff] }
 0x19a   : > { %1010 = vadd.xlane.f32.xlu0 %v948_v58  ;;  %v6237_v38 = vpop.xlane.xlu1 %744  ;;  %v6257_v58 = vld [vmem:[%s5423_s7 + $0x48] sm:$0xff] }
 0x19b   : > { %10296 = vst [vmem:[#allocation82_spill] sm:$0xff] %v6237_v38  ;;  %v6239_v60 = vpop.xlane.xlu0 %742 }
 0x19c   : > { %10297 = vst [vmem:[#allocation83_spill] sm:$0xff] %v6239_v60 }
 0x19d   : > { %1080 = vadd.xlane.f32.xlu1 %v6242_v49 }
 0x19e   : > { %1078 = vadd.xlane.f32.xlu0 %v6245_v50  ;;  %v6249_v37 = vpop.xlane.xlu1 %748 }
 0x19f   : > { %10298 = vst [vmem:[#allocation84_spill] sm:$0xff] %v6249_v37  ;;  %v6251_v0 = vpop.xlane.xlu0 %746 }
 0x1a0   : > { %10299 = vst [vmem:[#allocation85_spill] sm:$0xff] %v6251_v0 }
 0x1a1   : > { %1084 = vadd.xlane.f32.xlu1 %v6254_v41 }
 0x1a2   : > { %1082 = vadd.xlane.f32.xlu0 %v6257_v58  ;;  %v6261_v60 = vpop.xlane.xlu1 %752 }
 0x1a3   : > { %10300 = vst [vmem:[#allocation86_spill] sm:$0xff] %v6261_v60  ;;  %v6263_v38 = vpop.xlane.xlu0 %750  ;;  %v2553_v60 = vld [vmem:[%s10146_s1 + $0x18] sm:$0xff] }
 0x1a4   : > { %10301 = vst [vmem:[#allocation87_spill] sm:$0xff] %v6263_v38  ;;  %v2551_v38 = vld [vmem:[%s10146_s1 + $0x8] sm:$0xff] }
 0x1a5   : > { %1088 = vadd.xlane.f32.xlu1 %v6266_v63  ;;  %v4488_v1 = vpack.c.bf16 %v2553_v60, %v2551_v38  ;;  %v2550_v38 = vld [vmem:[%s10146_s1] sm:$0xff]  ;;  %v2552_v60 = vld [vmem:[%s10146_s1 + $0x10] sm:$0xff] }
 0x1a6   : > { %1086 = vadd.xlane.f32.xlu0 %v6269_v59  ;;  %v6273_v0 = vpop.xlane.xlu1 %756 }
 0x1a7   : > { %10302 = vst [vmem:[#allocation88_spill] sm:$0xff] %v6273_v0  ;;  %v6275_v37 = vpop.xlane.xlu0 %754  ;;  %v2679_v0 = vld [vmem:[%s10146_s1 + $0x408] sm:$0xff]  ;;  %4489 = vmatprep.subr.bf16.mxu1 %v4488_v1  ;;  %v2557_v1 = vld [vmem:[%s10146_s1 + $0x38] sm:$0xff] }
 0x1a8   : > { %10303 = vst [vmem:[#allocation89_spill] sm:$0xff] %v6275_v37  ;;  %v2681_v37 = vld [vmem:[%s10146_s1 + $0x418] sm:$0xff] }
 0x1a9   : > { %1092 = vadd.xlane.f32.xlu1 %v6278_v42  ;;  %v4616_v4 = vpack.c.bf16 %v2681_v37, %v2679_v0  ;;  %v4490_v37 = vpack.c.bf16 %v2552_v60, %v2550_v38  ;;  %v2680_v0 = vld [vmem:[%s10146_s1 + $0x410] sm:$0xff]  ;;  %v4492_v38 = vpack.c.bf16 %v2557_v1, %v2555_v28  ;;  %v2554_v28 = vld [vmem:[%s10146_s1 + $0x20] sm:$0xff] }
 0x1aa   : > { %1090 = vadd.xlane.f32.xlu0 %v6281_v57  ;;  %v825_v52 = vpop.xlane.xlu1 %824  ;;  %v4618_v19 = vpack.c.bf16 %v2680_v0, %v2678_v14  ;;  %v2556_v14 = vld [vmem:[%s10146_s1 + $0x30] sm:$0xff] }
 0x1ab   : > { %v823_v12 = vpop.xlane.xlu0 %822  ;;  %v6319_v11 = vadd.f32 %v825_v52, %v631_v8  ;;  %4617 = vmatprep.subr.bf16.mxu0 %v4616_v4  ;;  %4491 = vmatpush1.bf16.msra.mxu1 %v4490_v37  ;;  %v2683_v8 = vld [vmem:[%s10146_s1 + $0x428] sm:$0xff]  ;;  %v633_v4 = vadd.f32 %v5977_v55, %v5657_v13  ;;  %v2682_v13 = vld [vmem:[%s10146_s1 + $0x420] sm:$0xff]  ;;  %v4494_v37 = vpack.c.bf16 %v2556_v14, %v2554_v28  ;;  %v2684_v0 = vld [vmem:[%s10146_s1 + $0x430] sm:$0xff] }
 0x1ac   : > { %v6321_v20 = vadd.f32 %v823_v12, %v630_v5  ;;  %v2685_v12 = vld [vmem:[%s10146_s1 + $0x438] sm:$0xff]  ;;  %v632_v5 = vadd.f32 %v5979_v56, %v5645_v9  ;;  %v6351_v9 = vld [vmem:[%s5423_s7 + $0x268] sm:$0xff]  ;;  %4619 = vmatpush1.bf16.msra.mxu0 %v4618_v19  ;;  %4493 = vmatprep.subr.bf16.mxu1 %v4492_v38  ;;  %v634_v28 = vadd.f32 %v5991_v23, %v5671_v18 }
 0x1ad   : > { %10304 = vst [vmem:[#allocation90_spill] sm:$0xff] %v6319_v11  ;;  %1096 = vadd.xlane.f32.xlu1 %v6311_v10  ;;  %v4620_v60 = vpack.c.bf16 %v2685_v12, %v2683_v8  ;;  %v6354_v56 = vld [vmem:[%s5423_s7 + $0x248] sm:$0xff]  ;;  %v4622_v12 = vpack.c.bf16 %v2684_v0, %v2682_v13  ;;  %v2561_v19 = vld [vmem:[%s10146_s1 + $0x58] sm:$0xff]  ;;  %v2560_v13 = vld [vmem:[%s10146_s1 + $0x50] sm:$0xff] }
 0x1ae   : > { %10305 = vst [vmem:[#allocation91_spill] sm:$0xff] %v6321_v20  ;;  %1094 = vadd.xlane.f32.xlu0 %v6314_v40  ;;  %v829_v55 = vpop.xlane.xlu1 %828  ;;  %v2559_v20 = vld [vmem:[%s10146_s1 + $0x48] sm:$0xff] }
 0x1af   : > { %v827_v52 = vpop.xlane.xlu0 %826  ;;  %v6359_v1 = vadd.f32 %v829_v55, %v633_v4  ;;  %4621 = vmatprep.subr.bf16.mxu0 %v4620_v60  ;;  %4495 = vmatpush1.bf16.msra.mxu1 %v4494_v37  ;;  %v4496_v38 = vpack.c.bf16 %v2561_v19, %v2559_v20  ;;  %v2687_v4 = vld [vmem:[%s10146_s1 + $0x448] sm:$0xff]  ;;  %v635_v60 = vadd.f32 %v5989_v24, %v5669_v17  ;;  %v2558_v20 = vld [vmem:[%s10146_s1 + $0x40] sm:$0xff]  ;;  %v2688_v37 = vld [vmem:[%s10146_s1 + $0x450] sm:$0xff] }
 0x1b0   : > { %v6361_v8 = vadd.f32 %v827_v52, %v632_v5  ;;  %v2689_v5 = vld [vmem:[%s10146_s1 + $0x458] sm:$0xff]  ;;  %v2686_v17 = vld [vmem:[%s10146_s1 + $0x440] sm:$0xff]  ;;  %v6391_v18 = vld [vmem:[%s5423_s7 + $0x328] sm:$0xff]  ;;  %4623 = vmatpush1.bf16.msra.mxu0 %v4622_v12  ;;  %v4498_v52 = vpack.c.bf16 %v2560_v13, %v2558_v20  ;;  %v636_v20 = vadd.f32 %v6003_v15, %v5683_v22 }
 0x1b1   : > { %10306 = vst [vmem:[#allocation92_spill] sm:$0xff] %v6359_v1  ;;  %1100 = vadd.xlane.f32.xlu1 %v6351_v9  ;;  %v4624_v14 = vpack.c.bf16 %v2689_v5, %v2687_v4  ;;  %v6394_v23 = vld [vmem:[%s5423_s7 + $0x308] sm:$0xff]  ;;  %4497 = vmatprep.subr.bf16.mxu1 %v4496_v38  ;;  %v4626_v4 = vpack.c.bf16 %v2688_v37, %v2686_v17  ;;  %v2565_v12 = vld [vmem:[%s10146_s1 + $0x78] sm:$0xff]  ;;  %v2562_v17 = vld [vmem:[%s10146_s1 + $0x60] sm:$0xff] }
 0x1b2   : > { %10307 = vst [vmem:[#allocation93_spill] sm:$0xff] %v6361_v8  ;;  %1098 = vadd.xlane.f32.xlu0 %v6354_v56  ;;  %v833_v24 = vpop.xlane.xlu1 %832  ;;  %v2563_v5 = vld [vmem:[%s10146_s1 + $0x68] sm:$0xff]  ;;  %v2692_v37 = vld [vmem:[%s10146_s1 + $0x470] sm:$0xff] }
 0x1b3   : > { %v831_v55 = vpop.xlane.xlu0 %830  ;;  %v6399_v0 = vadd.f32 %v833_v24, %v635_v60  ;;  %4625 = vmatprep.subr.bf16.mxu0 %v4624_v14  ;;  %4499 = vmatpush1.bf16.msra.mxu1 %v4498_v52  ;;  %v4500_v38 = vpack.c.bf16 %v2565_v12, %v2563_v5  ;;  %v2691_v60 = vld [vmem:[%s10146_s1 + $0x468] sm:$0xff]  ;;  %v637_v14 = vadd.f32 %v6001_v16, %v5681_v21  ;;  %v2564_v24 = vld [vmem:[%s10146_s1 + $0x70] sm:$0xff]  ;;  %v2690_v21 = vld [vmem:[%s10146_s1 + $0x460] sm:$0xff] }
 0x1b4   : > { %v6401_v19 = vadd.f32 %v831_v55, %v634_v28  ;;  %v2693_v28 = vld [vmem:[%s10146_s1 + $0x478] sm:$0xff]  ;;  %v6431_v22 = vld [vmem:[%s5423_s7 + $0x368] sm:$0xff]  ;;  %4627 = vmatpush1.bf16.msra.mxu0 %v4626_v4  ;;  %v4502_v52 = vpack.c.bf16 %v2564_v24, %v2562_v17  ;;  %v638_v17 = vadd.f32 %v6015_v6, %v5695_v26 }
 0x1b5   : > { %10308 = vst [vmem:[#allocation94_spill] sm:$0xff] %v6399_v0  ;;  %1104 = vadd.xlane.f32.xlu1 %v6391_v18  ;;  %v4628_v13 = vpack.c.bf16 %v2693_v28, %v2691_v60  ;;  %v6434_v15 = vld [vmem:[%s5423_s7 + $0x348] sm:$0xff]  ;;  %4501 = vmatprep.subr.bf16.mxu1 %v4500_v38  ;;  %v4630_v60 = vpack.c.bf16 %v2692_v37, %v2690_v21  ;;  %v2569_v4 = vld [vmem:[%s10146_s1 + $0x98] sm:$0xff]  ;;  %v2566_v21 = vld [vmem:[%s10146_s1 + $0x80] sm:$0xff] }
 0x1b6   : > { %10309 = vst [vmem:[#allocation95_spill] sm:$0xff] %v6401_v19  ;;  %1102 = vadd.xlane.f32.xlu0 %v6394_v23  ;;  %v837_v16 = vpop.xlane.xlu1 %836  ;;  %v2567_v28 = vld [vmem:[%s10146_s1 + $0x88] sm:$0xff]  ;;  %v2696_v37 = vld [vmem:[%s10146_s1 + $0x490] sm:$0xff] }
 0x1b7   : > { %v835_v55 = vpop.xlane.xlu0 %834  ;;  %v6439_v5 = vadd.f32 %v837_v16, %v637_v14  ;;  %4629 = vmatprep.subr.bf16.mxu0 %v4628_v13  ;;  %4503 = vmatpush1.bf16.msra.mxu1 %v4502_v52  ;;  %v4504_v38 = vpack.c.bf16 %v2569_v4, %v2567_v28  ;;  %v2695_v14 = vld [vmem:[%s10146_s1 + $0x488] sm:$0xff]  ;;  %v639_v13 = vadd.f32 %v6013_v7, %v5693_v25  ;;  %v2568_v16 = vld [vmem:[%s10146_s1 + $0x90] sm:$0xff]  ;;  %v2694_v25 = vld [vmem:[%s10146_s1 + $0x480] sm:$0xff] }
 0x1b8   : > { %v6441_v12 = vadd.f32 %v835_v55, %v636_v20  ;;  %v2697_v20 = vld [vmem:[%s10146_s1 + $0x498] sm:$0xff]  ;;  %v6471_v26 = vld [vmem:[%s5423_s7 + $0x428] sm:$0xff]  ;;  %4631 = vmatpush1.bf16.msra.mxu0 %v4630_v60  ;;  %v4506_v52 = vpack.c.bf16 %v2568_v16, %v2566_v21  ;;  %v640_v21 = vadd.f32 %v6027_v2, %v5707_v30 }
 0x1b9   : > { %10310 = vst [vmem:[#allocation96_spill] sm:$0xff] %v6439_v5  ;;  %1108 = vadd.xlane.f32.xlu1 %v6431_v22  ;;  %v4632_v24 = vpack.c.bf16 %v2697_v20, %v2695_v14  ;;  %v6474_v6 = vld [vmem:[%s5423_s7 + $0x408] sm:$0xff]  ;;  %4505 = vmatprep.subr.bf16.mxu1 %v4504_v38  ;;  %v4634_v14 = vpack.c.bf16 %v2696_v37, %v2694_v25  ;;  %v2573_v60 = vld [vmem:[%s10146_s1 + $0xb8] sm:$0xff]  ;;  %v2570_v25 = vld [vmem:[%s10146_s1 + $0xa0] sm:$0xff] }
 0x1ba   : > { %10311 = vst [vmem:[#allocation97_spill] sm:$0xff] %v6441_v12  ;;  %1106 = vadd.xlane.f32.xlu0 %v6434_v15  ;;  %v841_v7 = vpop.xlane.xlu1 %840  ;;  %v2571_v20 = vld [vmem:[%s10146_s1 + $0xa8] sm:$0xff]  ;;  %v2700_v37 = vld [vmem:[%s10146_s1 + $0x4b0] sm:$0xff] }
 0x1bb   : > { %v839_v55 = vpop.xlane.xlu0 %838  ;;  %v6479_v28 = vadd.f32 %v841_v7, %v639_v13  ;;  %4633 = vmatprep.subr.bf16.mxu0 %v4632_v24  ;;  %4507 = vmatpush1.bf16.msra.mxu1 %v4506_v52  ;;  %v4508_v38 = vpack.c.bf16 %v2573_v60, %v2571_v20  ;;  %v2699_v13 = vld [vmem:[%s10146_s1 + $0x4a8] sm:$0xff]  ;;  %v641_v24 = vadd.f32 %v6025_v3, %v5705_v29  ;;  %v2572_v7 = vld [vmem:[%s10146_s1 + $0xb0] sm:$0xff]  ;;  %v2698_v29 = vld [vmem:[%s10146_s1 + $0x4a0] sm:$0xff] }
 0x1bc   : > { %v6481_v4 = vadd.f32 %v839_v55, %v638_v17  ;;  %v2701_v17 = vld [vmem:[%s10146_s1 + $0x4b8] sm:$0xff]  ;;  %v6511_v30 = vld [vmem:[%s5423_s7 + $0x468] sm:$0xff]  ;;  %4635 = vmatpush1.bf16.msra.mxu0 %v4634_v14  ;;  %v4510_v52 = vpack.c.bf16 %v2572_v7, %v2570_v25  ;;  %v10317_v25 = vld [vmem:[#allocation57_spill] sm:$0xff] }
 0x1bd   : > { %10312 = vst [vmem:[#allocation98_spill] sm:$0xff] %v6479_v28  ;;  %1112 = vadd.xlane.f32.xlu1 %v6471_v26  ;;  %v4636_v16 = vpack.c.bf16 %v2701_v17, %v2699_v13  ;;  %v6514_v2 = vld [vmem:[%s5423_s7 + $0x448] sm:$0xff]  ;;  %4509 = vmatprep.subr.bf16.mxu1 %v4508_v38  ;;  %v4638_v13 = vpack.c.bf16 %v2700_v37, %v2698_v29  ;;  %v2577_v14 = vld [vmem:[%s10146_s1 + $0xd8] sm:$0xff]  ;;  %v2574_v37 = vld [vmem:[%s10146_s1 + $0xc0] sm:$0xff] }
 0x1be   : > { %10313 = vst [vmem:[#allocation99_spill] sm:$0xff] %v6481_v4  ;;  %1110 = vadd.xlane.f32.xlu0 %v6474_v6  ;;  %v845_v3 = vpop.xlane.xlu1 %844  ;;  %v2575_v17 = vld [vmem:[%s10146_s1 + $0xc8] sm:$0xff] }
 0x1bf   : > { %v843_v55 = vpop.xlane.xlu0 %842  ;;  %v6519_v20 = vadd.f32 %v845_v3, %v641_v24  ;;  %4637 = vmatprep.subr.bf16.mxu0 %v4636_v16  ;;  %4511 = vmatpush1.bf16.msra.mxu1 %v4510_v52  ;;  %v4512_v38 = vpack.c.bf16 %v2577_v14, %v2575_v17  ;;  %v2703_v24 = vld [vmem:[%s10146_s1 + $0x4c8] sm:$0xff]  ;;  %v10316_v16 = vld [vmem:[#allocation5_spill] sm:$0xff]  ;;  %v2576_v17 = vld [vmem:[%s10146_s1 + $0xd0] sm:$0xff] }
 0x1c0   : > { %v6521_v60 = vadd.f32 %v843_v55, %v640_v21  ;;  %v2705_v21 = vld [vmem:[%s10146_s1 + $0x4d8] sm:$0xff]  ;;  %v643_v7 = vadd.f32 %v10317_v25, %v10316_v16  ;;  %v10318_v29 = vld [vmem:[#allocation6_spill] sm:$0xff]  ;;  %v2702_v14 = vld [vmem:[%s10146_s1 + $0x4c0] sm:$0xff]  ;;  %4639 = vmatpush1.bf16.msra.mxu0 %v4638_v13 }
 0x1c1   : > { %10314 = vst [vmem:[#allocation100_spill] sm:$0xff] %v6519_v20  ;;  %v10319_v3 = vld [vmem:[#allocation58_spill] sm:$0xff]  ;;  %1116 = vadd.xlane.f32.xlu1 %v6511_v30  ;;  %v4640_v52 = vpack.c.bf16 %v2705_v21, %v2703_v24  ;;  %4513 = vmatprep.subr.bf16.mxu1 %v4512_v38  ;;  %v4514_v24 = vpack.c.bf16 %v2576_v17, %v2574_v37  ;;  %v2704_v21 = vld [vmem:[%s10146_s1 + $0x4d0] sm:$0xff]  ;;  %v2581_v13 = vld [vmem:[%s10146_s1 + $0xf8] sm:$0xff] }
 0x1c2   : > { %10315 = vst [vmem:[#allocation101_spill] sm:$0xff] %v6521_v60  ;;  %v642_v55 = vadd.f32 %v10319_v3, %v10318_v29  ;;  %1114 = vadd.xlane.f32.xlu0 %v6514_v2  ;;  %v849_v16 = vpop.xlane.xlu1 %848  ;;  %v6551_v29 = vld [vmem:[%s5423_s7 + $0x528] sm:$0xff]  ;;  %v4642_v4 = vpack.c.bf16 %v2704_v21, %v2702_v14  ;;  %v10323_v37 = vld [vmem:[#allocation59_spill] sm:$0xff]  ;;  %v10324_v14 = vld [vmem:[#allocation8_spill] sm:$0xff] }
 0x1c3   : > { %v847_v25 = vpop.xlane.xlu0 %846  ;;  %v6554_v3 = vld [vmem:[%s5423_s7 + $0x508] sm:$0xff]  ;;  %v6559_v60 = vadd.f32 %v849_v16, %v643_v7  ;;  %4641 = vmatprep.subr.bf16.mxu0 %v4640_v52  ;;  %4515 = vmatpush1.bf16.msra.mxu1 %v4514_v24  ;;  %v10322_v52 = vld [vmem:[#allocation7_spill] sm:$0xff]  ;;  %v10325_v16 = vld [vmem:[#allocation60_spill] sm:$0xff] }
 0x1c4   : > { %v6561_v20 = vadd.f32 %v847_v25, %v642_v55  ;;  %v2579_v28 = vld [vmem:[%s10146_s1 + $0xe8] sm:$0xff]  ;;  %v2709_v55 = vld [vmem:[%s10146_s1 + $0x4f8] sm:$0xff]  ;;  %v645_v17 = vadd.f32 %v10323_v37, %v10322_v52  ;;  %v644_v25 = vadd.f32 %v10325_v16, %v10324_v14  ;;  %v2580_v21 = vld [vmem:[%s10146_s1 + $0xf0] sm:$0xff]  ;;  %4643 = vmatpush1.bf16.msra.mxu0 %v4642_v4 }
 0x1c5   : > { %10320 = vst [vmem:[#allocation5_spill] sm:$0xff] %v6559_v60  ;;  %v4516_v38 = vpack.c.bf16 %v2581_v13, %v2579_v28  ;;  %v2707_v7 = vld [vmem:[%s10146_s1 + $0x4e8] sm:$0xff]  ;;  %1120 = vadd.xlane.f32.xlu1 %v6551_v29  ;;  %v2578_v28 = vld [vmem:[%s10146_s1 + $0xe0] sm:$0xff]  ;;  %v2585_v4 = vld [vmem:[%s10146_s1 + $0x118] sm:$0xff] }
 0x1c6   : > { %10321 = vst [vmem:[#allocation57_spill] sm:$0xff] %v6561_v20  ;;  %1118 = vadd.xlane.f32.xlu0 %v6554_v3  ;;  %v4644_v24 = vpack.c.bf16 %v2709_v55, %v2707_v7  ;;  %v2706_v13 = vld [vmem:[%s10146_s1 + $0x4e0] sm:$0xff]  ;;  %v853_v52 = vpop.xlane.xlu1 %852  ;;  %v6591_v14 = vld [vmem:[%s5423_s7 + $0x568] sm:$0xff]  ;;  %v4518_v7 = vpack.c.bf16 %v2580_v21, %v2578_v28  ;;  %v2708_v55 = vld [vmem:[%s10146_s1 + $0x4f0] sm:$0xff] }
 0x1c7   : > { %v851_v37 = vpop.xlane.xlu0 %850  ;;  %v6594_v16 = vld [vmem:[%s5423_s7 + $0x548] sm:$0xff]  ;;  %4517 = vmatprep.subr.bf16.mxu1 %v4516_v38  ;;  %v6599_v20 = vadd.f32 %v853_v52, %v645_v17  ;;  %v4646_v12 = vpack.c.bf16 %v2708_v55, %v2706_v13  ;;  %v10329_v28 = vld [vmem:[#allocation61_spill] sm:$0xff]  ;;  %v2584_v55 = vld [vmem:[%s10146_s1 + $0x110] sm:$0xff] }
 0x1c8   : > { %v6601_v60 = vadd.f32 %v851_v37, %v644_v25  ;;  %4645 = vmatprep.subr.bf16.mxu0 %v4644_v24  ;;  %v2583_v5 = vld [vmem:[%s10146_s1 + $0x108] sm:$0xff]  ;;  %4519 = vmatpush1.bf16.msra.mxu1 %v4518_v7  ;;  %v2713_v25 = vld [vmem:[%s10146_s1 + $0x518] sm:$0xff]  ;;  %v10328_v24 = vld [vmem:[#allocation9_spill] sm:$0xff] }
 0x1c9   : > { %10326 = vst [vmem:[#allocation6_spill] sm:$0xff] %v6599_v20  ;;  %v4520_v38 = vpack.c.bf16 %v2585_v4, %v2583_v5  ;;  %v2711_v17 = vld [vmem:[%s10146_s1 + $0x508] sm:$0xff]  ;;  %v647_v21 = vadd.f32 %v10329_v28, %v10328_v24  ;;  %1124 = vadd.xlane.f32.xlu1 %v6591_v14  ;;  %v2582_v5 = vld [vmem:[%s10146_s1 + $0x100] sm:$0xff]  ;;  %4647 = vmatpush1.bf16.msra.mxu0 %v4646_v12  ;;  %v2589_v12 = vld [vmem:[%s10146_s1 + $0x138] sm:$0xff] }
 0x1ca   : > { %10327 = vst [vmem:[#allocation58_spill] sm:$0xff] %v6601_v60  ;;  %v10330_v13 = vld [vmem:[#allocation10_spill] sm:$0xff]  ;;  %1122 = vadd.xlane.f32.xlu0 %v6594_v16  ;;  %v4648_v7 = vpack.c.bf16 %v2713_v25, %v2711_v17  ;;  %v2710_v4 = vld [vmem:[%s10146_s1 + $0x500] sm:$0xff]  ;;  %v857_v24 = vpop.xlane.xlu1 %856  ;;  %v4522_v17 = vpack.c.bf16 %v2584_v55, %v2582_v5  ;;  %v2712_v25 = vld [vmem:[%s10146_s1 + $0x510] sm:$0xff] }
 0x1cb   : > { %v10331_v52 = vld [vmem:[#allocation62_spill] sm:$0xff]  ;;  %v855_v28 = vpop.xlane.xlu0 %854  ;;  %4521 = vmatprep.subr.bf16.mxu1 %v4520_v38  ;;  %v6639_v60 = vadd.f32 %v857_v24, %v647_v21  ;;  %v4650_v19 = vpack.c.bf16 %v2712_v25, %v2710_v4  ;;  %v10335_v5 = vld [vmem:[#allocation63_spill] sm:$0xff]  ;;  %v10336_v4 = vld [vmem:[#allocation12_spill] sm:$0xff] }
 0x1cc   : > { %v646_v37 = vadd.f32 %v10331_v52, %v10330_v13  ;;  %v6631_v13 = vld [vmem:[%s5423_s7 + $0x628] sm:$0xff]  ;;  %4649 = vmatprep.subr.bf16.mxu0 %v4648_v7  ;;  %4523 = vmatpush1.bf16.msra.mxu1 %v4522_v17  ;;  %v10334_v7 = vld [vmem:[#allocation11_spill] sm:$0xff]  ;;  %v10337_v24 = vld [vmem:[#allocation64_spill] sm:$0xff] }
 0x1cd   : > { %v6634_v52 = vld [vmem:[%s5423_s7 + $0x608] sm:$0xff]  ;;  %10332 = vst [vmem:[#allocation7_spill] sm:$0xff] %v6639_v60  ;;  %v649_v55 = vadd.f32 %v10335_v5, %v10334_v7  ;;  %1128 = vadd.xlane.f32.xlu1 %v6631_v13  ;;  %v2588_v25 = vld [vmem:[%s10146_s1 + $0x130] sm:$0xff]  ;;  %4651 = vmatpush1.bf16.msra.mxu0 %v4650_v19  ;;  %v2593_v19 = vld [vmem:[%s10146_s1 + $0x158] sm:$0xff] }
 0x1ce   : > { %v6641_v20 = vadd.f32 %v855_v28, %v646_v37  ;;  %v2587_v0 = vld [vmem:[%s10146_s1 + $0x128] sm:$0xff]  ;;  %v2717_v37 = vld [vmem:[%s10146_s1 + $0x538] sm:$0xff]  ;;  %v648_v28 = vadd.f32 %v10337_v24, %v10336_v4  ;;  %1126 = vadd.xlane.f32.xlu0 %v6634_v52  ;;  %v861_v7 = vpop.xlane.xlu1 %860 }
 0x1cf   : > { %v4524_v38 = vpack.c.bf16 %v2589_v12, %v2587_v0  ;;  %v2715_v21 = vld [vmem:[%s10146_s1 + $0x528] sm:$0xff]  ;;  %v2586_v0 = vld [vmem:[%s10146_s1 + $0x120] sm:$0xff]  ;;  %v859_v5 = vpop.xlane.xlu0 %858 }
 0x1d0   : > { %10333 = vst [vmem:[#allocation59_spill] sm:$0xff] %v6641_v20  ;;  %v4652_v17 = vpack.c.bf16 %v2717_v37, %v2715_v21  ;;  %v2714_v12 = vld [vmem:[%s10146_s1 + $0x520] sm:$0xff]  ;;  %v6671_v4 = vld [vmem:[%s5423_s7 + $0x668] sm:$0xff]  ;;  %v4526_v21 = vpack.c.bf16 %v2588_v25, %v2586_v0  ;;  %v2716_v37 = vld [vmem:[%s10146_s1 + $0x530] sm:$0xff]  ;;  %v6679_v20 = vadd.f32 %v861_v7, %v649_v55  ;;  %v6681_v60 = vadd.f32 %v859_v5, %v648_v28 }
 0x1d1   : > { %10338 = vst [vmem:[#allocation8_spill] sm:$0xff] %v6671_v4  ;;  %v6674_v24 = vld [vmem:[%s5423_s7 + $0x648] sm:$0xff]  ;;  %4525 = vmatprep.subr.bf16.mxu1 %v4524_v38  ;;  %v4654_v8 = vpack.c.bf16 %v2716_v37, %v2714_v12  ;;  %v2721_v28 = vld [vmem:[%s10146_s1 + $0x558] sm:$0xff]  ;;  %v10343_v0 = vld [vmem:[#allocation65_spill] sm:$0xff]  ;;  %1132 = vadd.xlane.f32.xlu1 %v6671_v4 }
 0x1d2   : > { %10339 = vst [vmem:[#allocation60_spill] sm:$0xff] %v6674_v24  ;;  %10340 = vst [vmem:[#allocation9_spill] sm:$0xff] %v6679_v20  ;;  %4653 = vmatprep.subr.bf16.mxu0 %v4652_v17  ;;  %v2591_v1 = vld [vmem:[%s10146_s1 + $0x148] sm:$0xff]  ;;  %4527 = vmatpush1.bf16.msra.mxu1 %v4526_v21  ;;  %v10342_v17 = vld [vmem:[#allocation13_spill] sm:$0xff] }
 0x1d3   : > { %10341 = vst [vmem:[#allocation61_spill] sm:$0xff] %v6681_v60  ;;  %v4528_v38 = vpack.c.bf16 %v2593_v19, %v2591_v1  ;;  %v2719_v55 = vld [vmem:[%s10146_s1 + $0x548] sm:$0xff]  ;;  %v651_v25 = vadd.f32 %v10343_v0, %v10342_v17  ;;  %1130 = vadd.xlane.f32.xlu0 %v6674_v24  ;;  %v2590_v1 = vld [vmem:[%s10146_s1 + $0x140] sm:$0xff]  ;;  %v2592_v37 = vld [vmem:[%s10146_s1 + $0x150] sm:$0xff]  ;;  %v865_v17 = vpop.xlane.xlu1 %864  ;;  %v863_v0 = vpop.xlane.xlu0 %862  ;;  %4655 = vmatpush1.bf16.msra.mxu0 %v4654_v8 }
 0x1d4   : > { %v10344_v12 = vld [vmem:[#allocation14_spill] sm:$0xff]  ;;  %v4656_v21 = vpack.c.bf16 %v2721_v28, %v2719_v55  ;;  %v2718_v19 = vld [vmem:[%s10146_s1 + $0x540] sm:$0xff]  ;;  %v4530_v55 = vpack.c.bf16 %v2592_v37, %v2590_v1  ;;  %v2720_v28 = vld [vmem:[%s10146_s1 + $0x550] sm:$0xff] }
 0x1d5   : > { %v10345_v7 = vld [vmem:[#allocation66_spill] sm:$0xff]  ;;  %4529 = vmatprep.subr.bf16.mxu1 %v4528_v38  ;;  %v6719_v60 = vadd.f32 %v865_v17, %v651_v25  ;;  %v4658_v11 = vpack.c.bf16 %v2720_v28, %v2718_v19  ;;  %v2597_v8 = vld [vmem:[%s10146_s1 + $0x178] sm:$0xff]  ;;  %v10351_v1 = vld [vmem:[#allocation67_spill] sm:$0xff] }
 0x1d6   : > { %v650_v5 = vadd.f32 %v10345_v7, %v10344_v12  ;;  %v6711_v12 = vld [vmem:[%s5423_s7 + $0x728] sm:$0xff]  ;;  %4657 = vmatprep.subr.bf16.mxu0 %v4656_v21  ;;  %4531 = vmatpush1.bf16.msra.mxu1 %v4530_v55  ;;  %v10350_v21 = vld [vmem:[#allocation15_spill] sm:$0xff]  ;;  %v10352_v19 = vld [vmem:[#allocation16_spill] sm:$0xff] }
 0x1d7   : > { %10346 = vst [vmem:[#allocation10_spill] sm:$0xff] %v6711_v12  ;;  %v6714_v7 = vld [vmem:[%s5423_s7 + $0x708] sm:$0xff]  ;;  %10348 = vst [vmem:[#allocation11_spill] sm:$0xff] %v6719_v60  ;;  %v653_v37 = vadd.f32 %v10351_v1, %v10350_v21  ;;  %v10353_v17 = vld [vmem:[#allocation68_spill] sm:$0xff]  ;;  %1136 = vadd.xlane.f32.xlu1 %v6711_v12  ;;  %v869_v21 = vpop.xlane.xlu1 %868  ;;  %v867_v1 = vpop.xlane.xlu0 %866  ;;  %4659 = vmatpush1.bf16.msra.mxu0 %v4658_v11 }
 0x1d8   : > { %10347 = vst [vmem:[#allocation62_spill] sm:$0xff] %v6714_v7  ;;  %v6721_v20 = vadd.f32 %v863_v0, %v650_v5  ;;  %v2595_v24 = vld [vmem:[%s10146_s1 + $0x168] sm:$0xff]  ;;  %v2725_v5 = vld [vmem:[%s10146_s1 + $0x578] sm:$0xff]  ;;  %v652_v0 = vadd.f32 %v10353_v17, %v10352_v19  ;;  %1134 = vadd.xlane.f32.xlu0 %v6714_v7  ;;  %v2596_v28 = vld [vmem:[%s10146_s1 + $0x170] sm:$0xff] }
 0x1d9   : > { %v4532_v38 = vpack.c.bf16 %v2597_v8, %v2595_v24  ;;  %v2723_v25 = vld [vmem:[%s10146_s1 + $0x568] sm:$0xff]  ;;  %v2594_v24 = vld [vmem:[%s10146_s1 + $0x160] sm:$0xff]  ;;  %v2601_v11 = vld [vmem:[%s10146_s1 + $0x198] sm:$0xff] }
 0x1da   : > { %10349 = vst [vmem:[#allocation63_spill] sm:$0xff] %v6721_v20  ;;  %v4660_v55 = vpack.c.bf16 %v2725_v5, %v2723_v25  ;;  %v2722_v8 = vld [vmem:[%s10146_s1 + $0x560] sm:$0xff]  ;;  %v6751_v19 = vld [vmem:[%s5423_s7 + $0x768] sm:$0xff]  ;;  %v4534_v25 = vpack.c.bf16 %v2596_v28, %v2594_v24  ;;  %v2724_v5 = vld [vmem:[%s10146_s1 + $0x570] sm:$0xff]  ;;  %v6759_v20 = vadd.f32 %v869_v21, %v653_v37  ;;  %v6761_v60 = vadd.f32 %v867_v1, %v652_v0 }
 0x1db   : > { %v6754_v17 = vld [vmem:[%s5423_s7 + $0x748] sm:$0xff]  ;;  %4533 = vmatprep.subr.bf16.mxu1 %v4532_v38  ;;  %v4662_v7 = vpack.c.bf16 %v2724_v5, %v2722_v8  ;;  %v10354_v38 = vld [vmem:[#allocation17_spill] sm:$0xff]  ;;  %1140 = vadd.xlane.f32.xlu1 %v6751_v19  ;;  %v2600_v21 = vld [vmem:[%s10146_s1 + $0x190] sm:$0xff]  ;;  %v871_v5 = vpop.xlane.xlu0 %870 }
 0x1dc   : > { %4661 = vmatprep.subr.bf16.mxu0 %v4660_v55  ;;  %v2599_v12 = vld [vmem:[%s10146_s1 + $0x188] sm:$0xff]  ;;  %v655_v24 = vadd.f32 %v6113_v61, %v10354_v38  ;;  %4535 = vmatpush1.bf16.msra.mxu1 %v4534_v25  ;;  %v2729_v55 = vld [vmem:[%s10146_s1 + $0x598] sm:$0xff]  ;;  %v1175_v61 = vmul.f32 %v6242_v49, %v6242_v49  ;;  %v2726_v1 = vld [vmem:[%s10146_s1 + $0x580] sm:$0xff]  ;;  %v873_v25 = vpop.xlane.xlu1 %872 }
 0x1dd   : > { %v10355_v28 = vld [vmem:[#allocation18_spill] sm:$0xff]  ;;  %v4536_v37 = vpack.c.bf16 %v2601_v11, %v2599_v12  ;;  %1138 = vadd.xlane.f32.xlu0 %v6754_v17  ;;  %v2598_v12 = vld [vmem:[%s10146_s1 + $0x180] sm:$0xff]  ;;  %4663 = vmatpush1.bf16.msra.mxu0 %v4662_v7  ;;  %v2605_v7 = vld [vmem:[%s10146_s1 + $0x1b8] sm:$0xff] }
 0x1de   : > { %v654_v4 = vadd.f32 %v6115_v34, %v10355_v28  ;;  %v2727_v0 = vld [vmem:[%s10146_s1 + $0x588] sm:$0xff]  ;;  %v1174_v34 = vmul.f32 %v6245_v50, %v6245_v50  ;;  %v4538_v49 = vpack.c.bf16 %v2600_v21, %v2598_v12  ;;  %v2728_v50 = vld [vmem:[%s10146_s1 + $0x590] sm:$0xff]  ;;  %v6797_v11 = vadd.f32 %v873_v25, %v655_v24  ;;  %v10357_v12 = vld [vmem:[#allocation20_spill] sm:$0xff] }
 0x1df   : > { %v4664_v8 = vpack.c.bf16 %v2729_v55, %v2727_v0  ;;  %4537 = vmatprep.subr.bf16.mxu1 %v4536_v37  ;;  %v4666_v28 = vpack.c.bf16 %v2728_v50, %v2726_v1  ;;  %v2603_v0 = vld [vmem:[%s10146_s1 + $0x1a8] sm:$0xff]  ;;  %v10356_v55 = vld [vmem:[#allocation19_spill] sm:$0xff]  ;;  %v2733_v1 = vld [vmem:[%s10146_s1 + $0x5b8] sm:$0xff]  ;;  %1208 = vadd.xlane.f32.xlu1 %v1175_v61 }
 0x1e0   : > { %v6799_v38 = vadd.f32 %v871_v5, %v654_v4  ;;  %v2731_v37 = vld [vmem:[%s10146_s1 + $0x5a8] sm:$0xff]  ;;  %v657_v24 = vadd.f32 %v6121_v62, %v10356_v55  ;;  %v656_v4 = vadd.f32 %v6123_v33, %v10357_v12  ;;  %4539 = vmatpush1.bf16.msra.mxu1 %v4538_v49  ;;  %v4540_v21 = vpack.c.bf16 %v2605_v7, %v2603_v0  ;;  %v2602_v25 = vld [vmem:[%s10146_s1 + $0x1a0] sm:$0xff]  ;;  %v2604_v62 = vld [vmem:[%s10146_s1 + $0x1b0] sm:$0xff]  ;;  %v877_v0 = vpop.xlane.xlu1 %876  ;;  %v875_v7 = vpop.xlane.xlu0 %874 }
 0x1e1   : > { %4665 = vmatprep.subr.bf16.mxu0 %v4664_v8  ;;  %v1177_v8 = vmul.f32 %v6254_v41, %v6254_v41  ;;  %1206 = vadd.xlane.f32.xlu0 %v1174_v34  ;;  %v1176_v33 = vmul.f32 %v6257_v58, %v6257_v58  ;;  %v4668_v41 = vpack.c.bf16 %v2733_v1, %v2731_v37  ;;  %v2730_v49 = vld [vmem:[%s10146_s1 + $0x5a0] sm:$0xff]  ;;  %v2732_v50 = vld [vmem:[%s10146_s1 + $0x5b0] sm:$0xff]  ;;  %v2607_v58 = vld [vmem:[%s10146_s1 + $0x1c8] sm:$0xff] }
 0x1e2   : > { %v4542_v5 = vpack.c.bf16 %v2604_v62, %v2602_v25  ;;  %4667 = vmatpush1.bf16.msra.mxu0 %v4666_v28  ;;  %4541 = vmatprep.subr.bf16.mxu1 %v4540_v21  ;;  %v4670_v55 = vpack.c.bf16 %v2732_v50, %v2730_v49  ;;  %v6833_v61 = vadd.f32 %v877_v0, %v657_v24  ;;  %v2609_v37 = vld [vmem:[%s10146_s1 + $0x1d8] sm:$0xff]  ;;  %v2735_v12 = vld [vmem:[%s10146_s1 + $0x5c8] sm:$0xff]  ;;  %v10358_v28 = vld [vmem:[#allocation21_spill] sm:$0xff] }
 0x1e3   : > { %v6835_v34 = vadd.f32 %v875_v7, %v656_v4  ;;  %4669 = vmatprep.subr.bf16.mxu0 %v4668_v41  ;;  %v659_v21 = vadd.f32 %v6129_v54, %v10358_v28  ;;  %v10359_v24 = vld [vmem:[#allocation22_spill] sm:$0xff]  ;;  %v1179_v1 = vmul.f32 %v6266_v63, %v6266_v63  ;;  %v4544_v25 = vpack.c.bf16 %v2609_v37, %v2607_v58  ;;  %v2737_v62 = vld [vmem:[%s10146_s1 + $0x5d8] sm:$0xff]  ;;  %v2606_v41 = vld [vmem:[%s10146_s1 + $0x1c0] sm:$0xff] }
 0x1e4   : > { %v658_v4 = vadd.f32 %v6131_v53, %v10359_v24  ;;  %4543 = vmatpush1.bf16.msra.mxu1 %v4542_v5  ;;  %v2608_v54 = vld [vmem:[%s10146_s1 + $0x1d0] sm:$0xff]  ;;  %1212 = vadd.xlane.f32.xlu1 %v1177_v8  ;;  %v1178_v53 = vmul.f32 %v6269_v59, %v6269_v59  ;;  %v4672_v63 = vpack.c.bf16 %v2737_v62, %v2735_v12  ;;  %v2734_v49 = vld [vmem:[%s10146_s1 + $0x5c0] sm:$0xff]  ;;  %v881_v0 = vpop.xlane.xlu1 %880  ;;  %v879_v7 = vpop.xlane.xlu0 %878  ;;  %v2611_v59 = vld [vmem:[%s10146_s1 + $0x1e8] sm:$0xff] }
 0x1e5   : > { %1210 = vadd.xlane.f32.xlu0 %v1176_v33  ;;  %v4546_v5 = vpack.c.bf16 %v2608_v54, %v2606_v41  ;;  %v2736_v50 = vld [vmem:[%s10146_s1 + $0x5d0] sm:$0xff]  ;;  %4545 = vmatprep.subr.bf16.mxu1 %v4544_v25  ;;  %v6869_v8 = vadd.f32 %v881_v0, %v659_v21  ;;  %v2613_v37 = vld [vmem:[%s10146_s1 + $0x1f8] sm:$0xff]  ;;  %v2739_v12 = vld [vmem:[%s10146_s1 + $0x5e8] sm:$0xff] }
 0x1e6   : > { %4671 = vmatpush1.bf16.msra.mxu0 %v4670_v55  ;;  %v4674_v58 = vpack.c.bf16 %v2736_v50, %v2734_v49  ;;  %v6871_v33 = vadd.f32 %v879_v7, %v658_v4  ;;  %v10360_v55 = vld [vmem:[#allocation23_spill] sm:$0xff]  ;;  %v10361_v21 = vld [vmem:[#allocation24_spill] sm:$0xff]  ;;  %v1181_v4 = vmul.f32 %v6278_v42, %v6278_v42  ;;  %v4548_v25 = vpack.c.bf16 %v2613_v37, %v2611_v59  ;;  %v2610_v41 = vld [vmem:[%s10146_s1 + $0x1e0] sm:$0xff] }
 0x1e7   : > { %4673 = vmatprep.subr.bf16.mxu0 %v4672_v63  ;;  %v661_v28 = vadd.f32 %v6137_v46, %v10360_v55  ;;  %v660_v24 = vadd.f32 %v6139_v45, %v10361_v21  ;;  %v2741_v62 = vld [vmem:[%s10146_s1 + $0x5f8] sm:$0xff]  ;;  %v2612_v46 = vld [vmem:[%s10146_s1 + $0x1f0] sm:$0xff]  ;;  %v1180_v45 = vmul.f32 %v6281_v57, %v6281_v57  ;;  %v2738_v63 = vld [vmem:[%s10146_s1 + $0x5e0] sm:$0xff]  ;;  %v1182_v55 = vmul.f32 %v6314_v40, %v6314_v40 }
 0x1e8   : > { %4547 = vmatpush1.bf16.msra.mxu1 %v4546_v5  ;;  %1216 = vadd.xlane.f32.xlu1 %v1179_v1  ;;  %v4676_v42 = vpack.c.bf16 %v2741_v62, %v2739_v12  ;;  %v4550_v54 = vpack.c.bf16 %v2612_v46, %v2610_v41  ;;  %v2740_v5 = vld [vmem:[%s10146_s1 + $0x5f0] sm:$0xff]  ;;  %v885_v49 = vpop.xlane.xlu1 %884  ;;  %v883_v50 = vpop.xlane.xlu0 %882  ;;  %v1558_v57 = vld [vmem:[%s5423_s7 + $0x18] sm:$0xff]  ;;  %v10362_v7 = vld [vmem:[#allocation25_spill] sm:$0xff]  ;;  %v1185_v46 = vmul.f32 %v6351_v9, %v6351_v9 }
 0x1e9   : > { %1214 = vadd.xlane.f32.xlu0 %v1178_v53  ;;  %4549 = vmatprep.subr.bf16.mxu1 %v4548_v25  ;;  %v4678_v0 = vpack.c.bf16 %v2740_v5, %v2738_v63  ;;  %v6905_v1 = vadd.f32 %v885_v49, %v661_v28  ;;  %v6907_v53 = vadd.f32 %v883_v50, %v660_v24  ;;  %v10363_v37 = vld [vmem:[#allocation26_spill] sm:$0xff]  ;;  %v5057_v25 = vld [vmem:[%s5423_s7] sm:$0xff]  ;;  %v10364_v62 = vld [vmem:[#allocation27_spill] sm:$0xff] }
 0x1ea   : > { %4675 = vmatpush1.bf16.msra.mxu0 %v4674_v58  ;;  %v759_v59 = vadd.f32 %v6145_v43, %v10362_v7  ;;  %3384 = vmatprep.mubr.f32.mxu0 %v1558_v57  ;;  %v758_v12 = vadd.f32 %v6147_v44, %v10363_v37  ;;  %v1183_v58 = vmul.f32 %v6311_v10, %v6311_v10  ;;  %v5058_v41 = vld [vmem:[%s5423_s7 + $0xa0] sm:$0xff]  ;;  %v10365_v10 = vld [vmem:[#allocation28_spill] sm:$0xff]  ;;  %v6953_v37 = vld [vmem:[%s5423_s7 + $0xb0] sm:$0xff] }
 0x1eb   : > { %4677 = vmatprep.subr.bf16.mxu0 %v4676_v42  ;;  %v761_v44 = vadd.f32 %v6153_v48, %v10364_v62  ;;  %v760_v40 = vadd.f32 %v6155_v36, %v10365_v10  ;;  %v6934_v42 = vld [vmem:[%s5423_s7 + $0x90] sm:$0xff]  ;;  %v5059_v36 = vld [vmem:[%s5423_s7 + $0x20] sm:$0xff]  ;;  %v1560_v50 = vld [vmem:[%s5423_s7 + $0x58] sm:$0xff]  ;;  %v1187_v7 = vmul.f32 %v6391_v18, %v6391_v18 }
 0x1ec   : > { %4551 = vmatpush1.bf16.msra.mxu1 %v4550_v54  ;;  %1220 = vadd.xlane.f32.xlu1 %v1181_v4  ;;  %v953_v28 = vpop.xlane.xlu1 %952  ;;  %v951_v21 = vpop.xlane.xlu0 %950  ;;  %v1559_v4 = vld [vmem:[%s5423_s7 + $0x38] sm:$0xff]  ;;  %v10366_v49 = vld [vmem:[#allocation29_spill] sm:$0xff] }
 0x1ed   : > { %1218 = vadd.xlane.f32.xlu0 %v1180_v45  ;;  %v6918_v43 = vadd.f32 %v953_v28, %v759_v59  ;;  %v6920_v24 = vadd.f32 %v951_v21, %v758_v12  ;;  %v1184_v45 = vmul.f32 %v6354_v56, %v6354_v56  ;;  %v763_v9 = vadd.f32 %v6161_v39, %v10366_v49  ;;  %v5060_v56 = vld [vmem:[%s5423_s7 + $0xc0] sm:$0xff]  ;;  %v10368_v28 = vld [vmem:[#allocation31_spill] sm:$0xff]  ;;  %v1561_v21 = vld [vmem:[%s5423_s7 + $0x78] sm:$0xff] }
 0x1ee   : > { %4679 = vmatpush1.bf16.msra.mxu0 %v4678_v0  ;;  %v10367_v0 = vld [vmem:[#allocation30_spill] sm:$0xff]  ;;  %v1186_v59 = vmul.f32 %v6394_v23, %v6394_v23  ;;  %v765_v18 = vadd.f32 %v6169_v35, %v10368_v28  ;;  %v5062_v23 = vld [vmem:[%s5423_s7 + $0xe0] sm:$0xff]  ;;  %v1191_v49 = vmul.f32 %v6471_v26, %v6471_v26  ;;  %v1193_v28 = vmul.f32 %v6511_v30, %v6511_v30 }
 0x1ef   : > { %2871 = vmatmul.mubr.f32.vlgmr.msra.gmra.mrb[0].mxu1 %v5057_v25  ;;  %v762_v57 = vadd.f32 %v6163_v51, %v10367_v0  ;;  %v5061_v51 = vld [vmem:[%s5423_s7 + $0x40] sm:$0xff]  ;;  %v10369_v25 = vld [vmem:[#allocation32_spill] sm:$0xff] }
 0x1f0   : > { %2876 = vmatprep.mubr.f32.mxu1 %v5058_v41  ;;  %1224 = vadd.xlane.f32.xlu1 %v1183_v58  ;;  %v957_v48 = vpop.xlane.xlu1 %956  ;;  %v955_v54 = vpop.xlane.xlu0 %954  ;;  %v764_v62 = vadd.f32 %v6171_v47, %v10369_v25  ;;  %v6972_v41 = vld [vmem:[%s5423_s7 + $0xd0] sm:$0xff]  ;;  %v5063_v47 = vld [vmem:[%s5423_s7 + $0x60] sm:$0xff] }
 0x1f1   : > { %1222 = vadd.xlane.f32.xlu0 %v1182_v55  ;;  %3385 = vmatmul.mubr.f32.vlgmr.msra.gmra.mrb[0].mxu0 %v6934_v42  ;;  %v6937_v63 = vadd.f32 %v957_v48, %v761_v44  ;;  %v6939_v5 = vadd.f32 %v955_v54, %v760_v40  ;;  %v1189_v44 = vmul.f32 %v6431_v22, %v6431_v22  ;;  %v1562_v48 = vld [vmem:[%s5423_s7 + $0x118] sm:$0xff]  ;;  %v10371_v54 = vld [vmem:[#allocation34_spill] sm:$0xff] }
 0x1f2   : > { %3390 = vmatprep.mubr.f32.mxu0 %v1559_v4  ;;  %v1188_v4 = vmul.f32 %v6434_v15, %v6434_v15  ;;  %v5064_v15 = vld [vmem:[%s5423_s7 + $0x180] sm:$0xff] }
 0x1f3   : > { %2877 = vmatmul.mubr.f32.gmra.mrb[2].mxu1 %v5059_v36  ;;  %v766_v36 = vadd.f32 %v6179_v32, %v10371_v54  ;;  %v5065_v32 = vld [vmem:[%s5423_s7 + $0x100] sm:$0xff]  ;;  %v7029_v54 = vld [vmem:[%s5423_s7 + $0x1b0] sm:$0xff] }
 0x1f4   : > { %2882 = vmatprep.mubr.f32.mxu1 %v5060_v56  ;;  %1228 = vadd.xlane.f32.xlu1 %v1185_v46  ;;  %v961_v39 = vpop.xlane.xlu1 %960  ;;  %v959_v12 = vpop.xlane.xlu0 %958 }
 0x1f5   : > { %1226 = vadd.xlane.f32.xlu0 %v1184_v45  ;;  %3391 = vmatmul.mubr.f32.gmra.mrb[2].mxu0 %v6953_v37  ;;  %v6956_v58 = vadd.f32 %v961_v39, %v763_v9  ;;  %v6958_v55 = vadd.f32 %v959_v12, %v762_v57  ;;  %v10370_v45 = vld [vmem:[#allocation33_spill] sm:$0xff]  ;;  %v1190_v9 = vmul.f32 %v6474_v6, %v6474_v6  ;;  %v10375_v39 = vld [vmem:[#allocation36_spill] sm:$0xff] }
 0x1f6   : > { %3396 = vmatprep.mubr.f32.mxu0 %v1560_v50  ;;  %v767_v22 = vadd.f32 %v6177_v31, %v10370_v45  ;;  %v6991_v50 = vld [vmem:[%s5423_s7 + $0xf0] sm:$0xff]  ;;  %v5066_v6 = vld [vmem:[%s5423_s7 + $0x1a0] sm:$0xff] }
 0x1f7   : > { %2883 = vmatmul.mubr.f32.gmra.mrb[4].mxu1 %v5061_v51  ;;  %v10376_v12 = vld [vmem:[#allocation69_spill] sm:$0xff]  ;;  %v10382_v45 = vld [vmem:[#allocation71_spill] sm:$0xff] }
 0x1f8   : > { %2888 = vmatprep.mubr.f32.mxu1 %v5062_v23  ;;  %1232 = vadd.xlane.f32.xlu1 %v1187_v7  ;;  %v965_v35 = vpop.xlane.xlu1 %964  ;;  %v963_v10 = vpop.xlane.xlu0 %962  ;;  %v10374_v7 = vld [vmem:[#allocation35_spill] sm:$0xff]  ;;  %v768_v51 = vadd.f32 %v10376_v12, %v10375_v39  ;;  %v1197_v12 = vmul.f32 %v6591_v14, %v6591_v14 }
 0x1f9   : > { %1230 = vadd.xlane.f32.xlu0 %v1186_v59  ;;  %3397 = vmatmul.mubr.f32.gmra.mrb[4].mxu0 %v6972_v41  ;;  %v6975_v40 = vadd.f32 %v965_v35, %v765_v18  ;;  %v6977_v46 = vadd.f32 %v963_v10, %v764_v62  ;;  %v769_v26 = vadd.f32 %v6185_v27, %v10374_v7  ;;  %v1563_v59 = vld [vmem:[%s5423_s7 + $0x138] sm:$0xff]  ;;  %v10380_v35 = vld [vmem:[#allocation70_spill] sm:$0xff] }
 0x1fa   : > { %3402 = vmatprep.mubr.f32.mxu0 %v1561_v21  ;;  %v1192_v18 = vmul.f32 %v6514_v2, %v6514_v2  ;;  %v7010_v21 = vld [vmem:[%s5423_s7 + $0x190] sm:$0xff]  ;;  %v1564_v10 = vld [vmem:[%s5423_s7 + $0x158] sm:$0xff]  ;;  %v5068_v2 = vld [vmem:[%s5423_s7 + $0x1c0] sm:$0xff] }
 0x1fb   : > { %2889 = vmatmul.mubr.f32.gmra.mrb[6].mxu1 %v5063_v47  ;;  %v10381_v47 = vld [vmem:[#allocation38_spill] sm:$0xff]  ;;  %v10386_v7 = vld [vmem:[#allocation72_spill] sm:$0xff] }
 0x1fc   : > { %2894 = vmatprep.mubr.f32.mxu1 %v5064_v15  ;;  %1236 = vadd.xlane.f32.xlu1 %v1189_v44  ;;  %v969_v31 = vpop.xlane.xlu1 %968  ;;  %v967_v56 = vpop.xlane.xlu0 %966  ;;  %v5067_v44 = vld [vmem:[%s5423_s7 + $0x120] sm:$0xff]  ;;  %v1194_v15 = vmul.f32 %v6554_v3, %v6554_v3 }
 0x1fd   : > { %1234 = vadd.xlane.f32.xlu0 %v1188_v4  ;;  %3403 = vmatmul.mubr.f32.gmra.mrb[6].mxu0 %v6991_v50  ;;  %v6994_v0 = vadd.f32 %v969_v31, %v767_v22  ;;  %v6996_v57 = vadd.f32 %v967_v56, %v766_v36  ;;  %v10379_v4 = vld [vmem:[#allocation37_spill] sm:$0xff]  ;;  %v770_v22 = vadd.f32 %v10382_v45, %v10381_v47  ;;  %v10394_v47 = vld [vmem:[#allocation75_spill] sm:$0xff] }
 0x1fe   : > { %3408 = vmatprep.mubr.f32.mxu0 %v1562_v48  ;;  %v771_v30 = vadd.f32 %v10380_v35, %v10379_v4  ;;  %v1195_v48 = vmul.f32 %v6551_v29, %v6551_v29  ;;  %v5069_v56 = vld [vmem:[%s5423_s7 + $0x140] sm:$0xff] }
 0x1ff   : > { %10372 = vst [vmem:[#allocation12_spill] sm:$0xff] %v6994_v0  ;;  %10373 = vst [vmem:[#allocation64_spill] sm:$0xff] %v6996_v57  ;;  %2895 = vmatmul.mubr.f32.gmra.mrb[8].mxu1 %v5065_v32  ;;  %v10385_v32 = vld [vmem:[#allocation39_spill] sm:$0xff]  ;;  %v5070_v3 = vld [vmem:[%s5423_s7 + $0x1e0] sm:$0xff] }
 0x200   : > { %2900 = vmatprep.mubr.f32.mxu1 %v5066_v6  ;;  %1240 = vadd.xlane.f32.xlu1 %v1191_v49  ;;  %v973_v27 = vpop.xlane.xlu1 %972  ;;  %v971_v23 = vpop.xlane.xlu0 %970  ;;  %v773_v29 = vadd.f32 %v10386_v7, %v10385_v32  ;;  %v10388_v6 = vld [vmem:[#allocation73_spill] sm:$0xff] }
 0x201   : > { %1238 = vadd.xlane.f32.xlu0 %v1190_v9  ;;  %3409 = vmatmul.mubr.f32.gmra.mrb[8].mxu0 %v7010_v21  ;;  %v7013_v25 = vadd.f32 %v973_v27, %v769_v26  ;;  %v7015_v62 = vadd.f32 %v971_v23, %v768_v51  ;;  %v1565_v26 = vld [vmem:[%s5423_s7 + $0x178] sm:$0xff]  ;;  %v1196_v51 = vmul.f32 %v6594_v16, %v6594_v16  ;;  %v5071_v4 = vld [vmem:[%s5423_s7 + $0x160] sm:$0xff] }
 0x202   : > { %3414 = vmatprep.mubr.f32.mxu0 %v1563_v59  ;;  %v10387_v59 = vld [vmem:[#allocation40_spill] sm:$0xff]  ;;  %v10391_v35 = vld [vmem:[#allocation41_spill] sm:$0xff] }
 0x203   : > { %10377 = vst [vmem:[#allocation13_spill] sm:$0xff] %v7013_v25  ;;  %10378 = vst [vmem:[#allocation65_spill] sm:$0xff] %v7015_v62  ;;  %2901 = vmatmul.mubr.f32.gmra.mrb[10].mxu1 %v5067_v44  ;;  %v772_v39 = vadd.f32 %v10388_v6, %v10387_v59  ;;  %v5072_v16 = vld [vmem:[%s5423_s7 + $0x280] sm:$0xff]  ;;  %v10399_v59 = vld [vmem:[#allocation44_spill] sm:$0xff] }
 0x204   : > { %2906 = vmatprep.mubr.f32.mxu1 %v5068_v2  ;;  %1244 = vadd.xlane.f32.xlu1 %v1193_v28  ;;  %v977_v36 = vpop.xlane.xlu1 %976  ;;  %v975_v49 = vpop.xlane.xlu0 %974  ;;  %v7048_v28 = vld [vmem:[%s5423_s7 + $0x1d0] sm:$0xff]  ;;  %v10393_v2 = vld [vmem:[#allocation42_spill] sm:$0xff]  ;;  %v5073_v7 = vld [vmem:[%s5423_s7 + $0x200] sm:$0xff] }
 0x205   : > { %1242 = vadd.xlane.f32.xlu0 %v1192_v18  ;;  %3415 = vmatmul.mubr.f32.gmra.mrb[10].mxu0 %v7029_v54  ;;  %v7032_v9 = vadd.f32 %v977_v36, %v771_v30  ;;  %v7034_v31 = vadd.f32 %v975_v49, %v770_v22  ;;  %v10392_v30 = vld [vmem:[#allocation74_spill] sm:$0xff]  ;;  %v774_v45 = vadd.f32 %v10394_v47, %v10393_v2  ;;  %v10400_v6 = vld [vmem:[#allocation77_spill] sm:$0xff] }
 0x206   : > { %3420 = vmatprep.mubr.f32.mxu0 %v1564_v10  ;;  %v775_v14 = vadd.f32 %v10392_v30, %v10391_v35  ;;  %v1566_v10 = vld [vmem:[%s5423_s7 + $0x218] sm:$0xff]  ;;  %v1199_v22 = vmul.f32 %v6631_v13, %v6631_v13  ;;  %v10405_v2 = vld [vmem:[#allocation45_spill] sm:$0xff]  ;;  %v10406_v47 = vld [vmem:[#allocation78_spill] sm:$0xff] }
 0x207   : > { %10383 = vst [vmem:[#allocation14_spill] sm:$0xff] %v7032_v9  ;;  %10384 = vst [vmem:[#allocation66_spill] sm:$0xff] %v7034_v31  ;;  %2907 = vmatmul.mubr.f32.gmra.mrb[12].mxu1 %v5069_v56  ;;  %v1579_v31 = vld [vmem:[%s5423_s7 + $0x538] sm:$0xff]  ;;  %v5098_v62 = vld [vmem:[%s5423_s7 + $0x5a0] sm:$0xff] }
 0x208   : > { %2912 = vmatprep.mubr.f32.mxu1 %v5070_v3  ;;  %1248 = vadd.xlane.f32.xlu1 %v1195_v48  ;;  %v981_v18 = vpop.xlane.xlu1 %980  ;;  %v979_v27 = vpop.xlane.xlu0 %978  ;;  %v1198_v48 = vmul.f32 %v6634_v52, %v6634_v52  ;;  %v1567_v3 = vld [vmem:[%s5423_s7 + $0x238] sm:$0xff]  ;;  %v5074_v52 = vld [vmem:[%s5423_s7 + $0x2a0] sm:$0xff] }
 0x209   : > { %1246 = vadd.xlane.f32.xlu0 %v1194_v15  ;;  %3421 = vmatmul.mubr.f32.gmra.mrb[12].mxu0 %v7048_v28  ;;  %v7051_v23 = vadd.f32 %v981_v18, %v773_v29  ;;  %v7053_v44 = vadd.f32 %v979_v27, %v772_v39  ;;  %v7067_v15 = vld [vmem:[%s5423_s7 + $0x1f0] sm:$0xff]  ;;  %v776_v39 = vadd.f32 %v10400_v6, %v10399_v59  ;;  %v10402_v18 = vld [vmem:[#allocation60_spill] sm:$0xff]  ;;  %v5104_v57 = vld [vmem:[%s5423_s7 + $0x680] sm:$0xff] }
 0x20a   : > { %3426 = vmatprep.mubr.f32.mxu0 %v1565_v26  ;;  %v10397_v29 = vld [vmem:[#allocation43_spill] sm:$0xff]  ;;  %v10398_v26 = vld [vmem:[#allocation76_spill] sm:$0xff]  ;;  %v1200_v27 = vmul.f32 %v10402_v18, %v10402_v18 }
 0x20b   : > { %10389 = vst [vmem:[#allocation15_spill] sm:$0xff] %v7051_v23  ;;  %10390 = vst [vmem:[#allocation67_spill] sm:$0xff] %v7053_v44  ;;  %2913 = vmatmul.mubr.f32.gmra.mrb[14].mxu1 %v5071_v4  ;;  %v777_v13 = vadd.f32 %v10398_v26, %v10397_v29  ;;  %v7086_v4 = vld [vmem:[%s5423_s7 + $0x290] sm:$0xff]  ;;  %v10409_v29 = vld [vmem:[#allocation10_spill] sm:$0xff] }
 0x20c   : > { %2918 = vmatprep.mubr.f32.mxu1 %v5072_v16  ;;  %1252 = vadd.xlane.f32.xlu1 %v1197_v12  ;;  %v985_v36 = vpop.xlane.xlu1 %984  ;;  %v983_v49 = vpop.xlane.xlu0 %982  ;;  %v10401_v12 = vld [vmem:[#allocation8_spill] sm:$0xff]  ;;  %v5075_v16 = vld [vmem:[%s5423_s7 + $0x220] sm:$0xff]  ;;  %v1203_v26 = vmul.f32 %v10409_v29, %v10409_v29  ;;  %v10413_v18 = vld [vmem:[#allocation47_spill] sm:$0xff] }
 0x20d   : > { %1250 = vadd.xlane.f32.xlu0 %v1196_v51  ;;  %3427 = vmatmul.mubr.f32.gmra.mrb[14].mxu0 %v7067_v15  ;;  %v7070_v56 = vadd.f32 %v985_v36, %v775_v14  ;;  %v7072_v32 = vadd.f32 %v983_v49, %v774_v45  ;;  %v1201_v51 = vmul.f32 %v10401_v12, %v10401_v12  ;;  %v10407_v36 = vld [vmem:[#allocation46_spill] sm:$0xff]  ;;  %v10408_v49 = vld [vmem:[#allocation79_spill] sm:$0xff] }
 0x20e   : > { %3432 = vmatprep.mubr.f32.mxu0 %v1566_v10  ;;  %v779_v45 = vadd.f32 %v10406_v47, %v10405_v2  ;;  %v10415_v2 = vld [vmem:[#allocation48_spill] sm:$0xff]  ;;  %v10416_v47 = vld [vmem:[#allocation81_spill] sm:$0xff] }
 0x20f   : > { %10395 = vst [vmem:[#allocation16_spill] sm:$0xff] %v7070_v56  ;;  %10396 = vst [vmem:[#allocation68_spill] sm:$0xff] %v7072_v32  ;;  %2919 = vmatmul.mubr.f32.gmra.mrb[16].mxu1 %v5073_v7  ;;  %v778_v7 = vadd.f32 %v10408_v49, %v10407_v36  ;;  %v7124_v36 = vld [vmem:[%s5423_s7 + $0x2d0] sm:$0xff]  ;;  %v1576_v32 = vld [vmem:[%s5423_s7 + $0x458] sm:$0xff] }
 0x210   : > { %2924 = vmatprep.mubr.f32.mxu1 %v5074_v52  ;;  %1256 = vadd.xlane.f32.xlu1 %v1199_v22  ;;  %v989_v35 = vpop.xlane.xlu1 %988  ;;  %v987_v30 = vpop.xlane.xlu0 %986  ;;  %v1568_v22 = vld [vmem:[%s5423_s7 + $0x258] sm:$0xff]  ;;  %v7105_v52 = vld [vmem:[%s5423_s7 + $0x2b0] sm:$0xff]  ;;  %v2751_v56 = vld [vmem:[%s10146_s1 + $0x648] sm:$0xff] }
 0x211   : > { %1254 = vadd.xlane.f32.xlu0 %v1198_v48  ;;  %3433 = vmatmul.mubr.f32.gmra.mrb[16].mxu0 %v7086_v4  ;;  %v7089_v14 = vadd.f32 %v989_v35, %v777_v13  ;;  %v7091_v10 = vadd.f32 %v987_v30, %v776_v39  ;;  %v5076_v48 = vld [vmem:[%s5423_s7 + $0x2c0] sm:$0xff]  ;;  %v10410_v13 = vld [vmem:[#allocation62_spill] sm:$0xff]  ;;  %v1569_v30 = vld [vmem:[%s5423_s7 + $0x278] sm:$0xff] }
 0x212   : > { %3438 = vmatprep.mubr.f32.mxu0 %v1567_v3  ;;  %v1202_v3 = vmul.f32 %v10410_v13, %v10410_v13 }
 0x213   : > { %10403 = vst [vmem:[#allocation17_spill] sm:$0xff] %v7089_v14  ;;  %10404 = vst [vmem:[#allocation18_spill] sm:$0xff] %v7091_v10  ;;  %2925 = vmatmul.mubr.f32.gmra.mrb[18].mxu1 %v5075_v16  ;;  %v5078_v16 = vld [vmem:[%s5423_s7 + $0x2e0] sm:$0xff] }
 0x214   : > { %2930 = vmatprep.mubr.f32.mxu1 %v5076_v48  ;;  %1260 = vadd.xlane.f32.xlu1 %v1201_v51  ;;  %v993_v59 = vpop.xlane.xlu1 %992  ;;  %v991_v6 = vpop.xlane.xlu0 %990  ;;  %v5077_v51 = vld [vmem:[%s5423_s7 + $0x240] sm:$0xff]  ;;  %v780_v48 = vadd.f32 %v10416_v47, %v10415_v2 }
 0x215   : > { %1258 = vadd.xlane.f32.xlu0 %v1200_v27  ;;  %3439 = vmatmul.mubr.f32.gmra.mrb[18].mxu0 %v7105_v52  ;;  %v7108_v39 = vadd.f32 %v993_v59, %v779_v45  ;;  %v7110_v12 = vadd.f32 %v991_v6, %v778_v7  ;;  %v10414_v27 = vld [vmem:[#allocation80_spill] sm:$0xff]  ;;  %v1205_v45 = vmul.f32 %v6751_v19, %v6751_v19  ;;  %v5080_v19 = vld [vmem:[%s5423_s7 + $0x380] sm:$0xff]  ;;  %v10420_v59 = vld [vmem:[#allocation82_spill] sm:$0xff] }
 0x216   : > { %3444 = vmatprep.mubr.f32.mxu0 %v1568_v22  ;;  %v781_v35 = vadd.f32 %v10414_v27, %v10413_v18  ;;  %v1204_v22 = vmul.f32 %v6754_v17, %v6754_v17  ;;  %v10419_v17 = vld [vmem:[#allocation49_spill] sm:$0xff]  ;;  %v10422_v18 = vld [vmem:[#allocation83_spill] sm:$0xff] }
 0x217   : > { %10411 = vst [vmem:[#allocation19_spill] sm:$0xff] %v7108_v39  ;;  %10412 = vst [vmem:[#allocation20_spill] sm:$0xff] %v7110_v12  ;;  %2931 = vmatmul.mubr.f32.gmra.mrb[20].mxu1 %v5077_v51  ;;  %v783_v6 = vadd.f32 %v10420_v59, %v10419_v17  ;;  %v10421_v51 = vld [vmem:[#allocation50_spill] sm:$0xff]  ;;  %v10428_v17 = vld [vmem:[#allocation85_spill] sm:$0xff] }
 0x218   : > { %2936 = vmatprep.mubr.f32.mxu1 %v5078_v16  ;;  %1264 = vadd.xlane.f32.xlu1 %v1203_v26  ;;  %v997_v49 = vpop.xlane.xlu1 %996  ;;  %v995_v7 = vpop.xlane.xlu0 %994  ;;  %v5079_v26 = vld [vmem:[%s5423_s7 + $0x260] sm:$0xff]  ;;  %v782_v27 = vadd.f32 %v10422_v18, %v10421_v51  ;;  %v2747_v12 = vld [vmem:[%s10146_s1 + $0x628] sm:$0xff]  ;;  %v7275_v39 = vld [vmem:[%s5423_s7 + $0x4b0] sm:$0xff] }
 0x219   : > { %1262 = vadd.xlane.f32.xlu0 %v1202_v3  ;;  %3445 = vmatmul.mubr.f32.gmra.mrb[20].mxu0 %v7124_v36  ;;  %v7127_v29 = vadd.f32 %v997_v49, %v781_v35  ;;  %v7129_v13 = vadd.f32 %v995_v7, %v780_v48  ;;  %v1570_v3 = vld [vmem:[%s5423_s7 + $0x318] sm:$0xff]  ;;  %v7139_v35 = vld [vmem:[%s5423_s7 + $0x2f0] sm:$0xff]  ;;  %v5081_v48 = vld [vmem:[%s5423_s7 + $0x300] sm:$0xff] }
 0x21a   : > { %3450 = vmatprep.mubr.f32.mxu0 %v1569_v30  ;;  %v1571_v49 = vld [vmem:[%s5423_s7 + $0x338] sm:$0xff]  ;;  %v5082_v7 = vld [vmem:[%s5423_s7 + $0x3a0] sm:$0xff] }
 0x21b   : > { %10417 = vst [vmem:[#allocation21_spill] sm:$0xff] %v7127_v29  ;;  %10418 = vst [vmem:[#allocation22_spill] sm:$0xff] %v7129_v13  ;;  %2937 = vmatmul.mubr.f32.gmra.mrb[22].mxu1 %v5079_v26  ;;  %v7237_v13 = vld [vmem:[%s5423_s7 + $0x490] sm:$0xff]  ;;  %v1575_v29 = vld [vmem:[%s5423_s7 + $0x438] sm:$0xff] }
 0x21c   : > { %2942 = vmatprep.mubr.f32.mxu1 %v5080_v19  ;;  %1268 = vadd.xlane.f32.xlu1 %v1205_v45  ;;  %v1001_v30 = vpop.xlane.xlu1 %1000  ;;  %v999_v16 = vpop.xlane.xlu0 %998  ;;  %v10425_v45 = vld [vmem:[#allocation51_spill] sm:$0xff]  ;;  %v10427_v19 = vld [vmem:[#allocation52_spill] sm:$0xff]  ;;  %10447 = vst [vmem:[#allocation33_spill] sm:$0xff] %v7237_v13  ;;  %v5090_v10 = vld [vmem:[%s5423_s7 + $0x4a0] sm:$0xff] }
 0x21d   : > { %1266 = vadd.xlane.f32.xlu0 %v1204_v22  ;;  %3451 = vmatmul.mubr.f32.gmra.mrb[22].mxu0 %v7139_v35  ;;  %v7142_v2 = vadd.f32 %v1001_v30, %v783_v6  ;;  %v7144_v47 = vadd.f32 %v999_v16, %v782_v27  ;;  %v10426_v22 = vld [vmem:[#allocation84_spill] sm:$0xff]  ;;  %v784_v59 = vadd.f32 %v10428_v17, %v10427_v19  ;;  %v7156_v6 = vld [vmem:[%s5423_s7 + $0x390] sm:$0xff]  ;;  %v5083_v30 = vld [vmem:[%s5423_s7 + $0x320] sm:$0xff] }
 0x21e   : > { %3456 = vmatprep.mubr.f32.mxu0 %v1570_v3  ;;  %v785_v26 = vadd.f32 %v10426_v22, %v10425_v45  ;;  %v1572_v16 = vld [vmem:[%s5423_s7 + $0x358] sm:$0xff]  ;;  %v10433_v22 = vld [vmem:[#allocation54_spill] sm:$0xff]  ;;  %v10434_v19 = vld [vmem:[#allocation87_spill] sm:$0xff] }
 0x21f   : > { %10423 = vst [vmem:[#allocation23_spill] sm:$0xff] %v7142_v2  ;;  %10424 = vst [vmem:[#allocation24_spill] sm:$0xff] %v7144_v47  ;;  %2943 = vmatmul.mubr.f32.gmra.mrb[24].mxu1 %v5081_v48  ;;  %v5084_v48 = vld [vmem:[%s5423_s7 + $0x3c0] sm:$0xff]  ;;  %v786_v17 = vadd.f32 %v10434_v19, %v10433_v22  ;;  %v10438_v22 = vld [vmem:[#allocation88_spill] sm:$0xff] }
 0x220   : > { %2948 = vmatprep.mubr.f32.mxu1 %v5082_v7  ;;  %1336 = vadd.xlane.f32.xlu1 %v6953_v37  ;;  %v1005_v3 = vpop.xlane.xlu1 %1004  ;;  %v1003_v51 = vpop.xlane.xlu0 %1002  ;;  %v10432_v7 = vld [vmem:[#allocation86_spill] sm:$0xff] }
 0x221   : > { %1334 = vadd.xlane.f32.xlu0 %v6934_v42  ;;  %3457 = vmatmul.mubr.f32.gmra.mrb[24].mxu0 %v7156_v6  ;;  %v7159_v18 = vadd.f32 %v1005_v3, %v785_v26  ;;  %v7161_v27 = vadd.f32 %v1003_v51, %v784_v59  ;;  %v10431_v42 = vld [vmem:[#allocation53_spill] sm:$0xff]  ;;  %v7173_v26 = vld [vmem:[%s5423_s7 + $0x3b0] sm:$0xff] }
 0x222   : > { %3462 = vmatprep.mubr.f32.mxu0 %v1571_v49  ;;  %v787_v45 = vadd.f32 %v10432_v7, %v10431_v42  ;;  %v5086_v42 = vld [vmem:[%s5423_s7 + $0x3e0] sm:$0xff]  ;;  %v10437_v7 = vld [vmem:[#allocation55_spill] sm:$0xff] }
 0x223   : > { %10429 = vst [vmem:[#allocation25_spill] sm:$0xff] %v7159_v18  ;;  %10430 = vst [vmem:[#allocation26_spill] sm:$0xff] %v7161_v27  ;;  %2949 = vmatmul.mubr.f32.gmra.mrb[26].mxu1 %v5083_v30  ;;  %v5085_v30 = vld [vmem:[%s5423_s7 + $0x340] sm:$0xff]  ;;  %v789_v19 = vadd.f32 %v10438_v22, %v10437_v7  ;;  %v10439_v27 = vld [vmem:[#allocation56_spill] sm:$0xff] }
 0x224   : > { %2954 = vmatprep.mubr.f32.mxu1 %v5084_v48  ;;  %1340 = vadd.xlane.f32.xlu1 %v6991_v50  ;;  %v1009_v49 = vpop.xlane.xlu1 %1008  ;;  %v1007_v59 = vpop.xlane.xlu0 %1006  ;;  %v1573_v48 = vld [vmem:[%s5423_s7 + $0x378] sm:$0xff]  ;;  %v10440_v18 = vld [vmem:[#allocation89_spill] sm:$0xff] }
 0x225   : > { %1338 = vadd.xlane.f32.xlu0 %v6972_v41  ;;  %3463 = vmatmul.mubr.f32.gmra.mrb[26].mxu0 %v7173_v26  ;;  %v7176_v3 = vadd.f32 %v1009_v49, %v787_v45  ;;  %v7178_v51 = vadd.f32 %v1007_v59, %v786_v17  ;;  %v788_v47 = vadd.f32 %v10440_v18, %v10439_v27  ;;  %v1574_v18 = vld [vmem:[%s5423_s7 + $0x418] sm:$0xff]  ;;  %v2615_v27 = vld [vmem:[%s10146_s1 + $0x208] sm:$0xff]  ;;  %v5088_v22 = vld [vmem:[%s5423_s7 + $0x480] sm:$0xff] }
 0x226   : > { %3468 = vmatprep.mubr.f32.mxu0 %v1572_v16  ;;  %v7190_v16 = vld [vmem:[%s5423_s7 + $0x3d0] sm:$0xff]  ;;  %v2617_v7 = vld [vmem:[%s10146_s1 + $0x218] sm:$0xff] }
 0x227   : > { %10435 = vst [vmem:[#allocation27_spill] sm:$0xff] %v7176_v3  ;;  %10436 = vst [vmem:[#allocation28_spill] sm:$0xff] %v7178_v51  ;;  %2955 = vmatmul.mubr.f32.gmra.mrb[28].mxu1 %v5085_v30  ;;  %v7198_v30 = vld [vmem:[%s5423_s7 + $0x3f0] sm:$0xff] }
 0x228   : > { %2960 = vmatprep.mubr.f32.mxu1 %v5086_v42  ;;  %1344 = vadd.xlane.f32.xlu1 %v7029_v54  ;;  %v1013_v45 = vpop.xlane.xlu1 %1012  ;;  %v1011_v17 = vpop.xlane.xlu0 %1010  ;;  %v5087_v42 = vld [vmem:[%s5423_s7 + $0x360] sm:$0xff]  ;;  %v10445_v3 = vld [vmem:[#allocation91_spill] sm:$0xff] }
 0x229   : > { %1342 = vadd.xlane.f32.xlu0 %v7010_v21  ;;  %3469 = vmatmul.mubr.f32.gmra.mrb[28].mxu0 %v7190_v16  ;;  %v7193_v49 = vadd.f32 %v1013_v45, %v789_v19  ;;  %v7195_v59 = vadd.f32 %v1011_v17, %v788_v47  ;;  %v4552_v19 = vpack.c.bf16 %v2617_v7, %v2615_v27  ;;  %v2743_v47 = vld [vmem:[%s10146_s1 + $0x608] sm:$0xff]  ;;  %v2614_v45 = vld [vmem:[%s10146_s1 + $0x200] sm:$0xff]  ;;  %v2744_v7 = vld [vmem:[%s10146_s1 + $0x610] sm:$0xff] }
 0x22a   : > { %3474 = vmatprep.mubr.f32.mxu0 %v1573_v48  ;;  %v2745_v48 = vld [vmem:[%s10146_s1 + $0x618] sm:$0xff]  ;;  %v2742_v27 = vld [vmem:[%s10146_s1 + $0x600] sm:$0xff] }
 0x22b   : > { %10441 = vst [vmem:[#allocation29_spill] sm:$0xff] %v7193_v49  ;;  %10442 = vst [vmem:[#allocation30_spill] sm:$0xff] %v7195_v59  ;;  %2961 = vmatmul.mubr.f32.gmra.mrb[30].mxu1 %v5087_v42  ;;  %v4680_v17 = vpack.c.bf16 %v2745_v48, %v2743_v47  ;;  %v2616_v42 = vld [vmem:[%s10146_s1 + $0x210] sm:$0xff]  ;;  %4553 = vmatprep.subr.bf16.mxu1 %v4552_v19  ;;  %v4682_v47 = vpack.c.bf16 %v2744_v7, %v2742_v27  ;;  %v10443_v48 = vld [vmem:[#allocation90_spill] sm:$0xff] }
 0x22c   : > { %2966 = vmatprep.mubr.f32.mxu1 %v5088_v22  ;;  %1348 = vadd.xlane.f32.xlu1 %v7067_v15  ;;  %v1081_v22 = vpop.xlane.xlu1 %1080  ;;  %v1079_v59 = vpop.xlane.xlu0 %1078  ;;  %v4554_v49 = vpack.c.bf16 %v2616_v42, %v2614_v45  ;;  %v2749_v19 = vld [vmem:[%s10146_s1 + $0x638] sm:$0xff]  ;;  %v5089_v45 = vld [vmem:[%s5423_s7 + $0x400] sm:$0xff]  ;;  %v2748_v27 = vld [vmem:[%s10146_s1 + $0x630] sm:$0xff] }
 0x22d   : > { %1346 = vadd.xlane.f32.xlu0 %v7048_v28  ;;  %3475 = vmatmul.mubr.f32.gmra.mrb[30].mxu0 %v7198_v30  ;;  %v7231_v51 = vadd.f32 %v1081_v22, %v10443_v48  ;;  %v7234_v2 = vadd.f32 %v1079_v59, %v10445_v3  ;;  %v4684_v42 = vpack.c.bf16 %v2749_v19, %v2747_v12  ;;  %v2619_v3 = vld [vmem:[%s10146_s1 + $0x228] sm:$0xff]  ;;  %v2621_v59 = vld [vmem:[%s10146_s1 + $0x238] sm:$0xff]  ;;  %v2620_v12 = vld [vmem:[%s10146_s1 + $0x230] sm:$0xff] }
 0x22e   : > { %3480 = vmatprep.mubr.f32.mxu0 %v1574_v18  ;;  %4681 = vmatprep.subr.bf16.mxu0 %v4680_v17  ;;  %v2618_v18 = vld [vmem:[%s10146_s1 + $0x220] sm:$0xff]  ;;  %v10448_v19 = vld [vmem:[#allocation92_spill] sm:$0xff] }
 0x22f   : > { %10444 = vst [vmem:[#allocation31_spill] sm:$0xff] %v7231_v51  ;;  %10446 = vst [vmem:[#allocation32_spill] sm:$0xff] %v7234_v2  ;;  %2967 = vmatmul.mubr.f32.gmra.mrb[32].mxu1 %v5089_v45  ;;  %4683 = vmatpush1.bf16.msra.mxu0 %v4682_v47  ;;  %v2746_v17 = vld [vmem:[%s10146_s1 + $0x620] sm:$0xff]  ;;  %v4556_v47 = vpack.c.bf16 %v2621_v59, %v2619_v3  ;;  %v4558_v48 = vpack.c.bf16 %v2620_v12, %v2618_v18  ;;  %v2752_v18 = vld [vmem:[%s10146_s1 + $0x650] sm:$0xff] }
 0x230   : > { %1352 = vadd.xlane.f32.xlu1 %v7105_v52  ;;  %v1085_v7 = vpop.xlane.xlu1 %1084  ;;  %v1083_v22 = vpop.xlane.xlu0 %1082  ;;  %4555 = vmatpush1.bf16.msra.mxu1 %v4554_v49  ;;  %v10450_v2 = vld [vmem:[#allocation93_spill] sm:$0xff]  ;;  %v4686_v14 = vpack.c.bf16 %v2748_v27, %v2746_v17  ;;  %v2753_v49 = vld [vmem:[%s10146_s1 + $0x658] sm:$0xff] }
 0x231   : > { %1350 = vadd.xlane.f32.xlu0 %v7086_v4  ;;  %3481 = vmatmul.mubr.f32.gmra.mrb[32].mxu0 %v7237_v13  ;;  %v7269_v45 = vadd.f32 %v1085_v7, %v10448_v19  ;;  %v7272_v51 = vadd.f32 %v1083_v22, %v10450_v2  ;;  %v5091_v3 = vld [vmem:[%s5423_s7 + $0x420] sm:$0xff]  ;;  %v2623_v2 = vld [vmem:[%s10146_s1 + $0x248] sm:$0xff]  ;;  %v4688_v27 = vpack.c.bf16 %v2753_v49, %v2751_v56  ;;  %v10454_v19 = vld [vmem:[#allocation95_spill] sm:$0xff] }
 0x232   : > { %3486 = vmatprep.mubr.f32.mxu0 %v1575_v29  ;;  %2972 = vmatprep.mubr.f32.mxu1 %v5090_v10  ;;  %v2625_v10 = vld [vmem:[%s10146_s1 + $0x258] sm:$0xff]  ;;  %v2622_v29 = vld [vmem:[%s10146_s1 + $0x240] sm:$0xff]  ;;  %v10452_v7 = vld [vmem:[#allocation94_spill] sm:$0xff] }
 0x233   : > { %10449 = vst [vmem:[#allocation34_spill] sm:$0xff] %v7269_v45  ;;  %10451 = vst [vmem:[#allocation35_spill] sm:$0xff] %v7272_v51  ;;  %4685 = vmatprep.subr.bf16.mxu0 %v4684_v42  ;;  %2973 = vmatmul.mubr.f32.gmra.mrb[34].mxu1 %v5091_v3  ;;  %v2624_v42 = vld [vmem:[%s10146_s1 + $0x250] sm:$0xff]  ;;  %v2750_v59 = vld [vmem:[%s10146_s1 + $0x640] sm:$0xff]  ;;  %v4560_v51 = vpack.c.bf16 %v2625_v10, %v2623_v2 }
 0x234   : > { %1356 = vadd.xlane.f32.xlu1 %v7139_v35  ;;  %v1089_v12 = vpop.xlane.xlu1 %1088  ;;  %v1087_v17 = vpop.xlane.xlu0 %1086  ;;  %4557 = vmatprep.subr.bf16.mxu1 %v4556_v47  ;;  %v5092_v45 = vld [vmem:[%s5423_s7 + $0x4c0] sm:$0xff]  ;;  %v4562_v44 = vpack.c.bf16 %v2624_v42, %v2622_v29  ;;  %v4690_v23 = vpack.c.bf16 %v2752_v18, %v2750_v59  ;;  %v2755_v56 = vld [vmem:[%s10146_s1 + $0x668] sm:$0xff]  ;;  %v2757_v47 = vld [vmem:[%s10146_s1 + $0x678] sm:$0xff] }
 0x235   : > { %1354 = vadd.xlane.f32.xlu0 %v7124_v36  ;;  %3487 = vmatmul.mubr.f32.gmra.mrb[34].mxu0 %v7275_v39  ;;  %v7308_v22 = vadd.f32 %v1089_v12, %v10452_v7  ;;  %v7311_v3 = vadd.f32 %v1087_v17, %v10454_v19  ;;  %v1577_v2 = vld [vmem:[%s5423_s7 + $0x478] sm:$0xff]  ;;  %v2626_v10 = vld [vmem:[%s10146_s1 + $0x260] sm:$0xff]  ;;  %v4692_v17 = vpack.c.bf16 %v2757_v47, %v2755_v56  ;;  %v2756_v19 = vld [vmem:[%s10146_s1 + $0x670] sm:$0xff] }
 0x236   : > { %4559 = vmatpush1.bf16.msra.mxu1 %v4558_v48  ;;  %4687 = vmatpush1.bf16.msra.mxu0 %v4686_v14  ;;  %v7323_v14 = vld [vmem:[%s5423_s7 + $0x4d0] sm:$0xff]  ;;  %v2629_v48 = vld [vmem:[%s10146_s1 + $0x278] sm:$0xff]  ;;  %v10459_v59 = vld [vmem:[#allocation97_spill] sm:$0xff] }
 0x237   : > { %10453 = vst [vmem:[#allocation36_spill] sm:$0xff] %v7308_v22  ;;  %10455 = vst [vmem:[#allocation69_spill] sm:$0xff] %v7311_v3  ;;  %3492 = vmatprep.mubr.f32.mxu0 %v1576_v32  ;;  %2978 = vmatprep.mubr.f32.mxu1 %v5092_v45  ;;  %v2627_v32 = vld [vmem:[%s10146_s1 + $0x268] sm:$0xff]  ;;  %v10457_v29 = vld [vmem:[#allocation96_spill] sm:$0xff] }
 0x238   : > { %1360 = vadd.xlane.f32.xlu1 %v7173_v26  ;;  %10456 = vst [vmem:[#allocation37_spill] sm:$0xff] %v7323_v14  ;;  %v1093_v45 = vpop.xlane.xlu1 %1092  ;;  %v1091_v49 = vpop.xlane.xlu0 %1090  ;;  %4689 = vmatprep.subr.bf16.mxu0 %v4688_v27  ;;  %v5093_v12 = vld [vmem:[%s5423_s7 + $0x440] sm:$0xff]  ;;  %v2628_v27 = vld [vmem:[%s10146_s1 + $0x270] sm:$0xff]  ;;  %v2761_v56 = vld [vmem:[%s10146_s1 + $0x698] sm:$0xff] }
 0x239   : > { %1358 = vadd.xlane.f32.xlu0 %v7156_v6  ;;  %3493 = vmatmul.mubr.f32.gmra.mrb[36].mxu0 %v7323_v14  ;;  %v7337_v42 = vadd.f32 %v1093_v45, %v10457_v29  ;;  %v7340_v18 = vadd.f32 %v1091_v49, %v10459_v59  ;;  %v2754_v7 = vld [vmem:[%s10146_s1 + $0x660] sm:$0xff]  ;;  %v4564_v45 = vpack.c.bf16 %v2629_v48, %v2627_v32  ;;  %v7361_v29 = vld [vmem:[%s5423_s7 + $0x4f0] sm:$0xff]  ;;  %v2631_v48 = vld [vmem:[%s10146_s1 + $0x288] sm:$0xff] }
 0x23a   : > { %2979 = vmatmul.mubr.f32.gmra.mrb[36].mxu1 %v5093_v12  ;;  %4561 = vmatprep.subr.bf16.mxu1 %v4560_v51  ;;  %v2759_v51 = vld [vmem:[%s10146_s1 + $0x688] sm:$0xff]  ;;  %10461 = vst [vmem:[#allocation71_spill] sm:$0xff] %v7361_v29  ;;  %v4694_v32 = vpack.c.bf16 %v2756_v19, %v2754_v7  ;;  %v5095_v7 = vld [vmem:[%s5423_s7 + $0x460] sm:$0xff] }
 0x23b   : > { %10458 = vst [vmem:[#allocation70_spill] sm:$0xff] %v7337_v42  ;;  %10460 = vst [vmem:[#allocation38_spill] sm:$0xff] %v7340_v18  ;;  %4563 = vmatpush1.bf16.msra.mxu1 %v4562_v44  ;;  %4691 = vmatpush1.bf16.msra.mxu0 %v4690_v23  ;;  %v5094_v23 = vld [vmem:[%s5423_s7 + $0x4e0] sm:$0xff]  ;;  %v4566_v44 = vpack.c.bf16 %v2628_v27, %v2626_v10  ;;  %v10462_v59 = vld [vmem:[#allocation98_spill] sm:$0xff]  ;;  %v4696_v19 = vpack.c.bf16 %v2761_v56, %v2759_v51 }
 0x23c   : > { %1364 = vadd.xlane.f32.xlu1 %v7198_v30  ;;  %v1097_v47 = vpop.xlane.xlu1 %1096  ;;  %v1095_v49 = vpop.xlane.xlu0 %1094  ;;  %3498 = vmatprep.mubr.f32.mxu0 %v1577_v2  ;;  %v10464_v18 = vld [vmem:[#allocation99_spill] sm:$0xff]  ;;  %v2633_v2 = vld [vmem:[%s10146_s1 + $0x298] sm:$0xff]  ;;  %v2630_v10 = vld [vmem:[%s10146_s1 + $0x280] sm:$0xff] }
 0x23d   : > { %1362 = vadd.xlane.f32.xlu0 %v7190_v16  ;;  %2984 = vmatprep.mubr.f32.mxu1 %v5094_v23  ;;  %v7368_v12 = vadd.f32 %v1097_v47, %v10462_v59  ;;  %v7371_v42 = vadd.f32 %v1095_v49, %v10464_v18  ;;  %v2632_v27 = vld [vmem:[%s10146_s1 + $0x290] sm:$0xff]  ;;  %v1578_v18 = vld [vmem:[%s5423_s7 + $0x518] sm:$0xff]  ;;  %v5096_v3 = vld [vmem:[%s5423_s7 + $0x580] sm:$0xff] }
 0x23e   : > { %3499 = vmatmul.mubr.f32.gmra.mrb[38].mxu0 %v7361_v29  ;;  %4693 = vmatprep.subr.bf16.mxu0 %v4692_v17  ;;  %v2758_v17 = vld [vmem:[%s10146_s1 + $0x680] sm:$0xff]  ;;  %v2760_v47 = vld [vmem:[%s10146_s1 + $0x690] sm:$0xff]  ;;  %v4570_v51 = vpack.c.bf16 %v2632_v27, %v2630_v10  ;;  %v10467_v56 = vld [vmem:[#allocation100_spill] sm:$0xff] }
 0x23f   : > { %10463 = vst [vmem:[#allocation39_spill] sm:$0xff] %v7368_v12  ;;  %10465 = vst [vmem:[#allocation72_spill] sm:$0xff] %v7371_v42  ;;  %2985 = vmatmul.mubr.f32.gmra.mrb[38].mxu1 %v5095_v7  ;;  %4565 = vmatprep.subr.bf16.mxu1 %v4564_v45  ;;  %v7394_v59 = vld [vmem:[%s5423_s7 + $0x590] sm:$0xff]  ;;  %v4568_v45 = vpack.c.bf16 %v2633_v2, %v2631_v48  ;;  %v10469_v42 = vld [vmem:[#allocation101_spill] sm:$0xff]  ;;  %v4698_v22 = vpack.c.bf16 %v2760_v47, %v2758_v17 }
 0x240   : > { %1368 = vadd.xlane.f32.xlu1 %v7275_v39  ;;  %v1101_v49 = vpop.xlane.xlu1 %1100  ;;  %v1099_v23 = vpop.xlane.xlu0 %1098  ;;  %10466 = vst [vmem:[#allocation40_spill] sm:$0xff] %v7394_v59  ;;  %4567 = vmatpush1.bf16.msra.mxu1 %v4566_v44  ;;  %v2763_v44 = vld [vmem:[%s10146_s1 + $0x6a8] sm:$0xff]  ;;  %v2634_v48 = vld [vmem:[%s10146_s1 + $0x2a0] sm:$0xff]  ;;  %v2636_v2 = vld [vmem:[%s10146_s1 + $0x2b0] sm:$0xff] }
 0x241   : > { %1366 = vadd.xlane.f32.xlu0 %v7237_v13  ;;  %4695 = vmatpush1.bf16.msra.mxu0 %v4694_v32  ;;  %v7397_v7 = vadd.f32 %v1101_v49, %v10467_v56  ;;  %v7400_v12 = vadd.f32 %v1099_v23, %v10469_v42  ;;  %v2765_v32 = vld [vmem:[%s10146_s1 + $0x6b8] sm:$0xff]  ;;  %v2635_v42 = vld [vmem:[%s10146_s1 + $0x2a8] sm:$0xff]  ;;  %v2762_v10 = vld [vmem:[%s10146_s1 + $0x6a0] sm:$0xff]  ;;  %v4574_v25 = vpack.c.bf16 %v2636_v2, %v2634_v48 }
 0x242   : > { %3504 = vmatprep.mubr.f32.mxu0 %v1578_v18  ;;  %2990 = vmatprep.mubr.f32.mxu1 %v5096_v3  ;;  %v2637_v3 = vld [vmem:[%s10146_s1 + $0x2b8] sm:$0xff]  ;;  %v2764_v27 = vld [vmem:[%s10146_s1 + $0x6b0] sm:$0xff]  ;;  %v5097_v47 = vld [vmem:[%s5423_s7 + $0x500] sm:$0xff]  ;;  %v4700_v49 = vpack.c.bf16 %v2765_v32, %v2763_v44 }
 0x243   : > { %10468 = vst [vmem:[#allocation73_spill] sm:$0xff] %v7397_v7  ;;  %10470 = vst [vmem:[#allocation41_spill] sm:$0xff] %v7400_v12  ;;  %3505 = vmatmul.mubr.f32.gmra.mrb[40].mxu0 %v7394_v59  ;;  %4697 = vmatprep.subr.bf16.mxu0 %v4696_v19  ;;  %v7432_v17 = vld [vmem:[%s5423_s7 + $0x5b0] sm:$0xff]  ;;  %v10472_v23 = vld [vmem:[#allocation5_spill] sm:$0xff]  ;;  %v4572_v9 = vpack.c.bf16 %v2637_v3, %v2635_v42 }
 0x244   : > { %1372 = vadd.xlane.f32.xlu1 %v7361_v29  ;;  %v1105_v18 = vpop.xlane.xlu1 %1104  ;;  %v1103_v19 = vpop.xlane.xlu0 %1102  ;;  %10471 = vst [vmem:[#allocation74_spill] sm:$0xff] %v7432_v17  ;;  %2991 = vmatmul.mubr.f32.gmra.mrb[40].mxu1 %v5097_v47  ;;  %v10474_v12 = vld [vmem:[#allocation57_spill] sm:$0xff]  ;;  %v7460_v32 = vld [vmem:[%s5423_s7 + $0x5d0] sm:$0xff]  ;;  %v1580_v42 = vld [vmem:[%s5423_s7 + $0x558] sm:$0xff] }
 0x245   : > { %1370 = vadd.xlane.f32.xlu0 %v7323_v14  ;;  %4569 = vmatprep.subr.bf16.mxu1 %v4568_v45  ;;  %v7436_v56 = vadd.f32 %v1105_v18, %v10472_v23  ;;  %v7439_v7 = vadd.f32 %v1103_v19, %v10474_v12  ;;  %v4702_v14 = vpack.c.bf16 %v2764_v27, %v2762_v10  ;;  %v2767_v45 = vld [vmem:[%s10146_s1 + $0x6c8] sm:$0xff]  ;;  %v2769_v12 = vld [vmem:[%s10146_s1 + $0x6d8] sm:$0xff]  ;;  %v2638_v3 = vld [vmem:[%s10146_s1 + $0x2c0] sm:$0xff] }
 0x246   : > { %4571 = vmatpush1.bf16.msra.mxu1 %v4570_v51  ;;  %4699 = vmatpush1.bf16.msra.mxu0 %v4698_v22  ;;  %v7451_v22 = vld [vmem:[%s5423_s7 + $0x5f0] sm:$0xff]  ;;  %10477 = vst [vmem:[#allocation76_spill] sm:$0xff] %v7460_v32  ;;  %v10478_v48 = vld [vmem:[#allocation6_spill] sm:$0xff]  ;;  %v5099_v18 = vld [vmem:[%s5423_s7 + $0x520] sm:$0xff]  ;;  %v4704_v19 = vpack.c.bf16 %v2769_v12, %v2767_v45 }
 0x247   : > { %10473 = vst [vmem:[#allocation42_spill] sm:$0xff] %v7436_v56  ;;  %10475 = vst [vmem:[#allocation75_spill] sm:$0xff] %v7439_v7  ;;  %3510 = vmatprep.mubr.f32.mxu0 %v1579_v31  ;;  %2996 = vmatprep.mubr.f32.mxu1 %v5098_v62  ;;  %v2639_v62 = vld [vmem:[%s10146_s1 + $0x2c8] sm:$0xff]  ;;  %v2641_v31 = vld [vmem:[%s10146_s1 + $0x2d8] sm:$0xff] }
 0x248   : > { %1376 = vadd.xlane.f32.xlu1 %v7432_v17  ;;  %10476 = vst [vmem:[#allocation43_spill] sm:$0xff] %v7451_v22  ;;  %v1109_v51 = vpop.xlane.xlu1 %1108  ;;  %v1107_v44 = vpop.xlane.xlu0 %1106  ;;  %3511 = vmatmul.mubr.f32.gmra.mrb[42].mxu0 %v7432_v17  ;;  %v10480_v10 = vld [vmem:[#allocation58_spill] sm:$0xff]  ;;  %v2640_v47 = vld [vmem:[%s10146_s1 + $0x2d0] sm:$0xff]  ;;  %v2773_v45 = vld [vmem:[%s10146_s1 + $0x6f8] sm:$0xff] }
 0x249   : > { %1374 = vadd.xlane.f32.xlu0 %v7394_v59  ;;  %4701 = vmatprep.subr.bf16.mxu0 %v4700_v49  ;;  %v7468_v2 = vadd.f32 %v1109_v51, %v10478_v48  ;;  %v7471_v27 = vadd.f32 %v1107_v44, %v10480_v10  ;;  %v2766_v49 = vld [vmem:[%s10146_s1 + $0x6c0] sm:$0xff]  ;;  %v2768_v23 = vld [vmem:[%s10146_s1 + $0x6d0] sm:$0xff]  ;;  %v4576_v51 = vpack.c.bf16 %v2641_v31, %v2639_v62  ;;  %v2643_v10 = vld [vmem:[%s10146_s1 + $0x2e8] sm:$0xff] }
 0x24a   : > { %2997 = vmatmul.mubr.f32.gmra.mrb[42].mxu1 %v5099_v18  ;;  %4573 = vmatprep.subr.bf16.mxu1 %v4572_v9  ;;  %v2771_v9 = vld [vmem:[%s10146_s1 + $0x6e8] sm:$0xff]  ;;  %v7492_v48 = vld [vmem:[%s5423_s7 + $0x6b0] sm:$0xff]  ;;  %v4578_v62 = vpack.c.bf16 %v2640_v47, %v2638_v3  ;;  %v4706_v31 = vpack.c.bf16 %v2768_v23, %v2766_v49  ;;  %v2642_v3 = vld [vmem:[%s10146_s1 + $0x2e0] sm:$0xff] }
 0x24b   : > { %10479 = vst [vmem:[#allocation44_spill] sm:$0xff] %v7468_v2  ;;  %10481 = vst [vmem:[#allocation77_spill] sm:$0xff] %v7471_v27  ;;  %4575 = vmatpush1.bf16.msra.mxu1 %v4574_v25  ;;  %4703 = vmatpush1.bf16.msra.mxu0 %v4702_v14  ;;  %v7495_v25 = vld [vmem:[%s5423_s7 + $0x690] sm:$0xff]  ;;  %v5100_v14 = vld [vmem:[%s5423_s7 + $0x5c0] sm:$0xff]  ;;  %v4708_v23 = vpack.c.bf16 %v2773_v45, %v2771_v9 }
 0x24c   : > { %1380 = vadd.xlane.f32.xlu1 %v7451_v22  ;;  %v1113_v12 = vpop.xlane.xlu1 %1112  ;;  %v1111_v44 = vpop.xlane.xlu0 %1110  ;;  %3516 = vmatprep.mubr.f32.mxu0 %v1580_v42  ;;  %v10482_v18 = vld [vmem:[#allocation7_spill] sm:$0xff]  ;;  %v2645_v42 = vld [vmem:[%s10146_s1 + $0x2f8] sm:$0xff]  ;;  %v5101_v49 = vld [vmem:[%s5423_s7 + $0x540] sm:$0xff] }
 0x24d   : > { %1378 = vadd.xlane.f32.xlu0 %v7460_v32  ;;  %3002 = vmatprep.mubr.f32.mxu1 %v5100_v14  ;;  %v7502_v27 = vadd.f32 %v1113_v12, %v10482_v18  ;;  %v10484_v2 = vld [vmem:[#allocation59_spill] sm:$0xff]  ;;  %v4580_v9 = vpack.c.bf16 %v2645_v42, %v2643_v10  ;;  %v1582_v17 = vld [vmem:[%s5423_s7 + $0x618] sm:$0xff]  ;;  %v2646_v10 = vld [vmem:[%s10146_s1 + $0x300] sm:$0xff] }
 0x24e   : > { %v7505_v7 = vadd.f32 %v1111_v44, %v10484_v2  ;;  %3517 = vmatmul.mubr.f32.gmra.mrb[44].mxu0 %v7460_v32  ;;  %4705 = vmatprep.subr.bf16.mxu0 %v4704_v19  ;;  %v2644_v47 = vld [vmem:[%s10146_s1 + $0x2f0] sm:$0xff]  ;;  %v1581_v2 = vld [vmem:[%s5423_s7 + $0x578] sm:$0xff]  ;;  %v2770_v19 = vld [vmem:[%s10146_s1 + $0x6e0] sm:$0xff] }
 0x24f   : > { %10483 = vst [vmem:[#allocation8_spill] sm:$0xff] %v7502_v27  ;;  %3003 = vmatmul.mubr.f32.gmra.mrb[44].mxu1 %v5101_v49  ;;  %4577 = vmatprep.subr.bf16.mxu1 %v4576_v51  ;;  %v2772_v12 = vld [vmem:[%s10146_s1 + $0x6f0] sm:$0xff]  ;;  %v4582_v45 = vpack.c.bf16 %v2644_v47, %v2642_v3  ;;  %v10486_v49 = vld [vmem:[#allocation9_spill] sm:$0xff] }
 0x250   : > { %10485 = vst [vmem:[#allocation60_spill] sm:$0xff] %v7505_v7  ;;  %1384 = vadd.xlane.f32.xlu1 %v7492_v48  ;;  %v1117_v44 = vpop.xlane.xlu1 %1116  ;;  %v1115_v14 = vpop.xlane.xlu0 %1114  ;;  %v7528_v18 = vld [vmem:[%s5423_s7 + $0x6f0] sm:$0xff]  ;;  %4579 = vmatpush1.bf16.msra.mxu1 %v4578_v62  ;;  %v10488_v27 = vld [vmem:[#allocation61_spill] sm:$0xff]  ;;  %v4710_v59 = vpack.c.bf16 %v2772_v12, %v2770_v19  ;;  %v2775_v62 = vld [vmem:[%s10146_s1 + $0x708] sm:$0xff] }
 0x251   : > { %1382 = vadd.xlane.f32.xlu0 %v7495_v25  ;;  %v7531_v51 = vld [vmem:[%s5423_s7 + $0x6d0] sm:$0xff]  ;;  %4707 = vmatpush1.bf16.msra.mxu0 %v4706_v31  ;;  %v7534_v7 = vadd.f32 %v1117_v44, %v10486_v49  ;;  %v7537_v56 = vadd.f32 %v1115_v14, %v10488_v27  ;;  %v5102_v32 = vld [vmem:[%s5423_s7 + $0x5e0] sm:$0xff]  ;;  %v2777_v31 = vld [vmem:[%s10146_s1 + $0x718] sm:$0xff] }
 0x252   : > { %3522 = vmatprep.mubr.f32.mxu0 %v1581_v2  ;;  %3008 = vmatprep.mubr.f32.mxu1 %v5102_v32  ;;  %v2647_v32 = vld [vmem:[%s10146_s1 + $0x308] sm:$0xff]  ;;  %v2649_v27 = vld [vmem:[%s10146_s1 + $0x318] sm:$0xff]  ;;  %v2648_v42 = vld [vmem:[%s10146_s1 + $0x310] sm:$0xff]  ;;  %v4712_v14 = vpack.c.bf16 %v2777_v31, %v2775_v62 }
 0x253   : > { %10487 = vst [vmem:[#allocation45_spill] sm:$0xff] %v7534_v7  ;;  %10489 = vst [vmem:[#allocation78_spill] sm:$0xff] %v7537_v56  ;;  %3523 = vmatmul.mubr.f32.gmra.mrb[46].mxu0 %v7451_v22  ;;  %4709 = vmatprep.subr.bf16.mxu0 %v4708_v23  ;;  %v2774_v3 = vld [vmem:[%s10146_s1 + $0x700] sm:$0xff]  ;;  %v2776_v47 = vld [vmem:[%s10146_s1 + $0x710] sm:$0xff]  ;;  %v4584_v29 = vpack.c.bf16 %v2649_v27, %v2647_v32  ;;  %v4586_v0 = vpack.c.bf16 %v2648_v42, %v2646_v10 }
 0x254   : > { %1388 = vadd.xlane.f32.xlu1 %v7528_v18  ;;  %v1121_v2 = vpop.xlane.xlu1 %1120  ;;  %v1119_v23 = vpop.xlane.xlu0 %1118  ;;  %v7569_v19 = vld [vmem:[%s5423_s7 + $0x7b0] sm:$0xff]  ;;  %v5103_v44 = vld [vmem:[%s5423_s7 + $0x560] sm:$0xff]  ;;  %4581 = vmatprep.subr.bf16.mxu1 %v4580_v9  ;;  %v4714_v13 = vpack.c.bf16 %v2776_v47, %v2774_v3  ;;  %v2779_v9 = vld [vmem:[%s10146_s1 + $0x728] sm:$0xff] }
 0x255   : > { %1386 = vadd.xlane.f32.xlu0 %v7531_v51  ;;  %v7572_v12 = vld [vmem:[%s5423_s7 + $0x790] sm:$0xff]  ;;  %3009 = vmatmul.mubr.f32.gmra.mrb[46].mxu1 %v5103_v44  ;;  %v7604_v32 = vld [vmem:[%s5423_s7 + $0x638] sm:$0xff]  ;;  %v2650_v27 = vld [vmem:[%s10146_s1 + $0x320] sm:$0xff] }
 0x256   : > { %v10490_v49 = vld [vmem:[#allocation11_spill] sm:$0xff]  ;;  %4583 = vmatpush1.bf16.msra.mxu1 %v4582_v45  ;;  %4711 = vmatpush1.bf16.msra.mxu0 %v4710_v59  ;;  %v5105_v3 = vld [vmem:[%s5423_s7 + $0x600] sm:$0xff] }
 0x257   : > { %v7576_v56 = vadd.f32 %v1121_v2, %v10490_v49  ;;  %v10491_v7 = vld [vmem:[#allocation63_spill] sm:$0xff]  ;;  %3528 = vmatprep.mubr.f32.mxu0 %v1582_v17  ;;  %3014 = vmatprep.mubr.f32.mxu1 %v5104_v57  ;;  %v2651_v57 = vld [vmem:[%s10146_s1 + $0x328] sm:$0xff]  ;;  %v2653_v17 = vld [vmem:[%s10146_s1 + $0x338] sm:$0xff] }
 0x258   : > { %v7579_v22 = vadd.f32 %v1119_v23, %v10491_v7  ;;  %v2781_v7 = vld [vmem:[%s10146_s1 + $0x738] sm:$0xff]  ;;  %1392 = vadd.xlane.f32.xlu1 %v7569_v19  ;;  %v7591_v59 = vld [vmem:[%s5423_s7 + $0x7f0] sm:$0xff]  ;;  %v1125_v45 = vpop.xlane.xlu1 %1124  ;;  %v1123_v62 = vpop.xlane.xlu0 %1122  ;;  %3529 = vmatmul.mubr.f32.gmra.mrb[48].mxu0 %v7495_v25  ;;  %v2778_v23 = vld [vmem:[%s10146_s1 + $0x720] sm:$0xff] }
 0x259   : > { %1390 = vadd.xlane.f32.xlu0 %v7572_v12  ;;  %v7600_v31 = vld [vmem:[%s5423_s7 + $0x7d0] sm:$0xff]  ;;  %4713 = vmatprep.subr.bf16.mxu0 %v4712_v14  ;;  %v7610_v10 = vadd.f32 %v1125_v45, %v6759_v20  ;;  %v7613_v42 = vadd.f32 %v1123_v62, %v6761_v60  ;;  %v4716_v47 = vpack.c.bf16 %v2781_v7, %v2779_v9  ;;  %v2783_v49 = vld [vmem:[%s10146_s1 + $0x748] sm:$0xff]  ;;  %v2785_v9 = vld [vmem:[%s10146_s1 + $0x758] sm:$0xff] }
 0x25a   : > { %3015 = vmatmul.mubr.f32.gmra.mrb[48].mxu1 %v5105_v3  ;;  %4585 = vmatprep.subr.bf16.mxu1 %v4584_v29  ;;  %v2652_v2 = vld [vmem:[%s10146_s1 + $0x330] sm:$0xff]  ;;  %v4588_v60 = vpack.c.bf16 %v2653_v17, %v2651_v57  ;;  %v1431_v29 = vmul.f32 %v6953_v37, %v6953_v37  ;;  %v5107_v7 = vld [vmem:[%s5423_s7 + $0x6a0] sm:$0xff]  ;;  %v2655_v17 = vld [vmem:[%s10146_s1 + $0x348] sm:$0xff] }
 0x25b   : > { %v2780_v20 = vld [vmem:[%s10146_s1 + $0x730] sm:$0xff]  ;;  %4587 = vmatpush1.bf16.msra.mxu1 %v4586_v0  ;;  %4715 = vmatpush1.bf16.msra.mxu0 %v4714_v13  ;;  %v4590_v57 = vpack.c.bf16 %v2652_v2, %v2650_v27  ;;  %v2657_v3 = vld [vmem:[%s10146_s1 + $0x358] sm:$0xff]  ;;  %v2654_v27 = vld [vmem:[%s10146_s1 + $0x340] sm:$0xff] }
 0x25c   : > { %1396 = vadd.xlane.f32.xlu1 %v7591_v59  ;;  %v5106_v44 = vld [vmem:[%s5423_s7 + $0x90] sm:$0xff]  ;;  %v1129_v0 = vpop.xlane.xlu1 %1128  ;;  %v1127_v13 = vpop.xlane.xlu0 %1126  ;;  %3534 = vmatprep.mubr.f32.mxu0 %v7604_v32  ;;  %v4718_v37 = vpack.c.bf16 %v2780_v20, %v2778_v23  ;;  %v4720_v23 = vpack.c.bf16 %v2785_v9, %v2783_v49  ;;  %v4592_v49 = vpack.c.bf16 %v2657_v3, %v2655_v17 }
 0x25d   : > { %1394 = vadd.xlane.f32.xlu0 %v7600_v31  ;;  %v1430_v14 = vmul.f32 %v5106_v44, %v5106_v44  ;;  %3020 = vmatprep.mubr.f32.mxu1 %v5107_v7  ;;  %v7642_v45 = vadd.f32 %v1129_v0, %v6797_v11  ;;  %v7645_v62 = vadd.f32 %v1127_v13, %v6799_v38  ;;  %v2656_v2 = vld [vmem:[%s10146_s1 + $0x350] sm:$0xff]  ;;  %v5108_v11 = vld [vmem:[%s5423_s7 + $0x620] sm:$0xff]  ;;  %v7659_v38 = vld [vmem:[%s5423_s7 + $0x658] sm:$0xff] }
 0x25e   : > { %3535 = vmatmul.mubr.f32.gmra.mrb[50].mxu0 %v7492_v48  ;;  %4717 = vmatprep.subr.bf16.mxu0 %v4716_v47  ;;  %v2782_v47 = vld [vmem:[%s10146_s1 + $0x740] sm:$0xff]  ;;  %v2784_v20 = vld [vmem:[%s10146_s1 + $0x750] sm:$0xff]  ;;  %v1433_v44 = vmul.f32 %v6991_v50, %v6991_v50  ;;  %v4594_v9 = vpack.c.bf16 %v2656_v2, %v2654_v27  ;;  %v1434_v17 = vmul.f32 %v7010_v21, %v7010_v21 }
 0x25f   : > { %3021 = vmatmul.mubr.f32.gmra.mrb[50].mxu1 %v5108_v11  ;;  %4589 = vmatprep.subr.bf16.mxu1 %v4588_v60  ;;  %v1432_v60 = vmul.f32 %v6972_v41, %v6972_v41  ;;  %v4722_v50 = vpack.c.bf16 %v2784_v20, %v2782_v47  ;;  %v2787_v41 = vld [vmem:[%s10146_s1 + $0x768] sm:$0xff]  ;;  %v2660_v3 = vld [vmem:[%s10146_s1 + $0x370] sm:$0xff]  ;;  %v2786_v27 = vld [vmem:[%s10146_s1 + $0x760] sm:$0xff] }
 0x260   : > { %1464 = vadd.xlane.f32.xlu1 %v1431_v29  ;;  %v1133_v0 = vpop.xlane.xlu1 %1132  ;;  %v1131_v13 = vpop.xlane.xlu0 %1130  ;;  %4591 = vmatpush1.bf16.msra.mxu1 %v4590_v57  ;;  %v5109_v29 = vld [vmem:[%s5423_s7 + $0x6c0] sm:$0xff]  ;;  %v2788_v2 = vld [vmem:[%s10146_s1 + $0x770] sm:$0xff] }
 0x261   : > { %1462 = vadd.xlane.f32.xlu0 %v1430_v14  ;;  %4719 = vmatpush1.bf16.msra.mxu0 %v4718_v37  ;;  %v7672_v7 = vadd.f32 %v1133_v0, %v6833_v61  ;;  %v7675_v11 = vadd.f32 %v1131_v13, %v6835_v34  ;;  %v2789_v14 = vld [vmem:[%s10146_s1 + $0x778] sm:$0xff]  ;;  %v2659_v61 = vld [vmem:[%s10146_s1 + $0x368] sm:$0xff]  ;;  %v2658_v57 = vld [vmem:[%s10146_s1 + $0x360] sm:$0xff]  ;;  %v1435_v37 = vmul.f32 %v7029_v54, %v7029_v54 }
 0x262   : > { %3540 = vmatprep.mubr.f32.mxu0 %v7659_v38  ;;  %3026 = vmatprep.mubr.f32.mxu1 %v5109_v29  ;;  %v2661_v34 = vld [vmem:[%s10146_s1 + $0x378] sm:$0xff]  ;;  %v5110_v20 = vld [vmem:[%s5423_s7 + $0x640] sm:$0xff]  ;;  %v4724_v54 = vpack.c.bf16 %v2789_v14, %v2787_v41  ;;  %v4598_v29 = vpack.c.bf16 %v2660_v3, %v2658_v57 }
 0x263   : > { %10492 = vst [vmem:[#allocation46_spill] sm:$0xff] %v7675_v11  ;;  %3541 = vmatmul.mubr.f32.gmra.mrb[52].mxu0 %v7531_v51  ;;  %4721 = vmatprep.subr.bf16.mxu0 %v4720_v23  ;;  %v4596_v0 = vpack.c.bf16 %v2661_v34, %v2659_v61  ;;  %v5111_v13 = vld [vmem:[%s5423_s7 + $0x6e0] sm:$0xff]  ;;  %v4726_v11 = vpack.c.bf16 %v2788_v2, %v2786_v27  ;;  %v2665_v41 = vld [vmem:[%s10146_s1 + $0x398] sm:$0xff] }
 0x264   : > { %1468 = vadd.xlane.f32.xlu1 %v1433_v44  ;;  %v1137_v23 = vpop.xlane.xlu1 %1136  ;;  %3027 = vmatmul.mubr.f32.gmra.mrb[52].mxu1 %v5110_v20  ;;  %v5112_v57 = vld [vmem:[%s5423_s7 + $0x660] sm:$0xff]  ;;  %v1439_v27 = vmul.f32 %v7105_v52, %v7105_v52  ;;  %v1438_v2 = vmul.f32 %v7086_v4, %v7086_v4  ;;  %v2797_v20 = vld [vmem:[%s10146_s1 + $0x7b8] sm:$0xff]  ;;  %v2667_v4 = vld [vmem:[%s10146_s1 + $0x3a8] sm:$0xff] }
 0x265   : > { %1466 = vadd.xlane.f32.xlu0 %v1432_v60  ;;  %v1135_v47 = vpop.xlane.xlu0 %1134  ;;  %4593 = vmatprep.subr.bf16.mxu1 %v4592_v49  ;;  %v7710_v21 = vadd.f32 %v1137_v23, %v6869_v8  ;;  %v7716_v60 = vld [vmem:[%s5423_s7 + $0x678] sm:$0xff]  ;;  %v2791_v8 = vld [vmem:[%s10146_s1 + $0x788] sm:$0xff]  ;;  %v1437_v49 = vmul.f32 %v7067_v15, %v7067_v15  ;;  %v2662_v15 = vld [vmem:[%s10146_s1 + $0x380] sm:$0xff] }
 0x266   : > { %v7713_v44 = vadd.f32 %v1135_v47, %v6871_v33  ;;  %4595 = vmatpush1.bf16.msra.mxu1 %v4594_v9  ;;  %4723 = vmatpush1.bf16.msra.mxu0 %v4722_v50  ;;  %v2793_v33 = vld [vmem:[%s10146_s1 + $0x798] sm:$0xff]  ;;  %v1436_v9 = vmul.f32 %v7048_v28, %v7048_v28  ;;  %v2663_v50 = vld [vmem:[%s10146_s1 + $0x388] sm:$0xff]  ;;  %v2790_v3 = vld [vmem:[%s10146_s1 + $0x780] sm:$0xff] }
 0x267   : > { %3546 = vmatprep.mubr.f32.mxu0 %v7716_v60  ;;  %3032 = vmatprep.mubr.f32.mxu1 %v5111_v13  ;;  %v7761_v23 = vld [vmem:[%s5423_s7 + $0x718] sm:$0xff]  ;;  %v2795_v47 = vld [vmem:[%s10146_s1 + $0x7a8] sm:$0xff] }
 0x268   : > { %1472 = vadd.xlane.f32.xlu1 %v1435_v37  ;;  %v1141_v14 = vpop.xlane.xlu1 %1140  ;;  %3547 = vmatmul.mubr.f32.gmra.mrb[54].mxu0 %v7528_v18  ;;  %v4728_v37 = vpack.c.bf16 %v2793_v33, %v2791_v8  ;;  %v2669_v33 = vld [vmem:[%s10146_s1 + $0x3b8] sm:$0xff] }
 0x269   : > { %1470 = vadd.xlane.f32.xlu0 %v1434_v17  ;;  %4725 = vmatprep.subr.bf16.mxu0 %v4724_v54  ;;  %v7741_v34 = vadd.f32 %v1141_v14, %v6905_v1  ;;  %v2664_v17 = vld [vmem:[%s10146_s1 + $0x390] sm:$0xff]  ;;  %v1441_v14 = vmul.f32 %v7139_v35, %v7139_v35  ;;  %v5115_v35 = vld [vmem:[%s5423_s7 + $0x7a0] sm:$0xff] }
 0x26a   : > { %v1139_v61 = vpop.xlane.xlu0 %1138  ;;  %3033 = vmatmul.mubr.f32.gmra.mrb[54].mxu1 %v5112_v57  ;;  %4597 = vmatprep.subr.bf16.mxu1 %v4596_v0  ;;  %v2792_v1 = vld [vmem:[%s10146_s1 + $0x790] sm:$0xff]  ;;  %v5113_v0 = vld [vmem:[%s5423_s7 + $0x780] sm:$0xff]  ;;  %v4602_v52 = vpack.c.bf16 %v2664_v17, %v2662_v15  ;;  %v4604_v17 = vpack.c.bf16 %v2669_v33, %v2667_v4 }
 0x26b   : > { %v7744_v28 = vadd.f32 %v1139_v61, %v6907_v53  ;;  %4599 = vmatpush1.bf16.msra.mxu1 %v4598_v29  ;;  %4727 = vmatpush1.bf16.msra.mxu0 %v4726_v11  ;;  %v4600_v53 = vpack.c.bf16 %v2665_v41, %v2663_v50  ;;  %v4730_v13 = vpack.c.bf16 %v2792_v1, %v2790_v3  ;;  %v2794_v50 = vld [vmem:[%s10146_s1 + $0x7a0] sm:$0xff]  ;;  %v2796_v41 = vld [vmem:[%s10146_s1 + $0x7b0] sm:$0xff] }
 0x26c   : > { %1476 = vadd.xlane.f32.xlu1 %v1437_v49  ;;  %v1209_v11 = vpop.xlane.xlu1 %1208  ;;  %3552 = vmatprep.mubr.f32.mxu0 %v7761_v23  ;;  %v2666_v49 = vld [vmem:[%s10146_s1 + $0x3a0] sm:$0xff]  ;;  %v1440_v61 = vmul.f32 %v7124_v36, %v7124_v36  ;;  %v2799_v36 = vld [vmem:[%s10146_s1 + $0x7c8] sm:$0xff] }
 0x26d   : > { %1474 = vadd.xlane.f32.xlu0 %v1436_v9  ;;  %3038 = vmatprep.mubr.f32.mxu1 %v5113_v0  ;;  %v7775_v29 = vadd.f32 %v1209_v11, %v6918_v43  ;;  %v2668_v43 = vld [vmem:[%s10146_s1 + $0x3b0] sm:$0xff]  ;;  %v5114_v9 = vld [vmem:[%s5423_s7 + $0x700] sm:$0xff]  ;;  %v1442_v11 = vmul.f32 %v7156_v6, %v7156_v6 }
 0x26e   : > { %v1207_v54 = vpop.xlane.xlu0 %1206  ;;  %3553 = vmatmul.mubr.f32.gmra.mrb[56].mxu0 %v7572_v12  ;;  %4729 = vmatprep.subr.bf16.mxu0 %v4728_v37  ;;  %v7802_v37 = vld [vmem:[%s5423_s7 + $0x738] sm:$0xff]  ;;  %v4606_v3 = vpack.c.bf16 %v2668_v43, %v2666_v49  ;;  %v2798_v0 = vld [vmem:[%s10146_s1 + $0x7c0] sm:$0xff] }
 0x26f   : > { %v7778_v8 = vadd.f32 %v1207_v54, %v6920_v24  ;;  %3039 = vmatmul.mubr.f32.gmra.mrb[56].mxu1 %v5114_v9  ;;  %4601 = vmatprep.subr.bf16.mxu1 %v4600_v53  ;;  %v4732_v24 = vpack.c.bf16 %v2797_v20, %v2795_v47  ;;  %v2670_v47 = vld [vmem:[%s10146_s1 + $0x3c0] sm:$0xff]  ;;  %v1443_v20 = vmul.f32 %v7173_v26, %v7173_v26  ;;  %v2672_v54 = vld [vmem:[%s10146_s1 + $0x3d0] sm:$0xff]  ;;  %v7849_v43 = vld [vmem:[%s5423_s7 + $0x758] sm:$0xff] }
 0x270   : > { %1480 = vadd.xlane.f32.xlu1 %v1439_v27  ;;  %4603 = vmatpush1.bf16.msra.mxu1 %v4602_v52  ;;  %v4734_v27 = vpack.c.bf16 %v2796_v41, %v2794_v50  ;;  %v2800_v52 = vld [vmem:[%s10146_s1 + $0x7d0] sm:$0xff]  ;;  %v5116_v33 = vld [vmem:[%s5423_s7 + $0x720] sm:$0xff]  ;;  %v4610_v50 = vpack.c.bf16 %v2672_v54, %v2670_v47 }
 0x271   : > { %1478 = vadd.xlane.f32.xlu0 %v1438_v2  ;;  %v1213_v15 = vpop.xlane.xlu1 %1212  ;;  %4731 = vmatpush1.bf16.msra.mxu0 %v4730_v13  ;;  %v2801_v2 = vld [vmem:[%s10146_s1 + $0x7d8] sm:$0xff]  ;;  %v4738_v41 = vpack.c.bf16 %v2800_v52, %v2798_v0  ;;  %v10493_v47 = vld [vmem:[#allocation33_spill] sm:$0xff] }
 0x272   : > { %v1211_v57 = vpop.xlane.xlu0 %1210  ;;  %v7805_v1 = vadd.f32 %v1213_v15, %v6937_v63  ;;  %3558 = vmatprep.mubr.f32.mxu0 %v7802_v37  ;;  %3044 = vmatprep.mubr.f32.mxu1 %v5115_v35  ;;  %v2671_v63 = vld [vmem:[%s10146_s1 + $0x3c8] sm:$0xff]  ;;  %v4736_v26 = vpack.c.bf16 %v2801_v2, %v2799_v36  ;;  %v2676_v2 = vld [vmem:[%s10146_s1 + $0x3f0] sm:$0xff]  ;;  %v5119_v52 = vld [vmem:[%s5423_s7 + $0x7e0] sm:$0xff] }
 0x273   : > { %v7808_v53 = vadd.f32 %v1211_v57, %v6939_v5  ;;  %3559 = vmatmul.mubr.f32.gmra.mrb[58].mxu0 %v7569_v19  ;;  %4733 = vmatprep.subr.bf16.mxu0 %v4732_v24  ;;  %v2673_v5 = vld [vmem:[%s10146_s1 + $0x3d8] sm:$0xff]  ;;  %v5117_v24 = vld [vmem:[%s5423_s7 + $0x7c0] sm:$0xff]  ;;  %v2675_v15 = vld [vmem:[%s10146_s1 + $0x3e8] sm:$0xff] }
 0x274   : > { %1484 = vadd.xlane.f32.xlu1 %v1441_v14  ;;  %3045 = vmatmul.mubr.f32.gmra.mrb[58].mxu1 %v5116_v33  ;;  %v4608_v9 = vpack.c.bf16 %v2673_v5, %v2671_v63  ;;  %v1445_v14 = vmul.f32 %v7198_v30, %v7198_v30  ;;  %v2677_v57 = vld [vmem:[%s10146_s1 + $0x3f8] sm:$0xff]  ;;  %v2674_v30 = vld [vmem:[%s10146_s1 + $0x3e0] sm:$0xff]  ;;  %v1447_v5 = vmul.f32 %v7275_v39, %v7275_v39 }
 0x275   : > { %1482 = vadd.xlane.f32.xlu0 %v1440_v61  ;;  %v1217_v13 = vpop.xlane.xlu1 %1216  ;;  %4605 = vmatprep.subr.bf16.mxu1 %v4604_v17  ;;  %v1444_v61 = vmul.f32 %v7190_v16, %v7190_v16  ;;  %v2802_v63 = vld [vmem:[%s10146_s1 + $0x7e0] sm:$0xff]  ;;  %v10494_v33 = vld [vmem:[#allocation12_spill] sm:$0xff] }
 0x276   : > { %v1215_v4 = vpop.xlane.xlu0 %1214  ;;  %v7843_v6 = vadd.f32 %v1217_v13, %v6956_v58  ;;  %4607 = vmatpush1.bf16.msra.mxu1 %v4606_v3  ;;  %4735 = vmatpush1.bf16.msra.mxu0 %v4734_v27  ;;  %v2803_v58 = vld [vmem:[%s10146_s1 + $0x7e8] sm:$0xff]  ;;  %v5118_v27 = vld [vmem:[%s5423_s7 + $0x740] sm:$0xff]  ;;  %v4614_v13 = vpack.c.bf16 %v2676_v2, %v2674_v30  ;;  %v4448_v2 = vld [vmem:[%s5423_s7 + $0xb8] sm:$0xff] }
 0x277   : > { %v7846_v49 = vadd.f32 %v1215_v4, %v6958_v55  ;;  %3564 = vmatprep.mubr.f32.mxu0 %v7849_v43  ;;  %3050 = vmatprep.mubr.f32.mxu1 %v5117_v24  ;;  %v2805_v55 = vld [vmem:[%s10146_s1 + $0x7f8] sm:$0xff]  ;;  %v5120_v39 = vld [vmem:[%s5423_s7 + $0x760] sm:$0xff] }
 0x278   : > { %1488 = vadd.xlane.f32.xlu1 %v1443_v20  ;;  %3565 = vmatmul.mubr.f32.gmra.mrb[60].mxu0 %v7600_v31  ;;  %v4740_v36 = vpack.c.bf16 %v2805_v55, %v2803_v58  ;;  %v1446_v20 = vmul.f32 %v10493_v47, %v10493_v47  ;;  %v10497_v55 = vld [vmem:[#allocation37_spill] sm:$0xff] }
 0x279   : > { %1486 = vadd.xlane.f32.xlu0 %v1442_v11  ;;  %v1221_v17 = vpop.xlane.xlu1 %1220  ;;  %4737 = vmatprep.subr.bf16.mxu0 %v4736_v26  ;;  %v7894_v11 = vld [vmem:[%s5423_s7 + $0x778] sm:$0xff] }
 0x27a   : > { %v1219_v3 = vpop.xlane.xlu0 %1218  ;;  %v7874_v35 = vadd.f32 %v1221_v17, %v6975_v40  ;;  %3051 = vmatmul.mubr.f32.gmra.mrb[60].mxu1 %v5118_v27  ;;  %4609 = vmatprep.subr.bf16.mxu1 %v4608_v9  ;;  %v2804_v40 = vld [vmem:[%s10146_s1 + $0x7f0] sm:$0xff]  ;;  %v10495_v9 = vld [vmem:[#allocation64_spill] sm:$0xff]  ;;  %v5121_v27 = vld [vmem:[%s5423_s7 + $0x8] sm:$0xff] }
 0x27b   : > { %v7877_v16 = vadd.f32 %v1219_v3, %v6977_v46  ;;  %4611 = vmatpush1.bf16.msra.mxu1 %v4610_v50  ;;  %4739 = vmatpush1.bf16.msra.mxu0 %v4738_v41  ;;  %v4612_v46 = vpack.c.bf16 %v2677_v57, %v2675_v15  ;;  %v4742_v4 = vpack.c.bf16 %v2804_v40, %v2802_v63  ;;  %v4447_v50 = vld [vmem:[%s5423_s7 + $0x98] sm:$0xff]  ;;  %v10496_v41 = vld [vmem:[#allocation71_spill] sm:$0xff]  ;;  %v10498_v57 = vld [vmem:[#allocation13_spill] sm:$0xff] }
 0x27c   : > { %1492 = vadd.xlane.f32.xlu1 %v1445_v14  ;;  %3570 = vmatprep.mubr.f32.mxu0 %v7894_v11  ;;  %v1449_v58 = vmul.f32 %v10496_v41, %v10496_v41  ;;  %v1448_v14 = vmul.f32 %v10497_v55, %v10497_v55  ;;  %v10499_v3 = vld [vmem:[#allocation65_spill] sm:$0xff]  ;;  %v10501_v63 = vld [vmem:[#allocation74_spill] sm:$0xff] }
 0x27d   : > { %1490 = vadd.xlane.f32.xlu0 %v1444_v61  ;;  %v1225_v54 = vpop.xlane.xlu1 %1224  ;;  %3056 = vmatprep.mubr.f32.mxu1 %v5119_v52  ;;  %v1451_v40 = vmul.f32 %v10501_v63, %v10501_v63  ;;  %v5125_v63 = vld [vmem:[%s5423_s7 + $0x48] sm:$0xff] }
 0x27e   : > { %v1223_v0 = vpop.xlane.xlu0 %1222  ;;  %v7899_v26 = vadd.f32 %v1225_v54, %v10494_v33  ;;  %3571 = vmatmul.mubr.f32.gmra.mrb[62].mxu0 %v7591_v59  ;;  %4741 = vmatprep.subr.bf16.mxu0 %v4740_v36  ;;  %v7919_v36 = vld [vmem:[%s5423_s7 + $0x88] sm:$0xff]  ;;  %v5122_v54 = vld [vmem:[%s5423_s7 + $0x10] sm:$0xff] }
 0x27f   : > { %v7902_v24 = vadd.f32 %v1223_v0, %v10495_v9  ;;  %3057 = vmatmul.mubr.f32.gmra.mrb[62].mxu1 %v5120_v39  ;;  %4613 = vmatprep.subr.bf16.mxu1 %v4612_v46  ;;  %10500 = vst [vmem:[#allocation79_spill] sm:$0xff] %v7919_v36  ;;  %v10502_v46 = vld [vmem:[#allocation40_spill] sm:$0xff]  ;;  %v10503_v0 = vld [vmem:[#allocation14_spill] sm:$0xff] }
 0x280   : > { %1496 = vadd.xlane.f32.xlu1 %v1447_v5  ;;  %4615 = vmatpush1.bf16.msra.mxu1 %v4614_v13  ;;  %v1450_v5 = vmul.f32 %v10502_v46, %v10502_v46  ;;  %v10505_v13 = vld [vmem:[#allocation66_spill] sm:$0xff]  ;;  %v4449_v39 = vld [vmem:[%s5423_s7 + $0xd8] sm:$0xff] }
 0x281   : > { %1494 = vadd.xlane.f32.xlu0 %v1446_v20  ;;  %v1229_v61 = vpop.xlane.xlu1 %1228  ;;  %4743 = vmatpush1.bf16.msra.mxu0 %v4742_v4  ;;  %v5123_v33 = vld [vmem:[%s5423_s7 + $0x28] sm:$0xff]  ;;  %v4450_v46 = vld [vmem:[%s5423_s7 + $0xf8] sm:$0xff] }
 0x282   : > { %v1227_v15 = vpop.xlane.xlu0 %1226  ;;  %v7912_v17 = vadd.f32 %v1229_v61, %v10498_v57  ;;  %3641 = vmatprep.mubr.f32.mxu0 %v4447_v50  ;;  %3127 = vmatprep.mubr.f32.mxu1 %v5121_v27  ;;  %v7936_v9 = vld [vmem:[%s5423_s7 + $0xa8] sm:$0xff]  ;;  %v10508_v50 = vld [vmem:[#allocation43_spill] sm:$0xff] }
 0x283   : > { %v7915_v30 = vadd.f32 %v1227_v15, %v10499_v3  ;;  %3128 = vmatmul.mubr.f32.vlgmr.msra.gmra.mrb[0].mxu1 %v5122_v54  ;;  %10507 = vst [vmem:[#allocation47_spill] sm:$0xff] %v7936_v9  ;;  %v1453_v41 = vmul.f32 %v10508_v50, %v10508_v50  ;;  %v5124_v15 = vld [vmem:[%s5423_s7 + $0x30] sm:$0xff] }
 0x284   : > { %1500 = vadd.xlane.f32.xlu1 %v1449_v58  ;;  %3642 = vmatmul.mubr.f32.vlgmr.msra.gmra.mrb[0].mxu0 %v7919_v36  ;;  %v10509_v58 = vld [vmem:[#allocation76_spill] sm:$0xff]  ;;  %v10510_v57 = vld [vmem:[#allocation15_spill] sm:$0xff] }
 0x285   : > { %1498 = vadd.xlane.f32.xlu0 %v1448_v14  ;;  %v1233_v47 = vpop.xlane.xlu1 %1232  ;;  %3647 = vmatprep.mubr.f32.mxu0 %v4448_v2  ;;  %v1452_v55 = vmul.f32 %v10509_v58, %v10509_v58  ;;  %v10512_v27 = vld [vmem:[#allocation67_spill] sm:$0xff]  ;;  %v1457_v58 = vmul.f32 %v7528_v18, %v7528_v18  ;;  %v7987_v18 = vld [vmem:[%s5423_s7 + $0x188] sm:$0xff]  ;;  %v8101_v36 = vld [vmem:[%s5423_s7 + $0x178] sm:$0xff] }
 0x286   : > { %v1231_v20 = vpop.xlane.xlu0 %1230  ;;  %v7929_v52 = vadd.f32 %v1233_v47, %v10503_v0  ;;  %3133 = vmatprep.mubr.f32.mxu1 %v5123_v33  ;;  %v1454_v47 = vmul.f32 %v7495_v25, %v7495_v25  ;;  %v5126_v0 = vld [vmem:[%s5423_s7 + $0x50] sm:$0xff]  ;;  %v4451_v25 = vld [vmem:[%s5423_s7 + $0x198] sm:$0xff]  ;;  %10524 = vst [vmem:[#allocation84_spill] sm:$0xff] %v7987_v18 }
 0x287   : > { %v7932_v4 = vadd.f32 %v1231_v20, %v10505_v13  ;;  %3134 = vmatmul.mubr.f32.gmra.mrb[2].mxu1 %v5124_v15  ;;  %v10515_v13 = vld [vmem:[#allocation16_spill] sm:$0xff]  ;;  %v5128_v15 = vld [vmem:[%s5423_s7 + $0x70] sm:$0xff] }
 0x288   : > { %10504 = vst [vmem:[#allocation10_spill] sm:$0xff] %v7929_v52  ;;  %1504 = vadd.xlane.f32.xlu1 %v1451_v40  ;;  %3648 = vmatmul.mubr.f32.gmra.mrb[2].mxu0 %v7936_v9  ;;  %v7953_v40 = vld [vmem:[%s5423_s7 + $0xc8] sm:$0xff]  ;;  %v4459_v9 = vld [vmem:[%s5423_s7 + $0x398] sm:$0xff] }
 0x289   : > { %10506 = vst [vmem:[#allocation62_spill] sm:$0xff] %v7932_v4  ;;  %1502 = vadd.xlane.f32.xlu0 %v1450_v5  ;;  %v1237_v14 = vpop.xlane.xlu1 %1236  ;;  %3653 = vmatprep.mubr.f32.mxu0 %v4449_v39  ;;  %10514 = vst [vmem:[#allocation81_spill] sm:$0xff] %v7953_v40  ;;  %v1455_v5 = vmul.f32 %v7492_v48, %v7492_v48  ;;  %v10517_v39 = vld [vmem:[#allocation68_spill] sm:$0xff]  ;;  %v7970_v48 = vld [vmem:[%s5423_s7 + $0xe8] sm:$0xff] }
 0x28a   : > { %v1235_v61 = vpop.xlane.xlu0 %1234  ;;  %v7946_v3 = vadd.f32 %v1237_v14, %v10510_v57  ;;  %3139 = vmatprep.mubr.f32.mxu1 %v5125_v63  ;;  %10519 = vst [vmem:[#allocation50_spill] sm:$0xff] %v7970_v48  ;;  %v10520_v57 = vld [vmem:[#allocation17_spill] sm:$0xff]  ;;  %v10522_v63 = vld [vmem:[#allocation18_spill] sm:$0xff]  ;;  %v8248_v4 = vld [vmem:[%s5423_s7 + $0x538] sm:$0xff] }
 0x28b   : > { %v7949_v2 = vadd.f32 %v1235_v61, %v10512_v27  ;;  %3140 = vmatmul.mubr.f32.gmra.mrb[4].mxu1 %v5126_v0  ;;  %v4466_v52 = vld [vmem:[%s5423_s7 + $0x4f8] sm:$0xff] }
 0x28c   : > { %10511 = vst [vmem:[#allocation80_spill] sm:$0xff] %v7946_v3  ;;  %1508 = vadd.xlane.f32.xlu1 %v1453_v41  ;;  %3654 = vmatmul.mubr.f32.gmra.mrb[4].mxu0 %v7953_v40  ;;  %v5127_v41 = vld [vmem:[%s5423_s7 + $0x68] sm:$0xff]  ;;  %v4465_v3 = vld [vmem:[%s5423_s7 + $0x4d8] sm:$0xff] }
 0x28d   : > { %10513 = vst [vmem:[#allocation48_spill] sm:$0xff] %v7949_v2  ;;  %1506 = vadd.xlane.f32.xlu0 %v1452_v55  ;;  %v1241_v20 = vpop.xlane.xlu1 %1240  ;;  %3659 = vmatprep.mubr.f32.mxu0 %v4450_v46  ;;  %v1456_v55 = vmul.f32 %v7531_v51, %v7531_v51  ;;  %v4452_v51 = vld [vmem:[%s5423_s7 + $0x1b8] sm:$0xff]  ;;  %v8076_v40 = vld [vmem:[%s5423_s7 + $0x2a8] sm:$0xff] }
 0x28e   : > { %v1239_v54 = vpop.xlane.xlu0 %1238  ;;  %v7963_v33 = vadd.f32 %v1241_v20, %v10515_v13  ;;  %3145 = vmatprep.mubr.f32.mxu1 %v5127_v41  ;;  %v1458_v20 = vmul.f32 %v7572_v12, %v7572_v12  ;;  %v5130_v13 = vld [vmem:[%s5423_s7 + $0x110] sm:$0xff]  ;;  %v4453_v12 = vld [vmem:[%s5423_s7 + $0x1d8] sm:$0xff]  ;;  %10549 = vst [vmem:[#allocation94_spill] sm:$0xff] %v8076_v40 }
 0x28f   : > { %v7966_v50 = vadd.f32 %v1239_v54, %v10517_v39  ;;  %3146 = vmatmul.mubr.f32.gmra.mrb[6].mxu1 %v5128_v15  ;;  %v10525_v39 = vld [vmem:[#allocation19_spill] sm:$0xff]  ;;  %v8227_v2 = vld [vmem:[%s5423_s7 + $0x478] sm:$0xff] }
 0x290   : > { %10516 = vst [vmem:[#allocation49_spill] sm:$0xff] %v7963_v33  ;;  %1512 = vadd.xlane.f32.xlu1 %v1455_v5  ;;  %3660 = vmatmul.mubr.f32.gmra.mrb[6].mxu0 %v7970_v48  ;;  %v5129_v5 = vld [vmem:[%s5423_s7 + $0x108] sm:$0xff]  ;;  %v4457_v48 = vld [vmem:[%s5423_s7 + $0x2d8] sm:$0xff] }
 0x291   : > { %10518 = vst [vmem:[#allocation82_spill] sm:$0xff] %v7966_v50  ;;  %1510 = vadd.xlane.f32.xlu0 %v1454_v47  ;;  %v1245_v14 = vpop.xlane.xlu1 %1244  ;;  %3665 = vmatprep.mubr.f32.mxu0 %v4451_v25  ;;  %v1459_v47 = vmul.f32 %v7569_v19, %v7569_v19  ;;  %v10527_v25 = vld [vmem:[#allocation20_spill] sm:$0xff]  ;;  %v8004_v19 = vld [vmem:[%s5423_s7 + $0x1a8] sm:$0xff] }
 0x292   : > { %v1243_v61 = vpop.xlane.xlu0 %1242  ;;  %v7980_v27 = vadd.f32 %v1245_v14, %v10520_v57  ;;  %3151 = vmatprep.mubr.f32.mxu1 %v5129_v5  ;;  %10529 = vst [vmem:[#allocation53_spill] sm:$0xff] %v8004_v19  ;;  %v10530_v5 = vld [vmem:[#allocation21_spill] sm:$0xff]  ;;  %v8206_v50 = vld [vmem:[%s5423_s7 + $0x438] sm:$0xff] }
 0x293   : > { %v7983_v46 = vadd.f32 %v1243_v61, %v10522_v63  ;;  %3152 = vmatmul.mubr.f32.gmra.mrb[8].mxu1 %v5130_v13  ;;  %v1460_v61 = vmul.f32 %v7600_v31, %v7600_v31  ;;  %v5132_v63 = vld [vmem:[%s5423_s7 + $0x130] sm:$0xff]  ;;  %v4454_v31 = vld [vmem:[%s5423_s7 + $0x1f8] sm:$0xff] }
 0x294   : > { %10521 = vst [vmem:[#allocation83_spill] sm:$0xff] %v7980_v27  ;;  %1516 = vadd.xlane.f32.xlu1 %v1457_v58  ;;  %3666 = vmatmul.mubr.f32.gmra.mrb[8].mxu0 %v7987_v18  ;;  %v5131_v58 = vld [vmem:[%s5423_s7 + $0x128] sm:$0xff]  ;;  %v8059_v18 = vld [vmem:[%s5423_s7 + $0x78] sm:$0xff] }
 0x295   : > { %10523 = vst [vmem:[#allocation51_spill] sm:$0xff] %v7983_v46  ;;  %1514 = vadd.xlane.f32.xlu0 %v1456_v55  ;;  %v1249_v54 = vpop.xlane.xlu1 %1248  ;;  %3671 = vmatprep.mubr.f32.mxu0 %v4452_v51  ;;  %v1461_v55 = vmul.f32 %v7591_v59, %v7591_v59  ;;  %v8021_v59 = vld [vmem:[%s5423_s7 + $0x1c8] sm:$0xff]  ;;  %v8185_v46 = vld [vmem:[%s5423_s7 + $0x378] sm:$0xff] }
 0x296   : > { %v1247_v0 = vpop.xlane.xlu0 %1246  ;;  %v7997_v41 = vadd.f32 %v1249_v54, %v10525_v39  ;;  %3157 = vmatprep.mubr.f32.mxu1 %v5131_v58  ;;  %v10532_v54 = vld [vmem:[#allocation22_spill] sm:$0xff]  ;;  %10534 = vst [vmem:[#allocation87_spill] sm:$0xff] %v8021_v59  ;;  %v5134_v39 = vld [vmem:[%s5423_s7 + $0x150] sm:$0xff]  ;;  %v4463_v27 = vld [vmem:[%s5423_s7 + $0x498] sm:$0xff] }
 0x297   : > { %v8000_v14 = vadd.f32 %v1247_v0, %v10527_v25  ;;  %3158 = vmatmul.mubr.f32.gmra.mrb[10].mxu1 %v5132_v63  ;;  %v10535_v25 = vld [vmem:[#allocation23_spill] sm:$0xff]  ;;  %v8038_v63 = vld [vmem:[%s5423_s7 + $0x38] sm:$0xff] }
 0x298   : > { %10526 = vst [vmem:[#allocation52_spill] sm:$0xff] %v7997_v41  ;;  %1520 = vadd.xlane.f32.xlu1 %v1459_v47  ;;  %3672 = vmatmul.mubr.f32.gmra.mrb[10].mxu0 %v8004_v19  ;;  %v5133_v47 = vld [vmem:[%s5423_s7 + $0x148] sm:$0xff]  ;;  %v4462_v41 = vld [vmem:[%s5423_s7 + $0x3f8] sm:$0xff] }
 0x299   : > { %10528 = vst [vmem:[#allocation85_spill] sm:$0xff] %v8000_v14  ;;  %1518 = vadd.xlane.f32.xlu0 %v1458_v20  ;;  %v1253_v15 = vpop.xlane.xlu1 %1252  ;;  %3677 = vmatprep.mubr.f32.mxu0 %v4453_v12  ;;  %v10537_v12 = vld [vmem:[#allocation24_spill] sm:$0xff]  ;;  %v5143_v19 = vld [vmem:[%s5423_s7 + $0x228] sm:$0xff] }
 0x29a   : > { %v1251_v57 = vpop.xlane.xlu0 %1250  ;;  %v8014_v51 = vadd.f32 %v1253_v15, %v10530_v5  ;;  %3163 = vmatprep.mubr.f32.mxu1 %v5133_v47  ;;  %v8042_v5 = vld [vmem:[%s5423_s7 + $0x18] sm:$0xff] }
 0x29b   : > { %v8017_v0 = vadd.f32 %v1251_v57, %v10532_v54  ;;  %3164 = vmatmul.mubr.f32.gmra.mrb[12].mxu1 %v5134_v39  ;;  %v5135_v57 = vld [vmem:[%s5423_s7 + $0x168] sm:$0xff]  ;;  %v8164_v14 = vld [vmem:[%s5423_s7 + $0x338] sm:$0xff] }
 0x29c   : > { %10531 = vst [vmem:[#allocation86_spill] sm:$0xff] %v8014_v51  ;;  %1524 = vadd.xlane.f32.xlu1 %v1461_v55  ;;  %3678 = vmatmul.mubr.f32.gmra.mrb[12].mxu0 %v8021_v59  ;;  %v8034_v55 = vld [vmem:[%s5423_s7 + $0x1e8] sm:$0xff]  ;;  %v4456_v59 = vld [vmem:[%s5423_s7 + $0x2b8] sm:$0xff] }
 0x29d   : > { %10533 = vst [vmem:[#allocation54_spill] sm:$0xff] %v8017_v0  ;;  %1522 = vadd.xlane.f32.xlu0 %v1460_v61  ;;  %v1257_v20 = vpop.xlane.xlu1 %1256  ;;  %3683 = vmatprep.mubr.f32.mxu0 %v4454_v31  ;;  %10539 = vst [vmem:[#allocation56_spill] sm:$0xff] %v8034_v55  ;;  %v4455_v61 = vld [vmem:[%s5423_s7 + $0x298] sm:$0xff]  ;;  %v5138_v31 = vld [vmem:[%s5423_s7 + $0x170] sm:$0xff] }
 0x29e   : > { %v1255_v13 = vpop.xlane.xlu0 %1254  ;;  %v8027_v58 = vadd.f32 %v1257_v20, %v10535_v25  ;;  %3169 = vmatprep.mubr.f32.mxu1 %v5135_v57  ;;  %v10540_v20 = vld [vmem:[#allocation25_spill] sm:$0xff]  ;;  %v10542_v39 = vld [vmem:[#allocation26_spill] sm:$0xff]  ;;  %v8143_v0 = vld [vmem:[%s5423_s7 + $0x278] sm:$0xff] }
 0x29f   : > { %v8030_v15 = vadd.f32 %v1255_v13, %v10537_v12  ;;  %3170 = vmatmul.mubr.f32.gmra.mrb[14].mxu1 %v5138_v31  ;;  %v5139_v12 = vld [vmem:[%s5423_s7 + $0x208] sm:$0xff]  ;;  %v8063_v31 = vld [vmem:[%s5423_s7 + $0x58] sm:$0xff] }
 0x2a0   : > { %10536 = vst [vmem:[#allocation55_spill] sm:$0xff] %v8027_v58  ;;  %1592 = vadd.xlane.f32.xlu1 %v8038_v63  ;;  %3684 = vmatmul.mubr.f32.gmra.mrb[14].mxu0 %v8034_v55  ;;  %v8055_v57 = vld [vmem:[%s5423_s7 + $0x288] sm:$0xff]  ;;  %v4460_v58 = vld [vmem:[%s5423_s7 + $0x3b8] sm:$0xff] }
 0x2a1   : > { %10538 = vst [vmem:[#allocation88_spill] sm:$0xff] %v8030_v15  ;;  %1590 = vadd.xlane.f32.xlu0 %v8042_v5  ;;  %v1261_v54 = vpop.xlane.xlu1 %1260  ;;  %3689 = vmatprep.mubr.f32.mxu0 %v4455_v61  ;;  %10544 = vst [vmem:[#allocation91_spill] sm:$0xff] %v8055_v57  ;;  %v8122_v15 = vld [vmem:[%s5423_s7 + $0x238] sm:$0xff] }
 0x2a2   : > { %v1259_v47 = vpop.xlane.xlu0 %1258  ;;  %v8048_v13 = vadd.f32 %v1261_v54, %v10540_v20  ;;  %3175 = vmatprep.mubr.f32.mxu1 %v5139_v12  ;;  %v10545_v20 = vld [vmem:[#allocation27_spill] sm:$0xff]  ;;  %v10547_v12 = vld [vmem:[#allocation28_spill] sm:$0xff] }
 0x2a3   : > { %v8051_v25 = vadd.f32 %v1259_v47, %v10542_v39  ;;  %v5142_v47 = vld [vmem:[%s5423_s7 + $0x210] sm:$0xff]  ;;  %v4461_v51 = vld [vmem:[%s5423_s7 + $0x3d8] sm:$0xff] }
 0x2a4   : > { %10541 = vst [vmem:[#allocation89_spill] sm:$0xff] %v8048_v13  ;;  %1596 = vadd.xlane.f32.xlu1 %v8059_v18  ;;  %3690 = vmatmul.mubr.f32.gmra.mrb[16].mxu0 %v8055_v57  ;;  %v4458_v13 = vld [vmem:[%s5423_s7 + $0x2f8] sm:$0xff] }
 0x2a5   : > { %10543 = vst [vmem:[#allocation90_spill] sm:$0xff] %v8051_v25  ;;  %1594 = vadd.xlane.f32.xlu0 %v8063_v31  ;;  %v1265_v54 = vpop.xlane.xlu1 %1264  ;;  %3176 = vmatmul.mubr.f32.gmra.mrb[16].mxu1 %v5142_v47  ;;  %v8080_v25 = vld [vmem:[%s5423_s7 + $0x138] sm:$0xff] }
 0x2a6   : > { %v1263_v61 = vpop.xlane.xlu0 %1262  ;;  %v8069_v39 = vadd.f32 %v1265_v54, %v10545_v20  ;;  %3695 = vmatprep.mubr.f32.mxu0 %v4456_v59  ;;  %3181 = vmatprep.mubr.f32.mxu1 %v5143_v19  ;;  %v8084_v47 = vld [vmem:[%s5423_s7 + $0x118] sm:$0xff]  ;;  %v5146_v19 = vld [vmem:[%s5423_s7 + $0x230] sm:$0xff] }
 0x2a7   : > { %v8072_v55 = vadd.f32 %v1263_v61, %v10547_v12  ;;  %v10550_v61 = vld [vmem:[#allocation29_spill] sm:$0xff]  ;;  %v10552_v12 = vld [vmem:[#allocation30_spill] sm:$0xff]  ;;  %v4464_v33 = vld [vmem:[%s5423_s7 + $0x4b8] sm:$0xff] }
 0x2a8   : > { %10546 = vst [vmem:[#allocation92_spill] sm:$0xff] %v8069_v39  ;;  %1600 = vadd.xlane.f32.xlu1 %v8080_v25  ;;  %3696 = vmatmul.mubr.f32.gmra.mrb[18].mxu0 %v8076_v40  ;;  %v8097_v39 = vld [vmem:[%s5423_s7 + $0x2c8] sm:$0xff] }
 0x2a9   : > { %10548 = vst [vmem:[#allocation93_spill] sm:$0xff] %v8072_v55  ;;  %1598 = vadd.xlane.f32.xlu0 %v8084_v47  ;;  %v1269_v54 = vpop.xlane.xlu1 %1268  ;;  %3182 = vmatmul.mubr.f32.gmra.mrb[18].mxu1 %v5146_v19  ;;  %v5147_v55 = vld [vmem:[%s5423_s7 + $0x248] sm:$0xff]  ;;  %10554 = vst [vmem:[#allocation97_spill] sm:$0xff] %v8097_v39  ;;  %v8105_v19 = vld [vmem:[%s5423_s7 + $0x158] sm:$0xff] }
 0x2aa   : > { %v1267_v59 = vpop.xlane.xlu0 %1266  ;;  %v8090_v20 = vadd.f32 %v1269_v54, %v10550_v61  ;;  %3701 = vmatprep.mubr.f32.mxu0 %v4457_v48  ;;  %3187 = vmatprep.mubr.f32.mxu1 %v5147_v55  ;;  %v5150_v55 = vld [vmem:[%s5423_s7 + $0x250] sm:$0xff] }
 0x2ab   : > { %v8093_v57 = vadd.f32 %v1267_v59, %v10552_v12  ;;  %v10555_v59 = vld [vmem:[#allocation31_spill] sm:$0xff]  ;;  %v10557_v12 = vld [vmem:[#allocation32_spill] sm:$0xff] }
 0x2ac   : > { %10551 = vst [vmem:[#allocation95_spill] sm:$0xff] %v8090_v20  ;;  %1604 = vadd.xlane.f32.xlu1 %v8101_v36  ;;  %3702 = vmatmul.mubr.f32.gmra.mrb[20].mxu0 %v8097_v39  ;;  %v8118_v20 = vld [vmem:[%s5423_s7 + $0x2e8] sm:$0xff] }
 0x2ad   : > { %10553 = vst [vmem:[#allocation96_spill] sm:$0xff] %v8093_v57  ;;  %1602 = vadd.xlane.f32.xlu0 %v8105_v19  ;;  %v1337_v54 = vpop.xlane.xlu1 %1336  ;;  %3188 = vmatmul.mubr.f32.gmra.mrb[20].mxu1 %v5150_v55  ;;  %v5151_v57 = vld [vmem:[%s5423_s7 + $0x268] sm:$0xff]  ;;  %10559 = vst [vmem:[#allocation100_spill] sm:$0xff] %v8118_v20  ;;  %v8126_v55 = vld [vmem:[%s5423_s7 + $0x218] sm:$0xff] }
 0x2ae   : > { %v1335_v48 = vpop.xlane.xlu0 %1334  ;;  %v8111_v61 = vadd.f32 %v1337_v54, %v10555_v59  ;;  %3707 = vmatprep.mubr.f32.mxu0 %v4458_v13  ;;  %3193 = vmatprep.mubr.f32.mxu1 %v5151_v57  ;;  %v5154_v57 = vld [vmem:[%s5423_s7 + $0x270] sm:$0xff] }
 0x2af   : > { %v8114_v40 = vadd.f32 %v1335_v48, %v10557_v12  ;;  %v10560_v48 = vld [vmem:[#allocation34_spill] sm:$0xff]  ;;  %v10562_v12 = vld [vmem:[#allocation35_spill] sm:$0xff] }
 0x2b0   : > { %10556 = vst [vmem:[#allocation98_spill] sm:$0xff] %v8111_v61  ;;  %1608 = vadd.xlane.f32.xlu1 %v8122_v15  ;;  %3708 = vmatmul.mubr.f32.gmra.mrb[22].mxu0 %v8118_v20  ;;  %v8139_v61 = vld [vmem:[%s5423_s7 + $0x388] sm:$0xff] }
 0x2b1   : > { %10558 = vst [vmem:[#allocation99_spill] sm:$0xff] %v8114_v40  ;;  %1606 = vadd.xlane.f32.xlu0 %v8126_v55  ;;  %v1341_v54 = vpop.xlane.xlu1 %1340  ;;  %3194 = vmatmul.mubr.f32.gmra.mrb[22].mxu1 %v5154_v57  ;;  %v5155_v40 = vld [vmem:[%s5423_s7 + $0x308] sm:$0xff]  ;;  %10564 = vst [vmem:[#allocation57_spill] sm:$0xff] %v8139_v61  ;;  %v8147_v57 = vld [vmem:[%s5423_s7 + $0x258] sm:$0xff] }
 0x2b2   : > { %v1339_v13 = vpop.xlane.xlu0 %1338  ;;  %v8132_v59 = vadd.f32 %v1341_v54, %v10560_v48  ;;  %3713 = vmatprep.mubr.f32.mxu0 %v4459_v9  ;;  %3199 = vmatprep.mubr.f32.mxu1 %v5155_v40  ;;  %v5158_v40 = vld [vmem:[%s5423_s7 + $0x310] sm:$0xff] }
 0x2b3   : > { %v8135_v39 = vadd.f32 %v1339_v13, %v10562_v12  ;;  %v10565_v13 = vld [vmem:[#allocation36_spill] sm:$0xff]  ;;  %v10567_v12 = vld [vmem:[#allocation69_spill] sm:$0xff] }
 0x2b4   : > { %10561 = vst [vmem:[#allocation101_spill] sm:$0xff] %v8132_v59  ;;  %1612 = vadd.xlane.f32.xlu1 %v8143_v0  ;;  %3714 = vmatmul.mubr.f32.gmra.mrb[24].mxu0 %v8139_v61  ;;  %v8160_v59 = vld [vmem:[%s5423_s7 + $0x3a8] sm:$0xff] }
 0x2b5   : > { %10563 = vst [vmem:[#allocation5_spill] sm:$0xff] %v8135_v39  ;;  %1610 = vadd.xlane.f32.xlu0 %v8147_v57  ;;  %v1345_v54 = vpop.xlane.xlu1 %1344  ;;  %3200 = vmatmul.mubr.f32.gmra.mrb[24].mxu1 %v5158_v40  ;;  %v5159_v39 = vld [vmem:[%s5423_s7 + $0x328] sm:$0xff]  ;;  %10569 = vst [vmem:[#allocation7_spill] sm:$0xff] %v8160_v59  ;;  %v8168_v40 = vld [vmem:[%s5423_s7 + $0x318] sm:$0xff] }
 0x2b6   : > { %v1343_v9 = vpop.xlane.xlu0 %1342  ;;  %v8153_v48 = vadd.f32 %v1345_v54, %v10565_v13  ;;  %3719 = vmatprep.mubr.f32.mxu0 %v4460_v58  ;;  %3205 = vmatprep.mubr.f32.mxu1 %v5159_v39  ;;  %v5162_v39 = vld [vmem:[%s5423_s7 + $0x330] sm:$0xff] }
 0x2b7   : > { %v8156_v20 = vadd.f32 %v1343_v9, %v10567_v12  ;;  %v10570_v9 = vld [vmem:[#allocation70_spill] sm:$0xff] }
 0x2b8   : > { %10566 = vst [vmem:[#allocation6_spill] sm:$0xff] %v8153_v48  ;;  %1616 = vadd.xlane.f32.xlu1 %v8164_v14  ;;  %3720 = vmatmul.mubr.f32.gmra.mrb[26].mxu0 %v8160_v59  ;;  %v10572_v12 = vld [vmem:[#allocation38_spill] sm:$0xff] }
 0x2b9   : > { %10568 = vst [vmem:[#allocation58_spill] sm:$0xff] %v8156_v20  ;;  %1614 = vadd.xlane.f32.xlu0 %v8168_v40  ;;  %v1349_v54 = vpop.xlane.xlu1 %1348  ;;  %3206 = vmatmul.mubr.f32.gmra.mrb[26].mxu1 %v5162_v39  ;;  %v5163_v20 = vld [vmem:[%s5423_s7 + $0x348] sm:$0xff]  ;;  %v8189_v39 = vld [vmem:[%s5423_s7 + $0x358] sm:$0xff] }
 0x2ba   : > { %v1347_v58 = vpop.xlane.xlu0 %1346  ;;  %v8174_v13 = vadd.f32 %v1349_v54, %v10570_v9  ;;  %3725 = vmatprep.mubr.f32.mxu0 %v4461_v51  ;;  %3211 = vmatprep.mubr.f32.mxu1 %v5163_v20  ;;  %v8181_v48 = vld [vmem:[%s5423_s7 + $0x3c8] sm:$0xff]  ;;  %v5166_v20 = vld [vmem:[%s5423_s7 + $0x350] sm:$0xff] }
 0x2bb   : > { %v8177_v61 = vadd.f32 %v1347_v58, %v10572_v12  ;;  %10574 = vst [vmem:[#allocation61_spill] sm:$0xff] %v8181_v48  ;;  %v10575_v58 = vld [vmem:[#allocation39_spill] sm:$0xff]  ;;  %v10577_v12 = vld [vmem:[#allocation72_spill] sm:$0xff]  ;;  %v8202_v59 = vld [vmem:[%s5423_s7 + $0x3e8] sm:$0xff] }
 0x2bc   : > { %10571 = vst [vmem:[#allocation59_spill] sm:$0xff] %v8174_v13  ;;  %1620 = vadd.xlane.f32.xlu1 %v8185_v46  ;;  %3726 = vmatmul.mubr.f32.gmra.mrb[28].mxu0 %v8181_v48  ;;  %v5167_v13 = vld [vmem:[%s5423_s7 + $0x368] sm:$0xff]  ;;  %10579 = vst [vmem:[#allocation33_spill] sm:$0xff] %v8202_v59 }
 0x2bd   : > { %10573 = vst [vmem:[#allocation9_spill] sm:$0xff] %v8177_v61  ;;  %1618 = vadd.xlane.f32.xlu0 %v8189_v39  ;;  %v1353_v54 = vpop.xlane.xlu1 %1352  ;;  %3212 = vmatmul.mubr.f32.gmra.mrb[28].mxu1 %v5166_v20  ;;  %v8210_v20 = vld [vmem:[%s5423_s7 + $0x418] sm:$0xff]  ;;  %v8223_v48 = vld [vmem:[%s5423_s7 + $0x488] sm:$0xff] }
 0x2be   : > { %v1351_v51 = vpop.xlane.xlu0 %1350  ;;  %v8195_v9 = vadd.f32 %v1353_v54, %v10575_v58  ;;  %3731 = vmatprep.mubr.f32.mxu0 %v4462_v41  ;;  %3217 = vmatprep.mubr.f32.mxu1 %v5167_v13  ;;  %v5170_v13 = vld [vmem:[%s5423_s7 + $0x370] sm:$0xff]  ;;  %10584 = vst [vmem:[#allocation71_spill] sm:$0xff] %v8223_v48 }
 0x2bf   : > { %v8198_v61 = vadd.f32 %v1351_v51, %v10577_v12  ;;  %v10580_v51 = vld [vmem:[#allocation73_spill] sm:$0xff] }
 0x2c0   : > { %10576 = vst [vmem:[#allocation11_spill] sm:$0xff] %v8195_v9  ;;  %1624 = vadd.xlane.f32.xlu1 %v8206_v50  ;;  %3732 = vmatmul.mubr.f32.gmra.mrb[30].mxu0 %v8202_v59  ;;  %v10582_v12 = vld [vmem:[#allocation41_spill] sm:$0xff]  ;;  %v5171_v9 = vld [vmem:[%s5423_s7 + $0x408] sm:$0xff] }
 0x2c1   : > { %10578 = vst [vmem:[#allocation63_spill] sm:$0xff] %v8198_v61  ;;  %1622 = vadd.xlane.f32.xlu0 %v8210_v20  ;;  %v1357_v54 = vpop.xlane.xlu1 %1356  ;;  %3218 = vmatmul.mubr.f32.gmra.mrb[30].mxu1 %v5170_v13  ;;  %v8231_v13 = vld [vmem:[%s5423_s7 + $0x458] sm:$0xff]  ;;  %v8244_v59 = vld [vmem:[%s5423_s7 + $0x4a8] sm:$0xff] }
 0x2c2   : > { %v1355_v41 = vpop.xlane.xlu0 %1354  ;;  %v8216_v58 = vadd.f32 %v1357_v54, %v10580_v51  ;;  %3737 = vmatprep.mubr.f32.mxu0 %v4463_v27  ;;  %3223 = vmatprep.mubr.f32.mxu1 %v5171_v9  ;;  %v5174_v9 = vld [vmem:[%s5423_s7 + $0x410] sm:$0xff]  ;;  %10589 = vst [vmem:[#allocation65_spill] sm:$0xff] %v8244_v59 }
 0x2c3   : > { %v8219_v61 = vadd.f32 %v1355_v41, %v10582_v12  ;;  %v10585_v41 = vld [vmem:[#allocation42_spill] sm:$0xff]  ;;  %v10587_v12 = vld [vmem:[#allocation75_spill] sm:$0xff] }
 0x2c4   : > { %10581 = vst [vmem:[#allocation12_spill] sm:$0xff] %v8216_v58  ;;  %1628 = vadd.xlane.f32.xlu1 %v8227_v2  ;;  %3738 = vmatmul.mubr.f32.gmra.mrb[32].mxu0 %v8223_v48  ;;  %v5175_v58 = vld [vmem:[%s5423_s7 + $0x428] sm:$0xff] }
 0x2c5   : > { %10583 = vst [vmem:[#allocation64_spill] sm:$0xff] %v8219_v61  ;;  %1626 = vadd.xlane.f32.xlu0 %v8231_v13  ;;  %v1361_v54 = vpop.xlane.xlu1 %1360  ;;  %3224 = vmatmul.mubr.f32.gmra.mrb[32].mxu1 %v5174_v9  ;;  %v8252_v9 = vld [vmem:[%s5423_s7 + $0x518] sm:$0xff]  ;;  %v8265_v48 = vld [vmem:[%s5423_s7 + $0x4c8] sm:$0xff] }
 0x2c6   : > { %v1359_v27 = vpop.xlane.xlu0 %1358  ;;  %v8237_v51 = vadd.f32 %v1361_v54, %v10585_v41  ;;  %3743 = vmatprep.mubr.f32.mxu0 %v4464_v33  ;;  %3229 = vmatprep.mubr.f32.mxu1 %v5175_v58  ;;  %10590 = vst [vmem:[#allocation74_spill] sm:$0xff] %v8252_v9  ;;  %v5178_v58 = vld [vmem:[%s5423_s7 + $0x430] sm:$0xff]  ;;  %10595 = vst [vmem:[#allocation66_spill] sm:$0xff] %v8265_v48 }
 0x2c7   : > { %v8240_v61 = vadd.f32 %v1359_v27, %v10587_v12  ;;  %v10591_v27 = vld [vmem:[#allocation44_spill] sm:$0xff]  ;;  %v10593_v12 = vld [vmem:[#allocation77_spill] sm:$0xff] }
 0x2c8   : > { %10586 = vst [vmem:[#allocation37_spill] sm:$0xff] %v8237_v51  ;;  %1632 = vadd.xlane.f32.xlu1 %v8248_v4  ;;  %3744 = vmatmul.mubr.f32.gmra.mrb[34].mxu0 %v8244_v59  ;;  %v5179_v51 = vld [vmem:[%s5423_s7 + $0x448] sm:$0xff] }
 0x2c9   : > { %10588 = vst [vmem:[#allocation13_spill] sm:$0xff] %v8240_v61  ;;  %1630 = vadd.xlane.f32.xlu0 %v8252_v9  ;;  %v1365_v54 = vpop.xlane.xlu1 %1364  ;;  %3230 = vmatmul.mubr.f32.gmra.mrb[34].mxu1 %v5178_v58  ;;  %v8269_v9 = vld [vmem:[%s5423_s7 + $0x578] sm:$0xff]  ;;  %v8286_v59 = vld [vmem:[%s5423_s7 + $0x4e8] sm:$0xff] }
 0x2ca   : > { %v1363_v33 = vpop.xlane.xlu0 %1362  ;;  %v8258_v41 = vadd.f32 %v1365_v54, %v10591_v27  ;;  %3749 = vmatprep.mubr.f32.mxu0 %v4465_v3  ;;  %3235 = vmatprep.mubr.f32.mxu1 %v5179_v51  ;;  %v8273_v58 = vld [vmem:[%s5423_s7 + $0x558] sm:$0xff]  ;;  %v5182_v3 = vld [vmem:[%s5423_s7 + $0x450] sm:$0xff]  ;;  %10601 = vst [vmem:[#allocation67_spill] sm:$0xff] %v8286_v59 }
 0x2cb   : > { %v8261_v61 = vadd.f32 %v1363_v33, %v10593_v12  ;;  %10596 = vst [vmem:[#allocation43_spill] sm:$0xff] %v8273_v58  ;;  %v10597_v51 = vld [vmem:[#allocation8_spill] sm:$0xff] }
 0x2cc   : > { %10592 = vst [vmem:[#allocation40_spill] sm:$0xff] %v8258_v41  ;;  %1636 = vadd.xlane.f32.xlu1 %v8269_v9  ;;  %3750 = vmatmul.mubr.f32.gmra.mrb[36].mxu0 %v8265_v48  ;;  %v10599_v12 = vld [vmem:[#allocation60_spill] sm:$0xff]  ;;  %v5183_v41 = vld [vmem:[%s5423_s7 + $0x468] sm:$0xff] }
 0x2cd   : > { %10594 = vst [vmem:[#allocation14_spill] sm:$0xff] %v8261_v61  ;;  %1634 = vadd.xlane.f32.xlu0 %v8273_v58  ;;  %v1369_v54 = vpop.xlane.xlu1 %1368  ;;  %3236 = vmatmul.mubr.f32.gmra.mrb[36].mxu1 %v5182_v3  ;;  %v4467_v58 = vld [vmem:[%s5423_s7 + $0x598] sm:$0xff] }
 0x2ce   : > { %v1367_v33 = vpop.xlane.xlu0 %1366  ;;  %v8279_v27 = vadd.f32 %v1369_v54, %v10597_v51  ;;  %3755 = vmatprep.mubr.f32.mxu0 %v4466_v52  ;;  %3241 = vmatprep.mubr.f32.mxu1 %v5183_v41  ;;  %v8291_v48 = vld [vmem:[%s5423_s7 + $0x618] sm:$0xff]  ;;  %v5185_v52 = vld [vmem:[%s5423_s7 + $0x470] sm:$0xff]  ;;  %v10603_v51 = vld [vmem:[#allocation78_spill] sm:$0xff] }
 0x2cf   : > { %v8282_v61 = vadd.f32 %v1367_v33, %v10599_v12  ;;  %v10602_v33 = vld [vmem:[#allocation45_spill] sm:$0xff] }
 0x2d0   : > { %10598 = vst [vmem:[#allocation76_spill] sm:$0xff] %v8279_v27  ;;  %1640 = vadd.xlane.f32.xlu1 %v7604_v32  ;;  %3756 = vmatmul.mubr.f32.gmra.mrb[38].mxu0 %v8286_v59  ;;  %v5186_v32 = vld [vmem:[%s5423_s7 + $0x508] sm:$0xff]  ;;  %v4468_v27 = vld [vmem:[%s5423_s7 + $0x5b8] sm:$0xff] }
 0x2d1   : > { %10600 = vst [vmem:[#allocation15_spill] sm:$0xff] %v8282_v61  ;;  %1638 = vadd.xlane.f32.xlu0 %v8291_v48  ;;  %v1373_v54 = vpop.xlane.xlu1 %1372  ;;  %3242 = vmatmul.mubr.f32.gmra.mrb[38].mxu1 %v5185_v52  ;;  %v8304_v61 = vld [vmem:[%s5423_s7 + $0x588] sm:$0xff] }
 0x2d2   : > { %v1371_v3 = vpop.xlane.xlu0 %1370  ;;  %v8297_v41 = vadd.f32 %v1373_v54, %v10602_v33  ;;  %3761 = vmatprep.mubr.f32.mxu0 %v4467_v58  ;;  %3247 = vmatprep.mubr.f32.mxu1 %v5186_v32  ;;  %v5187_v54 = vld [vmem:[%s5423_s7 + $0x510] sm:$0xff]  ;;  %v5188_v33 = vld [vmem:[%s5423_s7 + $0x528] sm:$0xff] }
 0x2d3   : > { %v8300_v12 = vadd.f32 %v1371_v3, %v10603_v51 }
 0x2d4   : > { %1644 = vadd.xlane.f32.xlu1 %v7716_v60  ;;  %3762 = vmatmul.mubr.f32.gmra.mrb[40].mxu0 %v8304_v61  ;;  %v4469_v60 = vld [vmem:[%s5423_s7 + $0x5d8] sm:$0xff] }
 0x2d5   : > { %1642 = vadd.xlane.f32.xlu0 %v7659_v38  ;;  %v1377_v52 = vpop.xlane.xlu1 %1376  ;;  %3248 = vmatmul.mubr.f32.gmra.mrb[40].mxu1 %v5187_v54  ;;  %v8319_v38 = vld [vmem:[%s5423_s7 + $0x5a8] sm:$0xff] }
 0x2d6   : > { %v1375_v59 = vpop.xlane.xlu0 %1374  ;;  %v8312_v58 = vadd.f32 %v1377_v52, %v7576_v56  ;;  %3767 = vmatprep.mubr.f32.mxu0 %v4468_v27  ;;  %3253 = vmatprep.mubr.f32.mxu1 %v5188_v33  ;;  %v5189_v56 = vld [vmem:[%s5423_s7 + $0x530] sm:$0xff]  ;;  %v5190_v27 = vld [vmem:[%s5423_s7 + $0x548] sm:$0xff] }
 0x2d7   : > { %v8315_v3 = vadd.f32 %v1375_v59, %v7579_v22  ;;  %v5191_v33 = vld [vmem:[%s5423_s7 + $0x550] sm:$0xff] }
 0x2d8   : > { %1648 = vadd.xlane.f32.xlu1 %v7802_v37  ;;  %3768 = vmatmul.mubr.f32.gmra.mrb[42].mxu0 %v8319_v38  ;;  %v8334_v37 = vld [vmem:[%s5423_s7 + $0x5c8] sm:$0xff] }
 0x2d9   : > { %1646 = vadd.xlane.f32.xlu0 %v7761_v23  ;;  %v1381_v51 = vpop.xlane.xlu1 %1380  ;;  %3254 = vmatmul.mubr.f32.gmra.mrb[42].mxu1 %v5189_v56  ;;  %v4470_v23 = vld [vmem:[%s5423_s7 + $0x5f8] sm:$0xff] }
 0x2da   : > { %v1379_v32 = vpop.xlane.xlu0 %1378  ;;  %v8327_v22 = vadd.f32 %v1381_v51, %v7610_v10  ;;  %3773 = vmatprep.mubr.f32.mxu0 %v4469_v60  ;;  %3259 = vmatprep.mubr.f32.mxu1 %v5190_v27  ;;  %v1687_v10 = vmul.f32 %v8038_v63, %v8038_v63  ;;  %v8353_v63 = vld [vmem:[%s5423_s7 + $0x5e8] sm:$0xff]  ;;  %v5193_v27 = vld [vmem:[%s5423_s7 + $0x570] sm:$0xff] }
 0x2db   : > { %v8330_v59 = vadd.f32 %v1379_v32, %v7613_v42  ;;  %v1686_v42 = vmul.f32 %v8042_v5, %v8042_v5  ;;  %v4471_v5 = vld [vmem:[%s5423_s7 + $0x698] sm:$0xff]  ;;  %v1689_v32 = vmul.f32 %v8059_v18, %v8059_v18  ;;  %v8370_v18 = vld [vmem:[%s5423_s7 + $0x688] sm:$0xff] }
 0x2dc   : > { %1652 = vadd.xlane.f32.xlu1 %v7894_v11  ;;  %3774 = vmatmul.mubr.f32.gmra.mrb[44].mxu0 %v8334_v37 }
 0x2dd   : > { %1650 = vadd.xlane.f32.xlu0 %v7849_v43  ;;  %v1385_v52 = vpop.xlane.xlu1 %1384  ;;  %3260 = vmatmul.mubr.f32.gmra.mrb[44].mxu1 %v5191_v33  ;;  %v5192_v43 = vld [vmem:[%s5423_s7 + $0x568] sm:$0xff] }
 0x2de   : > { %v1383_v54 = vpop.xlane.xlu0 %1382  ;;  %v8346_v60 = vadd.f32 %v1385_v52, %v7642_v45  ;;  %3779 = vmatprep.mubr.f32.mxu0 %v4470_v23  ;;  %3265 = vmatprep.mubr.f32.mxu1 %v5192_v43  ;;  %v1688_v45 = vmul.f32 %v8063_v31, %v8063_v31  ;;  %v10604_v52 = vld [vmem:[#allocation46_spill] sm:$0xff]  ;;  %v4472_v31 = vld [vmem:[%s5423_s7 + $0x6b8] sm:$0xff] }
 0x2df   : > { %v8349_v51 = vadd.f32 %v1383_v54, %v7645_v62 }
 0x2e0   : > { %1720 = vadd.xlane.f32.xlu1 %v1687_v10  ;;  %3780 = vmatmul.mubr.f32.gmra.mrb[46].mxu0 %v8353_v63  ;;  %v5194_v10 = vld [vmem:[%s5423_s7 + $0x608] sm:$0xff] }
 0x2e1   : > { %1718 = vadd.xlane.f32.xlu0 %v1686_v42  ;;  %v1389_v56 = vpop.xlane.xlu1 %1388  ;;  %3266 = vmatmul.mubr.f32.gmra.mrb[46].mxu1 %v5193_v27  ;;  %v1691_v42 = vmul.f32 %v8080_v25, %v8080_v25  ;;  %v5196_v25 = vld [vmem:[%s5423_s7 + $0x628] sm:$0xff] }
 0x2e2   : > { %v1387_v62 = vpop.xlane.xlu0 %1386  ;;  %v8363_v23 = vadd.f32 %v1389_v56, %v7672_v7  ;;  %3785 = vmatprep.mubr.f32.mxu0 %v4471_v5  ;;  %3271 = vmatprep.mubr.f32.mxu1 %v5194_v10  ;;  %v1690_v7 = vmul.f32 %v8084_v47, %v8084_v47  ;;  %v5195_v5 = vld [vmem:[%s5423_s7 + $0x610] sm:$0xff]  ;;  %v4473_v47 = vld [vmem:[%s5423_s7 + $0x6d8] sm:$0xff] }
 0x2e3   : > { %v8366_v54 = vadd.f32 %v1387_v62, %v10604_v52  ;;  %v5197_v52 = vld [vmem:[%s5423_s7 + $0x630] sm:$0xff] }
 0x2e4   : > { %1724 = vadd.xlane.f32.xlu1 %v1689_v32  ;;  %3786 = vmatmul.mubr.f32.gmra.mrb[48].mxu0 %v8370_v18  ;;  %v8386_v32 = vld [vmem:[%s5423_s7 + $0x6a8] sm:$0xff] }
 0x2e5   : > { %1722 = vadd.xlane.f32.xlu0 %v1688_v45  ;;  %v1393_v33 = vpop.xlane.xlu1 %1392  ;;  %3272 = vmatmul.mubr.f32.gmra.mrb[48].mxu1 %v5195_v5  ;;  %v1693_v45 = vmul.f32 %v8101_v36, %v8101_v36  ;;  %v8404_v36 = vld [vmem:[%s5423_s7 + $0x6c8] sm:$0xff] }
 0x2e6   : > { %v1391_v43 = vpop.xlane.xlu0 %1390  ;;  %v8380_v56 = vadd.f32 %v1393_v33, %v7710_v21  ;;  %3791 = vmatprep.mubr.f32.mxu0 %v4472_v31  ;;  %3277 = vmatprep.mubr.f32.mxu1 %v5196_v25  ;;  %v1692_v21 = vmul.f32 %v8105_v19, %v8105_v19  ;;  %v4474_v19 = vld [vmem:[%s5423_s7 + $0x6f8] sm:$0xff] }
 0x2e7   : > { %v8383_v62 = vadd.f32 %v1391_v43, %v7713_v44  ;;  %v5199_v43 = vld [vmem:[%s5423_s7 + $0x650] sm:$0xff] }
 0x2e8   : > { %1728 = vadd.xlane.f32.xlu1 %v1691_v42  ;;  %3792 = vmatmul.mubr.f32.gmra.mrb[50].mxu0 %v8386_v32  ;;  %v5198_v42 = vld [vmem:[%s5423_s7 + $0x648] sm:$0xff] }
 0x2e9   : > { %1726 = vadd.xlane.f32.xlu0 %v1690_v7  ;;  %v1397_v27 = vpop.xlane.xlu1 %1396  ;;  %3278 = vmatmul.mubr.f32.gmra.mrb[50].mxu1 %v5197_v52  ;;  %v1695_v7 = vmul.f32 %v8122_v15, %v8122_v15  ;;  %v4475_v15 = vld [vmem:[%s5423_s7 + $0x798] sm:$0xff] }
 0x2ea   : > { %v1395_v44 = vpop.xlane.xlu0 %1394  ;;  %v8397_v10 = vadd.f32 %v1397_v27, %v7741_v34  ;;  %3797 = vmatprep.mubr.f32.mxu0 %v4473_v47  ;;  %3283 = vmatprep.mubr.f32.mxu1 %v5198_v42  ;;  %v1694_v34 = vmul.f32 %v8126_v55, %v8126_v55  ;;  %v5200_v47 = vld [vmem:[%s5423_s7 + $0x668] sm:$0xff]  ;;  %v1697_v55 = vmul.f32 %v8143_v0, %v8143_v0  ;;  %v5201_v27 = vld [vmem:[%s5423_s7 + $0x670] sm:$0xff] }
 0x2eb   : > { %v8400_v31 = vadd.f32 %v1395_v44, %v7744_v28  ;;  %v5202_v0 = vld [vmem:[%s5423_s7 + $0x708] sm:$0xff]  ;;  %v1699_v42 = vmul.f32 %v8164_v14, %v8164_v14 }
 0x2ec   : > { %1732 = vadd.xlane.f32.xlu1 %v1693_v45  ;;  %3798 = vmatmul.mubr.f32.gmra.mrb[52].mxu0 %v8404_v36  ;;  %v1696_v45 = vmul.f32 %v8147_v57, %v8147_v57  ;;  %v4476_v57 = vld [vmem:[%s5423_s7 + $0x7b8] sm:$0xff]  ;;  %v5204_v14 = vld [vmem:[%s5423_s7 + $0x728] sm:$0xff] }
 0x2ed   : > { %1730 = vadd.xlane.f32.xlu0 %v1692_v21  ;;  %v1465_v33 = vpop.xlane.xlu1 %1464  ;;  %3284 = vmatmul.mubr.f32.gmra.mrb[52].mxu1 %v5199_v43  ;;  %v8426_v21 = vld [vmem:[%s5423_s7 + $0x6e8] sm:$0xff]  ;;  %v1701_v43 = vmul.f32 %v8185_v46, %v8185_v46 }
 0x2ee   : > { %v1463_v28 = vpop.xlane.xlu0 %1462  ;;  %v8414_v5 = vadd.f32 %v1465_v33, %v7775_v29  ;;  %3803 = vmatprep.mubr.f32.mxu0 %v4474_v19  ;;  %3289 = vmatprep.mubr.f32.mxu1 %v5200_v47  ;;  %v1698_v19 = vmul.f32 %v8168_v40, %v8168_v40  ;;  %v4477_v40 = vld [vmem:[%s5423_s7 + $0x7d8] sm:$0xff]  ;;  %v1700_v47 = vmul.f32 %v8189_v39, %v8189_v39  ;;  %v5206_v46 = vld [vmem:[%s5423_s7 + $0x748] sm:$0xff] }
 0x2ef   : > { %v8417_v25 = vadd.f32 %v1463_v28, %v7778_v8  ;;  %v4478_v39 = vld [vmem:[%s5423_s7 + $0x7f8] sm:$0xff] }
 0x2f0   : > { %1736 = vadd.xlane.f32.xlu1 %v1695_v7  ;;  %3804 = vmatmul.mubr.f32.gmra.mrb[54].mxu0 %v8426_v21  ;;  %v8443_v7 = vld [vmem:[%s5423_s7 + $0x788] sm:$0xff] }
 0x2f1   : > { %1734 = vadd.xlane.f32.xlu0 %v1694_v34  ;;  %v1469_v29 = vpop.xlane.xlu1 %1468  ;;  %3290 = vmatmul.mubr.f32.gmra.mrb[54].mxu1 %v5201_v27  ;;  %v5203_v34 = vld [vmem:[%s5423_s7 + $0x710] sm:$0xff]  ;;  %v1702_v27 = vmul.f32 %v8210_v20, %v8210_v20  ;;  %v1705_v20 = vmul.f32 %v8227_v2, %v8227_v2  ;;  %v1707_v2 = vmul.f32 %v8248_v4, %v8248_v4 }
 0x2f2   : > { %v1467_v8 = vpop.xlane.xlu0 %1466  ;;  %v8431_v44 = vadd.f32 %v1469_v29, %v7805_v1  ;;  %3809 = vmatprep.mubr.f32.mxu0 %v4475_v15  ;;  %3295 = vmatprep.mubr.f32.mxu1 %v5202_v0  ;;  %v8460_v15 = vld [vmem:[%s5423_s7 + $0x7a8] sm:$0xff] }
 0x2f3   : > { %v8434_v52 = vadd.f32 %v1467_v8, %v7808_v53  ;;  %v1703_v8 = vmul.f32 %v8206_v50, %v8206_v50  ;;  %v8477_v0 = vld [vmem:[%s5423_s7 + $0x7c8] sm:$0xff] }
 0x2f4   : > { %1740 = vadd.xlane.f32.xlu1 %v1697_v55  ;;  %3810 = vmatmul.mubr.f32.gmra.mrb[56].mxu0 %v8443_v7  ;;  %v5205_v55 = vld [vmem:[%s5423_s7 + $0x730] sm:$0xff]  ;;  %v5208_v50 = vld [vmem:[%s5423_s7 + $0x768] sm:$0xff] }
 0x2f5   : > { %1738 = vadd.xlane.f32.xlu0 %v1696_v45  ;;  %v1473_v1 = vpop.xlane.xlu1 %1472  ;;  %3296 = vmatmul.mubr.f32.gmra.mrb[56].mxu1 %v5203_v34 }
 0x2f6   : > { %v1471_v53 = vpop.xlane.xlu0 %1470  ;;  %v8448_v33 = vadd.f32 %v1473_v1, %v7843_v6  ;;  %3815 = vmatprep.mubr.f32.mxu0 %v4476_v57  ;;  %3301 = vmatprep.mubr.f32.mxu1 %v5204_v14  ;;  %v1704_v1 = vmul.f32 %v8231_v13, %v8231_v13  ;;  %v10605_v13 = vld [vmem:[#allocation74_spill] sm:$0xff] }
 0x2f7   : > { %v8451_v28 = vadd.f32 %v1471_v53, %v7846_v49  ;;  %v8493_v53 = vld [vmem:[%s5423_s7 + $0x7e8] sm:$0xff] }
 0x2f8   : > { %1744 = vadd.xlane.f32.xlu1 %v1699_v42  ;;  %3816 = vmatmul.mubr.f32.gmra.mrb[58].mxu0 %v8460_v15 }
 0x2f9   : > { %1742 = vadd.xlane.f32.xlu0 %v1698_v19  ;;  %v1477_v6 = vpop.xlane.xlu1 %1476  ;;  %3302 = vmatmul.mubr.f32.gmra.mrb[58].mxu1 %v5205_v55 }
 0x2fa   : > { %v1475_v49 = vpop.xlane.xlu0 %1474  ;;  %v8465_v45 = vadd.f32 %v1477_v6, %v7874_v35  ;;  %3821 = vmatprep.mubr.f32.mxu0 %v4477_v40  ;;  %3307 = vmatprep.mubr.f32.mxu1 %v5206_v46  ;;  %v10607_v46 = vld [vmem:[#allocation62_spill] sm:$0xff] }
 0x2fb   : > { %v8468_v29 = vadd.f32 %v1475_v49, %v7877_v16  ;;  %v5207_v16 = vld [vmem:[%s5423_s7 + $0x750] sm:$0xff]  ;;  %v10606_v49 = vld [vmem:[#allocation10_spill] sm:$0xff] }
 0x2fc   : > { %1748 = vadd.xlane.f32.xlu1 %v1701_v43  ;;  %3822 = vmatmul.mubr.f32.gmra.mrb[60].mxu0 %v8477_v0  ;;  %v1706_v43 = vmul.f32 %v10605_v13, %v10605_v13  ;;  %v10615_v13 = vld [vmem:[#allocation82_spill] sm:$0xff] }
 0x2fd   : > { %1746 = vadd.xlane.f32.xlu0 %v1700_v47  ;;  %v1481_v35 = vpop.xlane.xlu1 %1480  ;;  %3308 = vmatmul.mubr.f32.gmra.mrb[60].mxu1 %v5207_v16  ;;  %v10611_v16 = vld [vmem:[#allocation48_spill] sm:$0xff] }
 0x2fe   : > { %v1479_v57 = vpop.xlane.xlu0 %1478  ;;  %v8482_v42 = vadd.f32 %v1481_v35, %v7899_v26  ;;  %3827 = vmatprep.mubr.f32.mxu0 %v4478_v39  ;;  %3313 = vmatprep.mubr.f32.mxu1 %v5208_v50  ;;  %v5209_v26 = vld [vmem:[%s5423_s7 + $0x770] sm:$0xff]  ;;  %v10609_v35 = vld [vmem:[#allocation80_spill] sm:$0xff] }
 0x2ff   : > { %v8485_v19 = vadd.f32 %v1479_v57, %v7902_v24  ;;  %v10608_v39 = vld [vmem:[#allocation43_spill] sm:$0xff] }
 0x300   : > { %1752 = vadd.xlane.f32.xlu1 %v1703_v8  ;;  %3828 = vmatmul.mubr.f32.gmra.mrb[62].mxu0 %v8493_v53  ;;  %v1708_v4 = vmul.f32 %v10608_v39, %v10608_v39 }
 0x301   : > { %1750 = vadd.xlane.f32.xlu0 %v1702_v27  ;;  %v1485_v34 = vpop.xlane.xlu1 %1484  ;;  %3314 = vmatmul.mubr.f32.gmra.mrb[62].mxu1 %v5209_v26  ;;  %v10613_v26 = vld [vmem:[#allocation49_spill] sm:$0xff] }
 0x302   : > { %v1483_v14 = vpop.xlane.xlu0 %1482  ;;  %v8498_v24 = vadd.f32 %v1485_v34, %v7912_v17 }
 0x303   : > { %v8501_v40 = vadd.f32 %v1483_v14, %v7915_v30  ;;  %v1709_v30 = vmul.f32 %v8269_v9, %v8269_v9  ;;  %v1710_v9 = vmul.f32 %v8291_v48, %v8291_v48 }
 0x304   : > { %1756 = vadd.xlane.f32.xlu1 %v1705_v20  ;;  %v5210_v20 = vld [vmem:[%s5423_s7 + $0x638] sm:$0xff] }
 0x305   : > { %1754 = vadd.xlane.f32.xlu0 %v1704_v1  ;;  %v1489_v47 = vpop.xlane.xlu1 %1488  ;;  %v1711_v1 = vmul.f32 %v5210_v20, %v5210_v20  ;;  %v5214_v20 = vld [vmem:[%s5423_s7 + $0x718] sm:$0xff] }
 0x306   : > { %v1487_v6 = vpop.xlane.xlu0 %1486  ;;  %v8508_v55 = vadd.f32 %v1489_v47, %v10606_v49  ;;  %v5211_v47 = vld [vmem:[%s5423_s7 + $0x678] sm:$0xff] }
 0x307   : > { %v8511_v17 = vadd.f32 %v1487_v6, %v10607_v46  ;;  %v1713_v6 = vmul.f32 %v5211_v47, %v5211_v47  ;;  %v5212_v49 = vld [vmem:[%s5423_s7 + $0x658] sm:$0xff] }
 0x308   : > { %1760 = vadd.xlane.f32.xlu1 %v1707_v2  ;;  %v1712_v46 = vmul.f32 %v5212_v49, %v5212_v49  ;;  %v1717_v49 = vmul.f32 %v7894_v11, %v7894_v11  ;;  %v10633_v11 = vld [vmem:[#allocation47_spill] sm:$0xff] }
 0x309   : > { %1758 = vadd.xlane.f32.xlu0 %v1706_v43  ;;  %v1493_v8 = vpop.xlane.xlu1 %1492 }
 0x30a   : > { %v1491_v27 = vpop.xlane.xlu0 %1490  ;;  %v8518_v57 = vadd.f32 %v1493_v8, %v10609_v35  ;;  %v10619_v8 = vld [vmem:[#allocation51_spill] sm:$0xff]  ;;  %v5213_v35 = vld [vmem:[%s5423_s7 + $0x738] sm:$0xff] }
 0x30b   : > { %v8521_v50 = vadd.f32 %v1491_v27, %v10611_v16  ;;  %v1715_v16 = vmul.f32 %v5213_v35, %v5213_v35  ;;  %v10627_v35 = vld [vmem:[#allocation54_spill] sm:$0xff] }
 0x30c   : > { %10610 = vst [vmem:[#allocation16_spill] sm:$0xff] %v8518_v57  ;;  %1764 = vadd.xlane.f32.xlu1 %v1709_v30  ;;  %v10688_v57 = vld [vmem:[#allocation66_spill] sm:$0xff] }
 0x30d   : > { %10612 = vst [vmem:[#allocation68_spill] sm:$0xff] %v8521_v50  ;;  %1762 = vadd.xlane.f32.xlu0 %v1708_v4  ;;  %v1497_v34 = vpop.xlane.xlu1 %1496  ;;  %v10617_v4 = vld [vmem:[#allocation83_spill] sm:$0xff] }
 0x30e   : > { %v1495_v14 = vpop.xlane.xlu0 %1494  ;;  %v8527_v2 = vadd.f32 %v1497_v34, %v10613_v26  ;;  %v10687_v50 = vld [vmem:[#allocation67_spill] sm:$0xff] }
 0x30f   : > { %v8530_v43 = vadd.f32 %v1495_v14, %v10615_v13  ;;  %v10621_v14 = vld [vmem:[#allocation52_spill] sm:$0xff]  ;;  %v10623_v13 = vld [vmem:[#allocation85_spill] sm:$0xff] }
 0x310   : > { %10614 = vst [vmem:[#allocation17_spill] sm:$0xff] %v8527_v2  ;;  %1768 = vadd.xlane.f32.xlu1 %v1711_v1  ;;  %v1714_v1 = vmul.f32 %v5214_v20, %v5214_v20  ;;  %v10682_v2 = vld [vmem:[#allocation71_spill] sm:$0xff] }
 0x311   : > { %10616 = vst [vmem:[#allocation18_spill] sm:$0xff] %v8530_v43  ;;  %1766 = vadd.xlane.f32.xlu0 %v1710_v9  ;;  %v1501_v30 = vpop.xlane.xlu1 %1500  ;;  %v10681_v43 = vld [vmem:[#allocation65_spill] sm:$0xff] }
 0x312   : > { %v1499_v39 = vpop.xlane.xlu0 %1498  ;;  %v8535_v48 = vadd.f32 %v1501_v30, %v10617_v4  ;;  %v5215_v30 = vld [vmem:[%s5423_s7 + $0x758] sm:$0xff]  ;;  %v10625_v4 = vld [vmem:[#allocation86_spill] sm:$0xff] }
 0x313   : > { %v8538_v27 = vadd.f32 %v1499_v39, %v10619_v8 }
 0x314   : > { %10618 = vst [vmem:[#allocation19_spill] sm:$0xff] %v8535_v48  ;;  %1772 = vadd.xlane.f32.xlu1 %v1713_v6  ;;  %v1716_v6 = vmul.f32 %v5215_v30, %v5215_v30  ;;  %v10634_v30 = vld [vmem:[#allocation79_spill] sm:$0xff]  ;;  %v10676_v48 = vld [vmem:[#allocation61_spill] sm:$0xff] }
 0x315   : > { %10620 = vst [vmem:[#allocation20_spill] sm:$0xff] %v8538_v27  ;;  %1770 = vadd.xlane.f32.xlu0 %v1712_v46  ;;  %v1505_v9 = vpop.xlane.xlu1 %1504  ;;  %v10675_v27 = vld [vmem:[#allocation33_spill] sm:$0xff] }
 0x316   : > { %v1503_v34 = vpop.xlane.xlu0 %1502  ;;  %v8543_v26 = vadd.f32 %v1505_v9, %v10621_v14  ;;  %v10629_v14 = vld [vmem:[#allocation55_spill] sm:$0xff] }
 0x317   : > { %v8546_v47 = vadd.f32 %v1503_v34, %v10623_v13 }
 0x318   : > { %10622 = vst [vmem:[#allocation21_spill] sm:$0xff] %v8543_v26  ;;  %1776 = vadd.xlane.f32.xlu1 %v1715_v16  ;;  %v10670_v26 = vld [vmem:[#allocation57_spill] sm:$0xff] }
 0x319   : > { %10624 = vst [vmem:[#allocation22_spill] sm:$0xff] %v8546_v47  ;;  %1774 = vadd.xlane.f32.xlu0 %v1714_v1  ;;  %v1509_v46 = vpop.xlane.xlu1 %1508  ;;  %v10631_v1 = vld [vmem:[#allocation88_spill] sm:$0xff] }
 0x31a   : > { %v1507_v39 = vpop.xlane.xlu0 %1506  ;;  %v8552_v8 = vadd.f32 %v1509_v46, %v10625_v4  ;;  %v10635_v4 = vld [vmem:[#allocation89_spill] sm:$0xff] }
 0x31b   : > { %v8555_v20 = vadd.f32 %v1507_v39, %v10627_v35  ;;  %v10637_v39 = vld [vmem:[#allocation90_spill] sm:$0xff]  ;;  %v10640_v35 = vld [vmem:[#allocation81_spill] sm:$0xff] }
 0x31c   : > { %10626 = vst [vmem:[#allocation23_spill] sm:$0xff] %v8552_v8  ;;  %1780 = vadd.xlane.f32.xlu1 %v1717_v49 }
 0x31d   : > { %10628 = vst [vmem:[#allocation24_spill] sm:$0xff] %v8555_v20  ;;  %1778 = vadd.xlane.f32.xlu0 %v1716_v6  ;;  %v1513_v9 = vpop.xlane.xlu1 %1512  ;;  %v10639_v6 = vld [vmem:[#allocation50_spill] sm:$0xff]  ;;  %v10664_v20 = vld [vmem:[#allocation97_spill] sm:$0xff] }
 0x31e   : > { %v1511_v34 = vpop.xlane.xlu0 %1510  ;;  %v8558_v16 = vadd.f32 %v1513_v9, %v10629_v14 }
 0x31f   : > { %v8561_v13 = vadd.f32 %v1511_v34, %v10631_v1  ;;  %v10641_v34 = vld [vmem:[#allocation92_spill] sm:$0xff] }
 0x320   : > { %10630 = vst [vmem:[#allocation25_spill] sm:$0xff] %v8558_v16  ;;  %1848 = vadd.xlane.f32.xlu1 %v10633_v11  ;;  %v10643_v11 = vld [vmem:[#allocation93_spill] sm:$0xff]  ;;  %v10646_v16 = vld [vmem:[#allocation84_spill] sm:$0xff] }
 0x321   : > { %10632 = vst [vmem:[#allocation26_spill] sm:$0xff] %v8561_v13  ;;  %1846 = vadd.xlane.f32.xlu0 %v10634_v30  ;;  %v1517_v47 = vpop.xlane.xlu1 %1516  ;;  %v10645_v30 = vld [vmem:[#allocation53_spill] sm:$0xff] }
 0x322   : > { %v1515_v46 = vpop.xlane.xlu0 %1514  ;;  %v8566_v8 = vadd.f32 %v1517_v47, %v10635_v4 }
 0x323   : > { %v8569_v49 = vadd.f32 %v1515_v46, %v10637_v39  ;;  %v10647_v46 = vld [vmem:[#allocation95_spill] sm:$0xff] }
 0x324   : > { %10636 = vst [vmem:[#allocation27_spill] sm:$0xff] %v8566_v8  ;;  %1852 = vadd.xlane.f32.xlu1 %v10639_v6  ;;  %v10649_v6 = vld [vmem:[#allocation96_spill] sm:$0xff]  ;;  %v10652_v8 = vld [vmem:[#allocation87_spill] sm:$0xff] }
 0x325   : > { %10638 = vst [vmem:[#allocation28_spill] sm:$0xff] %v8569_v49  ;;  %1850 = vadd.xlane.f32.xlu0 %v10640_v35  ;;  %v1521_v9 = vpop.xlane.xlu1 %1520  ;;  %v10651_v35 = vld [vmem:[#allocation56_spill] sm:$0xff] }
 0x326   : > { %v1519_v14 = vpop.xlane.xlu0 %1518  ;;  %v8574_v1 = vadd.f32 %v1521_v9, %v10641_v34 }
 0x327   : > { %v8577_v13 = vadd.f32 %v1519_v14, %v10643_v11  ;;  %v10653_v14 = vld [vmem:[#allocation98_spill] sm:$0xff] }
 0x328   : > { %10642 = vst [vmem:[#allocation29_spill] sm:$0xff] %v8574_v1  ;;  %1856 = vadd.xlane.f32.xlu1 %v10645_v30  ;;  %v10655_v30 = vld [vmem:[#allocation99_spill] sm:$0xff] }
 0x329   : > { %10644 = vst [vmem:[#allocation30_spill] sm:$0xff] %v8577_v13  ;;  %1854 = vadd.xlane.f32.xlu0 %v10646_v16  ;;  %v1525_v47 = vpop.xlane.xlu1 %1524  ;;  %v10657_v16 = vld [vmem:[#allocation94_spill] sm:$0xff]  ;;  %v10658_v1 = vld [vmem:[#allocation91_spill] sm:$0xff] }
 0x32a   : > { %v1523_v4 = vpop.xlane.xlu0 %1522  ;;  %v8582_v39 = vadd.f32 %v1525_v47, %v10647_v46 }
 0x32b   : > { %v8585_v49 = vadd.f32 %v1523_v4, %v10649_v6  ;;  %v10659_v4 = vld [vmem:[#allocation101_spill] sm:$0xff] }
 0x32c   : > { %10648 = vst [vmem:[#allocation31_spill] sm:$0xff] %v8582_v39  ;;  %1860 = vadd.xlane.f32.xlu1 %v10651_v35 }
 0x32d   : > { %10650 = vst [vmem:[#allocation32_spill] sm:$0xff] %v8585_v49  ;;  %1858 = vadd.xlane.f32.xlu0 %v10652_v8  ;;  %v1593_v9 = vpop.xlane.xlu1 %1592  ;;  %v10661_v49 = vld [vmem:[#allocation5_spill] sm:$0xff]  ;;  %v10663_v8 = vld [vmem:[#allocation100_spill] sm:$0xff] }
 0x32e   : > { %v1591_v34 = vpop.xlane.xlu0 %1590  ;;  %v8590_v11 = vadd.f32 %v1593_v9, %v10653_v14 }
 0x32f   : > { %v8593_v13 = vadd.f32 %v1591_v34, %v10655_v30  ;;  %v10665_v34 = vld [vmem:[#allocation6_spill] sm:$0xff] }
 0x330   : > { %10654 = vst [vmem:[#allocation34_spill] sm:$0xff] %v8590_v11  ;;  %1864 = vadd.xlane.f32.xlu1 %v10657_v16 }
 0x331   : > { %10656 = vst [vmem:[#allocation35_spill] sm:$0xff] %v8593_v13  ;;  %1862 = vadd.xlane.f32.xlu0 %v10658_v1  ;;  %v1597_v47 = vpop.xlane.xlu1 %1596  ;;  %v10667_v13 = vld [vmem:[#allocation58_spill] sm:$0xff]  ;;  %v10669_v1 = vld [vmem:[#allocation7_spill] sm:$0xff] }
 0x332   : > { %v1595_v46 = vpop.xlane.xlu0 %1594  ;;  %v8598_v6 = vadd.f32 %v1597_v47, %v10659_v4 }
 0x333   : > { %v8601_v39 = vadd.f32 %v1595_v46, %v10661_v49  ;;  %v10671_v49 = vld [vmem:[#allocation59_spill] sm:$0xff] }
 0x334   : > { %10660 = vst [vmem:[#allocation36_spill] sm:$0xff] %v8598_v6  ;;  %1868 = vadd.xlane.f32.xlu1 %v10663_v8 }
 0x335   : > { %10662 = vst [vmem:[#allocation69_spill] sm:$0xff] %v8601_v39  ;;  %1866 = vadd.xlane.f32.xlu0 %v10664_v20  ;;  %v1601_v9 = vpop.xlane.xlu1 %1600  ;;  %v10673_v39 = vld [vmem:[#allocation9_spill] sm:$0xff] }
 0x336   : > { %v1599_v14 = vpop.xlane.xlu0 %1598  ;;  %v8606_v30 = vadd.f32 %v1601_v9, %v10665_v34 }
 0x337   : > { %v8609_v11 = vadd.f32 %v1599_v14, %v10667_v13  ;;  %v10677_v13 = vld [vmem:[#allocation11_spill] sm:$0xff] }
 0x338   : > { %10666 = vst [vmem:[#allocation70_spill] sm:$0xff] %v8606_v30  ;;  %1872 = vadd.xlane.f32.xlu1 %v10669_v1 }
 0x339   : > { %10668 = vst [vmem:[#allocation38_spill] sm:$0xff] %v8609_v11  ;;  %1870 = vadd.xlane.f32.xlu0 %v10670_v26  ;;  %v1605_v47 = vpop.xlane.xlu1 %1604  ;;  %v10679_v11 = vld [vmem:[#allocation63_spill] sm:$0xff] }
 0x33a   : > { %v1603_v4 = vpop.xlane.xlu0 %1602  ;;  %v8614_v46 = vadd.f32 %v1605_v47, %v10671_v49 }
 0x33b   : > { %v8617_v6 = vadd.f32 %v1603_v4, %v10673_v39  ;;  %v10683_v39 = vld [vmem:[#allocation12_spill] sm:$0xff] }
 0x33c   : > { %10672 = vst [vmem:[#allocation39_spill] sm:$0xff] %v8614_v46  ;;  %1876 = vadd.xlane.f32.xlu1 %v10675_v27 }
 0x33d   : > { %10674 = vst [vmem:[#allocation72_spill] sm:$0xff] %v8617_v6  ;;  %1874 = vadd.xlane.f32.xlu0 %v10676_v48  ;;  %v1609_v9 = vpop.xlane.xlu1 %1608  ;;  %v10685_v6 = vld [vmem:[#allocation64_spill] sm:$0xff] }
 0x33e   : > { %v1607_v34 = vpop.xlane.xlu0 %1606  ;;  %v8622_v14 = vadd.f32 %v1609_v9, %v10677_v13 }
 0x33f   : > { %v8625_v30 = vadd.f32 %v1607_v34, %v10679_v11  ;;  %v10689_v11 = vld [vmem:[#allocation37_spill] sm:$0xff] }
 0x340   : > { %10678 = vst [vmem:[#allocation73_spill] sm:$0xff] %v8622_v14  ;;  %1880 = vadd.xlane.f32.xlu1 %v10681_v43 }
 0x341   : > { %10680 = vst [vmem:[#allocation41_spill] sm:$0xff] %v8625_v30  ;;  %1878 = vadd.xlane.f32.xlu0 %v10682_v2  ;;  %v1613_v47 = vpop.xlane.xlu1 %1612  ;;  %v10691_v30 = vld [vmem:[#allocation13_spill] sm:$0xff] }
 0x342   : > { %v1611_v49 = vpop.xlane.xlu0 %1610  ;;  %v8630_v4 = vadd.f32 %v1613_v47, %v10683_v39 }
 0x343   : > { %v8633_v46 = vadd.f32 %v1611_v49, %v10685_v6  ;;  %v10693_v6 = vld [vmem:[#allocation40_spill] sm:$0xff] }
 0x344   : > { %10684 = vst [vmem:[#allocation42_spill] sm:$0xff] %v8630_v4  ;;  %1884 = vadd.xlane.f32.xlu1 %v10687_v50 }
 0x345   : > { %10686 = vst [vmem:[#allocation75_spill] sm:$0xff] %v8633_v46  ;;  %1882 = vadd.xlane.f32.xlu0 %v10688_v57  ;;  %v1617_v9 = vpop.xlane.xlu1 %1616  ;;  %v10694_v46 = vld [vmem:[#allocation14_spill] sm:$0xff] }
 0x346   : > { %v1615_v13 = vpop.xlane.xlu0 %1614  ;;  %v8638_v34 = vadd.f32 %v1617_v9, %v10689_v11 }
 0x347   : > { %v8641_v14 = vadd.f32 %v1615_v13, %v10691_v30  ;;  %v10695_v30 = vld [vmem:[#allocation76_spill] sm:$0xff] }
 0x348   : > { %10690 = vst [vmem:[#allocation44_spill] sm:$0xff] %v8638_v34  ;;  %1888 = vadd.xlane.f32.xlu1 %v8319_v38 }
 0x349   : > { %10692 = vst [vmem:[#allocation77_spill] sm:$0xff] %v8641_v14  ;;  %1886 = vadd.xlane.f32.xlu0 %v8304_v61  ;;  %v1621_v47 = vpop.xlane.xlu1 %1620  ;;  %v10697_v14 = vld [vmem:[#allocation15_spill] sm:$0xff] }
 0x34a   : > { %v1619_v39 = vpop.xlane.xlu0 %1618  ;;  %v8646_v49 = vadd.f32 %v1621_v47, %v10693_v6 }
 0x34b   : > { %v8649_v4 = vadd.f32 %v1619_v39, %v10694_v46 }
 0x34c   : > { %1892 = vadd.xlane.f32.xlu1 %v8353_v63 }
 0x34d   : > { %1890 = vadd.xlane.f32.xlu0 %v8334_v37  ;;  %v1625_v9 = vpop.xlane.xlu1 %1624 }
 0x34e   : > { %v1623_v11 = vpop.xlane.xlu0 %1622  ;;  %v8654_v13 = vadd.f32 %v1625_v9, %v10695_v30 }
 0x34f   : > { %v8657_v34 = vadd.f32 %v1623_v11, %v10697_v14 }
 0x350   : > { %10696 = vst [vmem:[#allocation8_spill] sm:$0xff] %v8654_v13  ;;  %1896 = vadd.xlane.f32.xlu1 %v8386_v32 }
 0x351   : > { %10698 = vst [vmem:[#allocation60_spill] sm:$0xff] %v8657_v34  ;;  %1894 = vadd.xlane.f32.xlu0 %v8370_v18  ;;  %v1629_v47 = vpop.xlane.xlu1 %1628  ;;  %v5217_v34 = vld [vmem:[%s5423_s7 + $0x88] sm:$0xff] }
 0x352   : > { %v1627_v6 = vpop.xlane.xlu0 %1626  ;;  %v8662_v46 = vadd.f32 %v1629_v47, %v8297_v41 }
 0x353   : > { %v8665_v39 = vadd.f32 %v1627_v6, %v8300_v12 }
 0x354   : > { %10699 = vst [vmem:[#allocation45_spill] sm:$0xff] %v8662_v46  ;;  %1900 = vadd.xlane.f32.xlu1 %v8426_v21 }
 0x355   : > { %10700 = vst [vmem:[#allocation78_spill] sm:$0xff] %v8665_v39  ;;  %1898 = vadd.xlane.f32.xlu0 %v8404_v36  ;;  %v1633_v9 = vpop.xlane.xlu1 %1632 }
 0x356   : > { %v1631_v30 = vpop.xlane.xlu0 %1630  ;;  %v8670_v14 = vadd.f32 %v1633_v9, %v8312_v58  ;;  %v3129_v12 = vpop.f32.mrb[0].mxu1 }
 0x357   : > { %v8673_v11 = vadd.f32 %v1631_v30, %v8315_v3  ;;  %v3643_v41 = vpop.f32.mrb[0].mxu0  ;;  %v3131_v3 = vpop.f32.mrb[1].mxu1 }
 0x358   : > { %10701 = vst [vmem:[#allocation46_spill] sm:$0xff] %v8670_v14  ;;  %1904 = vadd.xlane.f32.xlu1 %v8460_v15  ;;  %v8677_v39 = vadd.f32 %v3643_v41, %v3129_v12  ;;  %v3645_v9 = vpop.f32.mrb[1].mxu0  ;;  %v1942_v41 = vmul.f32 %v5217_v34, %v5217_v34 }
 0x359   : > { %10702 = vst [vmem:[#allocation74_spill] sm:$0xff] %v8673_v11  ;;  %1902 = vadd.xlane.f32.xlu0 %v8443_v7  ;;  %v1637_v47 = vpop.xlane.xlu1 %1636  ;;  %v8685_v30 = vadd.f32 %v3645_v9, %v3131_v3  ;;  %v5216_v11 = vld [vmem:[%s5423_s7 + $0xa8] sm:$0xff] }
 0x35a   : > { %v1635_v6 = vpop.xlane.xlu0 %1634  ;;  %10703 = vst [vmem:[#allocation10_spill] sm:$0xff] %v8677_v39  ;;  %v8680_v46 = vadd.f32 %v1637_v47, %v8327_v22  ;;  %v1943_v14 = vmul.f32 %v5216_v11, %v5216_v11  ;;  %v3135_v22 = vpop.f32.mrb[2].mxu1  ;;  %v5218_v11 = vld [vmem:[%s5423_s7 + $0xe8] sm:$0xff] }
 0x35b   : > { %v8683_v58 = vadd.f32 %v1635_v6, %v8330_v59  ;;  %10706 = vst [vmem:[#allocation80_spill] sm:$0xff] %v8685_v30  ;;  %v3649_v12 = vpop.f32.mrb[2].mxu0  ;;  %v3137_v30 = vpop.f32.mrb[3].mxu1  ;;  %v1945_v34 = vmul.f32 %v5218_v11, %v5218_v11  ;;  %v5221_v11 = vld [vmem:[%s5423_s7 + $0x188] sm:$0xff] }
 0x35c   : > { %10704 = vst [vmem:[#allocation62_spill] sm:$0xff] %v8680_v46  ;;  %1908 = vadd.xlane.f32.xlu1 %v8493_v53  ;;  %v8691_v59 = vadd.f32 %v3649_v12, %v3135_v22  ;;  %v3651_v3 = vpop.f32.mrb[3].mxu0  ;;  %v5219_v46 = vld [vmem:[%s5423_s7 + $0xc8] sm:$0xff] }
 0x35d   : > { %10705 = vst [vmem:[#allocation43_spill] sm:$0xff] %v8683_v58  ;;  %1906 = vadd.xlane.f32.xlu0 %v8477_v0  ;;  %v1641_v47 = vpop.xlane.xlu1 %1640  ;;  %v8699_v58 = vadd.f32 %v3651_v3, %v3137_v30  ;;  %v1944_v13 = vmul.f32 %v5219_v46, %v5219_v46  ;;  %v5220_v3 = vld [vmem:[%s5423_s7 + $0x1a8] sm:$0xff] }
 0x35e   : > { %v1639_v39 = vpop.xlane.xlu0 %1638  ;;  %10707 = vst [vmem:[#allocation48_spill] sm:$0xff] %v8691_v59  ;;  %v8694_v6 = vadd.f32 %v1641_v47, %v8346_v60  ;;  %v3141_v22 = vpop.f32.mrb[4].mxu1  ;;  %v1947_v46 = vmul.f32 %v5220_v3, %v5220_v3 }
 0x35f   : > { %v8697_v9 = vadd.f32 %v1639_v39, %v8349_v51  ;;  %10709 = vst [vmem:[#allocation82_spill] sm:$0xff] %v8699_v58  ;;  %v3655_v12 = vpop.f32.mrb[4].mxu0  ;;  %v3143_v30 = vpop.f32.mrb[5].mxu1  ;;  %v1946_v58 = vmul.f32 %v5221_v11, %v5221_v11 }
 0x360   : > { %1976 = vadd.xlane.f32.xlu1 %v1943_v14  ;;  %v8703_v47 = vadd.f32 %v3655_v12, %v3141_v22  ;;  %v3657_v14 = vpop.f32.mrb[5].mxu0 }
 0x361   : > { %10708 = vst [vmem:[#allocation49_spill] sm:$0xff] %v8697_v9  ;;  %1974 = vadd.xlane.f32.xlu0 %v1942_v41  ;;  %v1645_v59 = vpop.xlane.xlu1 %1644  ;;  %v8711_v41 = vadd.f32 %v3657_v14, %v3143_v30  ;;  %v1949_v14 = vmul.f32 %v10651_v35, %v10651_v35  ;;  %v5222_v30 = vld [vmem:[%s5423_s7 + $0x1c8] sm:$0xff]  ;;  %v1951_v35 = vmul.f32 %v10657_v16, %v10657_v16 }
 0x362   : > { %v1643_v60 = vpop.xlane.xlu0 %1642  ;;  %10710 = vst [vmem:[#allocation83_spill] sm:$0xff] %v8703_v47  ;;  %v8706_v51 = vadd.f32 %v1645_v59, %v8363_v23  ;;  %v3147_v12 = vpop.f32.mrb[6].mxu1  ;;  %v1948_v3 = vmul.f32 %v5222_v30, %v5222_v30  ;;  %v1953_v16 = vmul.f32 %v10663_v8, %v10663_v8  ;;  %v1954_v8 = vmul.f32 %v10670_v26, %v10670_v26 }
 0x363   : > { %v8709_v39 = vadd.f32 %v1643_v60, %v8366_v54  ;;  %10711 = vst [vmem:[#allocation51_spill] sm:$0xff] %v8711_v41  ;;  %v3661_v9 = vpop.f32.mrb[6].mxu0  ;;  %v1957_v26 = vmul.f32 %v10675_v27, %v10675_v27  ;;  %v1958_v27 = vmul.f32 %v10682_v2, %v10682_v2  ;;  %v1961_v2 = vmul.f32 %v10687_v50, %v10687_v50 }
 0x364   : > { %1980 = vadd.xlane.f32.xlu1 %v1945_v34  ;;  %v8715_v23 = vadd.f32 %v3661_v9, %v3147_v12  ;;  %v3663_v60 = vpop.f32.mrb[7].mxu0  ;;  %v3149_v34 = vpop.f32.mrb[7].mxu1  ;;  %v1962_v50 = vmul.f32 %v8304_v61, %v8304_v61  ;;  %v1965_v61 = vmul.f32 %v8353_v63, %v8353_v63  ;;  %v1966_v63 = vmul.f32 %v8370_v18, %v8370_v18 }
 0x365   : > { %1978 = vadd.xlane.f32.xlu0 %v1944_v13  ;;  %v1649_v22 = vpop.xlane.xlu1 %1648  ;;  %v8723_v13 = vadd.f32 %v3663_v60, %v3149_v34  ;;  %v5223_v34 = vld [vmem:[%s5423_s7 + $0x288] sm:$0xff]  ;;  %v1969_v18 = vmul.f32 %v8426_v21, %v8426_v21  ;;  %v1970_v21 = vmul.f32 %v8443_v7, %v8443_v7  ;;  %v1973_v7 = vmul.f32 %v8493_v53, %v8493_v53 }
 0x366   : > { %v1647_v47 = vpop.xlane.xlu0 %1646  ;;  %10712 = vst [vmem:[#allocation52_spill] sm:$0xff] %v8715_v23  ;;  %v8718_v54 = vadd.f32 %v1649_v22, %v8380_v56  ;;  %v3153_v11 = vpop.f32.mrb[8].mxu1  ;;  %v1950_v30 = vmul.f32 %v5223_v34, %v5223_v34 }
 0x367   : > { %v8721_v59 = vadd.f32 %v1647_v47, %v8383_v62  ;;  %10713 = vst [vmem:[#allocation85_spill] sm:$0xff] %v8723_v13  ;;  %v3667_v9 = vpop.f32.mrb[8].mxu0  ;;  %v8992_v13 = vld [vmem:[%s5423_s7 + $0x298] sm:$0xff] }
 0x368   : > { %1984 = vadd.xlane.f32.xlu1 %v1947_v46  ;;  %v8728_v22 = vadd.f32 %v3667_v9, %v3153_v11  ;;  %v3669_v46 = vpop.f32.mrb[9].mxu0 }
 0x369   : > { %1982 = vadd.xlane.f32.xlu0 %v1946_v58  ;;  %v1653_v12 = vpop.xlane.xlu1 %1652  ;;  %v3155_v58 = vpop.f32.mrb[9].mxu1 }
 0x36a   : > { %v1651_v56 = vpop.xlane.xlu0 %1650  ;;  %10714 = vst [vmem:[#allocation86_spill] sm:$0xff] %v8728_v22  ;;  %v8731_v62 = vadd.f32 %v1653_v12, %v8397_v10  ;;  %v8736_v60 = vadd.f32 %v3669_v46, %v3155_v58  ;;  %v3159_v9 = vpop.f32.mrb[10].mxu1  ;;  %v1952_v46 = vmul.f32 %v10664_v20, %v10664_v20  ;;  %v1955_v20 = vmul.f32 %v10669_v1, %v10669_v1 }
 0x36b   : > { %v8734_v47 = vadd.f32 %v1651_v56, %v8400_v31  ;;  %v3673_v41 = vpop.f32.mrb[10].mxu0  ;;  %v1956_v1 = vmul.f32 %v10676_v48, %v10676_v48  ;;  %v1959_v48 = vmul.f32 %v10681_v43, %v10681_v43  ;;  %v1960_v43 = vmul.f32 %v10688_v57, %v10688_v57 }
 0x36c   : > { %10715 = vst [vmem:[#allocation54_spill] sm:$0xff] %v8736_v60  ;;  %1988 = vadd.xlane.f32.xlu1 %v1949_v14  ;;  %v8741_v10 = vadd.f32 %v3673_v41, %v3159_v9  ;;  %v3675_v56 = vpop.f32.mrb[11].mxu0  ;;  %v3161_v14 = vpop.f32.mrb[11].mxu1  ;;  %v1963_v57 = vmul.f32 %v8319_v38, %v8319_v38  ;;  %v1964_v38 = vmul.f32 %v8334_v37, %v8334_v37 }
 0x36d   : > { %1986 = vadd.xlane.f32.xlu0 %v1948_v3  ;;  %v1721_v11 = vpop.xlane.xlu1 %1720  ;;  %v8749_v3 = vadd.f32 %v3675_v56, %v3161_v14  ;;  %v1967_v37 = vmul.f32 %v8386_v32, %v8386_v32  ;;  %v1968_v32 = vmul.f32 %v8404_v36, %v8404_v36  ;;  %v1971_v36 = vmul.f32 %v8460_v15, %v8460_v15 }
 0x36e   : > { %v1719_v22 = vpop.xlane.xlu0 %1718  ;;  %10716 = vst [vmem:[#allocation55_spill] sm:$0xff] %v8741_v10  ;;  %v8744_v31 = vadd.f32 %v1721_v11, %v8414_v5  ;;  %v3165_v58 = vpop.f32.mrb[12].mxu1  ;;  %v1972_v15 = vmul.f32 %v8477_v0, %v8477_v0  ;;  %v8988_v10 = vld [vmem:[%s5423_s7 + $0x2b8] sm:$0xff] }
 0x36f   : > { %v8747_v12 = vadd.f32 %v1719_v22, %v8417_v25  ;;  %10717 = vst [vmem:[#allocation88_spill] sm:$0xff] %v8749_v3  ;;  %v3679_v41 = vpop.f32.mrb[12].mxu0 }
 0x370   : > { %1992 = vadd.xlane.f32.xlu1 %v1951_v35  ;;  %v8755_v9 = vadd.f32 %v3679_v41, %v3165_v58  ;;  %v3681_v35 = vpop.f32.mrb[13].mxu0 }
 0x371   : > { %1990 = vadd.xlane.f32.xlu0 %v1950_v30  ;;  %v1725_v34 = vpop.xlane.xlu1 %1724  ;;  %v3167_v30 = vpop.f32.mrb[13].mxu1 }
 0x372   : > { %v1723_v5 = vpop.xlane.xlu0 %1722  ;;  %10718 = vst [vmem:[#allocation47_spill] sm:$0xff] %v8755_v9  ;;  %v8758_v25 = vadd.f32 %v1725_v34, %v8431_v44  ;;  %v8763_v11 = vadd.f32 %v3681_v35, %v3167_v30  ;;  %v3171_v14 = vpop.f32.mrb[14].mxu1 }
 0x373   : > { %v8761_v22 = vadd.f32 %v1723_v5, %v8434_v52  ;;  %v3685_v56 = vpop.f32.mrb[14].mxu0 }
 0x374   : > { %10719 = vst [vmem:[#allocation79_spill] sm:$0xff] %v8763_v11  ;;  %1996 = vadd.xlane.f32.xlu1 %v1953_v16  ;;  %v8769_v58 = vadd.f32 %v3685_v56, %v3171_v14  ;;  %v3687_v16 = vpop.f32.mrb[15].mxu0 }
 0x375   : > { %1994 = vadd.xlane.f32.xlu0 %v1952_v46  ;;  %v1729_v41 = vpop.xlane.xlu1 %1728  ;;  %v3173_v46 = vpop.f32.mrb[15].mxu1 }
 0x376   : > { %v1727_v44 = vpop.xlane.xlu0 %1726  ;;  %10720 = vst [vmem:[#allocation89_spill] sm:$0xff] %v8769_v58  ;;  %v8772_v52 = vadd.f32 %v1729_v41, %v8448_v33  ;;  %v8777_v5 = vadd.f32 %v3687_v16, %v3173_v46  ;;  %v8974_v58 = vld [vmem:[%s5423_s7 + $0x1d8] sm:$0xff] }
 0x377   : > { %v8775_v34 = vadd.f32 %v1727_v44, %v8451_v28  ;;  %v3691_v35 = vpop.f32.mrb[16].mxu0 }
 0x378   : > { %10721 = vst [vmem:[#allocation90_spill] sm:$0xff] %v8777_v5  ;;  %2000 = vadd.xlane.f32.xlu1 %v1955_v20  ;;  %v3177_v30 = vpop.f32.mrb[16].mxu1  ;;  %v3693_v20 = vpop.f32.mrb[17].mxu0  ;;  %v8970_v5 = vld [vmem:[%s5423_s7 + $0x1f8] sm:$0xff] }
 0x379   : > { %1998 = vadd.xlane.f32.xlu0 %v1954_v8  ;;  %v1733_v56 = vpop.xlane.xlu1 %1732  ;;  %v8783_v14 = vadd.f32 %v3691_v35, %v3177_v30  ;;  %v3179_v8 = vpop.f32.mrb[17].mxu1 }
 0x37a   : > { %v1731_v33 = vpop.xlane.xlu0 %1730  ;;  %v8786_v28 = vadd.f32 %v1733_v56, %v8465_v45  ;;  %v8791_v44 = vadd.f32 %v3693_v20, %v3179_v8 }
 0x37b   : > { %10722 = vst [vmem:[#allocation50_spill] sm:$0xff] %v8783_v14  ;;  %v8789_v41 = vadd.f32 %v1731_v33, %v8468_v29  ;;  %v3697_v16 = vpop.f32.mrb[18].mxu0 }
 0x37c   : > { %10723 = vst [vmem:[#allocation81_spill] sm:$0xff] %v8791_v44  ;;  %2004 = vadd.xlane.f32.xlu1 %v1957_v26  ;;  %v3183_v46 = vpop.f32.mrb[18].mxu1  ;;  %v3699_v26 = vpop.f32.mrb[19].mxu0 }
 0x37d   : > { %2002 = vadd.xlane.f32.xlu0 %v1956_v1  ;;  %v1737_v35 = vpop.xlane.xlu1 %1736  ;;  %v8797_v30 = vadd.f32 %v3697_v16, %v3183_v46  ;;  %v3185_v1 = vpop.f32.mrb[19].mxu1 }
 0x37e   : > { %v1735_v45 = vpop.xlane.xlu0 %1734  ;;  %v8800_v29 = vadd.f32 %v1737_v35, %v8482_v42  ;;  %v8805_v33 = vadd.f32 %v3699_v26, %v3185_v1 }
 0x37f   : > { %10724 = vst [vmem:[#allocation92_spill] sm:$0xff] %v8797_v30  ;;  %v8803_v56 = vadd.f32 %v1735_v45, %v8485_v19  ;;  %v3703_v20 = vpop.f32.mrb[20].mxu0  ;;  %v8956_v30 = vld [vmem:[%s5423_s7 + $0x198] sm:$0xff] }
 0x380   : > { %10725 = vst [vmem:[#allocation93_spill] sm:$0xff] %v8805_v33  ;;  %2008 = vadd.xlane.f32.xlu1 %v1959_v48  ;;  %v3189_v8 = vpop.f32.mrb[20].mxu1  ;;  %v3705_v48 = vpop.f32.mrb[21].mxu0  ;;  %v8952_v33 = vld [vmem:[%s5423_s7 + $0x1b8] sm:$0xff] }
 0x381   : > { %2006 = vadd.xlane.f32.xlu0 %v1958_v27  ;;  %v1741_v16 = vpop.xlane.xlu1 %1740  ;;  %v8811_v46 = vadd.f32 %v3703_v20, %v3189_v8  ;;  %v3191_v27 = vpop.f32.mrb[21].mxu1 }
 0x382   : > { %v1739_v42 = vpop.xlane.xlu0 %1738  ;;  %v8814_v19 = vadd.f32 %v1741_v16, %v8498_v24  ;;  %v8819_v45 = vadd.f32 %v3705_v48, %v3191_v27 }
 0x383   : > { %10726 = vst [vmem:[#allocation53_spill] sm:$0xff] %v8811_v46  ;;  %v8817_v35 = vadd.f32 %v1739_v42, %v8501_v40  ;;  %v3709_v26 = vpop.f32.mrb[22].mxu0 }
 0x384   : > { %10727 = vst [vmem:[#allocation84_spill] sm:$0xff] %v8819_v45  ;;  %2012 = vadd.xlane.f32.xlu1 %v1961_v2  ;;  %v3195_v1 = vpop.f32.mrb[22].mxu1  ;;  %v3711_v2 = vpop.f32.mrb[23].mxu0  ;;  %v10736_v45 = vld [vmem:[#allocation18_spill] sm:$0xff] }
 0x385   : > { %2010 = vadd.xlane.f32.xlu0 %v1960_v43  ;;  %v1745_v20 = vpop.xlane.xlu1 %1744  ;;  %v8825_v8 = vadd.f32 %v3709_v26, %v3195_v1  ;;  %v3197_v43 = vpop.f32.mrb[23].mxu1 }
 0x386   : > { %v1743_v24 = vpop.xlane.xlu0 %1742  ;;  %v8828_v40 = vadd.f32 %v1745_v20, %v8508_v55  ;;  %v8833_v42 = vadd.f32 %v3711_v2, %v3197_v43 }
 0x387   : > { %10728 = vst [vmem:[#allocation95_spill] sm:$0xff] %v8825_v8  ;;  %v8831_v16 = vadd.f32 %v1743_v24, %v8511_v17  ;;  %v3715_v48 = vpop.f32.mrb[24].mxu0  ;;  %v10731_v17 = vld [vmem:[#allocation16_spill] sm:$0xff] }
 0x388   : > { %10729 = vst [vmem:[#allocation96_spill] sm:$0xff] %v8833_v42  ;;  %2016 = vadd.xlane.f32.xlu1 %v1963_v57  ;;  %v3201_v27 = vpop.f32.mrb[24].mxu1  ;;  %v10732_v24 = vld [vmem:[#allocation68_spill] sm:$0xff]  ;;  %v3717_v57 = vpop.f32.mrb[25].mxu0 }
 0x389   : > { %2014 = vadd.xlane.f32.xlu0 %v1962_v50  ;;  %v1749_v26 = vpop.xlane.xlu1 %1748  ;;  %v8839_v1 = vadd.f32 %v3715_v48, %v3201_v27  ;;  %v3203_v50 = vpop.f32.mrb[25].mxu1  ;;  %v8938_v8 = vld [vmem:[%s5423_s7 + $0xd8] sm:$0xff] }
 0x38a   : > { %v1747_v55 = vpop.xlane.xlu0 %1746  ;;  %v8842_v20 = vadd.f32 %v1749_v26, %v10731_v17  ;;  %v8847_v43 = vadd.f32 %v3717_v57, %v3203_v50 }
 0x38b   : > { %10730 = vst [vmem:[#allocation56_spill] sm:$0xff] %v8839_v1  ;;  %v8845_v2 = vadd.f32 %v1747_v55, %v10732_v24  ;;  %v3721_v48 = vpop.f32.mrb[26].mxu0  ;;  %v10735_v55 = vld [vmem:[#allocation17_spill] sm:$0xff] }
 0x38c   : > { %10733 = vst [vmem:[#allocation87_spill] sm:$0xff] %v8847_v43  ;;  %2020 = vadd.xlane.f32.xlu1 %v1965_v61  ;;  %v3207_v27 = vpop.f32.mrb[26].mxu1  ;;  %v3723_v61 = vpop.f32.mrb[27].mxu0 }
 0x38d   : > { %2018 = vadd.xlane.f32.xlu0 %v1964_v38  ;;  %v1753_v1 = vpop.xlane.xlu1 %1752  ;;  %v8853_v17 = vadd.f32 %v3721_v48, %v3207_v27  ;;  %v3209_v38 = vpop.f32.mrb[27].mxu1 }
 0x38e   : > { %v1751_v26 = vpop.xlane.xlu0 %1750  ;;  %v8856_v24 = vadd.f32 %v1753_v1, %v10735_v55  ;;  %v8861_v50 = vadd.f32 %v3723_v61, %v3209_v38 }
 0x38f   : > { %10734 = vst [vmem:[#allocation98_spill] sm:$0xff] %v8853_v17  ;;  %v8859_v57 = vadd.f32 %v1751_v26, %v10736_v45  ;;  %v3727_v48 = vpop.f32.mrb[28].mxu0  ;;  %v10740_v45 = vld [vmem:[#allocation19_spill] sm:$0xff]  ;;  %v10742_v17 = vld [vmem:[#allocation20_spill] sm:$0xff] }
 0x390   : > { %10738 = vst [vmem:[#allocation94_spill] sm:$0xff] %v8861_v50  ;;  %2024 = vadd.xlane.f32.xlu1 %v1967_v37  ;;  %v3213_v27 = vpop.f32.mrb[28].mxu1  ;;  %v3729_v37 = vpop.f32.mrb[29].mxu0  ;;  %v10748_v50 = vld [vmem:[#allocation22_spill] sm:$0xff] }
 0x391   : > { %10737 = vst [vmem:[#allocation99_spill] sm:$0xff] %v8859_v57  ;;  %2022 = vadd.xlane.f32.xlu0 %v1966_v63  ;;  %v1757_v43 = vpop.xlane.xlu1 %1756  ;;  %v8867_v55 = vadd.f32 %v3727_v48, %v3213_v27  ;;  %v3215_v63 = vpop.f32.mrb[29].mxu1  ;;  %v9154_v57 = vld [vmem:[%s5423_s7 + $0x6d8] sm:$0xff] }
 0x392   : > { %v1755_v1 = vpop.xlane.xlu0 %1754  ;;  %v8870_v26 = vadd.f32 %v1757_v43, %v10740_v45  ;;  %v8875_v38 = vadd.f32 %v3729_v37, %v3215_v63  ;;  %10840 = vst [vmem:[#allocation108_spill] sm:$0xff] %v9154_v57 }
 0x393   : > { %10739 = vst [vmem:[#allocation91_spill] sm:$0xff] %v8867_v55  ;;  %v8873_v61 = vadd.f32 %v1755_v1, %v10742_v17  ;;  %v3733_v48 = vpop.f32.mrb[30].mxu0  ;;  %v10746_v17 = vld [vmem:[#allocation21_spill] sm:$0xff] }
 0x394   : > { %10741 = vst [vmem:[#allocation101_spill] sm:$0xff] %v8870_v26  ;;  %10744 = vst [vmem:[#allocation100_spill] sm:$0xff] %v8875_v38  ;;  %2028 = vadd.xlane.f32.xlu1 %v1969_v18  ;;  %v3219_v27 = vpop.f32.mrb[30].mxu1  ;;  %v3735_v18 = vpop.f32.mrb[31].mxu0  ;;  %v9150_v26 = vld [vmem:[%s5423_s7 + $0x6f8] sm:$0xff] }
 0x395   : > { %10743 = vst [vmem:[#allocation5_spill] sm:$0xff] %v8873_v61  ;;  %2026 = vadd.xlane.f32.xlu0 %v1968_v32  ;;  %v1761_v55 = vpop.xlane.xlu1 %1760  ;;  %v8881_v45 = vadd.f32 %v3733_v48, %v3219_v27  ;;  %v3221_v32 = vpop.f32.mrb[31].mxu1  ;;  %v9136_v61 = vld [vmem:[%s5423_s7 + $0x698] sm:$0xff]  ;;  %10839 = vst [vmem:[#allocation107_spill] sm:$0xff] %v9150_v26 }
 0x396   : > { %v1759_v43 = vpop.xlane.xlu0 %1758  ;;  %v8884_v1 = vadd.f32 %v1761_v55, %v10746_v17  ;;  %v8889_v63 = vadd.f32 %v3735_v18, %v3221_v32 }
 0x397   : > { %10745 = vst [vmem:[#allocation97_spill] sm:$0xff] %v8881_v45  ;;  %v8887_v37 = vadd.f32 %v1759_v43, %v10748_v50  ;;  %v3739_v48 = vpop.f32.mrb[32].mxu0  ;;  %v10752_v50 = vld [vmem:[#allocation23_spill] sm:$0xff]  ;;  %v10754_v45 = vld [vmem:[#allocation24_spill] sm:$0xff] }
 0x398   : > { %10747 = vst [vmem:[#allocation6_spill] sm:$0xff] %v8884_v1  ;;  %10750 = vst [vmem:[#allocation7_spill] sm:$0xff] %v8889_v63  ;;  %2032 = vadd.xlane.f32.xlu1 %v1971_v36  ;;  %v3225_v27 = vpop.f32.mrb[32].mxu1  ;;  %v3741_v36 = vpop.f32.mrb[33].mxu0  ;;  %v9132_v1 = vld [vmem:[%s5423_s7 + $0x6b8] sm:$0xff] }
 0x399   : > { %10749 = vst [vmem:[#allocation58_spill] sm:$0xff] %v8887_v37  ;;  %2030 = vadd.xlane.f32.xlu0 %v1970_v21  ;;  %v1765_v38 = vpop.xlane.xlu1 %1764  ;;  %v8895_v17 = vadd.f32 %v3739_v48, %v3225_v27  ;;  %v3227_v21 = vpop.f32.mrb[33].mxu1  ;;  %v10758_v27 = vld [vmem:[#allocation25_spill] sm:$0xff]  ;;  %v9100_v37 = vld [vmem:[%s5423_s7 + $0x598] sm:$0xff] }
 0x39a   : > { %v1763_v55 = vpop.xlane.xlu0 %1762  ;;  %v8898_v43 = vadd.f32 %v1765_v38, %v10752_v50  ;;  %v8903_v53 = vadd.f32 %v3741_v36, %v3227_v21  ;;  %v10760_v50 = vld [vmem:[#allocation26_spill] sm:$0xff]  ;;  %v8916_v36 = vld [vmem:[%s5423_s7 + $0xb8] sm:$0xff] }
 0x39b   : > { %10751 = vst [vmem:[#allocation57_spill] sm:$0xff] %v8895_v17  ;;  %v8901_v18 = vadd.f32 %v1763_v55, %v10754_v45  ;;  %v3745_v0 = vpop.f32.mrb[34].mxu0 }
 0x39c   : > { %10753 = vst [vmem:[#allocation59_spill] sm:$0xff] %v8898_v43  ;;  %10756 = vst [vmem:[#allocation33_spill] sm:$0xff] %v8903_v53  ;;  %2036 = vadd.xlane.f32.xlu1 %v1973_v7  ;;  %v3231_v32 = vpop.f32.mrb[34].mxu1  ;;  %v3747_v55 = vpop.f32.mrb[35].mxu0  ;;  %v8920_v7 = vld [vmem:[%s5423_s7 + $0x98] sm:$0xff] }
 0x39d   : > { %10755 = vst [vmem:[#allocation9_spill] sm:$0xff] %v8901_v18  ;;  %2034 = vadd.xlane.f32.xlu0 %v1972_v15  ;;  %v1769_v63 = vpop.xlane.xlu1 %1768  ;;  %v8905_v48 = vadd.f32 %v3745_v0, %v3231_v32  ;;  %v3233_v17 = vpop.f32.mrb[35].mxu1  ;;  %v10764_v32 = vld [vmem:[#allocation27_spill] sm:$0xff]  ;;  %v9082_v18 = vld [vmem:[%s5423_s7 + $0x4d8] sm:$0xff] }
 0x39e   : > { %v1767_v46 = vpop.xlane.xlu0 %1766  ;;  %v8908_v38 = vadd.f32 %v1769_v63, %v10758_v27  ;;  %v8913_v42 = vadd.f32 %v3747_v55, %v3233_v17  ;;  %v10766_v17 = vld [vmem:[#allocation28_spill] sm:$0xff] }
 0x39f   : > { %10757 = vst [vmem:[#allocation61_spill] sm:$0xff] %v8905_v48  ;;  %v8911_v45 = vadd.f32 %v1767_v46, %v10760_v50  ;;  %v3751_v15 = vpop.f32.mrb[36].mxu0  ;;  %v8934_v48 = vld [vmem:[%s5423_s7 + $0xf8] sm:$0xff] }
 0x3a0   : > { %10759 = vst [vmem:[#allocation11_spill] sm:$0xff] %v8908_v38  ;;  %10762 = vst [vmem:[#allocation65_spill] sm:$0xff] %v8913_v42  ;;  %2104 = vadd.xlane.f32.xlu1 %v8916_v36  ;;  %v3237_v63 = vpop.f32.mrb[36].mxu1  ;;  %v3753_v55 = vpop.f32.mrb[37].mxu0  ;;  %v9078_v38 = vld [vmem:[%s5423_s7 + $0x4f8] sm:$0xff] }
 0x3a1   : > { %10761 = vst [vmem:[#allocation63_spill] sm:$0xff] %v8911_v45  ;;  %2102 = vadd.xlane.f32.xlu0 %v8920_v7  ;;  %v1773_v21 = vpop.xlane.xlu1 %1772  ;;  %v8923_v46 = vadd.f32 %v3751_v15, %v3237_v63  ;;  %v3239_v53 = vpop.f32.mrb[37].mxu1  ;;  %v9064_v45 = vld [vmem:[%s5423_s7 + $0x498] sm:$0xff] }
 0x3a2   : > { %v1771_v0 = vpop.xlane.xlu0 %1770  ;;  %v8926_v27 = vadd.f32 %v1773_v21, %v10764_v32  ;;  %v8931_v42 = vadd.f32 %v3753_v55, %v3239_v53  ;;  %v10772_v53 = vld [vmem:[#allocation30_spill] sm:$0xff]  ;;  %v9096_v43 = vld [vmem:[%s5423_s7 + $0x5b8] sm:$0xff] }
 0x3a3   : > { %10763 = vst [vmem:[#allocation71_spill] sm:$0xff] %v8923_v46  ;;  %v8929_v50 = vadd.f32 %v1771_v0, %v10766_v17  ;;  %v3757_v15 = vpop.f32.mrb[38].mxu0  ;;  %v10770_v17 = vld [vmem:[#allocation29_spill] sm:$0xff] }
 0x3a4   : > { %10765 = vst [vmem:[#allocation12_spill] sm:$0xff] %v8926_v27  ;;  %10768 = vst [vmem:[#allocation67_spill] sm:$0xff] %v8931_v42  ;;  %2108 = vadd.xlane.f32.xlu1 %v8934_v48  ;;  %v3243_v63 = vpop.f32.mrb[38].mxu1  ;;  %v3759_v42 = vpop.f32.mrb[39].mxu0  ;;  %v9060_v27 = vld [vmem:[%s5423_s7 + $0x4b8] sm:$0xff] }
 0x3a5   : > { %10767 = vst [vmem:[#allocation64_spill] sm:$0xff] %v8929_v50  ;;  %2106 = vadd.xlane.f32.xlu0 %v8938_v8  ;;  %v1777_v21 = vpop.xlane.xlu1 %1776  ;;  %v8941_v0 = vadd.f32 %v3757_v15, %v3243_v63  ;;  %v3245_v44 = vpop.f32.mrb[39].mxu1  ;;  %v9046_v50 = vld [vmem:[%s5423_s7 + $0x3d8] sm:$0xff] }
 0x3a6   : > { %v1775_v32 = vpop.xlane.xlu0 %1774  ;;  %v8944_v46 = vadd.f32 %v1777_v21, %v10770_v17  ;;  %v8949_v14 = vadd.f32 %v3759_v42, %v3245_v44  ;;  %v10778_v44 = vld [vmem:[#allocation32_spill] sm:$0xff] }
 0x3a7   : > { %10769 = vst [vmem:[#allocation66_spill] sm:$0xff] %v8941_v0  ;;  %v8947_v55 = vadd.f32 %v1775_v32, %v10772_v53  ;;  %v3763_v15 = vpop.f32.mrb[40].mxu0  ;;  %v10776_v53 = vld [vmem:[#allocation31_spill] sm:$0xff] }
 0x3a8   : > { %10771 = vst [vmem:[#allocation37_spill] sm:$0xff] %v8944_v46  ;;  %10774 = vst [vmem:[#allocation40_spill] sm:$0xff] %v8949_v14  ;;  %2112 = vadd.xlane.f32.xlu1 %v8952_v33  ;;  %v3249_v63 = vpop.f32.mrb[40].mxu1  ;;  %v3765_v14 = vpop.f32.mrb[41].mxu0  ;;  %v9042_v46 = vld [vmem:[%s5423_s7 + $0x3f8] sm:$0xff] }
 0x3a9   : > { %10773 = vst [vmem:[#allocation13_spill] sm:$0xff] %v8947_v55  ;;  %2110 = vadd.xlane.f32.xlu0 %v8956_v30  ;;  %v1781_v21 = vpop.xlane.xlu1 %1780  ;;  %v8959_v32 = vadd.f32 %v3763_v15, %v3249_v63  ;;  %v3251_v11 = vpop.f32.mrb[41].mxu1  ;;  %v9028_v55 = vld [vmem:[%s5423_s7 + $0x398] sm:$0xff] }
 0x3aa   : > { %v1779_v17 = vpop.xlane.xlu0 %1778  ;;  %v8962_v0 = vadd.f32 %v1781_v21, %v10776_v53  ;;  %v8967_v9 = vadd.f32 %v3765_v14, %v3251_v11  ;;  %v10784_v11 = vld [vmem:[#allocation35_spill] sm:$0xff] }
 0x3ab   : > { %10775 = vst [vmem:[#allocation14_spill] sm:$0xff] %v8959_v32  ;;  %v8965_v42 = vadd.f32 %v1779_v17, %v10778_v44  ;;  %v3769_v15 = vpop.f32.mrb[42].mxu0  ;;  %v10782_v44 = vld [vmem:[#allocation34_spill] sm:$0xff] }
 0x3ac   : > { %10777 = vst [vmem:[#allocation76_spill] sm:$0xff] %v8962_v0  ;;  %10780 = vst [vmem:[#allocation16_spill] sm:$0xff] %v8967_v9  ;;  %2116 = vadd.xlane.f32.xlu1 %v8970_v5  ;;  %v3255_v63 = vpop.f32.mrb[42].mxu1  ;;  %v3771_v9 = vpop.f32.mrb[43].mxu0  ;;  %v9024_v0 = vld [vmem:[%s5423_s7 + $0x3b8] sm:$0xff] }
 0x3ad   : > { %10779 = vst [vmem:[#allocation15_spill] sm:$0xff] %v8965_v42  ;;  %2114 = vadd.xlane.f32.xlu0 %v8974_v58  ;;  %v1849_v21 = vpop.xlane.xlu1 %1848  ;;  %v8977_v17 = vadd.f32 %v3769_v15, %v3255_v63  ;;  %v3257_v60 = vpop.f32.mrb[43].mxu1  ;;  %v9010_v42 = vld [vmem:[%s5423_s7 + $0x2d8] sm:$0xff] }
 0x3ae   : > { %v1847_v53 = vpop.xlane.xlu0 %1846  ;;  %v8980_v32 = vadd.f32 %v1849_v21, %v10782_v44  ;;  %v8985_v3 = vadd.f32 %v3771_v9, %v3257_v60  ;;  %v10790_v60 = vld [vmem:[#allocation69_spill] sm:$0xff] }
 0x3af   : > { %10781 = vst [vmem:[#allocation68_spill] sm:$0xff] %v8977_v17  ;;  %v8983_v14 = vadd.f32 %v1847_v53, %v10784_v11  ;;  %v3775_v15 = vpop.f32.mrb[44].mxu0  ;;  %v10788_v11 = vld [vmem:[#allocation36_spill] sm:$0xff] }
 0x3b0   : > { %10783 = vst [vmem:[#allocation17_spill] sm:$0xff] %v8980_v32  ;;  %10786 = vst [vmem:[#allocation19_spill] sm:$0xff] %v8985_v3  ;;  %2120 = vadd.xlane.f32.xlu1 %v8988_v10  ;;  %v3261_v63 = vpop.f32.mrb[44].mxu1  ;;  %v3777_v3 = vpop.f32.mrb[45].mxu0  ;;  %v9006_v32 = vld [vmem:[%s5423_s7 + $0x2f8] sm:$0xff] }
 0x3b1   : > { %10785 = vst [vmem:[#allocation18_spill] sm:$0xff] %v8983_v14  ;;  %2118 = vadd.xlane.f32.xlu0 %v8992_v13  ;;  %v1853_v21 = vpop.xlane.xlu1 %1852  ;;  %v8995_v53 = vadd.f32 %v3775_v15, %v3261_v63  ;;  %v3263_v23 = vpop.f32.mrb[45].mxu1 }
 0x3b2   : > { %v1851_v44 = vpop.xlane.xlu0 %1850  ;;  %v8998_v17 = vadd.f32 %v1853_v21, %v10788_v11  ;;  %v9003_v14 = vadd.f32 %v3777_v3, %v3263_v23  ;;  %v10796_v23 = vld [vmem:[#allocation38_spill] sm:$0xff] }
 0x3b3   : > { %10787 = vst [vmem:[#allocation20_spill] sm:$0xff] %v8995_v53  ;;  %v9001_v9 = vadd.f32 %v1851_v44, %v10790_v60  ;;  %v3781_v15 = vpop.f32.mrb[46].mxu0  ;;  %v10794_v60 = vld [vmem:[#allocation70_spill] sm:$0xff] }
 0x3b4   : > { %10789 = vst [vmem:[#allocation21_spill] sm:$0xff] %v8998_v17  ;;  %10792 = vst [vmem:[#allocation23_spill] sm:$0xff] %v9003_v14  ;;  %2124 = vadd.xlane.f32.xlu1 %v9006_v32  ;;  %v3267_v63 = vpop.f32.mrb[46].mxu1  ;;  %v3783_v14 = vpop.f32.mrb[47].mxu0 }
 0x3b5   : > { %10791 = vst [vmem:[#allocation22_spill] sm:$0xff] %v9001_v9  ;;  %2122 = vadd.xlane.f32.xlu0 %v9010_v42  ;;  %v1857_v21 = vpop.xlane.xlu1 %1856  ;;  %v9013_v44 = vadd.f32 %v3781_v15, %v3267_v63  ;;  %v3269_v9 = vpop.f32.mrb[47].mxu1 }
 0x3b6   : > { %v1855_v11 = vpop.xlane.xlu0 %1854  ;;  %v9016_v53 = vadd.f32 %v1857_v21, %v10794_v60  ;;  %v9021_v17 = vadd.f32 %v3783_v14, %v3269_v9  ;;  %v10802_v14 = vld [vmem:[#allocation72_spill] sm:$0xff] }
 0x3b7   : > { %10793 = vst [vmem:[#allocation24_spill] sm:$0xff] %v9013_v44  ;;  %v9019_v3 = vadd.f32 %v1855_v11, %v10796_v23  ;;  %v3787_v63 = vpop.f32.mrb[48].mxu0  ;;  %v10800_v23 = vld [vmem:[#allocation39_spill] sm:$0xff] }
 0x3b8   : > { %10795 = vst [vmem:[#allocation25_spill] sm:$0xff] %v9016_v53  ;;  %10798 = vst [vmem:[#allocation27_spill] sm:$0xff] %v9021_v17  ;;  %2128 = vadd.xlane.f32.xlu1 %v9024_v0  ;;  %v3273_v15 = vpop.f32.mrb[48].mxu1  ;;  %v3789_v17 = vpop.f32.mrb[49].mxu0 }
 0x3b9   : > { %10797 = vst [vmem:[#allocation26_spill] sm:$0xff] %v9019_v3  ;;  %2126 = vadd.xlane.f32.xlu0 %v9028_v55  ;;  %v1861_v21 = vpop.xlane.xlu1 %1860  ;;  %v9031_v11 = vadd.f32 %v3787_v63, %v3273_v15  ;;  %v3275_v3 = vpop.f32.mrb[49].mxu1 }
 0x3ba   : > { %v1859_v60 = vpop.xlane.xlu0 %1858  ;;  %v9034_v44 = vadd.f32 %v1861_v21, %v10800_v23  ;;  %v9039_v53 = vadd.f32 %v3789_v17, %v3275_v3  ;;  %v10808_v17 = vld [vmem:[#allocation41_spill] sm:$0xff] }
 0x3bb   : > { %10799 = vst [vmem:[#allocation28_spill] sm:$0xff] %v9031_v11  ;;  %v9037_v9 = vadd.f32 %v1859_v60, %v10802_v14  ;;  %v3793_v63 = vpop.f32.mrb[50].mxu0  ;;  %v10806_v14 = vld [vmem:[#allocation73_spill] sm:$0xff] }
 0x3bc   : > { %10801 = vst [vmem:[#allocation29_spill] sm:$0xff] %v9034_v44  ;;  %10804 = vst [vmem:[#allocation31_spill] sm:$0xff] %v9039_v53  ;;  %2132 = vadd.xlane.f32.xlu1 %v9042_v46  ;;  %v3279_v15 = vpop.f32.mrb[50].mxu1  ;;  %v3795_v53 = vpop.f32.mrb[51].mxu0 }
 0x3bd   : > { %10803 = vst [vmem:[#allocation30_spill] sm:$0xff] %v9037_v9  ;;  %2130 = vadd.xlane.f32.xlu0 %v9046_v50  ;;  %v1865_v21 = vpop.xlane.xlu1 %1864  ;;  %v9049_v60 = vadd.f32 %v3793_v63, %v3279_v15  ;;  %v3281_v9 = vpop.f32.mrb[51].mxu1 }
 0x3be   : > { %v1863_v23 = vpop.xlane.xlu0 %1862  ;;  %v9052_v11 = vadd.f32 %v1865_v21, %v10806_v14  ;;  %v9057_v44 = vadd.f32 %v3795_v53, %v3281_v9  ;;  %v10814_v53 = vld [vmem:[#allocation75_spill] sm:$0xff] }
 0x3bf   : > { %10805 = vst [vmem:[#allocation32_spill] sm:$0xff] %v9049_v60  ;;  %v9055_v3 = vadd.f32 %v1863_v23, %v10808_v17  ;;  %v3799_v63 = vpop.f32.mrb[52].mxu0  ;;  %v10812_v17 = vld [vmem:[#allocation42_spill] sm:$0xff] }
 0x3c0   : > { %10807 = vst [vmem:[#allocation34_spill] sm:$0xff] %v9052_v11  ;;  %10810 = vst [vmem:[#allocation36_spill] sm:$0xff] %v9057_v44  ;;  %2136 = vadd.xlane.f32.xlu1 %v9060_v27  ;;  %v3285_v15 = vpop.f32.mrb[52].mxu1  ;;  %v3801_v44 = vpop.f32.mrb[53].mxu0 }
 0x3c1   : > { %10809 = vst [vmem:[#allocation35_spill] sm:$0xff] %v9055_v3  ;;  %2134 = vadd.xlane.f32.xlu0 %v9064_v45  ;;  %v1869_v21 = vpop.xlane.xlu1 %1868  ;;  %v9067_v23 = vadd.f32 %v3799_v63, %v3285_v15  ;;  %v3287_v3 = vpop.f32.mrb[53].mxu1 }
 0x3c2   : > { %v1867_v14 = vpop.xlane.xlu0 %1866  ;;  %v9070_v60 = vadd.f32 %v1869_v21, %v10812_v17  ;;  %v9075_v11 = vadd.f32 %v3801_v44, %v3287_v3  ;;  %v10820_v44 = vld [vmem:[#allocation77_spill] sm:$0xff] }
 0x3c3   : > { %10811 = vst [vmem:[#allocation69_spill] sm:$0xff] %v9067_v23  ;;  %v9073_v9 = vadd.f32 %v1867_v14, %v10814_v53  ;;  %v3805_v63 = vpop.f32.mrb[54].mxu0  ;;  %v10818_v53 = vld [vmem:[#allocation44_spill] sm:$0xff] }
 0x3c4   : > { %10813 = vst [vmem:[#allocation70_spill] sm:$0xff] %v9070_v60  ;;  %10816 = vst [vmem:[#allocation39_spill] sm:$0xff] %v9075_v11  ;;  %2140 = vadd.xlane.f32.xlu1 %v9078_v38  ;;  %v3291_v15 = vpop.f32.mrb[54].mxu1  ;;  %v3807_v11 = vpop.f32.mrb[55].mxu0 }
 0x3c5   : > { %10815 = vst [vmem:[#allocation38_spill] sm:$0xff] %v9073_v9  ;;  %2138 = vadd.xlane.f32.xlu0 %v9082_v18  ;;  %v1873_v21 = vpop.xlane.xlu1 %1872  ;;  %v9085_v14 = vadd.f32 %v3805_v63, %v3291_v15  ;;  %v3293_v9 = vpop.f32.mrb[55].mxu1 }
 0x3c6   : > { %v1871_v17 = vpop.xlane.xlu0 %1870  ;;  %v9088_v23 = vadd.f32 %v1873_v21, %v10818_v53  ;;  %v9093_v60 = vadd.f32 %v3807_v11, %v3293_v9 }
 0x3c7   : > { %10817 = vst [vmem:[#allocation72_spill] sm:$0xff] %v9085_v14  ;;  %v9091_v3 = vadd.f32 %v1871_v17, %v10820_v44  ;;  %v3811_v63 = vpop.f32.mrb[56].mxu0 }
 0x3c8   : > { %10819 = vst [vmem:[#allocation73_spill] sm:$0xff] %v9088_v23  ;;  %10822 = vst [vmem:[#allocation42_spill] sm:$0xff] %v9093_v60  ;;  %2144 = vadd.xlane.f32.xlu1 %v9096_v43  ;;  %v3297_v15 = vpop.f32.mrb[56].mxu1  ;;  %v3813_v9 = vpop.f32.mrb[57].mxu0  ;;  %v9118_v23 = vld [vmem:[%s5423_s7 + $0x5d8] sm:$0xff] }
 0x3c9   : > { %10821 = vst [vmem:[#allocation41_spill] sm:$0xff] %v9091_v3  ;;  %2142 = vadd.xlane.f32.xlu0 %v9100_v37  ;;  %v1877_v21 = vpop.xlane.xlu1 %1876  ;;  %v9103_v17 = vadd.f32 %v3811_v63, %v3297_v15  ;;  %v3299_v60 = vpop.f32.mrb[57].mxu1  ;;  %v9114_v3 = vld [vmem:[%s5423_s7 + $0x5f8] sm:$0xff] }
 0x3ca   : > { %v1875_v53 = vpop.xlane.xlu0 %1874  ;;  %v9106_v44 = vadd.f32 %v1877_v21, %v8646_v49  ;;  %v9111_v14 = vadd.f32 %v3813_v9, %v3299_v60  ;;  %v10830_v60 = vld [vmem:[#allocation60_spill] sm:$0xff] }
 0x3cb   : > { %10823 = vst [vmem:[#allocation75_spill] sm:$0xff] %v9103_v17  ;;  %v9109_v11 = vadd.f32 %v1875_v53, %v8649_v4  ;;  %v3817_v49 = vpop.f32.mrb[58].mxu0  ;;  %v10828_v53 = vld [vmem:[#allocation8_spill] sm:$0xff] }
 0x3cc   : > { %10824 = vst [vmem:[#allocation44_spill] sm:$0xff] %v9106_v44  ;;  %10826 = vst [vmem:[#allocation102_spill] sm:$0xff] %v9111_v14  ;;  %2148 = vadd.xlane.f32.xlu1 %v9114_v3  ;;  %v3303_v15 = vpop.f32.mrb[58].mxu1  ;;  %v3819_v14 = vpop.f32.mrb[59].mxu0 }
 0x3cd   : > { %10825 = vst [vmem:[#allocation77_spill] sm:$0xff] %v9109_v11  ;;  %2146 = vadd.xlane.f32.xlu0 %v9118_v23  ;;  %v1881_v63 = vpop.xlane.xlu1 %1880  ;;  %v9121_v4 = vadd.f32 %v3817_v49, %v3303_v15  ;;  %v3305_v11 = vpop.f32.mrb[59].mxu1 }
 0x3ce   : > { %v1879_v21 = vpop.xlane.xlu0 %1878  ;;  %v9124_v17 = vadd.f32 %v1881_v63, %v10828_v53  ;;  %v9129_v44 = vadd.f32 %v3819_v14, %v3305_v11  ;;  %v10836_v14 = vld [vmem:[#allocation78_spill] sm:$0xff] }
 0x3cf   : > { %10827 = vst [vmem:[#allocation103_spill] sm:$0xff] %v9121_v4  ;;  %v9127_v9 = vadd.f32 %v1879_v21, %v10830_v60  ;;  %v3823_v49 = vpop.f32.mrb[60].mxu0  ;;  %v10834_v60 = vld [vmem:[#allocation45_spill] sm:$0xff] }
 0x3d0   : > { %10829 = vst [vmem:[#allocation8_spill] sm:$0xff] %v9124_v17  ;;  %10832 = vst [vmem:[#allocation104_spill] sm:$0xff] %v9129_v44  ;;  %2152 = vadd.xlane.f32.xlu1 %v9132_v1  ;;  %v3309_v15 = vpop.f32.mrb[60].mxu1  ;;  %v3825_v44 = vpop.f32.mrb[61].mxu0 }
 0x3d1   : > { %10831 = vst [vmem:[#allocation60_spill] sm:$0xff] %v9127_v9  ;;  %2150 = vadd.xlane.f32.xlu0 %v9136_v61  ;;  %v1885_v63 = vpop.xlane.xlu1 %1884  ;;  %v9139_v21 = vadd.f32 %v3823_v49, %v3309_v15  ;;  %v3311_v9 = vpop.f32.mrb[61].mxu1 }
 0x3d2   : > { %v1883_v53 = vpop.xlane.xlu0 %1882  ;;  %v9142_v4 = vadd.f32 %v1885_v63, %v10834_v60  ;;  %v9147_v17 = vadd.f32 %v3825_v44, %v3311_v9  ;;  %v10844_v9 = vld [vmem:[#allocation74_spill] sm:$0xff] }
 0x3d3   : > { %10833 = vst [vmem:[#allocation105_spill] sm:$0xff] %v9139_v21  ;;  %v9145_v11 = vadd.f32 %v1883_v53, %v10836_v14  ;;  %v3829_v49 = vpop.f32.mrb[62].mxu0  ;;  %v10842_v14 = vld [vmem:[#allocation46_spill] sm:$0xff] }
 0x3d4   : > { %10835 = vst [vmem:[#allocation45_spill] sm:$0xff] %v9142_v4  ;;  %10838 = vst [vmem:[#allocation106_spill] sm:$0xff] %v9147_v17  ;;  %2156 = vadd.xlane.f32.xlu1 %v9150_v26  ;;  %v3315_v15 = vpop.f32.mrb[62].mxu1  ;;  %v3831_v21 = vpop.f32.mrb[63].mxu0  ;;  %v9168_v26 = vld [vmem:[%s5423_s7 + $0x7b8] sm:$0xff] }
 0x3d5   : > { %10837 = vst [vmem:[#allocation78_spill] sm:$0xff] %v9145_v11  ;;  %2154 = vadd.xlane.f32.xlu0 %v9154_v57  ;;  %v1889_v63 = vpop.xlane.xlu1 %1888  ;;  %v9157_v60 = vadd.f32 %v3829_v49, %v3315_v15  ;;  %v3317_v11 = vpop.f32.mrb[63].mxu1  ;;  %v9172_v57 = vld [vmem:[%s5423_s7 + $0x798] sm:$0xff] }
 0x3d6   : > { %v1887_v53 = vpop.xlane.xlu0 %1886  ;;  %v9160_v44 = vadd.f32 %v1889_v63, %v10842_v14  ;;  %v9165_v4 = vadd.f32 %v3831_v21, %v3317_v11  ;;  %v10849_v14 = vld [vmem:[#allocation43_spill] sm:$0xff]  ;;  %v9186_v21 = vld [vmem:[%s5423_s7 + $0x7d8] sm:$0xff]  ;;  %v2199_v11 = vmul.f32 %v8916_v36, %v8916_v36 }
 0x3d7   : > { %10841 = vst [vmem:[#allocation109_spill] sm:$0xff] %v9157_v60  ;;  %v9163_v17 = vadd.f32 %v1887_v53, %v10844_v9  ;;  %v10847_v60 = vld [vmem:[#allocation62_spill] sm:$0xff]  ;;  %v9182_v9 = vld [vmem:[%s5423_s7 + $0x7f8] sm:$0xff]  ;;  %10851 = vst [vmem:[#allocation111_spill] sm:$0xff] %v9186_v21 }
 0x3d8   : > { %10843 = vst [vmem:[#allocation46_spill] sm:$0xff] %v9160_v44  ;;  %10846 = vst [vmem:[#allocation110_spill] sm:$0xff] %v9165_v4  ;;  %2160 = vadd.xlane.f32.xlu1 %v9168_v26  ;;  %v2198_v4 = vmul.f32 %v8920_v7, %v8920_v7 }
 0x3d9   : > { %10845 = vst [vmem:[#allocation74_spill] sm:$0xff] %v9163_v17  ;;  %2158 = vadd.xlane.f32.xlu0 %v9172_v57  ;;  %v1893_v15 = vpop.xlane.xlu1 %1892 }
 0x3da   : > { %v1891_v49 = vpop.xlane.xlu0 %1890  ;;  %v9176_v63 = vadd.f32 %v1893_v15, %v10847_v60 }
 0x3db   : > { %v9179_v53 = vadd.f32 %v1891_v49, %v10849_v14  ;;  %v10852_v49 = vld [vmem:[#allocation49_spill] sm:$0xff] }
 0x3dc   : > { %10848 = vst [vmem:[#allocation62_spill] sm:$0xff] %v9176_v63  ;;  %2164 = vadd.xlane.f32.xlu1 %v9182_v9  ;;  %v2200_v63 = vmul.f32 %v8938_v8, %v8938_v8 }
 0x3dd   : > { %10850 = vst [vmem:[#allocation43_spill] sm:$0xff] %v9179_v53  ;;  %2162 = vadd.xlane.f32.xlu0 %v9186_v21  ;;  %v1897_v17 = vpop.xlane.xlu1 %1896  ;;  %v2201_v53 = vmul.f32 %v8934_v48, %v8934_v48 }
 0x3de   : > { %v1895_v60 = vpop.xlane.xlu0 %1894  ;;  %v9194_v15 = vadd.f32 %v1897_v17, %v8694_v6  ;;  %v2203_v6 = vmul.f32 %v8952_v33, %v8952_v33  ;;  %v2202_v17 = vmul.f32 %v8956_v30, %v8956_v30 }
 0x3df   : > { %v9197_v14 = vadd.f32 %v1895_v60, %v10852_v49 }
 0x3e0   : > { %2232 = vadd.xlane.f32.xlu1 %v2199_v11 }
 0x3e1   : > { %2230 = vadd.xlane.f32.xlu0 %v2198_v4  ;;  %v1901_v36 = vpop.xlane.xlu1 %1900 }
 0x3e2   : > { %v1899_v44 = vpop.xlane.xlu0 %1898  ;;  %v9204_v7 = vadd.f32 %v1901_v36, %v8706_v51  ;;  %v2205_v51 = vmul.f32 %v8970_v5, %v8970_v5 }
 0x3e3   : > { %v9207_v21 = vadd.f32 %v1899_v44, %v8709_v39  ;;  %v2204_v39 = vmul.f32 %v8974_v58, %v8974_v58 }
 0x3e4   : > { %2236 = vadd.xlane.f32.xlu1 %v2201_v53 }
 0x3e5   : > { %2234 = vadd.xlane.f32.xlu0 %v2200_v63  ;;  %v1905_v48 = vpop.xlane.xlu1 %1904 }
 0x3e6   : > { %v1903_v4 = vpop.xlane.xlu0 %1902  ;;  %v9214_v8 = vadd.f32 %v1905_v48, %v8718_v54  ;;  %v2207_v54 = vmul.f32 %v8988_v10, %v8988_v10 }
 0x3e7   : > { %v9217_v11 = vadd.f32 %v1903_v4, %v8721_v59  ;;  %v2206_v59 = vmul.f32 %v8992_v13, %v8992_v13 }
 0x3e8   : > { %2240 = vadd.xlane.f32.xlu1 %v2203_v6 }
 0x3e9   : > { %2238 = vadd.xlane.f32.xlu0 %v2202_v17  ;;  %v1909_v33 = vpop.xlane.xlu1 %1908 }
 0x3ea   : > { %v1907_v44 = vpop.xlane.xlu0 %1906  ;;  %v9224_v30 = vadd.f32 %v1909_v33, %v8731_v62  ;;  %v2209_v62 = vmul.f32 %v9006_v32, %v9006_v32 }
 0x3eb   : > { %v9227_v63 = vadd.f32 %v1907_v44, %v8734_v47  ;;  %v2208_v47 = vmul.f32 %v9010_v42, %v9010_v42 }
 0x3ec   : > { %2244 = vadd.xlane.f32.xlu1 %v2205_v51 }
 0x3ed   : > { %2242 = vadd.xlane.f32.xlu0 %v2204_v39  ;;  %v1977_v5 = vpop.xlane.xlu1 %1976 }
 0x3ee   : > { %v1975_v53 = vpop.xlane.xlu0 %1974  ;;  %v9234_v58 = vadd.f32 %v1977_v5, %v8744_v31  ;;  %v2211_v31 = vmul.f32 %v9024_v0, %v9024_v0 }
 0x3ef   : > { %v9237_v60 = vadd.f32 %v1975_v53, %v8747_v12  ;;  %v2210_v12 = vmul.f32 %v9028_v55, %v9028_v55 }
 0x3f0   : > { %2248 = vadd.xlane.f32.xlu1 %v2207_v54 }
 0x3f1   : > { %2246 = vadd.xlane.f32.xlu0 %v2206_v59  ;;  %v1981_v10 = vpop.xlane.xlu1 %1980 }
 0x3f2   : > { %v1979_v49 = vpop.xlane.xlu0 %1978  ;;  %v9244_v13 = vadd.f32 %v1981_v10, %v8758_v25  ;;  %v2213_v25 = vmul.f32 %v9042_v46, %v9042_v46 }
 0x3f3   : > { %v9247_v36 = vadd.f32 %v1979_v49, %v8761_v22  ;;  %v2212_v22 = vmul.f32 %v9046_v50, %v9046_v50  ;;  %v10861_v49 = vld [vmem:[#allocation108_spill] sm:$0xff] }
 0x3f4   : > { %2252 = vadd.xlane.f32.xlu1 %v2209_v62 }
 0x3f5   : > { %2250 = vadd.xlane.f32.xlu0 %v2208_v47  ;;  %v1985_v32 = vpop.xlane.xlu1 %1984  ;;  %v10858_v47 = vld [vmem:[#allocation99_spill] sm:$0xff] }
 0x3f6   : > { %v1983_v6 = vpop.xlane.xlu0 %1982  ;;  %v9254_v42 = vadd.f32 %v1985_v32, %v8772_v52  ;;  %v2215_v52 = vmul.f32 %v9060_v27, %v9060_v27  ;;  %v10862_v32 = vld [vmem:[#allocation101_spill] sm:$0xff] }
 0x3f7   : > { %v9257_v17 = vadd.f32 %v1983_v6, %v8775_v34  ;;  %v2214_v34 = vmul.f32 %v9064_v45, %v9064_v45  ;;  %v10864_v6 = vld [vmem:[#allocation5_spill] sm:$0xff] }
 0x3f8   : > { %2256 = vadd.xlane.f32.xlu1 %v2211_v31  ;;  %v2224_v31 = vmul.f32 %v10861_v49, %v10861_v49 }
 0x3f9   : > { %2254 = vadd.xlane.f32.xlu0 %v2210_v12  ;;  %v1989_v0 = vpop.xlane.xlu1 %1988 }
 0x3fa   : > { %v1987_v48 = vpop.xlane.xlu0 %1986  ;;  %v9264_v55 = vadd.f32 %v1989_v0, %v8786_v28  ;;  %v2217_v28 = vmul.f32 %v9078_v38, %v9078_v38 }
 0x3fb   : > { %v9267_v4 = vadd.f32 %v1987_v48, %v8789_v41  ;;  %v2216_v41 = vmul.f32 %v9082_v18, %v9082_v18 }
 0x3fc   : > { %2260 = vadd.xlane.f32.xlu1 %v2213_v25 }
 0x3fd   : > { %2258 = vadd.xlane.f32.xlu0 %v2212_v22  ;;  %v1993_v46 = vpop.xlane.xlu1 %1992  ;;  %v2226_v22 = vmul.f32 %v9172_v57, %v9172_v57 }
 0x3fe   : > { %v1991_v51 = vpop.xlane.xlu0 %1990  ;;  %v9274_v50 = vadd.f32 %v1993_v46, %v8800_v29  ;;  %v2219_v29 = vmul.f32 %v9096_v43, %v9096_v43  ;;  %v10868_v46 = vld [vmem:[#allocation58_spill] sm:$0xff] }
 0x3ff   : > { %v9277_v39 = vadd.f32 %v1991_v51, %v8803_v56  ;;  %v2218_v56 = vmul.f32 %v9100_v37, %v9100_v37 }
 0x400   : > { %2264 = vadd.xlane.f32.xlu1 %v2215_v52  ;;  %v10866_v52 = vld [vmem:[#allocation6_spill] sm:$0xff] }
 0x401   : > { %2262 = vadd.xlane.f32.xlu0 %v2214_v34  ;;  %v1997_v27 = vpop.xlane.xlu1 %1996 }
 0x402   : > { %v1995_v33 = vpop.xlane.xlu0 %1994  ;;  %v9284_v45 = vadd.f32 %v1997_v27, %v8814_v19  ;;  %v2221_v19 = vmul.f32 %v9114_v3, %v9114_v3 }
 0x403   : > { %v9287_v44 = vadd.f32 %v1995_v33, %v8817_v35  ;;  %v2220_v35 = vmul.f32 %v9118_v23, %v9118_v23 }
 0x404   : > { %2268 = vadd.xlane.f32.xlu1 %v2217_v28  ;;  %v2229_v28 = vmul.f32 %v9182_v9, %v9182_v9 }
 0x405   : > { %2266 = vadd.xlane.f32.xlu0 %v2216_v41  ;;  %v2001_v38 = vpop.xlane.xlu1 %2000  ;;  %v10870_v41 = vld [vmem:[#allocation111_spill] sm:$0xff] }
 0x406   : > { %v1999_v54 = vpop.xlane.xlu0 %1998  ;;  %v9294_v18 = vadd.f32 %v2001_v38, %v8828_v40  ;;  %v2223_v40 = vmul.f32 %v9132_v1, %v9132_v1  ;;  %v2228_v27 = vmul.f32 %v10870_v41, %v10870_v41 }
 0x407   : > { %v9297_v59 = vadd.f32 %v1999_v54, %v8831_v16  ;;  %v2222_v16 = vmul.f32 %v9136_v61, %v9136_v61 }
 0x408   : > { %10853 = vst [vmem:[#allocation49_spill] sm:$0xff] %v9294_v18  ;;  %2272 = vadd.xlane.f32.xlu1 %v2219_v29  ;;  %v10871_v29 = vld [vmem:[#allocation59_spill] sm:$0xff] }
 0x409   : > { %10854 = vst [vmem:[#allocation112_spill] sm:$0xff] %v9297_v59  ;;  %2270 = vadd.xlane.f32.xlu0 %v2218_v56  ;;  %v2005_v43 = vpop.xlane.xlu1 %2004  ;;  %v10873_v56 = vld [vmem:[#allocation9_spill] sm:$0xff] }
 0x40a   : > { %v2003_v5 = vpop.xlane.xlu0 %2002  ;;  %v9304_v37 = vadd.f32 %v2005_v43, %v8842_v20  ;;  %v10860_v20 = vld [vmem:[#allocation107_spill] sm:$0xff] }
 0x40b   : > { %v9307_v53 = vadd.f32 %v2003_v5, %v8845_v2  ;;  %v2225_v2 = vmul.f32 %v10860_v20, %v10860_v20  ;;  %v10877_v5 = vld [vmem:[#allocation63_spill] sm:$0xff] }
 0x40c   : > { %10855 = vst [vmem:[#allocation113_spill] sm:$0xff] %v9304_v37  ;;  %2276 = vadd.xlane.f32.xlu1 %v2221_v19 }
 0x40d   : > { %10856 = vst [vmem:[#allocation114_spill] sm:$0xff] %v9307_v53  ;;  %2274 = vadd.xlane.f32.xlu0 %v2220_v35  ;;  %v2009_v3 = vpop.xlane.xlu1 %2008  ;;  %v10875_v35 = vld [vmem:[#allocation11_spill] sm:$0xff] }
 0x40e   : > { %v2007_v62 = vpop.xlane.xlu0 %2006  ;;  %v9314_v23 = vadd.f32 %v2009_v3, %v8856_v24  ;;  %v2227_v24 = vmul.f32 %v9168_v26, %v9168_v26  ;;  %v10879_v3 = vld [vmem:[#allocation12_spill] sm:$0xff] }
 0x40f   : > { %v9317_v10 = vadd.f32 %v2007_v62, %v10858_v47  ;;  %v10881_v47 = vld [vmem:[#allocation64_spill] sm:$0xff] }
 0x410   : > { %10857 = vst [vmem:[#allocation115_spill] sm:$0xff] %v9314_v23  ;;  %2280 = vadd.xlane.f32.xlu1 %v2223_v40 }
 0x411   : > { %10859 = vst [vmem:[#allocation99_spill] sm:$0xff] %v9317_v10  ;;  %2278 = vadd.xlane.f32.xlu0 %v2222_v16  ;;  %v2013_v1 = vpop.xlane.xlu1 %2012  ;;  %v10913_v10 = vld [vmem:[#allocation21_spill] sm:$0xff] }
 0x412   : > { %v2011_v12 = vpop.xlane.xlu0 %2010  ;;  %v9324_v61 = vadd.f32 %v2013_v1, %v10862_v32 }
 0x413   : > { %v9327_v25 = vadd.f32 %v2011_v12, %v10864_v6  ;;  %v10885_v12 = vld [vmem:[#allocation13_spill] sm:$0xff] }
 0x414   : > { %10863 = vst [vmem:[#allocation107_spill] sm:$0xff] %v9324_v61  ;;  %2284 = vadd.xlane.f32.xlu1 %v2225_v2 }
 0x415   : > { %10865 = vst [vmem:[#allocation108_spill] sm:$0xff] %v9327_v25  ;;  %2282 = vadd.xlane.f32.xlu0 %v2224_v31  ;;  %v2017_v0 = vpop.xlane.xlu1 %2016  ;;  %v10883_v31 = vld [vmem:[#allocation37_spill] sm:$0xff] }
 0x416   : > { %v2015_v48 = vpop.xlane.xlu0 %2014  ;;  %v9334_v34 = vadd.f32 %v2017_v0, %v10866_v52 }
 0x417   : > { %v9337_v51 = vadd.f32 %v2015_v48, %v10868_v46  ;;  %v10889_v48 = vld [vmem:[#allocation15_spill] sm:$0xff] }
 0x418   : > { %10867 = vst [vmem:[#allocation101_spill] sm:$0xff] %v9334_v34  ;;  %2288 = vadd.xlane.f32.xlu1 %v2227_v24  ;;  %v10910_v34 = vld [vmem:[#allocation43_spill] sm:$0xff] }
 0x419   : > { %10869 = vst [vmem:[#allocation5_spill] sm:$0xff] %v9337_v51  ;;  %2286 = vadd.xlane.f32.xlu0 %v2226_v22  ;;  %v2021_v26 = vpop.xlane.xlu1 %2020  ;;  %v10887_v22 = vld [vmem:[#allocation76_spill] sm:$0xff] }
 0x41a   : > { %v2019_v33 = vpop.xlane.xlu0 %2018  ;;  %v9344_v57 = vadd.f32 %v2021_v26, %v10871_v29  ;;  %v10891_v29 = vld [vmem:[#allocation25_spill] sm:$0xff] }
 0x41b   : > { %v9347_v38 = vadd.f32 %v2019_v33, %v10873_v56 }
 0x41c   : > { %10872 = vst [vmem:[#allocation6_spill] sm:$0xff] %v9344_v57  ;;  %2292 = vadd.xlane.f32.xlu1 %v2229_v28 }
 0x41d   : > { %10874 = vst [vmem:[#allocation58_spill] sm:$0xff] %v9347_v38  ;;  %2290 = vadd.xlane.f32.xlu0 %v2228_v27  ;;  %v2025_v54 = vpop.xlane.xlu1 %2024  ;;  %v10908_v38 = vld [vmem:[#allocation74_spill] sm:$0xff] }
 0x41e   : > { %v2023_v19 = vpop.xlane.xlu0 %2022  ;;  %v9350_v43 = vadd.f32 %v2025_v54, %v10875_v35  ;;  %v10892_v54 = vld [vmem:[#allocation26_spill] sm:$0xff] }
 0x41f   : > { %v9353_v9 = vadd.f32 %v2023_v19, %v10877_v5 }
 0x420   : > { %10876 = vst [vmem:[#allocation111_spill] sm:$0xff] %v9350_v43 }
 0x421   : > { %10878 = vst [vmem:[#allocation59_spill] sm:$0xff] %v9353_v9  ;;  %v2029_v40 = vpop.xlane.xlu1 %2028  ;;  %v10906_v9 = vld [vmem:[#allocation78_spill] sm:$0xff] }
 0x422   : > { %v2027_v16 = vpop.xlane.xlu0 %2026  ;;  %v9356_v62 = vadd.f32 %v2029_v40, %v10879_v3  ;;  %v10893_v40 = vld [vmem:[#allocation29_spill] sm:$0xff]  ;;  %v10894_v3 = vld [vmem:[#allocation30_spill] sm:$0xff] }
 0x423   : > { %v9359_v20 = vadd.f32 %v2027_v16, %v10881_v47 }
 0x424   : > { %10880 = vst [vmem:[#allocation9_spill] sm:$0xff] %v9356_v62 }
 0x425   : > { %10882 = vst [vmem:[#allocation11_spill] sm:$0xff] %v9359_v20  ;;  %v2033_v2 = vpop.xlane.xlu1 %2032  ;;  %v10904_v20 = vld [vmem:[#allocation60_spill] sm:$0xff] }
 0x426   : > { %v2031_v49 = vpop.xlane.xlu0 %2030  ;;  %v9362_v1 = vadd.f32 %v2033_v2, %v10883_v31  ;;  %v10895_v31 = vld [vmem:[#allocation34_spill] sm:$0xff] }
 0x427   : > { %v9365_v32 = vadd.f32 %v2031_v49, %v10885_v12 }
 0x428   : > { %10884 = vst [vmem:[#allocation63_spill] sm:$0xff] %v9362_v1 }
 0x429   : > { %10886 = vst [vmem:[#allocation12_spill] sm:$0xff] %v9365_v32  ;;  %v2037_v6 = vpop.xlane.xlu1 %2036  ;;  %v10902_v32 = vld [vmem:[#allocation77_spill] sm:$0xff] }
 0x42a   : > { %v2035_v24 = vpop.xlane.xlu0 %2034  ;;  %v9368_v0 = vadd.f32 %v2037_v6, %v10887_v22  ;;  %v10896_v6 = vld [vmem:[#allocation35_spill] sm:$0xff] }
 0x42b   : > { %v9371_v52 = vadd.f32 %v2035_v24, %v10889_v48 }
 0x42c   : > { %10888 = vst [vmem:[#allocation64_spill] sm:$0xff] %v9368_v0 }
 0x42d   : > { %10890 = vst [vmem:[#allocation37_spill] sm:$0xff] %v9371_v52  ;;  %v2105_v46 = vpop.xlane.xlu1 %2104  ;;  %v10900_v52 = vld [vmem:[#allocation41_spill] sm:$0xff] }
 0x42e   : > { %v2103_v28 = vpop.xlane.xlu0 %2102 }
 0x431   : > { %v2109_v41 = vpop.xlane.xlu1 %2108 }
 0x432   : > { %v2107_v27 = vpop.xlane.xlu0 %2106  ;;  %v2169_v23 = vadd.f32 %v2109_v41, %v10913_v10  ;;  %v4070_v10 = vld [vmem:[%s10148_s3] sm:$0x3] }
 0x434   : > { %v9459_v41 = vmul.f32 0.0009765625, %v2169_v23 }
 0x435   : > { %v2113_v26 = vpop.xlane.xlu1 %2112 }
 0x436   : > { %v2111_v33 = vpop.xlane.xlu0 %2110  ;;  %v9374_v56 = vadd.f32 %v2113_v26, %v10891_v29  ;;  %v10897_v26 = vld [vmem:[#allocation70_spill] sm:$0xff] }
 0x437   : > { %v9377_v19 = vadd.f32 %v2111_v33, %v10892_v54  ;;  %v10898_v29 = vld [vmem:[#allocation38_spill] sm:$0xff] }
 0x439   : > { %v2117_v35 = vpop.xlane.xlu1 %2116 }
 0x43a   : > { %v2115_v5 = vpop.xlane.xlu0 %2114  ;;  %v9380_v16 = vadd.f32 %v2117_v35, %v10893_v40 }
 0x43b   : > { %v9383_v47 = vadd.f32 %v2115_v5, %v10894_v3  ;;  %v10899_v5 = vld [vmem:[#allocation73_spill] sm:$0xff] }
 0x43d   : > { %v2121_v2 = vpop.xlane.xlu1 %2120 }
 0x43e   : > { %v2119_v49 = vpop.xlane.xlu0 %2118  ;;  %v9386_v12 = vadd.f32 %v2121_v2, %v10895_v31 }
 0x43f   : > { %v9389_v24 = vadd.f32 %v2119_v49, %v10896_v6  ;;  %v10901_v49 = vld [vmem:[#allocation44_spill] sm:$0xff] }
 0x441   : > { %v2125_v22 = vpop.xlane.xlu1 %2124 }
 0x442   : > { %v2123_v48 = vpop.xlane.xlu0 %2122  ;;  %v9392_v33 = vadd.f32 %v2125_v22, %v10897_v26 }
 0x443   : > { %v9395_v54 = vadd.f32 %v2123_v48, %v10898_v29  ;;  %v10903_v48 = vld [vmem:[#allocation8_spill] sm:$0xff] }
 0x445   : > { %v2129_v35 = vpop.xlane.xlu1 %2128 }
 0x446   : > { %v2127_v40 = vpop.xlane.xlu0 %2126  ;;  %v9398_v3 = vadd.f32 %v2129_v35, %v10899_v5 }
 0x447   : > { %v9401_v0 = vadd.f32 %v2127_v40, %v10900_v52  ;;  %v10905_v52 = vld [vmem:[#allocation45_spill] sm:$0xff] }
 0x449   : > { %v2133_v2 = vpop.xlane.xlu1 %2132 }
 0x44a   : > { %v2131_v31 = vpop.xlane.xlu0 %2130  ;;  %v9404_v6 = vadd.f32 %v2133_v2, %v10901_v49 }
 0x44b   : > { %v9407_v1 = vadd.f32 %v2131_v31, %v10902_v32  ;;  %v10907_v32 = vld [vmem:[#allocation46_spill] sm:$0xff] }
 0x44d   : > { %v2137_v22 = vpop.xlane.xlu1 %2136 }
 0x44e   : > { %v2135_v26 = vpop.xlane.xlu0 %2134  ;;  %v9410_v29 = vadd.f32 %v2137_v22, %v10903_v48 }
 0x44f   : > { %v9413_v62 = vadd.f32 %v2135_v26, %v10904_v20  ;;  %v3932_v20 = vlaneseq  ;;  %v10909_v26 = vld [vmem:[#allocation62_spill] sm:$0xff] }
 0x451   : > { %v2141_v35 = vpop.xlane.xlu1 %2140 }
 0x452   : > { %v2139_v5 = vpop.xlane.xlu0 %2138  ;;  %v9416_v40 = vadd.f32 %v2141_v35, %v10905_v52 }
 0x453   : > { %v9419_v43 = vadd.f32 %v2139_v5, %v10906_v9  ;;  %v3933_v5 = vshrl.u32 %v3932_v20, 7 }
 0x455   : > { %v2145_v2 = vpop.xlane.xlu1 %2144  ;;  %v3938_v37 = vsub.s32 1, %v3933_v5 }
 0x456   : > { %v2143_v49 = vpop.xlane.xlu0 %2142  ;;  %v9422_v31 = vadd.f32 %v2145_v2, %v10907_v32  ;;  %v10912_v32 = vld [vmem:[#allocation18_spill] sm:$0xff] }
 0x457   : > { %v9425_v57 = vadd.f32 %v2143_v49, %v10908_v38  ;;  %v10911_v38 = vld [vmem:[#allocation17_spill] sm:$0xff]  ;;  %v2166_v61 = vadd.f32 %v2103_v28, %v10912_v32  ;;  %v9482_v32 = vmul.f32 0.0009765625, %v9374_v56  ;;  %v9502_v56 = vmul.f32 0.0009765625, %v9386_v12 }
 0x458   : > { %v2167_v49 = vadd.f32 %v2105_v46, %v10911_v38  ;;  %v9475_v38 = vrot.slane %v4070_v10, %v3938_v37 }
 0x459   : > { %v2149_v22 = vpop.xlane.xlu1 %2148  ;;  %v9454_v28 = vmul.f32 0.0009765625, %v2166_v61  ;;  %10915 = vst [vmem:[#allocation13_spill] sm:$0xff] %v9502_v56 }
 0x45a   : > { %v2147_v48 = vpop.xlane.xlu0 %2146  ;;  %v9428_v51 = vadd.f32 %v2149_v22, %v10909_v26  ;;  %v10914_v22 = vld [vmem:[#allocation22_spill] sm:$0xff]  ;;  %v9452_v46 = vmul.f32 0.0009765625, %v2167_v49 }
 0x45b   : > { %v9431_v35 = vadd.f32 %v2147_v48, %v10910_v34  ;;  %v2168_v26 = vadd.f32 %v2107_v27, %v10914_v22  ;;  %v3934_v48 = vsub.s32 0, %v3933_v5  ;;  %v2390_v49 = vmul.f32 %v9454_v28, %v9454_v28 }
 0x45c   : > { %v2391_v23 = vmul.f32 %v9452_v46, %v9452_v46  ;;  %v9485_v22 = vmul.f32 0.0009765625, %v9377_v19  ;;  %v9505_v19 = vmul.f32 0.0009765625, %v9389_v24 }
 0x45d   : > { %v2153_v52 = vpop.xlane.xlu1 %2152  ;;  %v9461_v27 = vmul.f32 0.0009765625, %v2168_v26  ;;  %v9473_v5 = vrot.slane %v4070_v10, %v3934_v48  ;;  %v9499_v26 = vmul.f32 0.0009765625, %v9383_v47  ;;  %v9517_v47 = vmul.f32 0.0009765625, %v9401_v0 }
 0x45e   : > { %v2151_v9 = vpop.xlane.xlu0 %2150  ;;  %v9434_v25 = vadd.f32 %v2153_v52, %v9194_v15  ;;  %10916 = vst [vmem:[#allocation76_spill] sm:$0xff] %v9505_v19  ;;  %v9537_v0 = vmul.f32 0.0009765625, %v9407_v1  ;;  %v9559_v1 = vmul.f32 %v9505_v19, %v9505_v19 }
 0x45f   : > { %v9437_v2 = vadd.f32 %v2151_v9, %v9197_v14  ;;  %v3930_v14 = vld [vmem:[%s10147_s2] sm:$0x3]  ;;  %10920 = vst [vmem:[#allocation29_spill] sm:$0xff] %v9517_v47 }
 0x460   : > { %v9465_v52 = vrot.slane %v3930_v14, %v3938_v37  ;;  %v9496_v37 = vmul.f32 0.0009765625, %v9380_v16  ;;  %v9514_v16 = vmul.f32 0.0009765625, %v9398_v3  ;;  %v9534_v3 = vmul.f32 0.0009765625, %v9404_v6  ;;  %10922 = vst [vmem:[#allocation34_spill] sm:$0xff] %v9537_v0 }
 0x461   : > { %v2157_v53 = vpop.xlane.xlu1 %2156  ;;  %v9555_v6 = vmul.f32 %v9502_v56, %v9502_v56  ;;  %v9575_v56 = vmul.f32 %v9517_v47, %v9517_v47 }
 0x462   : > { %v2155_v34 = vpop.xlane.xlu0 %2154  ;;  %v9444_v20 = vadd.f32 %v2157_v53, %v9204_v7  ;;  %10919 = vst [vmem:[#allocation26_spill] sm:$0xff] %v9514_v16  ;;  %10921 = vst [vmem:[#allocation30_spill] sm:$0xff] %v9534_v3 }
 0x463   : > { %v9447_v15 = vadd.f32 %v2155_v34, %v9207_v21  ;;  %v9463_v21 = vrot.slane %v3930_v14, %v3934_v48  ;;  %v9508_v34 = vmul.f32 0.0009765625, %v9392_v33  ;;  %v9511_v48 = vmul.f32 0.0009765625, %v9395_v54 }
 0x464   : > { %v9527_v33 = vmul.f32 %v9482_v32, %v9482_v32  ;;  %v9531_v54 = vmul.f32 %v9485_v22, %v9485_v22 }
 0x465   : > { %v2161_v7 = vpop.xlane.xlu1 %2160  ;;  %10917 = vst [vmem:[#allocation15_spill] sm:$0xff] %v9508_v34  ;;  %10918 = vst [vmem:[#allocation25_spill] sm:$0xff] %v9511_v48 }
 0x466   : > { %v2159_v53 = vpop.xlane.xlu0 %2158  ;;  %v9468_v9 = vadd.f32 %v2161_v7, %v9214_v8  ;;  %v9489_v8 = vmul.f32 %v9459_v41, %v9459_v41  ;;  %v9548_v7 = vmul.f32 0.0009765625, %v9410_v29 }
 0x467   : > { %v9471_v61 = vadd.f32 %v2159_v53, %v9217_v11  ;;  %v9493_v11 = vmul.f32 %v9461_v27, %v9461_v27  ;;  %v9551_v53 = vmul.f32 0.0009765625, %v9413_v62  ;;  %v9571_v62 = vmul.f32 %v9514_v16, %v9514_v16 }
 0x468   : > { %10923 = vst [vmem:[#allocation35_spill] sm:$0xff] %v9548_v7  ;;  %v9591_v16 = vmul.f32 0.0009765625, %v9419_v43  ;;  %v9595_v47 = vmul.f32 %v9548_v7, %v9548_v7  ;;  %v9611_v43 = vmul.f32 0.0009765625, %v9431_v35  ;;  %v9627_v35 = vmul.f32 0.0009765625, %v9437_v2 }
 0x469   : > { %v2165_v14 = vpop.xlane.xlu1 %2164  ;;  %10924 = vst [vmem:[#allocation70_spill] sm:$0xff] %v9551_v53 }
 0x46a   : > { %v2163_v10 = vpop.xlane.xlu0 %2162  ;;  %v9520_v12 = vadd.f32 %v2165_v14, %v9224_v30  ;;  %v9541_v30 = vmul.f32 %v9496_v37, %v9496_v37  ;;  %v9563_v14 = vmul.f32 %v9508_v34, %v9508_v34  ;;  %v9581_v34 = vmul.f32 %v9534_v3, %v9534_v3  ;;  %10927 = vst [vmem:[#allocation41_spill] sm:$0xff] %v9591_v16 }
 0x46b   : > { %v9523_v24 = vadd.f32 %v2163_v10, %v9227_v63  ;;  %v9545_v63 = vmul.f32 %v9499_v26, %v9499_v26  ;;  %v9567_v10 = vmul.f32 %v9511_v48, %v9511_v48  ;;  %v9585_v48 = vmul.f32 %v9537_v0, %v9537_v0  ;;  %10928 = vst [vmem:[#allocation44_spill] sm:$0xff] %v9595_v47 }
 0x46c   : > { %v9605_v0 = vmul.f32 0.0009765625, %v9425_v57  ;;  %10932 = vst [vmem:[#allocation45_spill] sm:$0xff] %v9611_v43  ;;  %v9621_v57 = vmul.f32 %v9591_v16, %v9591_v16 }
 0x46d   : > { %10925 = vst [vmem:[#allocation38_spill] sm:$0xff] %v9567_v10  ;;  %v2233_v29 = vpop.xlane.xlu1 %2232  ;;  %10926 = vst [vmem:[#allocation73_spill] sm:$0xff] %v9585_v48  ;;  %v9588_v10 = vmul.f32 0.0009765625, %v9416_v40  ;;  %v9608_v40 = vmul.f32 0.0009765625, %v9428_v51  ;;  %v9624_v51 = vmul.f32 0.0009765625, %v9434_v25  ;;  %v9643_v25 = vmul.f32 %v9611_v43, %v9611_v43 }
 0x46e   : > { %v2231_v59 = vpop.xlane.xlu0 %2230  ;;  %v2295_v19 = vadd.f32 %v2233_v29, %v9234_v58  ;;  %v9599_v58 = vmul.f32 %v9551_v53, %v9551_v53  ;;  %v9602_v29 = vmul.f32 0.0009765625, %v9422_v31  ;;  %10930 = vst [vmem:[#allocation8_spill] sm:$0xff] %v9605_v0 }
 0x46f   : > { %v2294_v18 = vadd.f32 %v2231_v59, %v9237_v60  ;;  %10931 = vst [vmem:[#allocation60_spill] sm:$0xff] %v9608_v40  ;;  %v9617_v31 = vmul.f32 %v9588_v10, %v9588_v10  ;;  %10933 = vst [vmem:[#allocation78_spill] sm:$0xff] %v9624_v51 }
 0x470   : > { %v2359_v60 = vmul.f32 0.0009765625, %v2295_v19  ;;  %10929 = vst [vmem:[#allocation77_spill] sm:$0xff] %v9602_v29 }
 0x471   : > { %v2358_v59 = vmul.f32 0.0009765625, %v2294_v18  ;;  %v2237_v7 = vpop.xlane.xlu1 %2236 }
 0x472   : > { %v2235_v3 = vpop.xlane.xlu0 %2234  ;;  %v2423_v47 = vsub.f32 %v2359_v60, %v2391_v23  ;;  %v2297_v53 = vadd.f32 %v2237_v7, %v9244_v13  ;;  %v9639_v7 = vmul.f32 %v9608_v40, %v9608_v40 }
 0x473   : > { %v2422_v48 = vsub.f32 %v2358_v59, %v2390_v49  ;;  %v2296_v18 = vadd.f32 %v2235_v3, %v9247_v36  ;;  %v9631_v36 = vmul.f32 %v9602_v29, %v9602_v29  ;;  %v9635_v3 = vmul.f32 %v9605_v0, %v9605_v0 }
 0x474   : > { %v2455_v23 = vmax.f32 %v2423_v47, 0.0  ;;  %v2361_v19 = vmul.f32 0.0009765625, %v2297_v53  ;;  %v9652_v0 = vmul.f32 0.0009765625, %v9444_v20  ;;  %v9658_v29 = vmul.f32 %v9627_v35, %v9627_v35 }
 0x475   : > { %v2454_v49 = vmax.f32 %v2422_v48, 0.0  ;;  %v2360_v13 = vmul.f32 0.0009765625, %v2296_v18  ;;  %v2241_v2 = vpop.xlane.xlu1 %2240  ;;  %v9649_v18 = vmul.f32 %v9624_v51, %v9624_v51 }
 0x476   : > { %v2239_v48 = vpop.xlane.xlu0 %2238  ;;  %v2487_v47 = vadd.f32 1e-05, %v2455_v23  ;;  %v2425_v60 = vsub.f32 %v2361_v19, %v9489_v8  ;;  %v2299_v40 = vadd.f32 %v2241_v2, %v9254_v42  ;;  %v9667_v2 = vmul.f32 %v9652_v0, %v9652_v0 }
 0x477   : > { %v2486_v53 = vadd.f32 1e-05, %v2454_v49  ;;  %v2424_v59 = vsub.f32 %v2360_v13, %v9493_v11  ;;  %v2298_v43 = vadd.f32 %v2239_v48, %v9257_v17  ;;  %v9661_v11 = vmul.f32 0.0009765625, %v9447_v15 }
 0x478   : > { %4993 = vrsqrt.f32 %v2487_v47  ;;  %v2457_v23 = vmax.f32 %v2425_v60, 0.0  ;;  %v2363_v49 = vmul.f32 0.0009765625, %v2299_v40  ;;  %v9670_v48 = vmul.f32 0.0009765625, %v9468_v9 }
 0x479   : > { %v2456_v8 = vmax.f32 %v2424_v59, 0.0  ;;  %4995 = vrsqrt.f32 %v2486_v53  ;;  %v2362_v19 = vmul.f32 0.0009765625, %v2298_v43  ;;  %v2245_v13 = vpop.xlane.xlu1 %2244  ;;  %v9675_v43 = vmul.f32 0.0009765625, %v9471_v61 }
 0x47a   : > { %v2243_v20 = vpop.xlane.xlu0 %2242  ;;  %v2489_v51 = vadd.f32 1e-05, %v2457_v23  ;;  %v2301_v42 = vadd.f32 %v2245_v13, %v9264_v55  ;;  %10934 = vst [vmem:[#allocation46_spill] sm:$0xff] %v9670_v48  ;;  %v2427_v15 = vsub.f32 %v2363_v49, %v9527_v33  ;;  %v9678_v55 = vmul.f32 0.0009765625, %v9520_v12 }
 0x47b   : > { %v2488_v16 = vadd.f32 1e-05, %v2456_v8  ;;  %v2300_v17 = vadd.f32 %v2243_v20, %v9267_v4  ;;  %v2426_v40 = vsub.f32 %v2362_v19, %v9531_v54  ;;  %10935 = vst [vmem:[#allocation74_spill] sm:$0xff] %v9675_v43 }
 0x47c   : > { %4997 = vrsqrt.f32 %v2489_v51  ;;  %v2365_v47 = vmul.f32 0.0009765625, %v2301_v42  ;;  %10936 = vst [vmem:[#allocation62_spill] sm:$0xff] %v9678_v55  ;;  %v2459_v4 = vmax.f32 %v2427_v15, 0.0  ;;  %v9686_v51 = vmul.f32 %v9661_v11, %v9661_v11 }
 0x47d   : > { %v2364_v53 = vmul.f32 0.0009765625, %v2300_v17  ;;  %4999 = vrsqrt.f32 %v2488_v16  ;;  %v2458_v60 = vmax.f32 %v2426_v40, 0.0  ;;  %v2249_v59 = vpop.xlane.xlu1 %2248  ;;  %v9690_v16 = vmul.f32 %v9670_v48, %v9670_v48 }
 0x47e   : > { %v2247_v23 = vpop.xlane.xlu0 %2246  ;;  %v2429_v9 = vsub.f32 %v2365_v47, %v9541_v30  ;;  %v2303_v54 = vadd.f32 %v2249_v59, %v9274_v50  ;;  %v2491_v12 = vadd.f32 1e-05, %v2459_v4  ;;  %v9698_v50 = vmul.f32 %v9678_v55, %v9678_v55  ;;  %v10937_v47 = vld [vmem:[#allocation48_spill] sm:$0xff]  ;;  %v10938_v4 = vld [vmem:[#allocation82_spill] sm:$0xff] }
 0x47f   : > { %v2428_v33 = vsub.f32 %v2364_v53, %v9545_v63  ;;  %v2302_v61 = vadd.f32 %v2247_v23, %v9277_v39  ;;  %v2490_v8 = vadd.f32 1e-05, %v2458_v60  ;;  %v9694_v63 = vmul.f32 %v9675_v43, %v9675_v43 }
 0x480   : > { %v2461_v49 = vmax.f32 %v2429_v9, 0.0  ;;  %v2367_v30 = vmul.f32 0.0009765625, %v2303_v54  ;;  %v9701_v39 = vmul.f32 0.0009765625, %v9523_v24  ;;  %5001 = vrsqrt.f32 %v2491_v12 }
 0x481   : > { %v2460_v19 = vmax.f32 %v2428_v33, 0.0  ;;  %v2366_v13 = vmul.f32 0.0009765625, %v2302_v61  ;;  %5003 = vrsqrt.f32 %v2490_v8  ;;  %v2253_v24 = vpop.xlane.xlu1 %2252  ;;  %v10939_v33 = vld [vmem:[#allocation10_spill] sm:$0xff]  ;;  %v10940_v61 = vld [vmem:[#allocation80_spill] sm:$0xff] }
 0x482   : > { %v4994_v20 = vpop.eup %4993  ;;  %v2493_v42 = vadd.f32 1e-05, %v2461_v49  ;;  %v2431_v15 = vsub.f32 %v2367_v30, %v9555_v6  ;;  %v9709_v9 = vpop.xlane.xlu0 %2250 }
 0x483   : > { %v2492_v17 = vadd.f32 1e-05, %v2460_v19  ;;  %v4996_v40 = vpop.eup %4995  ;;  %v3836_v53 = vmul.f32 %v4994_v20, %v10937_v47  ;;  %v3837_v60 = vmul.f32 %v4994_v20, %v10938_v4  ;;  %v3899_v59 = vmul.f32 %v4994_v20, %v9452_v46 }
 0x484   : > { %v2430_v23 = vsub.f32 %v2366_v13, %v9559_v1  ;;  %v3834_v54 = vmul.f32 %v4996_v40, %v10939_v33  ;;  %v3835_v12 = vmul.f32 %v4996_v40, %v10940_v61  ;;  %v3898_v8 = vmul.f32 %v4996_v40, %v9454_v28  ;;  %v10941_v40 = vld [vmem:[#allocation52_spill] sm:$0xff]  ;;  %v10942_v33 = vld [vmem:[#allocation85_spill] sm:$0xff] }
 0x485   : > { %5005 = vrsqrt.f32 %v2493_v42  ;;  %v3944_v6 = vmul.f32 %v9463_v21, %v3899_v59  ;;  %v3945_v49 = vmul.f32 %v9465_v52, %v3899_v59  ;;  %v2463_v46 = vmax.f32 %v2431_v15, 0.0  ;;  %v10943_v15 = vld [vmem:[#allocation83_spill] sm:$0xff] }
 0x486   : > { %5007 = vrsqrt.f32 %v2492_v17  ;;  %v4998_v19 = vpop.eup %4997  ;;  %v3942_v1 = vmul.f32 %v9463_v21, %v3898_v8  ;;  %v3943_v30 = vmul.f32 %v9465_v52, %v3898_v8  ;;  %v2462_v13 = vmax.f32 %v2430_v23, 0.0  ;;  %v10944_v8 = vld [vmem:[#allocation51_spill] sm:$0xff] }
 0x487   : > { %v9721_v20 = vadd.f32 %v2253_v24, %v9284_v45  ;;  %v5000_v47 = vpop.eup %4999  ;;  %v4008_v28 = vsub.f32 %v3836_v53, %v3944_v6  ;;  %v4009_v42 = vsub.f32 %v3837_v60, %v3945_v49  ;;  %v3840_v4 = vmul.f32 %v4998_v19, %v10941_v40  ;;  %v9731_v53 = vpop.xlane.xlu1 %2256 }
 0x488   : > { %v3841_v61 = vmul.f32 %v4998_v19, %v10942_v33  ;;  %v4006_v55 = vsub.f32 %v3834_v54, %v3942_v1  ;;  %v4007_v59 = vsub.f32 %v3835_v12, %v3943_v30  ;;  %v3901_v17 = vmul.f32 %v4998_v19, %v9459_v41  ;;  %v9733_v60 = vpop.xlane.xlu0 %2254  ;;  %v10946_v33 = vld [vmem:[#allocation88_spill] sm:$0xff] }
 0x489   : > { %v3838_v43 = vmul.f32 %v5000_v47, %v10943_v15  ;;  %v4084_v48 = vadd.f32 %v9473_v5, %v4008_v28  ;;  %v4085_v23 = vadd.f32 %v9475_v38, %v4009_v42  ;;  %v3839_v45 = vmul.f32 %v5000_v47, %v10944_v8  ;;  %v10945_v42 = vld [vmem:[#allocation55_spill] sm:$0xff] }
 0x48a   : > { %v3900_v24 = vmul.f32 %v5000_v47, %v9461_v27  ;;  %v4082_v6 = vadd.f32 %v9473_v5, %v4006_v55  ;;  %v4083_v54 = vadd.f32 %v9475_v38, %v4007_v59  ;;  %v3948_v41 = vmul.f32 %v9463_v21, %v3901_v17  ;;  %v5002_v49 = vpop.eup %5001 }
 0x48b   : > { %v3949_v12 = vmul.f32 %v9465_v52, %v3901_v17  ;;  %4148 = vst [vmem:[%s9739_s21 + $0x10] sm:$0xff] %v4084_v48  ;;  %4149 = vst [vmem:[%s9739_s21 + $0x18] sm:$0xff] %v4085_v23  ;;  %v2495_v55 = vadd.f32 1e-05, %v2463_v46  ;;  %v2494_v1 = vadd.f32 1e-05, %v2462_v13  ;;  %v5004_v30 = vpop.eup %5003  ;;  %v3844_v40 = vmul.f32 %v5002_v49, %v10945_v42 }
 0x48c   : > { %v3946_v27 = vmul.f32 %v9463_v21, %v3900_v24  ;;  %v3947_v19 = vmul.f32 %v9465_v52, %v3900_v24  ;;  %4146 = vst [vmem:[%s9739_s21] sm:$0xff] %v4082_v6  ;;  %4147 = vst [vmem:[%s9739_s21 + $0x8] sm:$0xff] %v4083_v54  ;;  %v4012_v47 = vsub.f32 %v3840_v4, %v3948_v41  ;;  %v10947_v23 = vld [vmem:[#allocation86_spill] sm:$0xff] }
 0x48d   : > { %v4013_v28 = vsub.f32 %v3841_v61, %v3949_v12  ;;  %v3845_v59 = vmul.f32 %v5002_v49, %v10946_v33  ;;  %v3903_v48 = vmul.f32 %v5002_v49, %v9482_v32  ;;  %v3842_v8 = vmul.f32 %v5004_v30, %v10947_v23  ;;  %v10948_v6 = vld [vmem:[#allocation54_spill] sm:$0xff]  ;;  %v2261_v12 = vpop.xlane.xlu1 %2260  ;;  %v2259_v49 = vpop.xlane.xlu0 %2258 }
 0x48e   : > { %v4010_v17 = vsub.f32 %v3838_v43, %v3946_v27  ;;  %v4011_v15 = vsub.f32 %v3839_v45, %v3947_v19  ;;  %v4088_v46 = vadd.f32 %v9473_v5, %v4012_v47  ;;  %v3843_v4 = vmul.f32 %v5004_v30, %v10948_v6  ;;  %v10949_v47 = vld [vmem:[#allocation89_spill] sm:$0xff] }
 0x48f   : > { %v5006_v24 = vpop.eup %5005  ;;  %v4089_v13 = vadd.f32 %v9475_v38, %v4013_v28  ;;  %v3902_v61 = vmul.f32 %v5004_v30, %v9485_v22  ;;  %v3952_v32 = vmul.f32 %v9463_v21, %v3903_v48  ;;  %v3953_v41 = vmul.f32 %v9465_v52, %v3903_v48  ;;  %v10950_v22 = vld [vmem:[#allocation90_spill] sm:$0xff] }
 0x490   : > { %v5008_v54 = vpop.eup %5007  ;;  %v4086_v43 = vadd.f32 %v9473_v5, %v4010_v17  ;;  %v4087_v45 = vadd.f32 %v9475_v38, %v4011_v15  ;;  %4152 = vst [vmem:[%s9739_s21 + $0x30] sm:$0xff] %v4088_v46  ;;  %v3848_v28 = vmul.f32 %v5006_v24, %v10949_v47  ;;  %v3849_v30 = vmul.f32 %v5006_v24, %v10950_v22  ;;  %v10951_v15 = vld [vmem:[#allocation47_spill] sm:$0xff] }
 0x491   : > { %4153 = vst [vmem:[%s9739_s21 + $0x38] sm:$0xff] %v4089_v13  ;;  %v3950_v27 = vmul.f32 %v9463_v21, %v3902_v61  ;;  %v3951_v19 = vmul.f32 %v9465_v52, %v3902_v61  ;;  %v4016_v42 = vsub.f32 %v3844_v40, %v3952_v32  ;;  %v4017_v33 = vsub.f32 %v3845_v59, %v3953_v41  ;;  %v10952_v13 = vld [vmem:[#allocation79_spill] sm:$0xff]  ;;  %v2265_v32 = vpop.xlane.xlu1 %2264  ;;  %v2263_v41 = vpop.xlane.xlu0 %2262 }
 0x492   : > { %4150 = vst [vmem:[%s9739_s21 + $0x20] sm:$0xff] %v4086_v43  ;;  %4151 = vst [vmem:[%s9739_s21 + $0x28] sm:$0xff] %v4087_v45  ;;  %v3905_v17 = vmul.f32 %v5006_v24, %v9496_v37  ;;  %v3846_v48 = vmul.f32 %v5008_v54, %v10951_v15  ;;  %v3847_v6 = vmul.f32 %v5008_v54, %v10952_v13  ;;  %5009 = vrsqrt.f32 %v2495_v55  ;;  %v10956_v13 = vld [vmem:[#allocation114_spill] sm:$0xff] }
 0x493   : > { %v4014_v23 = vsub.f32 %v3842_v8, %v3950_v27  ;;  %v4015_v46 = vsub.f32 %v3843_v4, %v3951_v19  ;;  %v3904_v61 = vmul.f32 %v5008_v54, %v9499_v26  ;;  %v4092_v47 = vadd.f32 %v9473_v5, %v4016_v42 }
 0x494   : > { %v4093_v43 = vadd.f32 %v9475_v38, %v4017_v33  ;;  %v3956_v40 = vmul.f32 %v9463_v21, %v3905_v17  ;;  %v3957_v59 = vmul.f32 %v9465_v52, %v3905_v17  ;;  %v2369_v45 = vmul.f32 0.0009765625, %v9721_v20 }
 0x495   : > { %v4090_v37 = vadd.f32 %v9473_v5, %v4014_v23  ;;  %v4091_v24 = vadd.f32 %v9475_v38, %v4015_v46  ;;  %v3954_v8 = vmul.f32 %v9463_v21, %v3904_v61  ;;  %v3955_v4 = vmul.f32 %v9465_v52, %v3904_v61  ;;  %4156 = vst [vmem:[%s9739_s21 + $0x50] sm:$0xff] %v4092_v47  ;;  %v10955_v23 = vld [vmem:[#allocation113_spill] sm:$0xff]  ;;  %v10958_v47 = vld [vmem:[#allocation115_spill] sm:$0xff] }
 0x496   : > { %4157 = vst [vmem:[%s9739_s21 + $0x58] sm:$0xff] %v4093_v43  ;;  %v4020_v26 = vsub.f32 %v3848_v28, %v3956_v40  ;;  %v4021_v54 = vsub.f32 %v3849_v30, %v3957_v59  ;;  %5011 = vrsqrt.f32 %v2494_v1  ;;  %v2304_v22 = vadd.f32 %v9709_v9, %v9287_v44  ;;  %v10953_v30 = vld [vmem:[#allocation49_spill] sm:$0xff]  ;;  %v10954_v1 = vld [vmem:[#allocation112_spill] sm:$0xff]  ;;  %v10959_v40 = vld [vmem:[#allocation99_spill] sm:$0xff] }
 0x497   : > { %4154 = vst [vmem:[%s9739_s21 + $0x40] sm:$0xff] %v4090_v37  ;;  %4155 = vst [vmem:[%s9739_s21 + $0x48] sm:$0xff] %v4091_v24  ;;  %v4018_v27 = vsub.f32 %v3846_v48, %v3954_v8  ;;  %v4019_v19 = vsub.f32 %v3847_v6, %v3955_v4  ;;  %v2433_v20 = vsub.f32 %v2369_v45, %v9563_v14  ;;  %v10957_v14 = vld [vmem:[#allocation38_spill] sm:$0xff]  ;;  %v2269_v4 = vpop.xlane.xlu1 %2268 }
 0x498   : > { %v4096_v28 = vadd.f32 %v9473_v5, %v4020_v26  ;;  %v4097_v55 = vadd.f32 %v9475_v38, %v4021_v54  ;;  %v2307_v42 = vadd.f32 %v9731_v53, %v10953_v30  ;;  %v2368_v15 = vmul.f32 0.0009765625, %v2304_v22  ;;  %v9805_v26 = vpop.xlane.xlu0 %2266 }
 0x499   : > { %v4094_v33 = vadd.f32 %v9473_v5, %v4018_v27  ;;  %v4095_v17 = vadd.f32 %v9475_v38, %v4019_v19  ;;  %v2306_v48 = vadd.f32 %v9733_v60, %v10954_v1  ;;  %v2465_v44 = vmax.f32 %v2433_v20, 0.0 }
 0x49a   : > { %4160 = vst [vmem:[%s9739_s21 + $0x70] sm:$0xff] %v4096_v28  ;;  %4161 = vst [vmem:[%s9739_s21 + $0x78] sm:$0xff] %v4097_v55  ;;  %v2371_v9 = vmul.f32 0.0009765625, %v2307_v42  ;;  %v2309_v46 = vadd.f32 %v2261_v12, %v10955_v23  ;;  %v2308_v6 = vadd.f32 %v2259_v49, %v10956_v13  ;;  %v2432_v53 = vsub.f32 %v2368_v15, %v10957_v14  ;;  %v10961_v55 = vld [vmem:[#allocation44_spill] sm:$0xff]  ;;  %v10962_v15 = vld [vmem:[#allocation107_spill] sm:$0xff] }
 0x49b   : > { %4158 = vst [vmem:[%s9739_s21 + $0x60] sm:$0xff] %v4094_v33  ;;  %4159 = vst [vmem:[%s9739_s21 + $0x68] sm:$0xff] %v4095_v17  ;;  %v2370_v61 = vmul.f32 0.0009765625, %v2306_v48  ;;  %v2311_v43 = vadd.f32 %v2265_v32, %v10958_v47  ;;  %v2310_v59 = vadd.f32 %v2263_v41, %v10959_v40  ;;  %v2497_v37 = vadd.f32 1e-05, %v2465_v44  ;;  %v10960_v32 = vld [vmem:[#allocation73_spill] sm:$0xff]  ;;  %v2273_v47 = vpop.xlane.xlu1 %2272 }
 0x49c   : > { %v2435_v60 = vsub.f32 %v2371_v9, %v9571_v62  ;;  %v2373_v24 = vmul.f32 0.0009765625, %v2309_v46  ;;  %v2372_v8 = vmul.f32 0.0009765625, %v2308_v6  ;;  %v2464_v12 = vmax.f32 %v2432_v53, 0.0  ;;  %v5010_v30 = vpop.eup %5009  ;;  %v10963_v48 = vld [vmem:[#allocation92_spill] sm:$0xff]  ;;  %v10964_v9 = vld [vmem:[#allocation93_spill] sm:$0xff]  ;;  %v10966_v13 = vld [vmem:[#allocation50_spill] sm:$0xff] }
 0x49d   : > { %v2434_v49 = vsub.f32 %v2370_v61, %v9575_v56  ;;  %v2375_v54 = vmul.f32 0.0009765625, %v2311_v43  ;;  %v2374_v45 = vmul.f32 0.0009765625, %v2310_v59  ;;  %5013 = vrsqrt.f32 %v2497_v37  ;;  %v10967_v14 = vld [vmem:[#allocation81_spill] sm:$0xff]  ;;  %v10968_v61 = vld [vmem:[#allocation76_spill] sm:$0xff]  ;;  %v2271_v43 = vpop.xlane.xlu0 %2270 }
 0x49e   : > { %v2467_v27 = vmax.f32 %v2435_v60, 0.0  ;;  %v2437_v19 = vsub.f32 %v2373_v24, %v9581_v34  ;;  %v2436_v22 = vsub.f32 %v2372_v8, %v10960_v32  ;;  %v2496_v41 = vadd.f32 1e-05, %v2464_v12  ;;  %v10965_v34 = vld [vmem:[#allocation13_spill] sm:$0xff] }
 0x49f   : > { %v2466_v28 = vmax.f32 %v2434_v49, 0.0  ;;  %v2439_v62 = vsub.f32 %v2375_v54, %v10961_v55  ;;  %v2438_v20 = vsub.f32 %v2374_v45, %v9599_v58  ;;  %v2313_v56 = vadd.f32 %v2269_v4, %v10962_v15 }
 0x4a0   : > { %v2499_v42 = vadd.f32 1e-05, %v2467_v27  ;;  %v2469_v33 = vmax.f32 %v2437_v19, 0.0  ;;  %v2468_v17 = vmax.f32 %v2436_v22, 0.0  ;;  %v5012_v1 = vpop.eup %5011  ;;  %v3852_v44 = vmul.f32 %v5010_v30, %v10963_v48 }
 0x4a1   : > { %v3853_v23 = vmul.f32 %v5010_v30, %v10964_v9  ;;  %v3907_v46 = vmul.f32 %v5010_v30, %v10965_v34  ;;  %5015 = vrsqrt.f32 %v2496_v41  ;;  %v3850_v6 = vmul.f32 %v5012_v1, %v10966_v13  ;;  %v10972_v34 = vld [vmem:[#allocation108_spill] sm:$0xff]  ;;  %v10973_v13 = vld [vmem:[#allocation101_spill] sm:$0xff] }
 0x4a2   : > { %v3851_v53 = vmul.f32 %v5012_v1, %v10967_v14  ;;  %v3906_v58 = vmul.f32 %v5012_v1, %v10968_v61  ;;  %5017 = vrsqrt.f32 %v2499_v42  ;;  %v2498_v37 = vadd.f32 1e-05, %v2466_v28  ;;  %v2277_v42 = vpop.xlane.xlu1 %2276  ;;  %v10970_v1 = vld [vmem:[#allocation96_spill] sm:$0xff] }
 0x4a3   : > { %v3960_v40 = vmul.f32 %v9463_v21, %v3907_v46  ;;  %v3961_v59 = vmul.f32 %v9465_v52, %v3907_v46  ;;  %v2501_v60 = vadd.f32 1e-05, %v2469_v33  ;;  %v2500_v4 = vadd.f32 1e-05, %v2468_v17  ;;  %v2275_v33 = vpop.xlane.xlu0 %2274  ;;  %v10969_v17 = vld [vmem:[#allocation95_spill] sm:$0xff] }
 0x4a4   : > { %v3958_v24 = vmul.f32 %v9463_v21, %v3906_v58  ;;  %v3959_v8 = vmul.f32 %v9465_v52, %v3906_v58  ;;  %v2471_v12 = vmax.f32 %v2439_v62, 0.0  ;;  %5019 = vrsqrt.f32 %v2498_v37  ;;  %v10976_v37 = vld [vmem:[#allocation58_spill] sm:$0xff] }
 0x4a5   : > { %v4024_v49 = vsub.f32 %v3852_v44, %v3960_v40  ;;  %v4025_v54 = vsub.f32 %v3853_v23, %v3961_v59  ;;  %v2470_v45 = vmax.f32 %v2438_v20, 0.0  ;;  %5021 = vrsqrt.f32 %v2501_v60  ;;  %v10971_v44 = vld [vmem:[#allocation15_spill] sm:$0xff]  ;;  %v10975_v40 = vld [vmem:[#allocation6_spill] sm:$0xff] }
 0x4a6   : > { %v4022_v27 = vsub.f32 %v3850_v6, %v3958_v24  ;;  %v4023_v19 = vsub.f32 %v3851_v53, %v3959_v8  ;;  %v2503_v32 = vadd.f32 1e-05, %v2471_v12  ;;  %5023 = vrsqrt.f32 %v2500_v4  ;;  %v10974_v6 = vld [vmem:[#allocation5_spill] sm:$0xff] }
 0x4a7   : > { %v4100_v22 = vadd.f32 %v9473_v5, %v4024_v49  ;;  %v4101_v41 = vadd.f32 %v9475_v38, %v4025_v54  ;;  %v2502_v28 = vadd.f32 1e-05, %v2470_v45  ;;  %v5014_v55 = vpop.eup %5013  ;;  %v2377_v20 = vmul.f32 0.0009765625, %v2313_v56  ;;  %v10977_v24 = vld [vmem:[#allocation53_spill] sm:$0xff]  ;;  %v10980_v45 = vld [vmem:[#allocation98_spill] sm:$0xff] }
 0x4a8   : > { %v4098_v62 = vadd.f32 %v9473_v5, %v4022_v27  ;;  %v4099_v30 = vadd.f32 %v9475_v38, %v4023_v19  ;;  %5025 = vrsqrt.f32 %v2503_v32  ;;  %v3856_v15 = vmul.f32 %v5014_v55, %v10969_v17  ;;  %v10981_v19 = vld [vmem:[#allocation94_spill] sm:$0xff] }
 0x4a9   : > { %4164 = vst [vmem:[%s9739_s21 + $0x90] sm:$0xff] %v4100_v22  ;;  %4165 = vst [vmem:[%s9739_s21 + $0x98] sm:$0xff] %v4101_v41  ;;  %v3857_v48 = vmul.f32 %v5014_v55, %v10970_v1  ;;  %v3909_v9 = vmul.f32 %v5014_v55, %v10971_v44  ;;  %5027 = vrsqrt.f32 %v2502_v28  ;;  %v2441_v23 = vsub.f32 %v2377_v20, %v9617_v31  ;;  %v10982_v28 = vld [vmem:[#allocation26_spill] sm:$0xff] }
 0x4aa   : > { %4162 = vst [vmem:[%s9739_s21 + $0x80] sm:$0xff] %v4098_v62  ;;  %4163 = vst [vmem:[%s9739_s21 + $0x88] sm:$0xff] %v4099_v30  ;;  %v2312_v46 = vadd.f32 %v9805_v26, %v10972_v34  ;;  %v2315_v56 = vadd.f32 %v2273_v47, %v10973_v13  ;;  %v9839_v14 = vadd.f32 %v2271_v43, %v10974_v6  ;;  %v10978_v26 = vld [vmem:[#allocation84_spill] sm:$0xff]  ;;  %v10979_v47 = vld [vmem:[#allocation25_spill] sm:$0xff] }
 0x4ab   : > { %v5016_v53 = vpop.eup %5015  ;;  %v3964_v61 = vmul.f32 %v9463_v21, %v3909_v9  ;;  %v3965_v58 = vmul.f32 %v9465_v52, %v3909_v9  ;;  %v9844_v59 = vadd.f32 %v2277_v42, %v10975_v40  ;;  %v9847_v60 = vadd.f32 %v2275_v33, %v10976_v37  ;;  %v10983_v34 = vld [vmem:[#allocation56_spill] sm:$0xff]  ;;  %v10984_v6 = vld [vmem:[#allocation87_spill] sm:$0xff] }
 0x4ac   : > { %v5018_v31 = vpop.eup %5017  ;;  %v3854_v8 = vmul.f32 %v5016_v53, %v10977_v24  ;;  %v3855_v4 = vmul.f32 %v5016_v53, %v10978_v26  ;;  %v3908_v12 = vmul.f32 %v5016_v53, %v10979_v47  ;;  %v2473_v43 = vmax.f32 %v2441_v23, 0.0 }
 0x4ad   : > { %v4028_v49 = vsub.f32 %v3856_v15, %v3964_v61  ;;  %v4029_v54 = vsub.f32 %v3857_v48, %v3965_v58  ;;  %v3860_v27 = vmul.f32 %v5018_v31, %v10980_v45  ;;  %v3861_v32 = vmul.f32 %v5018_v31, %v10981_v19 }
 0x4ae   : > { %v3962_v22 = vmul.f32 %v9463_v21, %v3908_v12  ;;  %v3963_v41 = vmul.f32 %v9465_v52, %v3908_v12  ;;  %v3911_v55 = vmul.f32 %v5018_v31, %v10982_v28  ;;  %v9857_v62 = vadd.f32 1e-05, %v2473_v43  ;;  %v5020_v30 = vpop.eup %5019  ;;  %v10987_v12 = vld [vmem:[#allocation7_spill] sm:$0xff] }
 0x4af   : > { %v4104_v20 = vadd.f32 %v9473_v5, %v4028_v49  ;;  %v4105_v42 = vadd.f32 %v9475_v38, %v4029_v54  ;;  %v9861_v33 = vmul.f32 0.0009765625, %v2312_v46  ;;  %v9863_v17 = vmul.f32 0.0009765625, %v2315_v56  ;;  %v5022_v15 = vpop.eup %5021  ;;  %v10985_v46 = vld [vmem:[#allocation29_spill] sm:$0xff]  ;;  %v10988_v49 = vld [vmem:[#allocation30_spill] sm:$0xff] }
 0x4b0   : > { %v4026_v1 = vsub.f32 %v3854_v8, %v3962_v22  ;;  %v4027_v48 = vsub.f32 %v3855_v4, %v3963_v41  ;;  %v3968_v44 = vmul.f32 %v9463_v21, %v3911_v55  ;;  %v3969_v9 = vmul.f32 %v9465_v52, %v3911_v55  ;;  %v5024_v23 = vpop.eup %5023  ;;  %v10986_v56 = vld [vmem:[#allocation97_spill] sm:$0xff]  ;;  %v10989_v22 = vld [vmem:[#allocation91_spill] sm:$0xff] }
 0x4b1   : > { %4168 = vst [vmem:[%s9739_s21 + $0xb0] sm:$0xff] %v4104_v20  ;;  %4169 = vst [vmem:[%s9739_s21 + $0xb8] sm:$0xff] %v4105_v42  ;;  %v3858_v13 = vmul.f32 %v5020_v30, %v10983_v34  ;;  %v3859_v53 = vmul.f32 %v5020_v30, %v10984_v6  ;;  %v3910_v61 = vmul.f32 %v5020_v30, %v10985_v46  ;;  %v2281_v42 = vpop.xlane.xlu1 %2280  ;;  %v10994_v6 = vld [vmem:[#allocation35_spill] sm:$0xff]  ;;  %5029 = vrsqrt.f32 %v9857_v62 }
 0x4b2   : > { %v3864_v58 = vmul.f32 %v5022_v15, %v10986_v56  ;;  %v5026_v40 = vpop.eup %5025  ;;  %v4102_v37 = vadd.f32 %v9473_v5, %v4026_v1  ;;  %v4103_v31 = vadd.f32 %v9475_v38, %v4027_v48  ;;  %v4032_v24 = vsub.f32 %v3860_v27, %v3968_v44  ;;  %v10992_v48 = vld [vmem:[#allocation61_spill] sm:$0xff] }
 0x4b3   : > { %v4033_v8 = vsub.f32 %v3861_v32, %v3969_v9  ;;  %v5028_v26 = vpop.eup %5027  ;;  %v3966_v4 = vmul.f32 %v9463_v21, %v3910_v61  ;;  %v3967_v47 = vmul.f32 %v9465_v52, %v3910_v61  ;;  %v3865_v43 = vmul.f32 %v5022_v15, %v10987_v12  ;;  %v10990_v32 = vld [vmem:[#allocation100_spill] sm:$0xff]  ;;  %v10993_v9 = vld [vmem:[#allocation65_spill] sm:$0xff] }
 0x4b4   : > { %v3913_v54 = vmul.f32 %v5022_v15, %v10988_v49  ;;  %4166 = vst [vmem:[%s9739_s21 + $0xa0] sm:$0xff] %v4102_v37  ;;  %4167 = vst [vmem:[%s9739_s21 + $0xa8] sm:$0xff] %v4103_v31  ;;  %v4108_v45 = vadd.f32 %v9473_v5, %v4032_v24  ;;  %v3862_v27 = vmul.f32 %v5024_v23, %v10989_v22  ;;  %v10991_v15 = vld [vmem:[#allocation34_spill] sm:$0xff] }
 0x4b5   : > { %v4109_v19 = vadd.f32 %v9475_v38, %v4033_v8  ;;  %v3863_v41 = vmul.f32 %v5024_v23, %v10990_v32  ;;  %v4030_v28 = vsub.f32 %v3858_v13, %v3966_v4  ;;  %v4031_v55 = vsub.f32 %v3859_v53, %v3967_v47  ;;  %v10995_v4 = vld [vmem:[#allocation57_spill] sm:$0xff]  ;;  %v10997_v22 = vld [vmem:[#allocation70_spill] sm:$0xff] }
 0x4b6   : > { %v3972_v30 = vmul.f32 %v9463_v21, %v3913_v54  ;;  %v3973_v20 = vmul.f32 %v9465_v52, %v3913_v54  ;;  %4172 = vst [vmem:[%s9739_s21 + $0xd0] sm:$0xff] %v4108_v45  ;;  %v3912_v1 = vmul.f32 %v5024_v23, %v10991_v15  ;;  %v3868_v44 = vmul.f32 %v5026_v40, %v10992_v48 }
 0x4b7   : > { %4173 = vst [vmem:[%s9739_s21 + $0xd8] sm:$0xff] %v4109_v19  ;;  %v3869_v34 = vmul.f32 %v5026_v40, %v10993_v9  ;;  %v3915_v46 = vmul.f32 %v5026_v40, %v10994_v6  ;;  %v4106_v13 = vadd.f32 %v9473_v5, %v4030_v28  ;;  %v4107_v53 = vadd.f32 %v9475_v38, %v4031_v55  ;;  %v2279_v19 = vpop.xlane.xlu0 %2278 }
 0x4b8   : > { %v4036_v61 = vsub.f32 %v3864_v58, %v3972_v30  ;;  %v4037_v56 = vsub.f32 %v3865_v43, %v3973_v20  ;;  %v3970_v37 = vmul.f32 %v9463_v21, %v3912_v1  ;;  %v3971_v31 = vmul.f32 %v9465_v52, %v3912_v1  ;;  %v10996_v58 = vld [vmem:[#allocation33_spill] sm:$0xff] }
 0x4b9   : > { %v3976_v23 = vmul.f32 %v9463_v21, %v3915_v46  ;;  %v3977_v24 = vmul.f32 %v9465_v52, %v3915_v46  ;;  %4170 = vst [vmem:[%s9739_s21 + $0xc0] sm:$0xff] %v4106_v13  ;;  %4171 = vst [vmem:[%s9739_s21 + $0xc8] sm:$0xff] %v4107_v53  ;;  %v3866_v47 = vmul.f32 %v5028_v26, %v10995_v4  ;;  %v11001_v4 = vld [vmem:[#allocation11_spill] sm:$0xff] }
 0x4ba   : > { %v4112_v40 = vadd.f32 %v9473_v5, %v4036_v61  ;;  %v4113_v8 = vadd.f32 %v9475_v38, %v4037_v56  ;;  %v3867_v12 = vmul.f32 %v5028_v26, %v10996_v58  ;;  %v4034_v43 = vsub.f32 %v3862_v27, %v3970_v37 }
 0x4bb   : > { %v4035_v49 = vsub.f32 %v3863_v41, %v3971_v31  ;;  %v4040_v54 = vsub.f32 %v3868_v44, %v3976_v23  ;;  %v4041_v45 = vsub.f32 %v3869_v34, %v3977_v24  ;;  %v3914_v32 = vmul.f32 %v5028_v26, %v10997_v22  ;;  %v2285_v41 = vpop.xlane.xlu1 %2284 }
 0x4bc   : > { %4176 = vst [vmem:[%s9739_s21 + $0xf0] sm:$0xff] %v4112_v40  ;;  %4177 = vst [vmem:[%s9739_s21 + $0xf8] sm:$0xff] %v4113_v8  ;;  %v2440_v28 = vsub.f32 %v9861_v33, %v9621_v57  ;;  %v2443_v27 = vsub.f32 %v9863_v17, %v9631_v36  ;;  %v4110_v55 = vadd.f32 %v9473_v5, %v4034_v43  ;;  %v2378_v57 = vmul.f32 0.0009765625, %v9839_v14  ;;  %v10998_v17 = vld [vmem:[#allocation111_spill] sm:$0xff]  ;;  %v2283_v14 = vpop.xlane.xlu0 %2282 }
 0x4bd   : > { %v4111_v30 = vadd.f32 %v9475_v38, %v4035_v49  ;;  %v4116_v20 = vadd.f32 %v9473_v5, %v4040_v54  ;;  %v4117_v15 = vadd.f32 %v9475_v38, %v4041_v45  ;;  %v3974_v26 = vmul.f32 %v9463_v21, %v3914_v32  ;;  %v11002_v49 = vld [vmem:[#allocation63_spill] sm:$0xff]  ;;  %v5030_v45 = vpop.eup %5029 }
 0x4be   : > { %v3975_v1 = vmul.f32 %v9465_v52, %v3914_v32  ;;  %v2472_v62 = vmax.f32 %v2440_v28, 0.0  ;;  %v2475_v48 = vmax.f32 %v2443_v27, 0.0  ;;  %4174 = vst [vmem:[%s9739_s21 + $0xe0] sm:$0xff] %v4110_v55  ;;  %v2381_v36 = vmul.f32 0.0009765625, %v9844_v59  ;;  %v11003_v27 = vld [vmem:[#allocation66_spill] sm:$0xff] }
 0x4bf   : > { %4175 = vst [vmem:[%s9739_s21 + $0xe8] sm:$0xff] %v4111_v30  ;;  %4180 = vst [vmem:[%s9739_s21 + $0x110] sm:$0xff] %v4116_v20  ;;  %v2380_v33 = vmul.f32 0.0009765625, %v9847_v60  ;;  %v2319_v44 = vadd.f32 %v2281_v42, %v10998_v17  ;;  %v4038_v9 = vsub.f32 %v3866_v47, %v3974_v26  ;;  %v2442_v13 = vsub.f32 %v2378_v57, %v9635_v3  ;;  %v10999_v42 = vld [vmem:[#allocation59_spill] sm:$0xff]  ;;  %v2289_v31 = vpop.xlane.xlu1 %2288  ;;  %v11004_v30 = vld [vmem:[#allocation40_spill] sm:$0xff] }
 0x4c0   : > { %4181 = vst [vmem:[%s9739_s21 + $0x118] sm:$0xff] %v4117_v15  ;;  %v4039_v34 = vsub.f32 %v3867_v12, %v3975_v1  ;;  %v2504_v6 = vadd.f32 1e-05, %v2472_v62  ;;  %v2507_v46 = vadd.f32 1e-05, %v2475_v48  ;;  %v2445_v53 = vsub.f32 %v2381_v36, %v9639_v7  ;;  %v2287_v1 = vpop.xlane.xlu0 %2286 }
 0x4c1   : > { %v2444_v61 = vsub.f32 %v2380_v33, %v9643_v25  ;;  %v2383_v56 = vmul.f32 0.0009765625, %v2319_v44  ;;  %v4114_v59 = vadd.f32 %v9473_v5, %v4038_v9  ;;  %v2318_v37 = vadd.f32 %v2279_v19, %v10999_v42  ;;  %v11000_v25 = vld [vmem:[#allocation9_spill] sm:$0xff]  ;;  %v11008_v42 = vld [vmem:[#allocation67_spill] sm:$0xff] }
 0x4c2   : > { %v4115_v60 = vadd.f32 %v9475_v38, %v4039_v34  ;;  %5031 = vrsqrt.f32 %v2504_v6  ;;  %v2474_v23 = vmax.f32 %v2442_v13, 0.0  ;;  %v2477_v24 = vmax.f32 %v2445_v53, 0.0  ;;  %v11005_v34 = vld [vmem:[#allocation12_spill] sm:$0xff] }
 0x4c3   : > { %5033 = vrsqrt.f32 %v2507_v46  ;;  %v2476_v40 = vmax.f32 %v2444_v61, 0.0  ;;  %4178 = vst [vmem:[%s9739_s21 + $0x100] sm:$0xff] %v4114_v59  ;;  %v2447_v3 = vsub.f32 %v2383_v56, %v9649_v18  ;;  %v2382_v7 = vmul.f32 0.0009765625, %v2318_v37  ;;  %v2293_v57 = vpop.xlane.xlu1 %2292  ;;  %v11006_v53 = vld [vmem:[#allocation64_spill] sm:$0xff]  ;;  %v11007_v59 = vld [vmem:[#allocation71_spill] sm:$0xff] }
 0x4c4   : > { %4179 = vst [vmem:[%s9739_s21 + $0x108] sm:$0xff] %v4115_v60  ;;  %v2321_v8 = vadd.f32 %v2285_v41, %v11000_v25  ;;  %v2320_v47 = vadd.f32 %v2283_v14, %v11001_v4  ;;  %v2506_v58 = vadd.f32 1e-05, %v2474_v23  ;;  %v2509_v12 = vadd.f32 1e-05, %v2477_v24  ;;  %v11010_v24 = vld [vmem:[#allocation68_spill] sm:$0xff] }
 0x4c5   : > { %v2508_v43 = vadd.f32 1e-05, %v2476_v40  ;;  %v2323_v54 = vadd.f32 %v2289_v31, %v11002_v49  ;;  %v2479_v19 = vmax.f32 %v2447_v3, 0.0  ;;  %v2446_v22 = vsub.f32 %v2382_v7, %v9658_v29  ;;  %v11009_v31 = vld [vmem:[#allocation41_spill] sm:$0xff]  ;;  %v11011_v3 = vld [vmem:[#allocation19_spill] sm:$0xff] }
 0x4c6   : > { %v2385_v32 = vmul.f32 0.0009765625, %v2321_v8  ;;  %v2384_v28 = vmul.f32 0.0009765625, %v2320_v47  ;;  %v3872_v55 = vmul.f32 %v5030_v45, %v11003_v27  ;;  %v3873_v18 = vmul.f32 %v5030_v45, %v11004_v30  ;;  %v11012_v25 = vld [vmem:[#allocation77_spill] sm:$0xff] }
 0x4c7   : > { %v3917_v20 = vmul.f32 %v5030_v45, %v9588_v10  ;;  %5035 = vrsqrt.f32 %v2506_v58  ;;  %v2511_v41 = vadd.f32 1e-05, %v2479_v19  ;;  %v2478_v15 = vmax.f32 %v2446_v22, 0.0 }
 0x4c8   : > { %5037 = vrsqrt.f32 %v2509_v12  ;;  %v2449_v26 = vsub.f32 %v2385_v32, %v9667_v2  ;;  %v2448_v29 = vsub.f32 %v2384_v28, %v9686_v51  ;;  %v2387_v17 = vmul.f32 0.0009765625, %v2323_v54 }
 0x4c9   : > { %v3980_v62 = vmul.f32 %v9463_v21, %v3917_v20  ;;  %v3981_v48 = vmul.f32 %v9465_v52, %v3917_v20  ;;  %5039 = vrsqrt.f32 %v2508_v43  ;;  %v2510_v36 = vadd.f32 1e-05, %v2478_v15  ;;  %v11013_v20 = vld [vmem:[#allocation14_spill] sm:$0xff]  ;;  %v11014_v15 = vld [vmem:[#allocation16_spill] sm:$0xff] }
 0x4ca   : > { %5041 = vrsqrt.f32 %v2511_v41  ;;  %v2481_v33 = vmax.f32 %v2449_v26, 0.0  ;;  %v2480_v9 = vmax.f32 %v2448_v29, 0.0  ;;  %v2322_v6 = vadd.f32 %v2287_v1, %v11005_v34  ;;  %v11015_v1 = vld [vmem:[#allocation8_spill] sm:$0xff]  ;;  %v11017_v34 = vld [vmem:[#allocation27_spill] sm:$0xff] }
 0x4cb   : > { %v4044_v10 = vsub.f32 %v3872_v55, %v3980_v62  ;;  %v4045_v44 = vsub.f32 %v3873_v18, %v3981_v48  ;;  %5043 = vrsqrt.f32 %v2510_v36  ;;  %v2451_v13 = vsub.f32 %v2387_v17, %v9690_v16  ;;  %v11016_v48 = vld [vmem:[#allocation24_spill] sm:$0xff] }
 0x4cc   : > { %v5032_v2 = vpop.eup %5031  ;;  %v2513_v46 = vadd.f32 1e-05, %v2481_v33  ;;  %v2325_v61 = vadd.f32 %v2293_v57, %v11006_v53  ;;  %v2512_v16 = vadd.f32 1e-05, %v2480_v9  ;;  %v9960_v47 = vmul.f32 0.0009765625, %v2322_v6  ;;  %v11019_v53 = vld [vmem:[#allocation20_spill] sm:$0xff] }
 0x4cd   : > { %v5034_v51 = vpop.eup %5033  ;;  %v4120_v56 = vadd.f32 %v9473_v5, %v4044_v10  ;;  %v4121_v14 = vadd.f32 %v9475_v38, %v4045_v44  ;;  %v3870_v60 = vmul.f32 %v5032_v2, %v11007_v59  ;;  %v3871_v37 = vmul.f32 %v5032_v2, %v11008_v42 }
 0x4ce   : > { %v3916_v23 = vmul.f32 %v5032_v2, %v11009_v31  ;;  %v3876_v40 = vmul.f32 %v5034_v51, %v11010_v24  ;;  %v3877_v7 = vmul.f32 %v5034_v51, %v11011_v3  ;;  %v3919_v8 = vmul.f32 %v5034_v51, %v11012_v25  ;;  %v11018_v2 = vld [vmem:[#allocation60_spill] sm:$0xff]  ;;  %v11020_v51 = vld [vmem:[#allocation23_spill] sm:$0xff] }
 0x4cf   : > { %4184 = vst [vmem:[%s9739_s21 + $0x130] sm:$0xff] %v4120_v56  ;;  %4185 = vst [vmem:[%s9739_s21 + $0x138] sm:$0xff] %v4121_v14  ;;  %5045 = vrsqrt.f32 %v2513_v46  ;;  %v2483_v4 = vmax.f32 %v2451_v13, 0.0  ;;  %v2450_v19 = vsub.f32 %v9960_v47, %v9694_v63  ;;  %v9970_v22 = vmul.f32 0.0009765625, %v2325_v61  ;;  %v11021_v14 = vld [vmem:[#allocation45_spill] sm:$0xff] }
 0x4d0   : > { %v3978_v58 = vmul.f32 %v9463_v21, %v3916_v23  ;;  %v3979_v12 = vmul.f32 %v9465_v52, %v3916_v23  ;;  %v3984_v43 = vmul.f32 %v9463_v21, %v3919_v8  ;;  %v3985_v49 = vmul.f32 %v9465_v52, %v3919_v8  ;;  %v11024_v8 = vld [vmem:[#allocation78_spill] sm:$0xff] }
 0x4d1   : > { %v5036_v54 = vpop.eup %5035  ;;  %5047 = vrsqrt.f32 %v2512_v16  ;;  %v9966_v45 = vadd.f32 1e-05, %v2483_v4 }
 0x4d2   : > { %v5038_v32 = vpop.eup %5037  ;;  %v4042_v28 = vsub.f32 %v3870_v60, %v3978_v58  ;;  %v4043_v27 = vsub.f32 %v3871_v37, %v3979_v12  ;;  %v4048_v55 = vsub.f32 %v3876_v40, %v3984_v43  ;;  %v4049_v30 = vsub.f32 %v3877_v7, %v3985_v49  ;;  %v11022_v60 = vld [vmem:[#allocation32_spill] sm:$0xff] }
 0x4d3   : > { %v5040_v18 = vpop.eup %5039  ;;  %v3874_v41 = vmul.f32 %v5036_v54, %v11013_v20  ;;  %v3875_v26 = vmul.f32 %v5036_v54, %v11014_v15  ;;  %v3918_v62 = vmul.f32 %v5036_v54, %v11015_v1  ;;  %v3880_v29 = vmul.f32 %v5038_v32, %v11016_v48  ;;  %v11023_v7 = vld [vmem:[#allocation36_spill] sm:$0xff]  ;;  %v11026_v15 = vld [vmem:[#allocation31_spill] sm:$0xff] }
 0x4d4   : > { %v5042_v57 = vpop.eup %5041  ;;  %v4118_v36 = vadd.f32 %v9473_v5, %v4042_v28  ;;  %v4119_v33 = vadd.f32 %v9475_v38, %v4043_v27  ;;  %v4124_v17 = vadd.f32 %v9473_v5, %v4048_v55  ;;  %v4125_v10 = vadd.f32 %v9475_v38, %v4049_v30  ;;  %v11025_v20 = vld [vmem:[#allocation28_spill] sm:$0xff] }
 0x4d5   : > { %v3982_v44 = vmul.f32 %v9463_v21, %v3918_v62  ;;  %v3983_v9 = vmul.f32 %v9465_v52, %v3918_v62  ;;  %v3881_v6 = vmul.f32 %v5038_v32, %v11017_v34  ;;  %v3921_v46 = vmul.f32 %v5038_v32, %v11018_v2  ;;  %v5044_v13 = vpop.eup %5043 }
 0x4d6   : > { %4182 = vst [vmem:[%s9739_s21 + $0x120] sm:$0xff] %v4118_v36  ;;  %4183 = vst [vmem:[%s9739_s21 + $0x128] sm:$0xff] %v4119_v33  ;;  %v3878_v61 = vmul.f32 %v5040_v18, %v11019_v53  ;;  %v3879_v56 = vmul.f32 %v5040_v18, %v11020_v51  ;;  %v3920_v59 = vmul.f32 %v5040_v18, %v11021_v14  ;;  %v11027_v36 = vld [vmem:[#allocation72_spill] sm:$0xff]  ;;  %5049 = vrsqrt.f32 %v9966_v45 }
 0x4d7   : > { %4188 = vst [vmem:[%s9739_s21 + $0x150] sm:$0xff] %v4124_v17  ;;  %4189 = vst [vmem:[%s9739_s21 + $0x158] sm:$0xff] %v4125_v10  ;;  %v3884_v42 = vmul.f32 %v5042_v57, %v11022_v60  ;;  %v4046_v37 = vsub.f32 %v3874_v41, %v3982_v44  ;;  %v4047_v31 = vsub.f32 %v3875_v26, %v3983_v9  ;;  %v11028_v17 = vld [vmem:[#allocation42_spill] sm:$0xff] }
 0x4d8   : > { %v3988_v23 = vmul.f32 %v9463_v21, %v3921_v46  ;;  %v3989_v24 = vmul.f32 %v9465_v52, %v3921_v46  ;;  %v3986_v40 = vmul.f32 %v9463_v21, %v3920_v59  ;;  %v3987_v3 = vmul.f32 %v9465_v52, %v3920_v59  ;;  %v11030_v46 = vld [vmem:[#allocation39_spill] sm:$0xff] }
 0x4d9   : > { %v3885_v25 = vmul.f32 %v5042_v57, %v11023_v7  ;;  %v3923_v16 = vmul.f32 %v5042_v57, %v11024_v8  ;;  %v5046_v4 = vpop.eup %5045  ;;  %v4122_v58 = vadd.f32 %v9473_v5, %v4046_v37  ;;  %v4123_v12 = vadd.f32 %v9475_v38, %v4047_v31  ;;  %v11031_v7 = vld [vmem:[#allocation37_spill] sm:$0xff] }
 0x4da   : > { %v4052_v43 = vsub.f32 %v3880_v29, %v3988_v23  ;;  %v4053_v49 = vsub.f32 %v3881_v6, %v3989_v24  ;;  %v4050_v54 = vsub.f32 %v3878_v61, %v3986_v40  ;;  %v4051_v32 = vsub.f32 %v3879_v56, %v3987_v3  ;;  %v11029_v6 = vld [vmem:[#allocation69_spill] sm:$0xff]  ;;  %v2291_v24 = vpop.xlane.xlu0 %2290 }
 0x4db   : > { %v3992_v28 = vmul.f32 %v9463_v21, %v3923_v16  ;;  %v3993_v27 = vmul.f32 %v9465_v52, %v3923_v16  ;;  %v5048_v55 = vpop.eup %5047  ;;  %4186 = vst [vmem:[%s9739_s21 + $0x140] sm:$0xff] %v4122_v58  ;;  %4187 = vst [vmem:[%s9739_s21 + $0x148] sm:$0xff] %v4123_v12  ;;  %v3882_v41 = vmul.f32 %v5044_v13, %v11025_v20  ;;  %v2482_v56 = vmax.f32 %v2450_v19, 0.0 }
 0x4dc   : > { %v4128_v30 = vadd.f32 %v9473_v5, %v4052_v43  ;;  %v4129_v18 = vadd.f32 %v9475_v38, %v4053_v49  ;;  %v3883_v26 = vmul.f32 %v5044_v13, %v11026_v15  ;;  %v4126_v1 = vadd.f32 %v9473_v5, %v4050_v54  ;;  %v11032_v49 = vld [vmem:[#allocation103_spill] sm:$0xff] }
 0x4dd   : > { %v4127_v62 = vadd.f32 %v9475_v38, %v4051_v32  ;;  %v4056_v48 = vsub.f32 %v3884_v42, %v3992_v28  ;;  %v4057_v29 = vsub.f32 %v3885_v25, %v3993_v27  ;;  %v3922_v57 = vmul.f32 %v5044_v13, %v9627_v35  ;;  %v11033_v32 = vld [vmem:[#allocation104_spill] sm:$0xff]  ;;  %v11034_v27 = vld [vmem:[#allocation46_spill] sm:$0xff] }
 0x4de   : > { %4192 = vst [vmem:[%s9739_s21 + $0x170] sm:$0xff] %v4128_v30  ;;  %4193 = vst [vmem:[%s9739_s21 + $0x178] sm:$0xff] %v4129_v18  ;;  %v3888_v33 = vmul.f32 %v5046_v4, %v11027_v36  ;;  %v3889_v10 = vmul.f32 %v5046_v4, %v11028_v17  ;;  %v3925_v44 = vmul.f32 %v5046_v4, %v9652_v0  ;;  %v2514_v45 = vadd.f32 1e-05, %v2482_v56 }
 0x4df   : > { %4190 = vst [vmem:[%s9739_s21 + $0x160] sm:$0xff] %v4126_v1  ;;  %4191 = vst [vmem:[%s9739_s21 + $0x168] sm:$0xff] %v4127_v62  ;;  %v4132_v9 = vadd.f32 %v9473_v5, %v4056_v48  ;;  %v4133_v34 = vadd.f32 %v9475_v38, %v4057_v29  ;;  %v3886_v2 = vmul.f32 %v5048_v55, %v11029_v6  ;;  %v11035_v62 = vld [vmem:[#allocation75_spill] sm:$0xff]  ;;  %v11036_v29 = vld [vmem:[#allocation102_spill] sm:$0xff] }
 0x4e0   : > { %v3887_v53 = vmul.f32 %v5048_v55, %v11030_v46  ;;  %v3990_v61 = vmul.f32 %v9463_v21, %v3922_v57  ;;  %v3991_v35 = vmul.f32 %v9465_v52, %v3922_v57  ;;  %v3996_v13 = vmul.f32 %v9463_v21, %v3925_v44  ;;  %v5050_v43 = vpop.eup %5049  ;;  %v11039_v6 = vld [vmem:[#allocation110_spill] sm:$0xff] }
 0x4e1   : > { %v3997_v51 = vmul.f32 %v9465_v52, %v3925_v44  ;;  %4196 = vst [vmem:[%s9739_s21 + $0x190] sm:$0xff] %v4132_v9  ;;  %4197 = vst [vmem:[%s9739_s21 + $0x198] sm:$0xff] %v4133_v34  ;;  %v3924_v0 = vmul.f32 %v5048_v55, %v9661_v11  ;;  %v2453_v14 = vsub.f32 %v9970_v22, %v9698_v50  ;;  %5051 = vrsqrt.f32 %v2514_v45  ;;  %v11038_v9 = vld [vmem:[#allocation109_spill] sm:$0xff] }
 0x4e2   : > { %v4054_v59 = vsub.f32 %v3882_v41, %v3990_v61  ;;  %v4055_v60 = vsub.f32 %v3883_v26, %v3991_v35  ;;  %v4060_v42 = vsub.f32 %v3888_v33, %v3996_v13  ;;  %v2324_v25 = vadd.f32 %v2291_v24, %v11031_v7  ;;  %v11037_v33 = vld [vmem:[#allocation74_spill] sm:$0xff]  ;;  %v11041_v45 = vld [vmem:[#allocation105_spill] sm:$0xff] }
 0x4e3   : > { %v4061_v37 = vsub.f32 %v3889_v10, %v3997_v51  ;;  %v3994_v31 = vmul.f32 %v9463_v21, %v3924_v0  ;;  %v3995_v11 = vmul.f32 %v9465_v52, %v3924_v0  ;;  %v2485_v23 = vmax.f32 %v2453_v14, 0.0  ;;  %v11040_v61 = vld [vmem:[#allocation62_spill] sm:$0xff] }
 0x4e4   : > { %v4130_v63 = vadd.f32 %v9473_v5, %v4054_v59  ;;  %v4131_v47 = vadd.f32 %v9475_v38, %v4055_v60  ;;  %v4136_v50 = vadd.f32 %v9473_v5, %v4060_v42  ;;  %v2420_v4 = vmul.f32 %v9701_v39, %v9701_v39  ;;  %v11042_v24 = vld [vmem:[#allocation106_spill] sm:$0xff] }
 0x4e5   : > { %v4137_v19 = vadd.f32 %v9475_v38, %v4061_v37  ;;  %v4058_v22 = vsub.f32 %v3886_v2, %v3994_v31  ;;  %v4059_v40 = vsub.f32 %v3887_v53, %v3995_v11  ;;  %v2517_v3 = vadd.f32 1e-05, %v2485_v23 }
 0x4e6   : > { %4194 = vst [vmem:[%s9739_s21 + $0x180] sm:$0xff] %v4130_v63  ;;  %4195 = vst [vmem:[%s9739_s21 + $0x188] sm:$0xff] %v4131_v47  ;;  %v2388_v58 = vmul.f32 0.0009765625, %v2324_v25  ;;  %v3892_v54 = vmul.f32 %v5050_v43, %v11032_v49  ;;  %v3893_v28 = vmul.f32 %v5050_v43, %v11033_v32  ;;  %v3927_v55 = vmul.f32 %v5050_v43, %v11034_v27 }
 0x4e7   : > { %4200 = vst [vmem:[%s9739_s21 + $0x1b0] sm:$0xff] %v4136_v50  ;;  %4201 = vst [vmem:[%s9739_s21 + $0x1b8] sm:$0xff] %v4137_v19  ;;  %v4134_v8 = vadd.f32 %v9473_v5, %v4058_v22  ;;  %v4135_v16 = vadd.f32 %v9475_v38, %v4059_v40  ;;  %5053 = vrsqrt.f32 %v2517_v3 }
 0x4e8   : > { %v2452_v12 = vsub.f32 %v2388_v58, %v2420_v4  ;;  %v4000_v18 = vmul.f32 %v9463_v21, %v3927_v55  ;;  %v4001_v20 = vmul.f32 %v9465_v52, %v3927_v55 }
 0x4e9   : > { %4198 = vst [vmem:[%s9739_s21 + $0x1a0] sm:$0xff] %v4134_v8  ;;  %4199 = vst [vmem:[%s9739_s21 + $0x1a8] sm:$0xff] %v4135_v16 }
 0x4ea   : > { %v2484_v30 = vmax.f32 %v2452_v12, 0.0  ;;  %v4064_v26 = vsub.f32 %v3892_v54, %v4000_v18  ;;  %v4065_v1 = vsub.f32 %v3893_v28, %v4001_v20 }
 0x4eb   : > { %v5052_v15 = vpop.eup %5051 }
 0x4ec   : > { %v2516_v41 = vadd.f32 1e-05, %v2484_v30  ;;  %v3890_v48 = vmul.f32 %v5052_v15, %v11035_v62  ;;  %v3891_v57 = vmul.f32 %v5052_v15, %v11036_v29  ;;  %v3926_v17 = vmul.f32 %v5052_v15, %v11037_v33 }
 0x4ed   : > { %v4140_v10 = vadd.f32 %v9473_v5, %v4064_v26  ;;  %v4141_v44 = vadd.f32 %v9475_v38, %v4065_v1 }
 0x4ee   : > { %5055 = vrsqrt.f32 %v2516_v41  ;;  %v3998_v46 = vmul.f32 %v9463_v21, %v3926_v17  ;;  %v3999_v53 = vmul.f32 %v9465_v52, %v3926_v17 }
 0x4ef   : > { %4204 = vst [vmem:[%s9739_s21 + $0x1d0] sm:$0xff] %v4140_v10  ;;  %4205 = vst [vmem:[%s9739_s21 + $0x1d8] sm:$0xff] %v4141_v44 }
 0x4f0   : > { %v4062_v13 = vsub.f32 %v3890_v48, %v3998_v46  ;;  %v4063_v51 = vsub.f32 %v3891_v57, %v3999_v53 }
 0x4f1   : > { %v5054_v36 = vpop.eup %5053 }
 0x4f2   : > { %v3896_v34 = vmul.f32 %v5054_v36, %v11038_v9  ;;  %v3897_v2 = vmul.f32 %v5054_v36, %v11039_v6  ;;  %v3929_v35 = vmul.f32 %v5054_v36, %v11040_v61  ;;  %v4138_v14 = vadd.f32 %v9473_v5, %v4062_v13 }
 0x4f3   : > { %v4139_v59 = vadd.f32 %v9475_v38, %v4063_v51 }
 0x4f4   : > { %v4004_v0 = vmul.f32 %v9463_v21, %v3929_v35  ;;  %v4005_v56 = vmul.f32 %v9465_v52, %v3929_v35  ;;  %4202 = vst [vmem:[%s9739_s21 + $0x1c0] sm:$0xff] %v4138_v14 }
 0x4f5   : > { %4203 = vst [vmem:[%s9739_s21 + $0x1c8] sm:$0xff] %v4139_v59 }
 0x4f6   : > { %v4068_v60 = vsub.f32 %v3896_v34, %v4004_v0  ;;  %v4069_v42 = vsub.f32 %v3897_v2, %v4005_v56 }
 0x4f8   : > { %v4144_v37 = vadd.f32 %v9473_v5, %v4068_v60  ;;  %v4145_v31 = vadd.f32 %v9475_v38, %v4069_v42  ;;  %v5056_v11 = vpop.eup %5055 }
 0x4f9   : > { %v3894_v23 = vmul.f32 %v5056_v11, %v11041_v45  ;;  %v3895_v63 = vmul.f32 %v5056_v11, %v11042_v24  ;;  %v3928_v47 = vmul.f32 %v5056_v11, %v9701_v39 }
 0x4fa   : > { %4208 = vst [vmem:[%s9739_s21 + $0x1f0] sm:$0xff] %v4144_v37  ;;  %4209 = vst [vmem:[%s9739_s21 + $0x1f8] sm:$0xff] %v4145_v31 }
 0x4fb   : > { %v4002_v50 = vmul.f32 %v9463_v21, %v3928_v47  ;;  %v4003_v19 = vmul.f32 %v9465_v52, %v3928_v47 }
 0x4fd   : > { %v4066_v22 = vsub.f32 %v3894_v23, %v4002_v50  ;;  %v4067_v40 = vsub.f32 %v3895_v63, %v4003_v19 }
 0x4ff   : > { %v4142_v39 = vadd.f32 %v9473_v5, %v4066_v22  ;;  %v4143_v21 = vadd.f32 %v9475_v38, %v4067_v40 }
 0x501   : > { %4206 = vst [vmem:[%s9739_s21 + $0x1e0] sm:$0xff] %v4142_v39  ;;  %4207 = vst [vmem:[%s9739_s21 + $0x1e8] sm:$0xff] %v4143_v21 }
 0x502   : > { %5269 = shalt.err (!%p5266_p5)
}
 0x503   : > { %s5270_s7 = scalar_lea.hbm %s10089_s30, 8192  ;;  %s5274_s12 = scalar_lea.hbm %s10149_s4, 32768 }
 0x504   : > { %p5271_p6 = scmp.ne.s32.totalorder %s10089_s30, %s5270_s7  ;;  %p5275_p10 = scmp.lt.u32.totalorder %s10089_s30, %s10149_s4 }
 0x505   : > { %p5276_p11 = scmp.lt.u32.totalorder %s5274_s12, %s5270_s7  ;;  %p5278_p13 = scmp.lt.u32.totalorder %s5270_s7, %s10089_s30 }
 0x506   : > { %p5272_p7 = pnand %p5271_p6, %p5404_p4 }
 0x507   : > { %p5277_p12 = por %p5276_p11, %p5275_p10 }
 0x508   : > { %p5273_p9 = pneg %p5272_p7 }
 0x509   : > { %p5279_p0 = por %p5278_p13, %p5277_p12 }
 0x50b   : > { %p5280_p1 = pnand %p5279_p0, %p5273_p9 }
 0x50d   : > { %5283 = shalt.err (!%p5280_p1)
}
 0x50e   : > { %s5337_s21 = smov 256   ;;  %s5338_s22 = smov 16  }
 0x50f   : > { %4936 = dma.vmem_to_hbm [thread:$0]  (%p5404_p4), %s10091_s24, 8192, %s10089_s30, %s10099_s18, %s5337_s21, %s5337_s21, %s5338_s22  }
 0x510 PF: > { %p4942_p2 = scmp.ge.s32.totalorder %s5334_s20, 2  ;;  %s4242_s26 = sand.u32 1, %s5314_s15  }
 0x511   : > { %s4243_s29 = scalar_lea.sflag [#allocation3], %s4242_s26 }
 0x512   : > { %p4939_p3 = pnand %p4942_p2, %p5411_p8 }
 0x514   : > { %5309 = dma.done.wait (!%p4939_p3), %s4243_s29, 8192  }
 0x515   : > { %5311 = vsyncadd (!%p4939_p3), %s4243_s29, 4294959104  ;;  %s17_s20 = sadd.s32 1, %s5334_s20   ;;  %s11043_s15 = smov %s5318_s16 }
 0x516   : > { %p14_p5 = scmp.ge.s32.totalorder %s17_s20, 6   ;;  %s11044_s16 = smov %s5322_s17 }
 0x517   : > { %s11045_s17 = smov %s5417_s28  ;;  %s11046_s18 = smov %s5330_s19 }
 0x518   : > { %s11047_s19 = smov %s11049_s23  ;;  %16 = sbr.rel (!%p14_p5) target bundleno = 4 (0x4), region = 81 }
 0x51f   :  { %4248 = vsyncpa [#allocation3], 1 }
 0x520   :  { %4250 = vsyncpa [#allocation3 + $0x1], 1 }

</bundles_post_ra>
